<compile_context>
chip_gen: v5e
topology: v5e:2x2
jax: 0.10.0
libtpu: 0.0.40
codegen_flags: <defaults>
</compile_context>

<pallas_src>
import functools
import numpy as np
import jax
import jax.numpy as jnp
from jax import lax
from jax.experimental import pallas as pl
from jax.experimental.pallas import tpu as pltpu


def _round_up(x, m):
    return ((x + m - 1) // m) * m


# ----------------------------------------------------------------------------
# Pallas kernels: channel-major batched matmul (convs / channel mixing)
# ----------------------------------------------------------------------------

def _cmm_kernel(w_ref, x_ref, o_ref):
    o_ref[0] = jnp.dot(w_ref[...].astype(jnp.float32),
                       x_ref[0].astype(jnp.float32),
                       preferred_element_type=jnp.float32)


def _cmm_bias_kernel(w_ref, x_ref, b_ref, o_ref):
    o_ref[0] = (jnp.dot(w_ref[...].astype(jnp.float32),
                        x_ref[0].astype(jnp.float32),
                        preferred_element_type=jnp.float32)
                + b_ref[...])


def pallas_cmm(w, x, bias=None, tile_m=2048):
    """out[n] = w @ x[n] (+ bias).  w:(O,K) f32, x:(N,K,M), out:(N,O,M) f32.

    Channel-major matmul: the large spatial axis M sits on lanes so stores are
    lane-dense and the result is already NCHW.  Grid = (batch, M tiles), both
    'parallel' (v7x megacore can shard either).  Weights stay f32; spike
    operands arrive bf16 and are widened in-register.
    """
    N, K, M = x.shape
    O = w.shape[0]
    w = w.astype(jnp.float32)
    if M <= tile_m:
        tm, grid_m, Mp = M, 1, M
    else:
        tm = tile_m
        grid_m = pl.cdiv(M, tm)
        Mp = grid_m * tm
        if Mp != M:
            x = jnp.pad(x, ((0, 0), (0, 0), (0, Mp - M)))
    if bias is None:
        kernel = _cmm_kernel
        operands = (w, x)
        in_specs = [pl.BlockSpec((O, K), lambda n, i: (0, 0)),
                    pl.BlockSpec((1, K, tm), lambda n, i: (n, 0, i))]
    else:
        kernel = _cmm_bias_kernel
        operands = (w, x, bias.reshape(O, 1).astype(jnp.float32))
        in_specs = [pl.BlockSpec((O, K), lambda n, i: (0, 0)),
                    pl.BlockSpec((1, K, tm), lambda n, i: (n, 0, i)),
                    pl.BlockSpec((O, 1), lambda n, i: (0, 0))]
    out = pl.pallas_call(
        kernel,
        out_shape=jax.ShapeDtypeStruct((N, O, Mp), jnp.float32),
        grid=(N, grid_m),
        in_specs=in_specs,
        out_specs=pl.BlockSpec((1, O, tm), lambda n, i: (n, 0, i)),
        compiler_params=pltpu.CompilerParams(
            dimension_semantics=("parallel", "parallel")),
    )(*operands)
    return out[:, :, :M] if Mp != M else out


# ----------------------------------------------------------------------------
# Pallas kernels: plain 2-D matmul (Haar Kronecker transform, classifier head)
# ----------------------------------------------------------------------------

def _mm_kernel(a_ref, b_ref, o_ref):
    o_ref[...] = jnp.dot(a_ref[...].astype(jnp.float32),
                         b_ref[...].astype(jnp.float32),
                         preferred_element_type=jnp.float32)


def _mm_bias_kernel(a_ref, b_ref, c_ref, o_ref):
    o_ref[...] = (jnp.dot(a_ref[...].astype(jnp.float32),
                          b_ref[...].astype(jnp.float32),
                          preferred_element_type=jnp.float32)
                  + c_ref[...])


def pallas_matmul2d(a, b, bias=None, tile_m=512):
    """C = A @ B (+ bias).  A:(M,K) B:(K,N).  f32 accumulate, f32 weights."""
    M, K = a.shape
    K2, N = b.shape
    assert K == K2
    b = b.astype(jnp.float32)
    if M > tile_m:
        tm = tile_m
    elif M > 16:
        tm = _round_up(pl.cdiv(M, 2), 16)     # keep >= 2 grid steps (megacore)
    else:
        tm = _round_up(max(M, 1), 16)
    grid = pl.cdiv(M, tm)
    Mp = grid * tm
    if Mp != M:
        a = jnp.pad(a, ((0, Mp - M), (0, 0)))
    if bias is None:
        kernel = _mm_kernel
        operands = (a, b)
        in_specs = [pl.BlockSpec((tm, K), lambda i: (i, 0)),
                    pl.BlockSpec((K, N), lambda i: (0, 0))]
    else:
        kernel = _mm_bias_kernel
        operands = (a, b, bias.reshape(1, N).astype(jnp.float32))
        in_specs = [pl.BlockSpec((tm, K), lambda i: (i, 0)),
                    pl.BlockSpec((K, N), lambda i: (0, 0)),
                    pl.BlockSpec((1, N), lambda i: (0, 0))]
    out = pl.pallas_call(
        kernel,
        out_shape=jax.ShapeDtypeStruct((Mp, N), jnp.float32),
        grid=(grid,),
        in_specs=in_specs,
        out_specs=pl.BlockSpec((tm, N), lambda i: (i, 0)),
        compiler_params=pltpu.CompilerParams(dimension_semantics=("parallel",)),
    )(*operands)
    return out[:M] if Mp != M else out


# ----------------------------------------------------------------------------
# Pallas kernels: spiking neurons (T-axis scan with optional fused BN affine)
# ----------------------------------------------------------------------------

def _lif_kernel(x_ref, sc_ref, sh_ref, o_ref, *, tau):
    # Multi-step LIF (spikingjelly semantics): v += (x - v)/tau ; spike = v>=1;
    # hard reset to 0.  Optional per-row affine (fused BatchNorm) in prologue.
    T = x_ref.shape[0]
    inv_tau = jnp.float32(1.0 / tau)
    scale = sc_ref[...]           # (rb, 1) broadcasts over lanes
    shift = sh_ref[...]

    def step(t, v):
        xt = x_ref[t].astype(jnp.float32) * scale + shift
        v = v + (xt - v) * inv_tau
        spike = (v >= 1.0).astype(jnp.float32)
        o_ref[t] = spike.astype(o_ref.dtype)
        return v * (1.0 - spike)

    lax.fori_loop(0, T, step, jnp.zeros(x_ref.shape[1:], jnp.float32),
                  unroll=True)


def _negif_kernel(x_ref, sc_ref, sh_ref, o_ref):
    # TODO(synk): MultiStepNegIFNode source not provided; implemented as a
    # ternary IF neuron (spikes in {-1,0,+1}, hard reset), charge v += x.
    T = x_ref.shape[0]
    scale = sc_ref[...]
    shift = sh_ref[...]

    def step(t, v):
        v = v + x_ref[t].astype(jnp.float32) * scale + shift
        pos = (v >= 1.0).astype(jnp.float32)
        neg = (v <= -1.0).astype(jnp.float32)
        o_ref[t] = (pos - neg).astype(o_ref.dtype)
        return v * (1.0 - pos - neg)

    lax.fori_loop(0, T, step, jnp.zeros(x_ref.shape[1:], jnp.float32),
                  unroll=True)


def _run_neuron(kernel, x, scale_rows=None, shift_rows=None):
    """Scan T sequentially per block over the flattened (rows, 128) feature
    axis.  256-row blocks (32-vreg membrane carry) with >= 2 grid steps when
    the tensor allows it; spikes are written bf16 (exact)."""
    T = x.shape[0]
    flat = x.reshape(T, -1)
    n = flat.shape[1]
    lanes = 128
    rows = pl.cdiv(n, lanes)
    if rows > 256:
        rb = 256
    elif rows > 16:
        rb = _round_up(pl.cdiv(rows, 2), 16)
    else:
        rb = 16
    grid = pl.cdiv(rows, rb)
    rows_p = grid * rb
    n_p = rows_p * lanes
    if n_p != n:
        flat = jnp.pad(flat, ((0, 0), (0, n_p - n)))
    x3 = flat.reshape(T, rows_p, lanes)
    if scale_rows is None:
        scale_rows = jnp.ones((rows,), jnp.float32)
    if shift_rows is None:
        shift_rows = jnp.zeros((rows,), jnp.float32)
    sc = jnp.pad(scale_rows.astype(jnp.float32), (0, rows_p - rows)).reshape(rows_p, 1)
    sh = jnp.pad(shift_rows.astype(jnp.float32), (0, rows_p - rows)).reshape(rows_p, 1)
    out = pl.pallas_call(
        kernel,
        out_shape=jax.ShapeDtypeStruct((T, rows_p, lanes), jnp.bfloat16),
        grid=(grid,),
        in_specs=[pl.BlockSpec((T, rb, lanes), lambda i: (0, i, 0)),
                  pl.BlockSpec((rb, 1), lambda i: (i, 0)),
                  pl.BlockSpec((rb, 1), lambda i: (i, 0))],
        out_specs=pl.BlockSpec((T, rb, lanes), lambda i: (0, i, 0)),
        compiler_params=pltpu.CompilerParams(
            dimension_semantics=("parallel",)),
    )(x3, sc, sh)
    return out.reshape(T, n_p)[:, :n].reshape(x.shape)


def lif(x, tau=2.0):
    return _run_neuron(functools.partial(_lif_kernel, tau=tau), x)


def neg_if(x):
    return _run_neuron(_negif_kernel, x)


def lif_bn(x5, gamma, beta, tau=2.0, eps=1e-5):
    """Training-mode BatchNorm2d fused into the LIF prologue.

    Stats are one JAX reduction over the raw conv output; the per-channel
    affine is applied inside the neuron kernel, so the normalized activation
    never round-trips through HBM.  Falls back to an explicit BN when the
    spatial size is not a multiple of 128 lanes (tiny late-stage tensors)."""
    T, B, C, H, W = x5.shape
    xf = x5.astype(jnp.float32)
    mean = xf.mean(axis=(0, 1, 3, 4))
    var = xf.var(axis=(0, 1, 3, 4))
    scale_c = gamma / jnp.sqrt(var + eps)
    shift_c = beta - mean * scale_c
    hw = H * W
    if hw % 128 == 0:
        blk = hw // 128
        scale_rows = jnp.tile(jnp.repeat(scale_c, blk), B)
        shift_rows = jnp.tile(jnp.repeat(shift_c, blk), B)
        return _run_neuron(functools.partial(_lif_kernel, tau=tau), x5,
                           scale_rows, shift_rows)
    xn = xf * scale_c.reshape(1, 1, C, 1, 1) + shift_c.reshape(1, 1, C, 1, 1)
    return lif(xn, tau)


# ----------------------------------------------------------------------------
# JAX glue ops (im2col conv wrapper, pooling, batch-norm, Haar helpers)
# ----------------------------------------------------------------------------

def conv2d(x, w, bias=None, padding=0):
    """Stride-1 conv (the only kind in this model) as a channel-major Pallas
    matmul: out[n] = Wmat(O,K) @ patches[n](K, Ho*Wo) -> NCHW directly
    (lane-dense stores, no output relayout).  1x1 convs skip im2col.
    TODO(synk): a halo'd in-kernel 9-tap conv would remove the remaining
    kh*kw patch blow-up for 3x3 convs."""
    N, C, H, W = x.shape
    O, _, kh, kw = w.shape
    Ho = H + 2 * padding - kh + 1
    Wo = W + 2 * padding - kw + 1
    if kh == 1 and kw == 1:
        rhs = x.reshape(N, C, H * W)
        wmat = w.reshape(O, C)
    else:
        xp = jnp.pad(x, ((0, 0), (0, 0), (padding, padding), (padding, padding)))
        cols = [xp[:, :, i:i + Ho, j:j + Wo] for i in range(kh) for j in range(kw)]
        rhs = jnp.stack(cols, axis=2).reshape(N, C * kh * kw, Ho * Wo)
        wmat = w.reshape(O, C * kh * kw)
    out = pallas_cmm(wmat, rhs, bias)            # (N, O, Ho*Wo) f32
    return out.reshape(N, O, Ho, Wo)


def maxpool2d(x, kernel=3, stride=2, padding=1):
    neg_inf = jnp.asarray(-jnp.inf, dtype=x.dtype)
    return lax.reduce_window(
        x, neg_inf, lax.max,
        window_dimensions=(1, 1, kernel, kernel),
        window_strides=(1, 1, stride, stride),
        padding=((0, 0), (0, 0), (padding, padding), (padding, padding)))


def erode(x5):
    # nn.MaxPool3d(kernel=(1,3,3), stride=1, padding=(0,1,1)) on (T,B,C,H,W)
    T, B, C, H, W = x5.shape
    y = maxpool2d(x5.reshape(T * B, C, H, W), 3, 1, 1)
    return y.reshape(T, B, C, H, W)


def batchnorm2d(x, gamma, beta, eps=1e-5):
    # Training-mode BatchNorm (batch statistics, f32), matching a fresh nn.Module.
    x = x.astype(jnp.float32)
    mean = x.mean(axis=(0, 2, 3), keepdims=True)
    var = x.var(axis=(0, 2, 3), keepdims=True)
    xn = (x - mean) / jnp.sqrt(var + eps)
    return xn * gamma.reshape(1, -1, 1, 1) + beta.reshape(1, -1, 1, 1)


def haar_matrix_np(n):
    """Orthonormal Haar matrix of size n (n power of 2)."""
    if n == 1:
        return np.array([[1.0]])
    h = haar_matrix_np(n // 2)
    top = np.kron(h, [1.0, 1.0])
    bot = np.kron(np.eye(n // 2), [1.0, -1.0])
    m = np.vstack([top, bot])
    m = m / np.sqrt((m * m).sum(axis=1, keepdims=True))
    return m


def haar_kron_np(n):
    """Precomputed Hm (x) Hm so the separable 2-D Haar is one matmul."""
    hm = haar_matrix_np(n)
    return np.kron(hm, hm)


def haar2d(x5, m):
    """Fused 2-D orthonormal Haar on the last two dims; forward uses m = K^T,
    inverse uses m = K, where K = Hm (x) Hm.  Single matmul, no transposes."""
    T, B, C, H, W = x5.shape
    y = pallas_matmul2d(x5.reshape(T * B * C, H * W), m)
    return y.reshape(T, B, C, H, W)


def _block_diag_t(w):
    """(nb, bs, bs) -> block-diag of transposed blocks (C, C) so the FATM
    einsum('...bd,bdk->...bk') becomes one channel-major matmul."""
    nb, bsz, _ = w.shape
    out = jnp.zeros((nb * bsz, nb * bsz), jnp.float32)
    for i in range(nb):
        out = out.at[i * bsz:(i + 1) * bsz, i * bsz:(i + 1) * bsz].set(w[i].T)
    return out


# ----------------------------------------------------------------------------
# Modules
# ----------------------------------------------------------------------------

def sps_forward(x, p, T, B):
    _, _, Cin, H, W = x.shape
    H2, W2 = H // 2, W // 2
    H4, W4 = H // 4, W // 4
    H16, W16 = H // 16, W // 16

    xf = conv2d(x.reshape(T * B, Cin, H, W), p['proj_conv_w'], None, padding=1)
    s = lif_bn(xf.reshape(T, B, -1, H, W), p['proj_bn_g'], p['proj_bn_b'])
    xf = maxpool2d(s.reshape(T * B, -1, H, W), 3, 2, 1)              # H/2

    xf = conv2d(xf, p['proj_conv1_w'], None, padding=1)
    s = lif_bn(xf.reshape(T, B, -1, H2, W2), p['proj_bn1_g'], p['proj_bn1_b'])
    xf = maxpool2d(s.reshape(T * B, -1, H2, W2), 3, 2, 1)            # H/4

    xf = conv2d(xf, p['proj_conv2_w'], None, padding=1)
    s = lif_bn(xf.reshape(T, B, -1, H4, W4), p['proj_bn2_g'], p['proj_bn2_b'])
    xf = maxpool2d(s.reshape(T * B, -1, H4, W4), 3, 2, 1)            # H/8

    xf = conv2d(xf, p['proj_conv3_w'], None, padding=1)
    xf = batchnorm2d(xf, p['proj_bn3_g'], p['proj_bn3_b'])
    xf = maxpool2d(xf, 3, 2, 1)                                      # H/16
    x_feat = xf
    s = lif(xf.reshape(T, B, -1, H16, W16))
    xf = conv2d(s.reshape(T * B, -1, H16, W16), p['rpe_conv_w'], None, padding=1)
    xf = batchnorm2d(xf, p['rpe_bn_g'], p['rpe_bn_b'])
    return (xf + x_feat).reshape(T, B, -1, H16, W16)


def fatm_forward(x, p, T, B, nb, hk, hk_t):
    # TODO(synk): Haar2DForward/Haar2DInverse internals not provided; implemented
    # as NegIF spiking followed by the orthonormal 2-D Haar transform / inverse.
    _, _, C, H, W = x.shape
    bs = C // nb
    s = lif(x)                                              # x_neuron
    s = erode(s)
    h = neg_if(s)                                           # haar_forward neuron
    h = haar2d(h, hk_t)                                     # forward Haar
    h = batchnorm2d(h.reshape(T * B, C, H, W),
                    p['haar_fwd_bn_g'], p['haar_fwd_bn_b']).reshape(T, B, C, H, W)
    h = lif(h)                                              # haar_neuron
    # Per-frequency einsum('...bd,bdk->...bk') == channel-major block-diag
    # matmul with the precomputed (C,C) weight (no transposes, one launch).
    h = pallas_cmm(p['haar_wbd_t'], h.reshape(T * B, C, H * W)).reshape(T * B, C, H, W)
    h = batchnorm2d(h, p['haar_mul_bn_g'], p['haar_mul_bn_b']).reshape(T, B, C, H, W)
    h = neg_if(h)                                           # haar_inverse neuron
    h = haar2d(h, hk)                                       # inverse Haar
    h = batchnorm2d(h.reshape(T * B, C, H, W),
                    p['haar_inv_bn_g'], p['haar_inv_bn_b']).reshape(T, B, C, H, W)
    h = erode(h)
    xr = h.reshape(T * B * nb, bs, H, W)
    # Merged conv2 (3x3) + conv1 (1x1 embedded at the centre tap): one patch
    # pass, one matmul, double-width output channels.
    cc = conv2d(xr, p['fatm_conv_w'], p['fatm_conv_b'], padding=1)   # (TBnb, 2bs, H, W)
    c2 = cc[:, :bs].reshape(T * B, C, H, W)
    c1 = cc[:, bs:].reshape(T * B, C, H, W)
    c1 = batchnorm2d(c1, p['conv1_bn_g'], p['conv1_bn_b'])
    c2 = batchnorm2d(c2, p['conv2_bn_g'], p['conv2_bn_b'])
    return (c1 + c2).reshape(T, B, C, H, W)


def mlp_forward(x, p, T, B):
    _, _, C, H, W = x.shape
    hidden = p['fc1_w'].shape[0]
    s = lif(x)
    h = conv2d(s.reshape(T * B, C, H, W), p['fc1_w'], p['fc1_b'], padding=0)
    h = batchnorm2d(h, p['fc1_bn_g'], p['fc1_bn_b'])
    s = lif(h.reshape(T, B, hidden, H, W))
    h = conv2d(s.reshape(T * B, hidden, H, W), p['fc2_w'], p['fc2_b'], padding=0)
    h = batchnorm2d(h, p['fc2_bn_g'], p['fc2_bn_b'])
    return h.reshape(T, B, C, H, W)


def swformer_forward(params, x, *, T, nb):
    if x.ndim == 4:
        x = jnp.broadcast_to(x[None], (T,) + x.shape)
    else:
        x = jnp.swapaxes(x, 0, 1)
    Tt, B = x.shape[0], x.shape[1]
    x = sps_forward(x, params['sps'], Tt, B)
    hk, hk_t = params['haar_kron'], params['haar_kron_t']
    for bp in params['blocks']:
        x = x + fatm_forward(x, bp['fatm'], Tt, B, nb, hk, hk_t)
        x = x + mlp_forward(x, bp['mlp'], Tt, B)
    feat = x.reshape(Tt, B, x.shape[2], -1).mean(axis=3)             # (T,B,C)
    logits = pallas_matmul2d(feat.reshape(Tt * B, -1),
                             params['head_w_t'], params['head_b'])
    return logits.reshape(Tt, B, -1)


# ----------------------------------------------------------------------------
# Parameter init (deterministic, per the PyTorch __init__ shapes) + derived
# constants precomputed once (block-diag weight, merged FATM conv, Haar Kron).
# ----------------------------------------------------------------------------

def init_params(key, *, in_channels, embed, nb, depths, mlp_ratio, num_classes, h_trans):
    keys = iter(jax.random.split(key, 256))

    def nrm(shape, std=0.1):
        return std * jax.random.normal(next(keys), shape, jnp.float32)

    def bn(c):
        return jnp.ones((c,), jnp.float32), jnp.zeros((c,), jnp.float32)

    e = embed
    bs = e // nb
    hidden = int(e * mlp_ratio)

    sps = {}
    sps['proj_conv_w'] = nrm((e // 8, in_channels, 3, 3))
    sps['proj_bn_g'], sps['proj_bn_b'] = bn(e // 8)
    sps['proj_conv1_w'] = nrm((e // 4, e // 8, 3, 3))
    sps['proj_bn1_g'], sps['proj_bn1_b'] = bn(e // 4)
    sps['proj_conv2_w'] = nrm((e // 2, e // 4, 3, 3))
    sps['proj_bn2_g'], sps['proj_bn2_b'] = bn(e // 2)
    sps['proj_conv3_w'] = nrm((e, e // 2, 3, 3))
    sps['proj_bn3_g'], sps['proj_bn3_b'] = bn(e)
    sps['rpe_conv_w'] = nrm((e, e, 3, 3))
    sps['rpe_bn_g'], sps['rpe_bn_b'] = bn(e)

    blocks = []
    for _ in range(depths):
        haar_weight = 0.02 * jax.random.normal(next(keys), (nb, bs, bs), jnp.float32)
        conv1_w = nrm((bs, bs, 1, 1), 0.3)
        conv1_b = nrm((bs,), 0.05)
        conv2_w = nrm((bs, bs, 3, 3), 0.3)
        conv2_b = nrm((bs,), 0.05)
        # merged conv: first bs outputs = conv2 (3x3), next bs = conv1 (centre tap)
        wc = jnp.zeros((2 * bs, bs, 3, 3), jnp.float32)
        wc = wc.at[:bs].set(conv2_w)
        wc = wc.at[bs:, :, 1, 1].set(conv1_w[:, :, 0, 0])
        fatm = {
            'haar_weight': haar_weight,
            'haar_wbd_t': _block_diag_t(haar_weight),
            'fatm_conv_w': wc,
            'fatm_conv_b': jnp.concatenate([conv2_b, conv1_b]),
        }
        fatm['haar_fwd_bn_g'], fatm['haar_fwd_bn_b'] = bn(e)
        fatm['haar_mul_bn_g'], fatm['haar_mul_bn_b'] = bn(e)
        fatm['haar_inv_bn_g'], fatm['haar_inv_bn_b'] = bn(e)
        fatm['conv1_bn_g'], fatm['conv1_bn_b'] = bn(e)
        fatm['conv2_bn_g'], fatm['conv2_bn_b'] = bn(e)
        mlp = {
            'fc1_w': nrm((hidden, e, 1, 1)),
            'fc1_b': nrm((hidden,), 0.05),
            'fc2_w': nrm((e, hidden, 1, 1)),
            'fc2_b': nrm((e,), 0.05),
        }
        mlp['fc1_bn_g'], mlp['fc1_bn_b'] = bn(hidden)
        mlp['fc2_bn_g'], mlp['fc2_bn_b'] = bn(e)
        blocks.append({'fatm': fatm, 'mlp': mlp})

    head_w = 0.02 * jax.random.normal(next(keys), (num_classes, e), jnp.float32)
    hk = jnp.asarray(haar_kron_np(h_trans), jnp.float32)
    params = {
        'sps': sps,
        'blocks': blocks,
        'head_w_t': head_w.T,
        'head_b': jnp.zeros((num_classes,), jnp.float32),
        'haar_kron': hk,
        'haar_kron_t': hk.T,
    }
    return params


# ----------------------------------------------------------------------------
# Demo
# ----------------------------------------------------------------------------

if __name__ == "__main__":
    # SPS assumes a 128x128 input (downsamples to 64/32/16/8), so spatial = 128.
    # Keep everything else small: T=2, B=1, embed=32, 8 frequency blocks, 1 layer.
    T, B, Cin, H, W = 2, 1, 2, 128, 128
    embed, nb, depths, mlp_ratio, ncls = 32, 8, 1, 2, 11

    key = jax.random.PRNGKey(0)
    kparam, kx = jax.random.split(key)
    params = init_params(kparam, in_channels=Cin, embed=embed, nb=nb,
                         depths=depths, mlp_ratio=mlp_ratio,
                         num_classes=ncls, h_trans=H // 16)
    x = jax.random.normal(kx, (B, Cin, H, W), jnp.float32)

    fwd = jax.jit(functools.partial(swformer_forward, T=T, nb=nb))
    out = jax.block_until_ready(fwd(params, x))

    assert out.shape == (T, B, ncls), out.shape
    assert bool(jnp.all(jnp.isfinite(out)))
    print("KERNEL_OK")
</pallas_src>

<mosaic_0001>
module attributes {stable_mosaic.version = 11 : i64} {
  func.func @_cmm_kernel(%arg0: i32, %arg1: i32, %arg2: memref<4x18xf32, #tpu.memory_space<vmem>>, %arg3: memref<1x18x2048xf32, #tpu.memory_space<vmem>>, %arg4: memref<1x4x2048xf32, #tpu.memory_space<vmem>>) attributes {dimension_semantics = [#tpu.dimension_semantics<parallel>, #tpu.dimension_semantics<parallel>], iteration_bounds = array<i64: 2, 8>, scalar_prefetch = 0 : i64, scratch_operands = 0 : i64, tpu.core_type = #tpu.core_type<tc>, window_params = [{pipeline_mode = #tpu.pipeline_mode<synchronous>, transform_indices = @transform_0, window_bounds = array<i64: 4, 18>}, {transform_indices = @transform_1, window_bounds = array<i64: 1, 18, 2048>}, {transform_indices = @transform_2, window_bounds = array<i64: 1, 4, 2048>}]} {
    %c0 = arith.constant 0 : index
    %c0_0 = arith.constant 0 : index
    %0 = vector.load %arg2[%c0, %c0_0] : memref<4x18xf32, #tpu.memory_space<vmem>>, vector<4x18xf32>
    %c0_1 = arith.constant 0 : index
    %c0_2 = arith.constant 0 : index
    %c0_3 = arith.constant 0 : index
    %1 = vector.load %arg3[%c0_1, %c0_2, %c0_3] : memref<1x18x2048xf32, #tpu.memory_space<vmem>>, vector<1x18x2048xf32>
    %2 = vector.shape_cast %1 : vector<1x18x2048xf32> to vector<18x2048xf32>
    %cst = arith.constant dense<0.000000e+00> : vector<4x2048xf32>
    %3 = tpu.matmul %0, %2, %cst {dimension_numbers = #tpu.dot_dimension_numbers<[1], [0], [0], [1], [0, 0, 1, 1], [], []>} : vector<4x18xf32>, vector<18x2048xf32>, vector<4x2048xf32> -> vector<4x2048xf32>
    %c0_4 = arith.constant 0 : index
    %c0_5 = arith.constant 0 : index
    %c0_6 = arith.constant 0 : index
    %4 = vector.load %arg4[%c0_4, %c0_5, %c0_6] : memref<1x4x2048xf32, #tpu.memory_space<vmem>>, vector<1x4x2048xf32>
    %5 = vector.shape_cast %4 : vector<1x4x2048xf32> to vector<4x2048xf32>
    %6 = vector.shape_cast %3 : vector<4x2048xf32> to vector<1x4x2048xf32>
    tpu.vector_store %arg4[%c0_4, %c0_5, %c0_6], %6 {strides = array<i32>} : memref<1x4x2048xf32, #tpu.memory_space<vmem>>, vector<1x4x2048xf32>,
    return
  }
  func.func @transform_0(%arg0: i32, %arg1: i32) -> (i32, i32) {
    %c0_i32 = arith.constant 0 : i32
    %c0_i32_0 = arith.constant 0 : i32
    %c0_i32_1 = arith.constant 0 : i32
    return %c0_i32, %c0_i32_0 : i32, i32
  }
  func.func @transform_1(%arg0: i32, %arg1: i32) -> (i32, i32, i32) {
    %c0_i32 = arith.constant 0 : i32
    %c0_i32_0 = arith.constant 0 : i32
    return %arg0, %c0_i32, %arg1 : i32, i32, i32
  }
  func.func @transform_2(%arg0: i32, %arg1: i32) -> (i32, i32, i32) {
    %c0_i32 = arith.constant 0 : i32
    %c0_i32_0 = arith.constant 0 : i32
    return %arg0, %c0_i32, %arg1 : i32, i32, i32
  }
}

module attributes {stable_mosaic.version = 11 : i64} {
  func.func @_lif_kernel(%arg0: i32, %arg1: memref<2x256x128xf32, #tpu.memory_space<vmem>>, %arg2: memref<256x1xf32, #tpu.memory_space<vmem>>, %arg3: memref<256x1xf32, #tpu.memory_space<vmem>>, %arg4: memref<2x256x128xbf16, #tpu.memory_space<vmem>>) attributes {dimension_semantics = [#tpu.dimension_semantics<parallel>], iteration_bounds = array<i64: 2>, scalar_prefetch = 0 : i64, scratch_operands = 0 : i64, tpu.core_type = #tpu.core_type<tc>, window_params = [{transform_indices = @transform_0, window_bounds = array<i64: 2, 256, 128>}, {transform_indices = @transform_1, window_bounds = array<i64: 256, 1>}, {transform_indices = @transform_2, window_bounds = array<i64: 256, 1>}, {transform_indices = @transform_3, window_bounds = array<i64: 2, 256, 128>}]} {
    %c0 = arith.constant 0 : index
    %c0_0 = arith.constant 0 : index
    %0 = vector.load %arg2[%c0, %c0_0] : memref<256x1xf32, #tpu.memory_space<vmem>>, vector<256x1xf32>
    %c0_1 = arith.constant 0 : index
    %c0_2 = arith.constant 0 : index
    %1 = vector.load %arg3[%c0_1, %c0_2] : memref<256x1xf32, #tpu.memory_space<vmem>>, vector<256x1xf32>
    %cst = arith.constant 0.000000e+00 : f32
    %2 = vector.broadcast %cst : f32 to vector<256x128xf32>
    %cst_3 = arith.constant 5.000000e-01 : f32
    %c0_i32 = arith.constant 0 : i32
    %3 = arith.index_cast %c0_i32 : i32 to index
    %c0_4 = arith.constant 0 : index
    %c0_5 = arith.constant 0 : index
    %4 = vector.load %arg1[%3, %c0_4, %c0_5] : memref<2x256x128xf32, #tpu.memory_space<vmem>>, vector<1x256x128xf32>
    %5 = vector.shape_cast %4 : vector<1x256x128xf32> to vector<256x128xf32>
    %6 = vector.broadcast %0 : vector<256x1xf32> to vector<256x128xf32>
    %7 = arith.mulf %5, %6 : vector<256x128xf32>
    %8 = vector.broadcast %1 : vector<256x1xf32> to vector<256x128xf32>
    %9 = arith.addf %7, %8 : vector<256x128xf32>
    %10 = arith.subf %9, %2 : vector<256x128xf32>
    %11 = vector.broadcast %cst_3 : f32 to vector<256x128xf32>
    %12 = arith.mulf %10, %11 : vector<256x128xf32>
    %13 = arith.addf %2, %12 : vector<256x128xf32>
    %cst_6 = arith.constant 1.000000e+00 : f32
    %14 = vector.broadcast %cst_6 : f32 to vector<256x128xf32>
    %15 = arith.cmpf oge, %13, %14 : vector<256x128xf32>
    %16 = arith.extui %15 : vector<256x128xi1> to vector<256x128xi32>
    %17 = arith.sitofp %16 : vector<256x128xi32> to vector<256x128xf32>
    %18 = arith.truncf %17 : vector<256x128xf32> to vector<256x128xbf16>
    %19 = arith.index_cast %c0_i32 : i32 to index
    %c0_7 = arith.constant 0 : index
    %c0_8 = arith.constant 0 : index
    %20 = vector.load %arg4[%19, %c0_7, %c0_8] : memref<2x256x128xbf16, #tpu.memory_space<vmem>>, vector<1x256x128xbf16>
    %21 = vector.shape_cast %20 : vector<1x256x128xbf16> to vector<256x128xbf16>
    %22 = vector.shape_cast %18 : vector<256x128xbf16> to vector<1x256x128xbf16>
    tpu.vector_store %arg4[%19, %c0_7, %c0_8], %22 {strides = array<i32>} : memref<2x256x128xbf16, #tpu.memory_space<vmem>>, vector<1x256x128xbf16>,
    %cst_9 = arith.constant 1.000000e+00 : f32
    %23 = vector.broadcast %cst_9 : f32 to vector<256x128xf32>
    %24 = arith.subf %23, %17 : vector<256x128xf32>
    %25 = arith.mulf %13, %24 : vector<256x128xf32>
    %c1_i32 = arith.constant 1 : i32
    %26 = arith.index_cast %c1_i32 : i32 to index
    %c0_10 = arith.constant 0 : index
    %c0_11 = arith.constant 0 : index
    %27 = vector.load %arg1[%26, %c0_10, %c0_11] : memref<2x256x128xf32, #tpu.memory_space<vmem>>, vector<1x256x128xf32>
    %28 = vector.shape_cast %27 : vector<1x256x128xf32> to vector<256x128xf32>
    %29 = vector.broadcast %0 : vector<256x1xf32> to vector<256x128xf32>
    %30 = arith.mulf %28, %29 : vector<256x128xf32>
    %31 = vector.broadcast %1 : vector<256x1xf32> to vector<256x128xf32>
    %32 = arith.addf %30, %31 : vector<256x128xf32>
    %33 = arith.subf %32, %25 : vector<256x128xf32>
    %34 = vector.broadcast %cst_3 : f32 to vector<256x128xf32>
    %35 = arith.mulf %33, %34 : vector<256x128xf32>
    %36 = arith.addf %25, %35 : vector<256x128xf32>
    %cst_12 = arith.constant 1.000000e+00 : f32
    %37 = vector.broadcast %cst_12 : f32 to vector<256x128xf32>
    %38 = arith.cmpf oge, %36, %37 : vector<256x128xf32>
    %39 = arith.extui %38 : vector<256x128xi1> to vector<256x128xi32>
    %40 = arith.sitofp %39 : vector<256x128xi32> to vector<256x128xf32>
    %41 = arith.truncf %40 : vector<256x128xf32> to vector<256x128xbf16>
    %42 = arith.index_cast %c1_i32 : i32 to index
    %c0_13 = arith.constant 0 : index
    %c0_14 = arith.constant 0 : index
    %43 = vector.load %arg4[%42, %c0_13, %c0_14] : memref<2x256x128xbf16, #tpu.memory_space<vmem>>, vector<1x256x128xbf16>
    %44 = vector.shape_cast %43 : vector<1x256x128xbf16> to vector<256x128xbf16>
    %45 = vector.shape_cast %41 : vector<256x128xbf16> to vector<1x256x128xbf16>
    tpu.vector_store %arg4[%42, %c0_13, %c0_14], %45 {strides = array<i32>} : memref<2x256x128xbf16, #tpu.memory_space<vmem>>, vector<1x256x128xbf16>,
    %cst_15 = arith.constant 1.000000e+00 : f32
    %46 = vector.broadcast %cst_15 : f32 to vector<256x128xf32>
    %47 = arith.subf %46, %40 : vector<256x128xf32>
    %48 = arith.mulf %36, %47 : vector<256x128xf32>
    %c2_i32 = arith.constant 2 : i32
    return
  }
  func.func @transform_0(%arg0: i32) -> (i32, i32, i32) {
    %c0_i32 = arith.constant 0 : i32
    %c0_i32_0 = arith.constant 0 : i32
    %c0_i32_1 = arith.constant 0 : i32
    return %c0_i32, %arg0, %c0_i32_0 : i32, i32, i32
  }
  func.func @transform_1(%arg0: i32) -> (i32, i32) {
    %c0_i32 = arith.constant 0 : i32
    %c0_i32_0 = arith.constant 0 : i32
    return %arg0, %c0_i32 : i32, i32
  }
  func.func @transform_2(%arg0: i32) -> (i32, i32) {
    %c0_i32 = arith.constant 0 : i32
    %c0_i32_0 = arith.constant 0 : i32
    return %arg0, %c0_i32 : i32, i32
  }
  func.func @transform_3(%arg0: i32) -> (i32, i32, i32) {
    %c0_i32 = arith.constant 0 : i32
    %c0_i32_0 = arith.constant 0 : i32
    %c0_i32_1 = arith.constant 0 : i32
    return %c0_i32, %arg0, %c0_i32_0 : i32, i32, i32
  }
}

module attributes {stable_mosaic.version = 11 : i64} {
  func.func @_cmm_kernel(%arg0: i32, %arg1: i32, %arg2: memref<8x36xf32, #tpu.memory_space<vmem>>, %arg3: memref<1x36x2048xbf16, #tpu.memory_space<vmem>>, %arg4: memref<1x8x2048xf32, #tpu.memory_space<vmem>>) attributes {dimension_semantics = [#tpu.dimension_semantics<parallel>, #tpu.dimension_semantics<parallel>], iteration_bounds = array<i64: 2, 2>, scalar_prefetch = 0 : i64, scratch_operands = 0 : i64, tpu.core_type = #tpu.core_type<tc>, window_params = [{pipeline_mode = #tpu.pipeline_mode<synchronous>, transform_indices = @transform_0, window_bounds = array<i64: 8, 36>}, {transform_indices = @transform_1, window_bounds = array<i64: 1, 36, 2048>}, {transform_indices = @transform_2, window_bounds = array<i64: 1, 8, 2048>}]} {
    %c0 = arith.constant 0 : index
    %c0_0 = arith.constant 0 : index
    %0 = vector.load %arg2[%c0, %c0_0] : memref<8x36xf32, #tpu.memory_space<vmem>>, vector<8x36xf32>
    %c0_1 = arith.constant 0 : index
    %c0_2 = arith.constant 0 : index
    %c0_3 = arith.constant 0 : index
    %1 = vector.load %arg3[%c0_1, %c0_2, %c0_3] : memref<1x36x2048xbf16, #tpu.memory_space<vmem>>, vector<1x36x2048xbf16>
    %2 = vector.shape_cast %1 : vector<1x36x2048xbf16> to vector<36x2048xbf16>
    %3 = arith.extf %2 : vector<36x2048xbf16> to vector<36x2048xf32>
    %cst = arith.constant dense<0.000000e+00> : vector<8x2048xf32>
    %4 = tpu.matmul %0, %3, %cst {dimension_numbers = #tpu.dot_dimension_numbers<[1], [0], [0], [1], [0, 0, 1, 1], [], []>} : vector<8x36xf32>, vector<36x2048xf32>, vector<8x2048xf32> -> vector<8x2048xf32>
    %c0_4 = arith.constant 0 : index
    %c0_5 = arith.constant 0 : index
    %c0_6 = arith.constant 0 : index
    %5 = vector.load %arg4[%c0_4, %c0_5, %c0_6] : memref<1x8x2048xf32, #tpu.memory_space<vmem>>, vector<1x8x2048xf32>
    %6 = vector.shape_cast %5 : vector<1x8x2048xf32> to vector<8x2048xf32>
    %7 = vector.shape_cast %4 : vector<8x2048xf32> to vector<1x8x2048xf32>
    tpu.vector_store %arg4[%c0_4, %c0_5, %c0_6], %7 {strides = array<i32>} : memref<1x8x2048xf32, #tpu.memory_space<vmem>>, vector<1x8x2048xf32>,
    return
  }
  func.func @transform_0(%arg0: i32, %arg1: i32) -> (i32, i32) {
    %c0_i32 = arith.constant 0 : i32
    %c0_i32_0 = arith.constant 0 : i32
    %c0_i32_1 = arith.constant 0 : i32
    return %c0_i32, %c0_i32_0 : i32, i32
  }
  func.func @transform_1(%arg0: i32, %arg1: i32) -> (i32, i32, i32) {
    %c0_i32 = arith.constant 0 : i32
    %c0_i32_0 = arith.constant 0 : i32
    return %arg0, %c0_i32, %arg1 : i32, i32, i32
  }
  func.func @transform_2(%arg0: i32, %arg1: i32) -> (i32, i32, i32) {
    %c0_i32 = arith.constant 0 : i32
    %c0_i32_0 = arith.constant 0 : i32
    return %arg0, %c0_i32, %arg1 : i32, i32, i32
  }
}

module attributes {stable_mosaic.version = 11 : i64} {
  func.func @_lif_kernel(%arg0: i32, %arg1: memref<2x128x128xf32, #tpu.memory_space<vmem>>, %arg2: memref<128x1xf32, #tpu.memory_space<vmem>>, %arg3: memref<128x1xf32, #tpu.memory_space<vmem>>, %arg4: memref<2x128x128xbf16, #tpu.memory_space<vmem>>) attributes {dimension_semantics = [#tpu.dimension_semantics<parallel>], iteration_bounds = array<i64: 2>, scalar_prefetch = 0 : i64, scratch_operands = 0 : i64, tpu.core_type = #tpu.core_type<tc>, window_params = [{transform_indices = @transform_0, window_bounds = array<i64: 2, 128, 128>}, {transform_indices = @transform_1, window_bounds = array<i64: 128, 1>}, {transform_indices = @transform_2, window_bounds = array<i64: 128, 1>}, {transform_indices = @transform_3, window_bounds = array<i64: 2, 128, 128>}]} {
    %c0 = arith.constant 0 : index
    %c0_0 = arith.constant 0 : index
    %0 = vector.load %arg2[%c0, %c0_0] : memref<128x1xf32, #tpu.memory_space<vmem>>, vector<128x1xf32>
    %c0_1 = arith.constant 0 : index
    %c0_2 = arith.constant 0 : index
    %1 = vector.load %arg3[%c0_1, %c0_2] : memref<128x1xf32, #tpu.memory_space<vmem>>, vector<128x1xf32>
    %cst = arith.constant 0.000000e+00 : f32
    %2 = vector.broadcast %cst : f32 to vector<128x128xf32>
    %cst_3 = arith.constant 5.000000e-01 : f32
    %c0_i32 = arith.constant 0 : i32
    %3 = arith.index_cast %c0_i32 : i32 to index
    %c0_4 = arith.constant 0 : index
    %c0_5 = arith.constant 0 : index
    %4 = vector.load %arg1[%3, %c0_4, %c0_5] : memref<2x128x128xf32, #tpu.memory_space<vmem>>, vector<1x128x128xf32>
    %5 = vector.shape_cast %4 : vector<1x128x128xf32> to vector<128x128xf32>
    %6 = vector.broadcast %0 : vector<128x1xf32> to vector<128x128xf32>
    %7 = arith.mulf %5, %6 : vector<128x128xf32>
    %8 = vector.broadcast %1 : vector<128x1xf32> to vector<128x128xf32>
    %9 = arith.addf %7, %8 : vector<128x128xf32>
    %10 = arith.subf %9, %2 : vector<128x128xf32>
    %11 = vector.broadcast %cst_3 : f32 to vector<128x128xf32>
    %12 = arith.mulf %10, %11 : vector<128x128xf32>
    %13 = arith.addf %2, %12 : vector<128x128xf32>
    %cst_6 = arith.constant 1.000000e+00 : f32
    %14 = vector.broadcast %cst_6 : f32 to vector<128x128xf32>
    %15 = arith.cmpf oge, %13, %14 : vector<128x128xf32>
    %16 = arith.extui %15 : vector<128x128xi1> to vector<128x128xi32>
    %17 = arith.sitofp %16 : vector<128x128xi32> to vector<128x128xf32>
    %18 = arith.truncf %17 : vector<128x128xf32> to vector<128x128xbf16>
    %19 = arith.index_cast %c0_i32 : i32 to index
    %c0_7 = arith.constant 0 : index
    %c0_8 = arith.constant 0 : index
    %20 = vector.load %arg4[%19, %c0_7, %c0_8] : memref<2x128x128xbf16, #tpu.memory_space<vmem>>, vector<1x128x128xbf16>
    %21 = vector.shape_cast %20 : vector<1x128x128xbf16> to vector<128x128xbf16>
    %22 = vector.shape_cast %18 : vector<128x128xbf16> to vector<1x128x128xbf16>
    tpu.vector_store %arg4[%19, %c0_7, %c0_8], %22 {strides = array<i32>} : memref<2x128x128xbf16, #tpu.memory_space<vmem>>, vector<1x128x128xbf16>,
    %cst_9 = arith.constant 1.000000e+00 : f32
    %23 = vector.broadcast %cst_9 : f32 to vector<128x128xf32>
    %24 = arith.subf %23, %17 : vector<128x128xf32>
    %25 = arith.mulf %13, %24 : vector<128x128xf32>
    %c1_i32 = arith.constant 1 : i32
    %26 = arith.index_cast %c1_i32 : i32 to index
    %c0_10 = arith.constant 0 : index
    %c0_11 = arith.constant 0 : index
    %27 = vector.load %arg1[%26, %c0_10, %c0_11] : memref<2x128x128xf32, #tpu.memory_space<vmem>>, vector<1x128x128xf32>
    %28 = vector.shape_cast %27 : vector<1x128x128xf32> to vector<128x128xf32>
    %29 = vector.broadcast %0 : vector<128x1xf32> to vector<128x128xf32>
    %30 = arith.mulf %28, %29 : vector<128x128xf32>
    %31 = vector.broadcast %1 : vector<128x1xf32> to vector<128x128xf32>
    %32 = arith.addf %30, %31 : vector<128x128xf32>
    %33 = arith.subf %32, %25 : vector<128x128xf32>
    %34 = vector.broadcast %cst_3 : f32 to vector<128x128xf32>
    %35 = arith.mulf %33, %34 : vector<128x128xf32>
    %36 = arith.addf %25, %35 : vector<128x128xf32>
    %cst_12 = arith.constant 1.000000e+00 : f32
    %37 = vector.broadcast %cst_12 : f32 to vector<128x128xf32>
    %38 = arith.cmpf oge, %36, %37 : vector<128x128xf32>
    %39 = arith.extui %38 : vector<128x128xi1> to vector<128x128xi32>
    %40 = arith.sitofp %39 : vector<128x128xi32> to vector<128x128xf32>
    %41 = arith.truncf %40 : vector<128x128xf32> to vector<128x128xbf16>
    %42 = arith.index_cast %c1_i32 : i32 to index
    %c0_13 = arith.constant 0 : index
    %c0_14 = arith.constant 0 : index
    %43 = vector.load %arg4[%42, %c0_13, %c0_14] : memref<2x128x128xbf16, #tpu.memory_space<vmem>>, vector<1x128x128xbf16>
    %44 = vector.shape_cast %43 : vector<1x128x128xbf16> to vector<128x128xbf16>
    %45 = vector.shape_cast %41 : vector<128x128xbf16> to vector<1x128x128xbf16>
    tpu.vector_store %arg4[%42, %c0_13, %c0_14], %45 {strides = array<i32>} : memref<2x128x128xbf16, #tpu.memory_space<vmem>>, vector<1x128x128xbf16>,
    %cst_15 = arith.constant 1.000000e+00 : f32
    %46 = vector.broadcast %cst_15 : f32 to vector<128x128xf32>
    %47 = arith.subf %46, %40 : vector<128x128xf32>
    %48 = arith.mulf %36, %47 : vector<128x128xf32>
    %c2_i32 = arith.constant 2 : i32
    return
  }
  func.func @transform_0(%arg0: i32) -> (i32, i32, i32) {
    %c0_i32 = arith.constant 0 : i32
    %c0_i32_0 = arith.constant 0 : i32
    %c0_i32_1 = arith.constant 0 : i32
    return %c0_i32, %arg0, %c0_i32_0 : i32, i32, i32
  }
  func.func @transform_1(%arg0: i32) -> (i32, i32) {
    %c0_i32 = arith.constant 0 : i32
    %c0_i32_0 = arith.constant 0 : i32
    return %arg0, %c0_i32 : i32, i32
  }
  func.func @transform_2(%arg0: i32) -> (i32, i32) {
    %c0_i32 = arith.constant 0 : i32
    %c0_i32_0 = arith.constant 0 : i32
    return %arg0, %c0_i32 : i32, i32
  }
  func.func @transform_3(%arg0: i32) -> (i32, i32, i32) {
    %c0_i32 = arith.constant 0 : i32
    %c0_i32_0 = arith.constant 0 : i32
    %c0_i32_1 = arith.constant 0 : i32
    return %c0_i32, %arg0, %c0_i32_0 : i32, i32, i32
  }
}

module attributes {stable_mosaic.version = 11 : i64} {
  func.func @_cmm_kernel(%arg0: i32, %arg1: i32, %arg2: memref<16x72xf32, #tpu.memory_space<vmem>>, %arg3: memref<1x72x1024xbf16, #tpu.memory_space<vmem>>, %arg4: memref<1x16x1024xf32, #tpu.memory_space<vmem>>) attributes {dimension_semantics = [#tpu.dimension_semantics<parallel>, #tpu.dimension_semantics<parallel>], iteration_bounds = array<i64: 2, 1>, scalar_prefetch = 0 : i64, scratch_operands = 0 : i64, tpu.core_type = #tpu.core_type<tc>, window_params = [{pipeline_mode = #tpu.pipeline_mode<synchronous>, transform_indices = @transform_0, window_bounds = array<i64: 16, 72>}, {transform_indices = @transform_1, window_bounds = array<i64: 1, 72, 1024>}, {transform_indices = @transform_2, window_bounds = array<i64: 1, 16, 1024>}]} {
    %c0 = arith.constant 0 : index
    %c0_0 = arith.constant 0 : index
    %0 = vector.load %arg2[%c0, %c0_0] : memref<16x72xf32, #tpu.memory_space<vmem>>, vector<16x72xf32>
    %c0_1 = arith.constant 0 : index
    %c0_2 = arith.constant 0 : index
    %c0_3 = arith.constant 0 : index
    %1 = vector.load %arg3[%c0_1, %c0_2, %c0_3] : memref<1x72x1024xbf16, #tpu.memory_space<vmem>>, vector<1x72x1024xbf16>
    %2 = vector.shape_cast %1 : vector<1x72x1024xbf16> to vector<72x1024xbf16>
    %3 = arith.extf %2 : vector<72x1024xbf16> to vector<72x1024xf32>
    %cst = arith.constant dense<0.000000e+00> : vector<16x1024xf32>
    %4 = tpu.matmul %0, %3, %cst {dimension_numbers = #tpu.dot_dimension_numbers<[1], [0], [0], [1], [0, 0, 1, 1], [], []>} : vector<16x72xf32>, vector<72x1024xf32>, vector<16x1024xf32> -> vector<16x1024xf32>
    %c0_4 = arith.constant 0 : index
    %c0_5 = arith.constant 0 : index
    %c0_6 = arith.constant 0 : index
    %5 = vector.load %arg4[%c0_4, %c0_5, %c0_6] : memref<1x16x1024xf32, #tpu.memory_space<vmem>>, vector<1x16x1024xf32>
    %6 = vector.shape_cast %5 : vector<1x16x1024xf32> to vector<16x1024xf32>
    %7 = vector.shape_cast %4 : vector<16x1024xf32> to vector<1x16x1024xf32>
    tpu.vector_store %arg4[%c0_4, %c0_5, %c0_6], %7 {strides = array<i32>} : memref<1x16x1024xf32, #tpu.memory_space<vmem>>, vector<1x16x1024xf32>,
    return
  }
  func.func @transform_0(%arg0: i32, %arg1: i32) -> (i32, i32) {
    %c0_i32 = arith.constant 0 : i32
    %c0_i32_0 = arith.constant 0 : i32
    %c0_i32_1 = arith.constant 0 : i32
    return %c0_i32, %c0_i32_0 : i32, i32
  }
  func.func @transform_1(%arg0: i32, %arg1: i32) -> (i32, i32, i32) {
    %c0_i32 = arith.constant 0 : i32
    %c0_i32_0 = arith.constant 0 : i32
    return %arg0, %c0_i32, %arg1 : i32, i32, i32
  }
  func.func @transform_2(%arg0: i32, %arg1: i32) -> (i32, i32, i32) {
    %c0_i32 = arith.constant 0 : i32
    %c0_i32_0 = arith.constant 0 : i32
    return %arg0, %c0_i32, %arg1 : i32, i32, i32
  }
}

module attributes {stable_mosaic.version = 11 : i64} {
  func.func @_lif_kernel(%arg0: i32, %arg1: memref<2x64x128xf32, #tpu.memory_space<vmem>>, %arg2: memref<64x1xf32, #tpu.memory_space<vmem>>, %arg3: memref<64x1xf32, #tpu.memory_space<vmem>>, %arg4: memref<2x64x128xbf16, #tpu.memory_space<vmem>>) attributes {dimension_semantics = [#tpu.dimension_semantics<parallel>], iteration_bounds = array<i64: 2>, scalar_prefetch = 0 : i64, scratch_operands = 0 : i64, tpu.core_type = #tpu.core_type<tc>, window_params = [{transform_indices = @transform_0, window_bounds = array<i64: 2, 64, 128>}, {transform_indices = @transform_1, window_bounds = array<i64: 64, 1>}, {transform_indices = @transform_2, window_bounds = array<i64: 64, 1>}, {transform_indices = @transform_3, window_bounds = array<i64: 2, 64, 128>}]} {
    %c0 = arith.constant 0 : index
    %c0_0 = arith.constant 0 : index
    %0 = vector.load %arg2[%c0, %c0_0] : memref<64x1xf32, #tpu.memory_space<vmem>>, vector<64x1xf32>
    %c0_1 = arith.constant 0 : index
    %c0_2 = arith.constant 0 : index
    %1 = vector.load %arg3[%c0_1, %c0_2] : memref<64x1xf32, #tpu.memory_space<vmem>>, vector<64x1xf32>
    %cst = arith.constant 0.000000e+00 : f32
    %2 = vector.broadcast %cst : f32 to vector<64x128xf32>
    %cst_3 = arith.constant 5.000000e-01 : f32
    %c0_i32 = arith.constant 0 : i32
    %3 = arith.index_cast %c0_i32 : i32 to index
    %c0_4 = arith.constant 0 : index
    %c0_5 = arith.constant 0 : index
    %4 = vector.load %arg1[%3, %c0_4, %c0_5] : memref<2x64x128xf32, #tpu.memory_space<vmem>>, vector<1x64x128xf32>
    %5 = vector.shape_cast %4 : vector<1x64x128xf32> to vector<64x128xf32>
    %6 = vector.broadcast %0 : vector<64x1xf32> to vector<64x128xf32>
    %7 = arith.mulf %5, %6 : vector<64x128xf32>
    %8 = vector.broadcast %1 : vector<64x1xf32> to vector<64x128xf32>
    %9 = arith.addf %7, %8 : vector<64x128xf32>
    %10 = arith.subf %9, %2 : vector<64x128xf32>
    %11 = vector.broadcast %cst_3 : f32 to vector<64x128xf32>
    %12 = arith.mulf %10, %11 : vector<64x128xf32>
    %13 = arith.addf %2, %12 : vector<64x128xf32>
    %cst_6 = arith.constant 1.000000e+00 : f32
    %14 = vector.broadcast %cst_6 : f32 to vector<64x128xf32>
    %15 = arith.cmpf oge, %13, %14 : vector<64x128xf32>
    %16 = arith.extui %15 : vector<64x128xi1> to vector<64x128xi32>
    %17 = arith.sitofp %16 : vector<64x128xi32> to vector<64x128xf32>
    %18 = arith.truncf %17 : vector<64x128xf32> to vector<64x128xbf16>
    %19 = arith.index_cast %c0_i32 : i32 to index
    %c0_7 = arith.constant 0 : index
    %c0_8 = arith.constant 0 : index
    %20 = vector.load %arg4[%19, %c0_7, %c0_8] : memref<2x64x128xbf16, #tpu.memory_space<vmem>>, vector<1x64x128xbf16>
    %21 = vector.shape_cast %20 : vector<1x64x128xbf16> to vector<64x128xbf16>
    %22 = vector.shape_cast %18 : vector<64x128xbf16> to vector<1x64x128xbf16>
    tpu.vector_store %arg4[%19, %c0_7, %c0_8], %22 {strides = array<i32>} : memref<2x64x128xbf16, #tpu.memory_space<vmem>>, vector<1x64x128xbf16>,
    %cst_9 = arith.constant 1.000000e+00 : f32
    %23 = vector.broadcast %cst_9 : f32 to vector<64x128xf32>
    %24 = arith.subf %23, %17 : vector<64x128xf32>
    %25 = arith.mulf %13, %24 : vector<64x128xf32>
    %c1_i32 = arith.constant 1 : i32
    %26 = arith.index_cast %c1_i32 : i32 to index
    %c0_10 = arith.constant 0 : index
    %c0_11 = arith.constant 0 : index
    %27 = vector.load %arg1[%26, %c0_10, %c0_11] : memref<2x64x128xf32, #tpu.memory_space<vmem>>, vector<1x64x128xf32>
    %28 = vector.shape_cast %27 : vector<1x64x128xf32> to vector<64x128xf32>
    %29 = vector.broadcast %0 : vector<64x1xf32> to vector<64x128xf32>
    %30 = arith.mulf %28, %29 : vector<64x128xf32>
    %31 = vector.broadcast %1 : vector<64x1xf32> to vector<64x128xf32>
    %32 = arith.addf %30, %31 : vector<64x128xf32>
    %33 = arith.subf %32, %25 : vector<64x128xf32>
    %34 = vector.broadcast %cst_3 : f32 to vector<64x128xf32>
    %35 = arith.mulf %33, %34 : vector<64x128xf32>
    %36 = arith.addf %25, %35 : vector<64x128xf32>
    %cst_12 = arith.constant 1.000000e+00 : f32
    %37 = vector.broadcast %cst_12 : f32 to vector<64x128xf32>
    %38 = arith.cmpf oge, %36, %37 : vector<64x128xf32>
    %39 = arith.extui %38 : vector<64x128xi1> to vector<64x128xi32>
    %40 = arith.sitofp %39 : vector<64x128xi32> to vector<64x128xf32>
    %41 = arith.truncf %40 : vector<64x128xf32> to vector<64x128xbf16>
    %42 = arith.index_cast %c1_i32 : i32 to index
    %c0_13 = arith.constant 0 : index
    %c0_14 = arith.constant 0 : index
    %43 = vector.load %arg4[%42, %c0_13, %c0_14] : memref<2x64x128xbf16, #tpu.memory_space<vmem>>, vector<1x64x128xbf16>
    %44 = vector.shape_cast %43 : vector<1x64x128xbf16> to vector<64x128xbf16>
    %45 = vector.shape_cast %41 : vector<64x128xbf16> to vector<1x64x128xbf16>
    tpu.vector_store %arg4[%42, %c0_13, %c0_14], %45 {strides = array<i32>} : memref<2x64x128xbf16, #tpu.memory_space<vmem>>, vector<1x64x128xbf16>,
    %cst_15 = arith.constant 1.000000e+00 : f32
    %46 = vector.broadcast %cst_15 : f32 to vector<64x128xf32>
    %47 = arith.subf %46, %40 : vector<64x128xf32>
    %48 = arith.mulf %36, %47 : vector<64x128xf32>
    %c2_i32 = arith.constant 2 : i32
    return
  }
  func.func @transform_0(%arg0: i32) -> (i32, i32, i32) {
    %c0_i32 = arith.constant 0 : i32
    %c0_i32_0 = arith.constant 0 : i32
    %c0_i32_1 = arith.constant 0 : i32
    return %c0_i32, %arg0, %c0_i32_0 : i32, i32, i32
  }
  func.func @transform_1(%arg0: i32) -> (i32, i32) {
    %c0_i32 = arith.constant 0 : i32
    %c0_i32_0 = arith.constant 0 : i32
    return %arg0, %c0_i32 : i32, i32
  }
  func.func @transform_2(%arg0: i32) -> (i32, i32) {
    %c0_i32 = arith.constant 0 : i32
    %c0_i32_0 = arith.constant 0 : i32
    return %arg0, %c0_i32 : i32, i32
  }
  func.func @transform_3(%arg0: i32) -> (i32, i32, i32) {
    %c0_i32 = arith.constant 0 : i32
    %c0_i32_0 = arith.constant 0 : i32
    %c0_i32_1 = arith.constant 0 : i32
    return %c0_i32, %arg0, %c0_i32_0 : i32, i32, i32
  }
}

module attributes {stable_mosaic.version = 11 : i64} {
  func.func @_cmm_kernel(%arg0: i32, %arg1: i32, %arg2: memref<32x144xf32, #tpu.memory_space<vmem>>, %arg3: memref<1x144x256xbf16, #tpu.memory_space<vmem>>, %arg4: memref<1x32x256xf32, #tpu.memory_space<vmem>>) attributes {dimension_semantics = [#tpu.dimension_semantics<parallel>, #tpu.dimension_semantics<parallel>], iteration_bounds = array<i64: 2, 1>, scalar_prefetch = 0 : i64, scratch_operands = 0 : i64, tpu.core_type = #tpu.core_type<tc>, window_params = [{pipeline_mode = #tpu.pipeline_mode<synchronous>, transform_indices = @transform_0, window_bounds = array<i64: 32, 144>}, {transform_indices = @transform_1, window_bounds = array<i64: 1, 144, 256>}, {transform_indices = @transform_2, window_bounds = array<i64: 1, 32, 256>}]} {
    %c0 = arith.constant 0 : index
    %c0_0 = arith.constant 0 : index
    %0 = vector.load %arg2[%c0, %c0_0] : memref<32x144xf32, #tpu.memory_space<vmem>>, vector<32x144xf32>
    %c0_1 = arith.constant 0 : index
    %c0_2 = arith.constant 0 : index
    %c0_3 = arith.constant 0 : index
    %1 = vector.load %arg3[%c0_1, %c0_2, %c0_3] : memref<1x144x256xbf16, #tpu.memory_space<vmem>>, vector<1x144x256xbf16>
    %2 = vector.shape_cast %1 : vector<1x144x256xbf16> to vector<144x256xbf16>
    %3 = arith.extf %2 : vector<144x256xbf16> to vector<144x256xf32>
    %cst = arith.constant dense<0.000000e+00> : vector<32x256xf32>
    %4 = tpu.matmul %0, %3, %cst {dimension_numbers = #tpu.dot_dimension_numbers<[1], [0], [0], [1], [0, 0, 1, 1], [], []>} : vector<32x144xf32>, vector<144x256xf32>, vector<32x256xf32> -> vector<32x256xf32>
    %c0_4 = arith.constant 0 : index
    %c0_5 = arith.constant 0 : index
    %c0_6 = arith.constant 0 : index
    %5 = vector.load %arg4[%c0_4, %c0_5, %c0_6] : memref<1x32x256xf32, #tpu.memory_space<vmem>>, vector<1x32x256xf32>
    %6 = vector.shape_cast %5 : vector<1x32x256xf32> to vector<32x256xf32>
    %7 = vector.shape_cast %4 : vector<32x256xf32> to vector<1x32x256xf32>
    tpu.vector_store %arg4[%c0_4, %c0_5, %c0_6], %7 {strides = array<i32>} : memref<1x32x256xf32, #tpu.memory_space<vmem>>, vector<1x32x256xf32>,
    return
  }
  func.func @transform_0(%arg0: i32, %arg1: i32) -> (i32, i32) {
    %c0_i32 = arith.constant 0 : i32
    %c0_i32_0 = arith.constant 0 : i32
    %c0_i32_1 = arith.constant 0 : i32
    return %c0_i32, %c0_i32_0 : i32, i32
  }
  func.func @transform_1(%arg0: i32, %arg1: i32) -> (i32, i32, i32) {
    %c0_i32 = arith.constant 0 : i32
    %c0_i32_0 = arith.constant 0 : i32
    return %arg0, %c0_i32, %arg1 : i32, i32, i32
  }
  func.func @transform_2(%arg0: i32, %arg1: i32) -> (i32, i32, i32) {
    %c0_i32 = arith.constant 0 : i32
    %c0_i32_0 = arith.constant 0 : i32
    return %arg0, %c0_i32, %arg1 : i32, i32, i32
  }
}

module attributes {stable_mosaic.version = 11 : i64} {
  func.func @_lif_kernel(%arg0: i32, %arg1: memref<2x16x128xf32, #tpu.memory_space<vmem>>, %arg2: memref<16x1xf32, #tpu.memory_space<vmem>>, %arg3: memref<16x1xf32, #tpu.memory_space<vmem>>, %arg4: memref<2x16x128xbf16, #tpu.memory_space<vmem>>) attributes {dimension_semantics = [#tpu.dimension_semantics<parallel>], iteration_bounds = array<i64: 1>, scalar_prefetch = 0 : i64, scratch_operands = 0 : i64, tpu.core_type = #tpu.core_type<tc>, window_params = [{transform_indices = @transform_0, window_bounds = array<i64: 2, 16, 128>}, {transform_indices = @transform_1, window_bounds = array<i64: 16, 1>}, {transform_indices = @transform_2, window_bounds = array<i64: 16, 1>}, {transform_indices = @transform_3, window_bounds = array<i64: 2, 16, 128>}]} {
    %c0 = arith.constant 0 : index
    %c0_0 = arith.constant 0 : index
    %0 = vector.load %arg2[%c0, %c0_0] : memref<16x1xf32, #tpu.memory_space<vmem>>, vector<16x1xf32>
    %c0_1 = arith.constant 0 : index
    %c0_2 = arith.constant 0 : index
    %1 = vector.load %arg3[%c0_1, %c0_2] : memref<16x1xf32, #tpu.memory_space<vmem>>, vector<16x1xf32>
    %cst = arith.constant 0.000000e+00 : f32
    %2 = vector.broadcast %cst : f32 to vector<16x128xf32>
    %cst_3 = arith.constant 5.000000e-01 : f32
    %c0_i32 = arith.constant 0 : i32
    %3 = arith.index_cast %c0_i32 : i32 to index
    %c0_4 = arith.constant 0 : index
    %c0_5 = arith.constant 0 : index
    %4 = vector.load %arg1[%3, %c0_4, %c0_5] : memref<2x16x128xf32, #tpu.memory_space<vmem>>, vector<1x16x128xf32>
    %5 = vector.shape_cast %4 : vector<1x16x128xf32> to vector<16x128xf32>
    %6 = vector.broadcast %0 : vector<16x1xf32> to vector<16x128xf32>
    %7 = arith.mulf %5, %6 : vector<16x128xf32>
    %8 = vector.broadcast %1 : vector<16x1xf32> to vector<16x128xf32>
    %9 = arith.addf %7, %8 : vector<16x128xf32>
    %10 = arith.subf %9, %2 : vector<16x128xf32>
    %11 = vector.broadcast %cst_3 : f32 to vector<16x128xf32>
    %12 = arith.mulf %10, %11 : vector<16x128xf32>
    %13 = arith.addf %2, %12 : vector<16x128xf32>
    %cst_6 = arith.constant 1.000000e+00 : f32
    %14 = vector.broadcast %cst_6 : f32 to vector<16x128xf32>
    %15 = arith.cmpf oge, %13, %14 : vector<16x128xf32>
    %16 = arith.extui %15 : vector<16x128xi1> to vector<16x128xi32>
    %17 = arith.sitofp %16 : vector<16x128xi32> to vector<16x128xf32>
    %18 = arith.truncf %17 : vector<16x128xf32> to vector<16x128xbf16>
    %19 = arith.index_cast %c0_i32 : i32 to index
    %c0_7 = arith.constant 0 : index
    %c0_8 = arith.constant 0 : index
    %20 = vector.load %arg4[%19, %c0_7, %c0_8] : memref<2x16x128xbf16, #tpu.memory_space<vmem>>, vector<1x16x128xbf16>
    %21 = vector.shape_cast %20 : vector<1x16x128xbf16> to vector<16x128xbf16>
    %22 = vector.shape_cast %18 : vector<16x128xbf16> to vector<1x16x128xbf16>
    tpu.vector_store %arg4[%19, %c0_7, %c0_8], %22 {strides = array<i32>} : memref<2x16x128xbf16, #tpu.memory_space<vmem>>, vector<1x16x128xbf16>,
    %cst_9 = arith.constant 1.000000e+00 : f32
    %23 = vector.broadcast %cst_9 : f32 to vector<16x128xf32>
    %24 = arith.subf %23, %17 : vector<16x128xf32>
    %25 = arith.mulf %13, %24 : vector<16x128xf32>
    %c1_i32 = arith.constant 1 : i32
    %26 = arith.index_cast %c1_i32 : i32 to index
    %c0_10 = arith.constant 0 : index
    %c0_11 = arith.constant 0 : index
    %27 = vector.load %arg1[%26, %c0_10, %c0_11] : memref<2x16x128xf32, #tpu.memory_space<vmem>>, vector<1x16x128xf32>
    %28 = vector.shape_cast %27 : vector<1x16x128xf32> to vector<16x128xf32>
    %29 = vector.broadcast %0 : vector<16x1xf32> to vector<16x128xf32>
    %30 = arith.mulf %28, %29 : vector<16x128xf32>
    %31 = vector.broadcast %1 : vector<16x1xf32> to vector<16x128xf32>
    %32 = arith.addf %30, %31 : vector<16x128xf32>
    %33 = arith.subf %32, %25 : vector<16x128xf32>
    %34 = vector.broadcast %cst_3 : f32 to vector<16x128xf32>
    %35 = arith.mulf %33, %34 : vector<16x128xf32>
    %36 = arith.addf %25, %35 : vector<16x128xf32>
    %cst_12 = arith.constant 1.000000e+00 : f32
    %37 = vector.broadcast %cst_12 : f32 to vector<16x128xf32>
    %38 = arith.cmpf oge, %36, %37 : vector<16x128xf32>
    %39 = arith.extui %38 : vector<16x128xi1> to vector<16x128xi32>
    %40 = arith.sitofp %39 : vector<16x128xi32> to vector<16x128xf32>
    %41 = arith.truncf %40 : vector<16x128xf32> to vector<16x128xbf16>
    %42 = arith.index_cast %c1_i32 : i32 to index
    %c0_13 = arith.constant 0 : index
    %c0_14 = arith.constant 0 : index
    %43 = vector.load %arg4[%42, %c0_13, %c0_14] : memref<2x16x128xbf16, #tpu.memory_space<vmem>>, vector<1x16x128xbf16>
    %44 = vector.shape_cast %43 : vector<1x16x128xbf16> to vector<16x128xbf16>
    %45 = vector.shape_cast %41 : vector<16x128xbf16> to vector<1x16x128xbf16>
    tpu.vector_store %arg4[%42, %c0_13, %c0_14], %45 {strides = array<i32>} : memref<2x16x128xbf16, #tpu.memory_space<vmem>>, vector<1x16x128xbf16>,
    %cst_15 = arith.constant 1.000000e+00 : f32
    %46 = vector.broadcast %cst_15 : f32 to vector<16x128xf32>
    %47 = arith.subf %46, %40 : vector<16x128xf32>
    %48 = arith.mulf %36, %47 : vector<16x128xf32>
    %c2_i32 = arith.constant 2 : i32
    return
  }
  func.func @transform_0(%arg0: i32) -> (i32, i32, i32) {
    %c0_i32 = arith.constant 0 : i32
    %c0_i32_0 = arith.constant 0 : i32
    %c0_i32_1 = arith.constant 0 : i32
    return %c0_i32, %arg0, %c0_i32_0 : i32, i32, i32
  }
  func.func @transform_1(%arg0: i32) -> (i32, i32) {
    %c0_i32 = arith.constant 0 : i32
    %c0_i32_0 = arith.constant 0 : i32
    return %arg0, %c0_i32 : i32, i32
  }
  func.func @transform_2(%arg0: i32) -> (i32, i32) {
    %c0_i32 = arith.constant 0 : i32
    %c0_i32_0 = arith.constant 0 : i32
    return %arg0, %c0_i32 : i32, i32
  }
  func.func @transform_3(%arg0: i32) -> (i32, i32, i32) {
    %c0_i32 = arith.constant 0 : i32
    %c0_i32_0 = arith.constant 0 : i32
    %c0_i32_1 = arith.constant 0 : i32
    return %c0_i32, %arg0, %c0_i32_0 : i32, i32, i32
  }
}

module attributes {stable_mosaic.version = 11 : i64} {
  func.func @_cmm_kernel(%arg0: i32, %arg1: i32, %arg2: memref<32x288xf32, #tpu.memory_space<vmem>>, %arg3: memref<1x288x64xbf16, #tpu.memory_space<vmem>>, %arg4: memref<1x32x64xf32, #tpu.memory_space<vmem>>) attributes {dimension_semantics = [#tpu.dimension_semantics<parallel>, #tpu.dimension_semantics<parallel>], iteration_bounds = array<i64: 2, 1>, scalar_prefetch = 0 : i64, scratch_operands = 0 : i64, tpu.core_type = #tpu.core_type<tc>, window_params = [{pipeline_mode = #tpu.pipeline_mode<synchronous>, transform_indices = @transform_0, window_bounds = array<i64: 32, 288>}, {transform_indices = @transform_1, window_bounds = array<i64: 1, 288, 64>}, {transform_indices = @transform_2, window_bounds = array<i64: 1, 32, 64>}]} {
    %c0 = arith.constant 0 : index
    %c0_0 = arith.constant 0 : index
    %0 = vector.load %arg2[%c0, %c0_0] : memref<32x288xf32, #tpu.memory_space<vmem>>, vector<32x288xf32>
    %c0_1 = arith.constant 0 : index
    %c0_2 = arith.constant 0 : index
    %c0_3 = arith.constant 0 : index
    %1 = vector.load %arg3[%c0_1, %c0_2, %c0_3] : memref<1x288x64xbf16, #tpu.memory_space<vmem>>, vector<1x288x64xbf16>
    %2 = vector.shape_cast %1 : vector<1x288x64xbf16> to vector<288x64xbf16>
    %3 = arith.extf %2 : vector<288x64xbf16> to vector<288x64xf32>
    %cst = arith.constant dense<0.000000e+00> : vector<32x64xf32>
    %4 = tpu.matmul %0, %3, %cst {dimension_numbers = #tpu.dot_dimension_numbers<[1], [0], [0], [1], [0, 0, 1, 1], [], []>} : vector<32x288xf32>, vector<288x64xf32>, vector<32x64xf32> -> vector<32x64xf32>
    %c0_4 = arith.constant 0 : index
    %c0_5 = arith.constant 0 : index
    %c0_6 = arith.constant 0 : index
    %5 = vector.load %arg4[%c0_4, %c0_5, %c0_6] : memref<1x32x64xf32, #tpu.memory_space<vmem>>, vector<1x32x64xf32>
    %6 = vector.shape_cast %5 : vector<1x32x64xf32> to vector<32x64xf32>
    %7 = vector.shape_cast %4 : vector<32x64xf32> to vector<1x32x64xf32>
    tpu.vector_store %arg4[%c0_4, %c0_5, %c0_6], %7 {strides = array<i32>} : memref<1x32x64xf32, #tpu.memory_space<vmem>>, vector<1x32x64xf32>,
    return
  }
  func.func @transform_0(%arg0: i32, %arg1: i32) -> (i32, i32) {
    %c0_i32 = arith.constant 0 : i32
    %c0_i32_0 = arith.constant 0 : i32
    %c0_i32_1 = arith.constant 0 : i32
    return %c0_i32, %c0_i32_0 : i32, i32
  }
  func.func @transform_1(%arg0: i32, %arg1: i32) -> (i32, i32, i32) {
    %c0_i32 = arith.constant 0 : i32
    %c0_i32_0 = arith.constant 0 : i32
    return %arg0, %c0_i32, %arg1 : i32, i32, i32
  }
  func.func @transform_2(%arg0: i32, %arg1: i32) -> (i32, i32, i32) {
    %c0_i32 = arith.constant 0 : i32
    %c0_i32_0 = arith.constant 0 : i32
    return %arg0, %c0_i32, %arg1 : i32, i32, i32
  }
}

module attributes {stable_mosaic.version = 11 : i64} {
  func.func @_negif_kernel(%arg0: i32, %arg1: memref<2x16x128xbf16, #tpu.memory_space<vmem>>, %arg2: memref<16x1xf32, #tpu.memory_space<vmem>>, %arg3: memref<16x1xf32, #tpu.memory_space<vmem>>, %arg4: memref<2x16x128xbf16, #tpu.memory_space<vmem>>) attributes {dimension_semantics = [#tpu.dimension_semantics<parallel>], iteration_bounds = array<i64: 1>, scalar_prefetch = 0 : i64, scratch_operands = 0 : i64, tpu.core_type = #tpu.core_type<tc>, window_params = [{transform_indices = @transform_0, window_bounds = array<i64: 2, 16, 128>}, {transform_indices = @transform_1, window_bounds = array<i64: 16, 1>}, {transform_indices = @transform_2, window_bounds = array<i64: 16, 1>}, {transform_indices = @transform_3, window_bounds = array<i64: 2, 16, 128>}]} {
    %c0 = arith.constant 0 : index
    %c0_0 = arith.constant 0 : index
    %0 = vector.load %arg2[%c0, %c0_0] : memref<16x1xf32, #tpu.memory_space<vmem>>, vector<16x1xf32>
    %c0_1 = arith.constant 0 : index
    %c0_2 = arith.constant 0 : index
    %1 = vector.load %arg3[%c0_1, %c0_2] : memref<16x1xf32, #tpu.memory_space<vmem>>, vector<16x1xf32>
    %cst = arith.constant 0.000000e+00 : f32
    %2 = vector.broadcast %cst : f32 to vector<16x128xf32>
    %c0_i32 = arith.constant 0 : i32
    %3 = arith.index_cast %c0_i32 : i32 to index
    %c0_3 = arith.constant 0 : index
    %c0_4 = arith.constant 0 : index
    %4 = vector.load %arg1[%3, %c0_3, %c0_4] : memref<2x16x128xbf16, #tpu.memory_space<vmem>>, vector<1x16x128xbf16>
    %5 = vector.shape_cast %4 : vector<1x16x128xbf16> to vector<16x128xbf16>
    %6 = arith.extf %5 : vector<16x128xbf16> to vector<16x128xf32>
    %7 = vector.broadcast %0 : vector<16x1xf32> to vector<16x128xf32>
    %8 = arith.mulf %6, %7 : vector<16x128xf32>
    %9 = arith.addf %2, %8 : vector<16x128xf32>
    %10 = vector.broadcast %1 : vector<16x1xf32> to vector<16x128xf32>
    %11 = arith.addf %9, %10 : vector<16x128xf32>
    %cst_5 = arith.constant 1.000000e+00 : f32
    %12 = vector.broadcast %cst_5 : f32 to vector<16x128xf32>
    %13 = arith.cmpf oge, %11, %12 : vector<16x128xf32>
    %14 = arith.extui %13 : vector<16x128xi1> to vector<16x128xi32>
    %15 = arith.sitofp %14 : vector<16x128xi32> to vector<16x128xf32>
    %cst_6 = arith.constant -1.000000e+00 : f32
    %16 = vector.broadcast %cst_6 : f32 to vector<16x128xf32>
    %17 = arith.cmpf ole, %11, %16 : vector<16x128xf32>
    %18 = arith.extui %17 : vector<16x128xi1> to vector<16x128xi32>
    %19 = arith.sitofp %18 : vector<16x128xi32> to vector<16x128xf32>
    %20 = arith.subf %15, %19 : vector<16x128xf32>
    %21 = arith.truncf %20 : vector<16x128xf32> to vector<16x128xbf16>
    %22 = arith.index_cast %c0_i32 : i32 to index
    %c0_7 = arith.constant 0 : index
    %c0_8 = arith.constant 0 : index
    %23 = vector.load %arg4[%22, %c0_7, %c0_8] : memref<2x16x128xbf16, #tpu.memory_space<vmem>>, vector<1x16x128xbf16>
    %24 = vector.shape_cast %23 : vector<1x16x128xbf16> to vector<16x128xbf16>
    %25 = vector.shape_cast %21 : vector<16x128xbf16> to vector<1x16x128xbf16>
    tpu.vector_store %arg4[%22, %c0_7, %c0_8], %25 {strides = array<i32>} : memref<2x16x128xbf16, #tpu.memory_space<vmem>>, vector<1x16x128xbf16>,
    %cst_9 = arith.constant 1.000000e+00 : f32
    %26 = vector.broadcast %cst_9 : f32 to vector<16x128xf32>
    %27 = arith.subf %26, %15 : vector<16x128xf32>
    %28 = arith.subf %27, %19 : vector<16x128xf32>
    %29 = arith.mulf %11, %28 : vector<16x128xf32>
    %c1_i32 = arith.constant 1 : i32
    %30 = arith.index_cast %c1_i32 : i32 to index
    %c0_10 = arith.constant 0 : index
    %c0_11 = arith.constant 0 : index
    %31 = vector.load %arg1[%30, %c0_10, %c0_11] : memref<2x16x128xbf16, #tpu.memory_space<vmem>>, vector<1x16x128xbf16>
    %32 = vector.shape_cast %31 : vector<1x16x128xbf16> to vector<16x128xbf16>
    %33 = arith.extf %32 : vector<16x128xbf16> to vector<16x128xf32>
    %34 = vector.broadcast %0 : vector<16x1xf32> to vector<16x128xf32>
    %35 = arith.mulf %33, %34 : vector<16x128xf32>
    %36 = arith.addf %29, %35 : vector<16x128xf32>
    %37 = vector.broadcast %1 : vector<16x1xf32> to vector<16x128xf32>
    %38 = arith.addf %36, %37 : vector<16x128xf32>
    %cst_12 = arith.constant 1.000000e+00 : f32
    %39 = vector.broadcast %cst_12 : f32 to vector<16x128xf32>
    %40 = arith.cmpf oge, %38, %39 : vector<16x128xf32>
    %41 = arith.extui %40 : vector<16x128xi1> to vector<16x128xi32>
    %42 = arith.sitofp %41 : vector<16x128xi32> to vector<16x128xf32>
    %cst_13 = arith.constant -1.000000e+00 : f32
    %43 = vector.broadcast %cst_13 : f32 to vector<16x128xf32>
    %44 = arith.cmpf ole, %38, %43 : vector<16x128xf32>
    %45 = arith.extui %44 : vector<16x128xi1> to vector<16x128xi32>
    %46 = arith.sitofp %45 : vector<16x128xi32> to vector<16x128xf32>
    %47 = arith.subf %42, %46 : vector<16x128xf32>
    %48 = arith.truncf %47 : vector<16x128xf32> to vector<16x128xbf16>
    %49 = arith.index_cast %c1_i32 : i32 to index
    %c0_14 = arith.constant 0 : index
    %c0_15 = arith.constant 0 : index
    %50 = vector.load %arg4[%49, %c0_14, %c0_15] : memref<2x16x128xbf16, #tpu.memory_space<vmem>>, vector<1x16x128xbf16>
    %51 = vector.shape_cast %50 : vector<1x16x128xbf16> to vector<16x128xbf16>
    %52 = vector.shape_cast %48 : vector<16x128xbf16> to vector<1x16x128xbf16>
    tpu.vector_store %arg4[%49, %c0_14, %c0_15], %52 {strides = array<i32>} : memref<2x16x128xbf16, #tpu.memory_space<vmem>>, vector<1x16x128xbf16>,
    %cst_16 = arith.constant 1.000000e+00 : f32
    %53 = vector.broadcast %cst_16 : f32 to vector<16x128xf32>
    %54 = arith.subf %53, %42 : vector<16x128xf32>
    %55 = arith.subf %54, %46 : vector<16x128xf32>
    %56 = arith.mulf %38, %55 : vector<16x128xf32>
    %c2_i32 = arith.constant 2 : i32
    return
  }
  func.func @transform_0(%arg0: i32) -> (i32, i32, i32) {
    %c0_i32 = arith.constant 0 : i32
    %c0_i32_0 = arith.constant 0 : i32
    %c0_i32_1 = arith.constant 0 : i32
    return %c0_i32, %arg0, %c0_i32_0 : i32, i32, i32
  }
  func.func @transform_1(%arg0: i32) -> (i32, i32) {
    %c0_i32 = arith.constant 0 : i32
    %c0_i32_0 = arith.constant 0 : i32
    return %arg0, %c0_i32 : i32, i32
  }
  func.func @transform_2(%arg0: i32) -> (i32, i32) {
    %c0_i32 = arith.constant 0 : i32
    %c0_i32_0 = arith.constant 0 : i32
    return %arg0, %c0_i32 : i32, i32
  }
  func.func @transform_3(%arg0: i32) -> (i32, i32, i32) {
    %c0_i32 = arith.constant 0 : i32
    %c0_i32_0 = arith.constant 0 : i32
    %c0_i32_1 = arith.constant 0 : i32
    return %c0_i32, %arg0, %c0_i32_0 : i32, i32, i32
  }
}

module attributes {stable_mosaic.version = 11 : i64} {
  func.func @_mm_kernel(%arg0: i32, %arg1: memref<32x64xbf16, #tpu.memory_space<vmem>>, %arg2: memref<64x64xf32, #tpu.memory_space<vmem>>, %arg3: memref<32x64xf32, #tpu.memory_space<vmem>>) attributes {dimension_semantics = [#tpu.dimension_semantics<parallel>], iteration_bounds = array<i64: 2>, scalar_prefetch = 0 : i64, scratch_operands = 0 : i64, tpu.core_type = #tpu.core_type<tc>, window_params = [{transform_indices = @transform_0, window_bounds = array<i64: 32, 64>}, {pipeline_mode = #tpu.pipeline_mode<synchronous>, transform_indices = @transform_1, window_bounds = array<i64: 64, 64>}, {transform_indices = @transform_2, window_bounds = array<i64: 32, 64>}]} {
    %c0 = arith.constant 0 : index
    %c0_0 = arith.constant 0 : index
    %0 = vector.load %arg1[%c0, %c0_0] : memref<32x64xbf16, #tpu.memory_space<vmem>>, vector<32x64xbf16>
    %1 = arith.extf %0 : vector<32x64xbf16> to vector<32x64xf32>
    %c0_1 = arith.constant 0 : index
    %c0_2 = arith.constant 0 : index
    %2 = vector.load %arg2[%c0_1, %c0_2] : memref<64x64xf32, #tpu.memory_space<vmem>>, vector<64x64xf32>
    %cst = arith.constant dense<0.000000e+00> : vector<32x64xf32>
    %3 = tpu.matmul %1, %2, %cst {dimension_numbers = #tpu.dot_dimension_numbers<[1], [0], [0], [1], [0, 0, 1, 1], [], []>} : vector<32x64xf32>, vector<64x64xf32>, vector<32x64xf32> -> vector<32x64xf32>
    %c0_3 = arith.constant 0 : index
    %c0_4 = arith.constant 0 : index
    %4 = vector.load %arg3[%c0_3, %c0_4] : memref<32x64xf32, #tpu.memory_space<vmem>>, vector<32x64xf32>
    tpu.vector_store %arg3[%c0_3, %c0_4], %3 {strides = array<i32>} : memref<32x64xf32, #tpu.memory_space<vmem>>, vector<32x64xf32>,
    return
  }
  func.func @transform_0(%arg0: i32) -> (i32, i32) {
    %c0_i32 = arith.constant 0 : i32
    %c0_i32_0 = arith.constant 0 : i32
    return %arg0, %c0_i32 : i32, i32
  }
  func.func @transform_1(%arg0: i32) -> (i32, i32) {
    %c0_i32 = arith.constant 0 : i32
    %c0_i32_0 = arith.constant 0 : i32
    %c0_i32_1 = arith.constant 0 : i32
    return %c0_i32, %c0_i32_0 : i32, i32
  }
  func.func @transform_2(%arg0: i32) -> (i32, i32) {
    %c0_i32 = arith.constant 0 : i32
    %c0_i32_0 = arith.constant 0 : i32
    return %arg0, %c0_i32 : i32, i32
  }
}

module attributes {stable_mosaic.version = 11 : i64} {
  func.func @_cmm_kernel(%arg0: i32, %arg1: i32, %arg2: memref<32x32xf32, #tpu.memory_space<vmem>>, %arg3: memref<1x32x64xbf16, #tpu.memory_space<vmem>>, %arg4: memref<1x32x64xf32, #tpu.memory_space<vmem>>) attributes {dimension_semantics = [#tpu.dimension_semantics<parallel>, #tpu.dimension_semantics<parallel>], iteration_bounds = array<i64: 2, 1>, scalar_prefetch = 0 : i64, scratch_operands = 0 : i64, tpu.core_type = #tpu.core_type<tc>, window_params = [{pipeline_mode = #tpu.pipeline_mode<synchronous>, transform_indices = @transform_0, window_bounds = array<i64: 32, 32>}, {transform_indices = @transform_1, window_bounds = array<i64: 1, 32, 64>}, {transform_indices = @transform_2, window_bounds = array<i64: 1, 32, 64>}]} {
    %c0 = arith.constant 0 : index
    %c0_0 = arith.constant 0 : index
    %0 = vector.load %arg2[%c0, %c0_0] : memref<32x32xf32, #tpu.memory_space<vmem>>, vector<32x32xf32>
    %c0_1 = arith.constant 0 : index
    %c0_2 = arith.constant 0 : index
    %c0_3 = arith.constant 0 : index
    %1 = vector.load %arg3[%c0_1, %c0_2, %c0_3] : memref<1x32x64xbf16, #tpu.memory_space<vmem>>, vector<1x32x64xbf16>
    %2 = vector.shape_cast %1 : vector<1x32x64xbf16> to vector<32x64xbf16>
    %3 = arith.extf %2 : vector<32x64xbf16> to vector<32x64xf32>
    %cst = arith.constant dense<0.000000e+00> : vector<32x64xf32>
    %4 = tpu.matmul %0, %3, %cst {dimension_numbers = #tpu.dot_dimension_numbers<[1], [0], [0], [1], [0, 0, 1, 1], [], []>} : vector<32x32xf32>, vector<32x64xf32>, vector<32x64xf32> -> vector<32x64xf32>
    %c0_4 = arith.constant 0 : index
    %c0_5 = arith.constant 0 : index
    %c0_6 = arith.constant 0 : index
    %5 = vector.load %arg4[%c0_4, %c0_5, %c0_6] : memref<1x32x64xf32, #tpu.memory_space<vmem>>, vector<1x32x64xf32>
    %6 = vector.shape_cast %5 : vector<1x32x64xf32> to vector<32x64xf32>
    %7 = vector.shape_cast %4 : vector<32x64xf32> to vector<1x32x64xf32>
    tpu.vector_store %arg4[%c0_4, %c0_5, %c0_6], %7 {strides = array<i32>} : memref<1x32x64xf32, #tpu.memory_space<vmem>>, vector<1x32x64xf32>,
    return
  }
  func.func @transform_0(%arg0: i32, %arg1: i32) -> (i32, i32) {
    %c0_i32 = arith.constant 0 : i32
    %c0_i32_0 = arith.constant 0 : i32
    %c0_i32_1 = arith.constant 0 : i32
    return %c0_i32, %c0_i32_0 : i32, i32
  }
  func.func @transform_1(%arg0: i32, %arg1: i32) -> (i32, i32, i32) {
    %c0_i32 = arith.constant 0 : i32
    %c0_i32_0 = arith.constant 0 : i32
    return %arg0, %c0_i32, %arg1 : i32, i32, i32
  }
  func.func @transform_2(%arg0: i32, %arg1: i32) -> (i32, i32, i32) {
    %c0_i32 = arith.constant 0 : i32
    %c0_i32_0 = arith.constant 0 : i32
    return %arg0, %c0_i32, %arg1 : i32, i32, i32
  }
}

module attributes {stable_mosaic.version = 11 : i64} {
  func.func @_negif_kernel(%arg0: i32, %arg1: memref<2x16x128xf32, #tpu.memory_space<vmem>>, %arg2: memref<16x1xf32, #tpu.memory_space<vmem>>, %arg3: memref<16x1xf32, #tpu.memory_space<vmem>>, %arg4: memref<2x16x128xbf16, #tpu.memory_space<vmem>>) attributes {dimension_semantics = [#tpu.dimension_semantics<parallel>], iteration_bounds = array<i64: 1>, scalar_prefetch = 0 : i64, scratch_operands = 0 : i64, tpu.core_type = #tpu.core_type<tc>, window_params = [{transform_indices = @transform_0, window_bounds = array<i64: 2, 16, 128>}, {transform_indices = @transform_1, window_bounds = array<i64: 16, 1>}, {transform_indices = @transform_2, window_bounds = array<i64: 16, 1>}, {transform_indices = @transform_3, window_bounds = array<i64: 2, 16, 128>}]} {
    %c0 = arith.constant 0 : index
    %c0_0 = arith.constant 0 : index
    %0 = vector.load %arg2[%c0, %c0_0] : memref<16x1xf32, #tpu.memory_space<vmem>>, vector<16x1xf32>
    %c0_1 = arith.constant 0 : index
    %c0_2 = arith.constant 0 : index
    %1 = vector.load %arg3[%c0_1, %c0_2] : memref<16x1xf32, #tpu.memory_space<vmem>>, vector<16x1xf32>
    %cst = arith.constant 0.000000e+00 : f32
    %2 = vector.broadcast %cst : f32 to vector<16x128xf32>
    %c0_i32 = arith.constant 0 : i32
    %3 = arith.index_cast %c0_i32 : i32 to index
    %c0_3 = arith.constant 0 : index
    %c0_4 = arith.constant 0 : index
    %4 = vector.load %arg1[%3, %c0_3, %c0_4] : memref<2x16x128xf32, #tpu.memory_space<vmem>>, vector<1x16x128xf32>
    %5 = vector.shape_cast %4 : vector<1x16x128xf32> to vector<16x128xf32>
    %6 = vector.broadcast %0 : vector<16x1xf32> to vector<16x128xf32>
    %7 = arith.mulf %5, %6 : vector<16x128xf32>
    %8 = arith.addf %2, %7 : vector<16x128xf32>
    %9 = vector.broadcast %1 : vector<16x1xf32> to vector<16x128xf32>
    %10 = arith.addf %8, %9 : vector<16x128xf32>
    %cst_5 = arith.constant 1.000000e+00 : f32
    %11 = vector.broadcast %cst_5 : f32 to vector<16x128xf32>
    %12 = arith.cmpf oge, %10, %11 : vector<16x128xf32>
    %13 = arith.extui %12 : vector<16x128xi1> to vector<16x128xi32>
    %14 = arith.sitofp %13 : vector<16x128xi32> to vector<16x128xf32>
    %cst_6 = arith.constant -1.000000e+00 : f32
    %15 = vector.broadcast %cst_6 : f32 to vector<16x128xf32>
    %16 = arith.cmpf ole, %10, %15 : vector<16x128xf32>
    %17 = arith.extui %16 : vector<16x128xi1> to vector<16x128xi32>
    %18 = arith.sitofp %17 : vector<16x128xi32> to vector<16x128xf32>
    %19 = arith.subf %14, %18 : vector<16x128xf32>
    %20 = arith.truncf %19 : vector<16x128xf32> to vector<16x128xbf16>
    %21 = arith.index_cast %c0_i32 : i32 to index
    %c0_7 = arith.constant 0 : index
    %c0_8 = arith.constant 0 : index
    %22 = vector.load %arg4[%21, %c0_7, %c0_8] : memref<2x16x128xbf16, #tpu.memory_space<vmem>>, vector<1x16x128xbf16>
    %23 = vector.shape_cast %22 : vector<1x16x128xbf16> to vector<16x128xbf16>
    %24 = vector.shape_cast %20 : vector<16x128xbf16> to vector<1x16x128xbf16>
    tpu.vector_store %arg4[%21, %c0_7, %c0_8], %24 {strides = array<i32>} : memref<2x16x128xbf16, #tpu.memory_space<vmem>>, vector<1x16x128xbf16>,
    %cst_9 = arith.constant 1.000000e+00 : f32
    %25 = vector.broadcast %cst_9 : f32 to vector<16x128xf32>
    %26 = arith.subf %25, %14 : vector<16x128xf32>
    %27 = arith.subf %26, %18 : vector<16x128xf32>
    %28 = arith.mulf %10, %27 : vector<16x128xf32>
    %c1_i32 = arith.constant 1 : i32
    %29 = arith.index_cast %c1_i32 : i32 to index
    %c0_10 = arith.constant 0 : index
    %c0_11 = arith.constant 0 : index
    %30 = vector.load %arg1[%29, %c0_10, %c0_11] : memref<2x16x128xf32, #tpu.memory_space<vmem>>, vector<1x16x128xf32>
    %31 = vector.shape_cast %30 : vector<1x16x128xf32> to vector<16x128xf32>
    %32 = vector.broadcast %0 : vector<16x1xf32> to vector<16x128xf32>
    %33 = arith.mulf %31, %32 : vector<16x128xf32>
    %34 = arith.addf %28, %33 : vector<16x128xf32>
    %35 = vector.broadcast %1 : vector<16x1xf32> to vector<16x128xf32>
    %36 = arith.addf %34, %35 : vector<16x128xf32>
    %cst_12 = arith.constant 1.000000e+00 : f32
    %37 = vector.broadcast %cst_12 : f32 to vector<16x128xf32>
    %38 = arith.cmpf oge, %36, %37 : vector<16x128xf32>
    %39 = arith.extui %38 : vector<16x128xi1> to vector<16x128xi32>
    %40 = arith.sitofp %39 : vector<16x128xi32> to vector<16x128xf32>
    %cst_13 = arith.constant -1.000000e+00 : f32
    %41 = vector.broadcast %cst_13 : f32 to vector<16x128xf32>
    %42 = arith.cmpf ole, %36, %41 : vector<16x128xf32>
    %43 = arith.extui %42 : vector<16x128xi1> to vector<16x128xi32>
    %44 = arith.sitofp %43 : vector<16x128xi32> to vector<16x128xf32>
    %45 = arith.subf %40, %44 : vector<16x128xf32>
    %46 = arith.truncf %45 : vector<16x128xf32> to vector<16x128xbf16>
    %47 = arith.index_cast %c1_i32 : i32 to index
    %c0_14 = arith.constant 0 : index
    %c0_15 = arith.constant 0 : index
    %48 = vector.load %arg4[%47, %c0_14, %c0_15] : memref<2x16x128xbf16, #tpu.memory_space<vmem>>, vector<1x16x128xbf16>
    %49 = vector.shape_cast %48 : vector<1x16x128xbf16> to vector<16x128xbf16>
    %50 = vector.shape_cast %46 : vector<16x128xbf16> to vector<1x16x128xbf16>
    tpu.vector_store %arg4[%47, %c0_14, %c0_15], %50 {strides = array<i32>} : memref<2x16x128xbf16, #tpu.memory_space<vmem>>, vector<1x16x128xbf16>,
    %cst_16 = arith.constant 1.000000e+00 : f32
    %51 = vector.broadcast %cst_16 : f32 to vector<16x128xf32>
    %52 = arith.subf %51, %40 : vector<16x128xf32>
    %53 = arith.subf %52, %44 : vector<16x128xf32>
    %54 = arith.mulf %36, %53 : vector<16x128xf32>
    %c2_i32 = arith.constant 2 : i32
    return
  }
  func.func @transform_0(%arg0: i32) -> (i32, i32, i32) {
    %c0_i32 = arith.constant 0 : i32
    %c0_i32_0 = arith.constant 0 : i32
    %c0_i32_1 = arith.constant 0 : i32
    return %c0_i32, %arg0, %c0_i32_0 : i32, i32, i32
  }
  func.func @transform_1(%arg0: i32) -> (i32, i32) {
    %c0_i32 = arith.constant 0 : i32
    %c0_i32_0 = arith.constant 0 : i32
    return %arg0, %c0_i32 : i32, i32
  }
  func.func @transform_2(%arg0: i32) -> (i32, i32) {
    %c0_i32 = arith.constant 0 : i32
    %c0_i32_0 = arith.constant 0 : i32
    return %arg0, %c0_i32 : i32, i32
  }
  func.func @transform_3(%arg0: i32) -> (i32, i32, i32) {
    %c0_i32 = arith.constant 0 : i32
    %c0_i32_0 = arith.constant 0 : i32
    %c0_i32_1 = arith.constant 0 : i32
    return %c0_i32, %arg0, %c0_i32_0 : i32, i32, i32
  }
}

module attributes {stable_mosaic.version = 11 : i64} {
  func.func @_cmm_bias_kernel(%arg0: i32, %arg1: i32, %arg2: memref<8x36xf32, #tpu.memory_space<vmem>>, %arg3: memref<1x36x64xf32, #tpu.memory_space<vmem>>, %arg4: memref<8x1xf32, #tpu.memory_space<vmem>>, %arg5: memref<1x8x64xf32, #tpu.memory_space<vmem>>) attributes {dimension_semantics = [#tpu.dimension_semantics<parallel>, #tpu.dimension_semantics<parallel>], iteration_bounds = array<i64: 16, 1>, scalar_prefetch = 0 : i64, scratch_operands = 0 : i64, tpu.core_type = #tpu.core_type<tc>, window_params = [{pipeline_mode = #tpu.pipeline_mode<synchronous>, transform_indices = @transform_0, window_bounds = array<i64: 8, 36>}, {transform_indices = @transform_1, window_bounds = array<i64: 1, 36, 64>}, {pipeline_mode = #tpu.pipeline_mode<synchronous>, transform_indices = @transform_2, window_bounds = array<i64: 8, 1>}, {transform_indices = @transform_3, window_bounds = array<i64: 1, 8, 64>}]} {
    %c0 = arith.constant 0 : index
    %c0_0 = arith.constant 0 : index
    %0 = vector.load %arg2[%c0, %c0_0] : memref<8x36xf32, #tpu.memory_space<vmem>>, vector<8x36xf32>
    %c0_1 = arith.constant 0 : index
    %c0_2 = arith.constant 0 : index
    %c0_3 = arith.constant 0 : index
    %1 = vector.load %arg3[%c0_1, %c0_2, %c0_3] : memref<1x36x64xf32, #tpu.memory_space<vmem>>, vector<1x36x64xf32>
    %2 = vector.shape_cast %1 : vector<1x36x64xf32> to vector<36x64xf32>
    %cst = arith.constant dense<0.000000e+00> : vector<8x64xf32>
    %3 = tpu.matmul %0, %2, %cst {dimension_numbers = #tpu.dot_dimension_numbers<[1], [0], [0], [1], [0, 0, 1, 1], [], []>} : vector<8x36xf32>, vector<36x64xf32>, vector<8x64xf32> -> vector<8x64xf32>
    %c0_4 = arith.constant 0 : index
    %c0_5 = arith.constant 0 : index
    %4 = vector.load %arg4[%c0_4, %c0_5] : memref<8x1xf32, #tpu.memory_space<vmem>>, vector<8x1xf32>
    %5 = vector.broadcast %4 : vector<8x1xf32> to vector<8x64xf32>
    %6 = arith.addf %3, %5 : vector<8x64xf32>
    %c0_6 = arith.constant 0 : index
    %c0_7 = arith.constant 0 : index
    %c0_8 = arith.constant 0 : index
    %7 = vector.load %arg5[%c0_6, %c0_7, %c0_8] : memref<1x8x64xf32, #tpu.memory_space<vmem>>, vector<1x8x64xf32>
    %8 = vector.shape_cast %7 : vector<1x8x64xf32> to vector<8x64xf32>
    %9 = vector.shape_cast %6 : vector<8x64xf32> to vector<1x8x64xf32>
    tpu.vector_store %arg5[%c0_6, %c0_7, %c0_8], %9 {strides = array<i32>} : memref<1x8x64xf32, #tpu.memory_space<vmem>>, vector<1x8x64xf32>,
    return
  }
  func.func @transform_0(%arg0: i32, %arg1: i32) -> (i32, i32) {
    %c0_i32 = arith.constant 0 : i32
    %c0_i32_0 = arith.constant 0 : i32
    %c0_i32_1 = arith.constant 0 : i32
    return %c0_i32, %c0_i32_0 : i32, i32
  }
  func.func @transform_1(%arg0: i32, %arg1: i32) -> (i32, i32, i32) {
    %c0_i32 = arith.constant 0 : i32
    %c0_i32_0 = arith.constant 0 : i32
    return %arg0, %c0_i32, %arg1 : i32, i32, i32
  }
  func.func @transform_2(%arg0: i32, %arg1: i32) -> (i32, i32) {
    %c0_i32 = arith.constant 0 : i32
    %c0_i32_0 = arith.constant 0 : i32
    %c0_i32_1 = arith.constant 0 : i32
    return %c0_i32, %c0_i32_0 : i32, i32
  }
  func.func @transform_3(%arg0: i32, %arg1: i32) -> (i32, i32, i32) {
    %c0_i32 = arith.constant 0 : i32
    %c0_i32_0 = arith.constant 0 : i32
    return %arg0, %c0_i32, %arg1 : i32, i32, i32
  }
}

module attributes {stable_mosaic.version = 11 : i64} {
  func.func @_cmm_bias_kernel(%arg0: i32, %arg1: i32, %arg2: memref<64x32xf32, #tpu.memory_space<vmem>>, %arg3: memref<1x32x64xbf16, #tpu.memory_space<vmem>>, %arg4: memref<64x1xf32, #tpu.memory_space<vmem>>, %arg5: memref<1x64x64xf32, #tpu.memory_space<vmem>>) attributes {dimension_semantics = [#tpu.dimension_semantics<parallel>, #tpu.dimension_semantics<parallel>], iteration_bounds = array<i64: 2, 1>, scalar_prefetch = 0 : i64, scratch_operands = 0 : i64, tpu.core_type = #tpu.core_type<tc>, window_params = [{pipeline_mode = #tpu.pipeline_mode<synchronous>, transform_indices = @transform_0, window_bounds = array<i64: 64, 32>}, {transform_indices = @transform_1, window_bounds = array<i64: 1, 32, 64>}, {pipeline_mode = #tpu.pipeline_mode<synchronous>, transform_indices = @transform_2, window_bounds = array<i64: 64, 1>}, {transform_indices = @transform_3, window_bounds = array<i64: 1, 64, 64>}]} {
    %c0 = arith.constant 0 : index
    %c0_0 = arith.constant 0 : index
    %0 = vector.load %arg2[%c0, %c0_0] : memref<64x32xf32, #tpu.memory_space<vmem>>, vector<64x32xf32>
    %c0_1 = arith.constant 0 : index
    %c0_2 = arith.constant 0 : index
    %c0_3 = arith.constant 0 : index
    %1 = vector.load %arg3[%c0_1, %c0_2, %c0_3] : memref<1x32x64xbf16, #tpu.memory_space<vmem>>, vector<1x32x64xbf16>
    %2 = vector.shape_cast %1 : vector<1x32x64xbf16> to vector<32x64xbf16>
    %3 = arith.extf %2 : vector<32x64xbf16> to vector<32x64xf32>
    %cst = arith.constant dense<0.000000e+00> : vector<64x64xf32>
    %4 = tpu.matmul %0, %3, %cst {dimension_numbers = #tpu.dot_dimension_numbers<[1], [0], [0], [1], [0, 0, 1, 1], [], []>} : vector<64x32xf32>, vector<32x64xf32>, vector<64x64xf32> -> vector<64x64xf32>
    %c0_4 = arith.constant 0 : index
    %c0_5 = arith.constant 0 : index
    %5 = vector.load %arg4[%c0_4, %c0_5] : memref<64x1xf32, #tpu.memory_space<vmem>>, vector<64x1xf32>
    %6 = vector.broadcast %5 : vector<64x1xf32> to vector<64x64xf32>
    %7 = arith.addf %4, %6 : vector<64x64xf32>
    %c0_6 = arith.constant 0 : index
    %c0_7 = arith.constant 0 : index
    %c0_8 = arith.constant 0 : index
    %8 = vector.load %arg5[%c0_6, %c0_7, %c0_8] : memref<1x64x64xf32, #tpu.memory_space<vmem>>, vector<1x64x64xf32>
    %9 = vector.shape_cast %8 : vector<1x64x64xf32> to vector<64x64xf32>
    %10 = vector.shape_cast %7 : vector<64x64xf32> to vector<1x64x64xf32>
    tpu.vector_store %arg5[%c0_6, %c0_7, %c0_8], %10 {strides = array<i32>} : memref<1x64x64xf32, #tpu.memory_space<vmem>>, vector<1x64x64xf32>,
    return
  }
  func.func @transform_0(%arg0: i32, %arg1: i32) -> (i32, i32) {
    %c0_i32 = arith.constant 0 : i32
    %c0_i32_0 = arith.constant 0 : i32
    %c0_i32_1 = arith.constant 0 : i32
    return %c0_i32, %c0_i32_0 : i32, i32
  }
  func.func @transform_1(%arg0: i32, %arg1: i32) -> (i32, i32, i32) {
    %c0_i32 = arith.constant 0 : i32
    %c0_i32_0 = arith.constant 0 : i32
    return %arg0, %c0_i32, %arg1 : i32, i32, i32
  }
  func.func @transform_2(%arg0: i32, %arg1: i32) -> (i32, i32) {
    %c0_i32 = arith.constant 0 : i32
    %c0_i32_0 = arith.constant 0 : i32
    %c0_i32_1 = arith.constant 0 : i32
    return %c0_i32, %c0_i32_0 : i32, i32
  }
  func.func @transform_3(%arg0: i32, %arg1: i32) -> (i32, i32, i32) {
    %c0_i32 = arith.constant 0 : i32
    %c0_i32_0 = arith.constant 0 : i32
    return %arg0, %c0_i32, %arg1 : i32, i32, i32
  }
}

module attributes {stable_mosaic.version = 11 : i64} {
  func.func @_lif_kernel(%arg0: i32, %arg1: memref<2x16x128xf32, #tpu.memory_space<vmem>>, %arg2: memref<16x1xf32, #tpu.memory_space<vmem>>, %arg3: memref<16x1xf32, #tpu.memory_space<vmem>>, %arg4: memref<2x16x128xbf16, #tpu.memory_space<vmem>>) attributes {dimension_semantics = [#tpu.dimension_semantics<parallel>], iteration_bounds = array<i64: 2>, scalar_prefetch = 0 : i64, scratch_operands = 0 : i64, tpu.core_type = #tpu.core_type<tc>, window_params = [{transform_indices = @transform_0, window_bounds = array<i64: 2, 16, 128>}, {transform_indices = @transform_1, window_bounds = array<i64: 16, 1>}, {transform_indices = @transform_2, window_bounds = array<i64: 16, 1>}, {transform_indices = @transform_3, window_bounds = array<i64: 2, 16, 128>}]} {
    %c0 = arith.constant 0 : index
    %c0_0 = arith.constant 0 : index
    %0 = vector.load %arg2[%c0, %c0_0] : memref<16x1xf32, #tpu.memory_space<vmem>>, vector<16x1xf32>
    %c0_1 = arith.constant 0 : index
    %c0_2 = arith.constant 0 : index
    %1 = vector.load %arg3[%c0_1, %c0_2] : memref<16x1xf32, #tpu.memory_space<vmem>>, vector<16x1xf32>
    %cst = arith.constant 0.000000e+00 : f32
    %2 = vector.broadcast %cst : f32 to vector<16x128xf32>
    %cst_3 = arith.constant 5.000000e-01 : f32
    %c0_i32 = arith.constant 0 : i32
    %3 = arith.index_cast %c0_i32 : i32 to index
    %c0_4 = arith.constant 0 : index
    %c0_5 = arith.constant 0 : index
    %4 = vector.load %arg1[%3, %c0_4, %c0_5] : memref<2x16x128xf32, #tpu.memory_space<vmem>>, vector<1x16x128xf32>
    %5 = vector.shape_cast %4 : vector<1x16x128xf32> to vector<16x128xf32>
    %6 = vector.broadcast %0 : vector<16x1xf32> to vector<16x128xf32>
    %7 = arith.mulf %5, %6 : vector<16x128xf32>
    %8 = vector.broadcast %1 : vector<16x1xf32> to vector<16x128xf32>
    %9 = arith.addf %7, %8 : vector<16x128xf32>
    %10 = arith.subf %9, %2 : vector<16x128xf32>
    %11 = vector.broadcast %cst_3 : f32 to vector<16x128xf32>
    %12 = arith.mulf %10, %11 : vector<16x128xf32>
    %13 = arith.addf %2, %12 : vector<16x128xf32>
    %cst_6 = arith.constant 1.000000e+00 : f32
    %14 = vector.broadcast %cst_6 : f32 to vector<16x128xf32>
    %15 = arith.cmpf oge, %13, %14 : vector<16x128xf32>
    %16 = arith.extui %15 : vector<16x128xi1> to vector<16x128xi32>
    %17 = arith.sitofp %16 : vector<16x128xi32> to vector<16x128xf32>
    %18 = arith.truncf %17 : vector<16x128xf32> to vector<16x128xbf16>
    %19 = arith.index_cast %c0_i32 : i32 to index
    %c0_7 = arith.constant 0 : index
    %c0_8 = arith.constant 0 : index
    %20 = vector.load %arg4[%19, %c0_7, %c0_8] : memref<2x16x128xbf16, #tpu.memory_space<vmem>>, vector<1x16x128xbf16>
    %21 = vector.shape_cast %20 : vector<1x16x128xbf16> to vector<16x128xbf16>
    %22 = vector.shape_cast %18 : vector<16x128xbf16> to vector<1x16x128xbf16>
    tpu.vector_store %arg4[%19, %c0_7, %c0_8], %22 {strides = array<i32>} : memref<2x16x128xbf16, #tpu.memory_space<vmem>>, vector<1x16x128xbf16>,
    %cst_9 = arith.constant 1.000000e+00 : f32
    %23 = vector.broadcast %cst_9 : f32 to vector<16x128xf32>
    %24 = arith.subf %23, %17 : vector<16x128xf32>
    %25 = arith.mulf %13, %24 : vector<16x128xf32>
    %c1_i32 = arith.constant 1 : i32
    %26 = arith.index_cast %c1_i32 : i32 to index
    %c0_10 = arith.constant 0 : index
    %c0_11 = arith.constant 0 : index
    %27 = vector.load %arg1[%26, %c0_10, %c0_11] : memref<2x16x128xf32, #tpu.memory_space<vmem>>, vector<1x16x128xf32>
    %28 = vector.shape_cast %27 : vector<1x16x128xf32> to vector<16x128xf32>
    %29 = vector.broadcast %0 : vector<16x1xf32> to vector<16x128xf32>
    %30 = arith.mulf %28, %29 : vector<16x128xf32>
    %31 = vector.broadcast %1 : vector<16x1xf32> to vector<16x128xf32>
    %32 = arith.addf %30, %31 : vector<16x128xf32>
    %33 = arith.subf %32, %25 : vector<16x128xf32>
    %34 = vector.broadcast %cst_3 : f32 to vector<16x128xf32>
    %35 = arith.mulf %33, %34 : vector<16x128xf32>
    %36 = arith.addf %25, %35 : vector<16x128xf32>
    %cst_12 = arith.constant 1.000000e+00 : f32
    %37 = vector.broadcast %cst_12 : f32 to vector<16x128xf32>
    %38 = arith.cmpf oge, %36, %37 : vector<16x128xf32>
    %39 = arith.extui %38 : vector<16x128xi1> to vector<16x128xi32>
    %40 = arith.sitofp %39 : vector<16x128xi32> to vector<16x128xf32>
    %41 = arith.truncf %40 : vector<16x128xf32> to vector<16x128xbf16>
    %42 = arith.index_cast %c1_i32 : i32 to index
    %c0_13 = arith.constant 0 : index
    %c0_14 = arith.constant 0 : index
    %43 = vector.load %arg4[%42, %c0_13, %c0_14] : memref<2x16x128xbf16, #tpu.memory_space<vmem>>, vector<1x16x128xbf16>
    %44 = vector.shape_cast %43 : vector<1x16x128xbf16> to vector<16x128xbf16>
    %45 = vector.shape_cast %41 : vector<16x128xbf16> to vector<1x16x128xbf16>
    tpu.vector_store %arg4[%42, %c0_13, %c0_14], %45 {strides = array<i32>} : memref<2x16x128xbf16, #tpu.memory_space<vmem>>, vector<1x16x128xbf16>,
    %cst_15 = arith.constant 1.000000e+00 : f32
    %46 = vector.broadcast %cst_15 : f32 to vector<16x128xf32>
    %47 = arith.subf %46, %40 : vector<16x128xf32>
    %48 = arith.mulf %36, %47 : vector<16x128xf32>
    %c2_i32 = arith.constant 2 : i32
    return
  }
  func.func @transform_0(%arg0: i32) -> (i32, i32, i32) {
    %c0_i32 = arith.constant 0 : i32
    %c0_i32_0 = arith.constant 0 : i32
    %c0_i32_1 = arith.constant 0 : i32
    return %c0_i32, %arg0, %c0_i32_0 : i32, i32, i32
  }
  func.func @transform_1(%arg0: i32) -> (i32, i32) {
    %c0_i32 = arith.constant 0 : i32
    %c0_i32_0 = arith.constant 0 : i32
    return %arg0, %c0_i32 : i32, i32
  }
  func.func @transform_2(%arg0: i32) -> (i32, i32) {
    %c0_i32 = arith.constant 0 : i32
    %c0_i32_0 = arith.constant 0 : i32
    return %arg0, %c0_i32 : i32, i32
  }
  func.func @transform_3(%arg0: i32) -> (i32, i32, i32) {
    %c0_i32 = arith.constant 0 : i32
    %c0_i32_0 = arith.constant 0 : i32
    %c0_i32_1 = arith.constant 0 : i32
    return %c0_i32, %arg0, %c0_i32_0 : i32, i32, i32
  }
}

module attributes {stable_mosaic.version = 11 : i64} {
  func.func @_cmm_bias_kernel(%arg0: i32, %arg1: i32, %arg2: memref<32x64xf32, #tpu.memory_space<vmem>>, %arg3: memref<1x64x64xbf16, #tpu.memory_space<vmem>>, %arg4: memref<32x1xf32, #tpu.memory_space<vmem>>, %arg5: memref<1x32x64xf32, #tpu.memory_space<vmem>>) attributes {dimension_semantics = [#tpu.dimension_semantics<parallel>, #tpu.dimension_semantics<parallel>], iteration_bounds = array<i64: 2, 1>, scalar_prefetch = 0 : i64, scratch_operands = 0 : i64, tpu.core_type = #tpu.core_type<tc>, window_params = [{pipeline_mode = #tpu.pipeline_mode<synchronous>, transform_indices = @transform_0, window_bounds = array<i64: 32, 64>}, {transform_indices = @transform_1, window_bounds = array<i64: 1, 64, 64>}, {pipeline_mode = #tpu.pipeline_mode<synchronous>, transform_indices = @transform_2, window_bounds = array<i64: 32, 1>}, {transform_indices = @transform_3, window_bounds = array<i64: 1, 32, 64>}]} {
    %c0 = arith.constant 0 : index
    %c0_0 = arith.constant 0 : index
    %0 = vector.load %arg2[%c0, %c0_0] : memref<32x64xf32, #tpu.memory_space<vmem>>, vector<32x64xf32>
    %c0_1 = arith.constant 0 : index
    %c0_2 = arith.constant 0 : index
    %c0_3 = arith.constant 0 : index
    %1 = vector.load %arg3[%c0_1, %c0_2, %c0_3] : memref<1x64x64xbf16, #tpu.memory_space<vmem>>, vector<1x64x64xbf16>
    %2 = vector.shape_cast %1 : vector<1x64x64xbf16> to vector<64x64xbf16>
    %3 = arith.extf %2 : vector<64x64xbf16> to vector<64x64xf32>
    %cst = arith.constant dense<0.000000e+00> : vector<32x64xf32>
    %4 = tpu.matmul %0, %3, %cst {dimension_numbers = #tpu.dot_dimension_numbers<[1], [0], [0], [1], [0, 0, 1, 1], [], []>} : vector<32x64xf32>, vector<64x64xf32>, vector<32x64xf32> -> vector<32x64xf32>
    %c0_4 = arith.constant 0 : index
    %c0_5 = arith.constant 0 : index
    %5 = vector.load %arg4[%c0_4, %c0_5] : memref<32x1xf32, #tpu.memory_space<vmem>>, vector<32x1xf32>
    %6 = vector.broadcast %5 : vector<32x1xf32> to vector<32x64xf32>
    %7 = arith.addf %4, %6 : vector<32x64xf32>
    %c0_6 = arith.constant 0 : index
    %c0_7 = arith.constant 0 : index
    %c0_8 = arith.constant 0 : index
    %8 = vector.load %arg5[%c0_6, %c0_7, %c0_8] : memref<1x32x64xf32, #tpu.memory_space<vmem>>, vector<1x32x64xf32>
    %9 = vector.shape_cast %8 : vector<1x32x64xf32> to vector<32x64xf32>
    %10 = vector.shape_cast %7 : vector<32x64xf32> to vector<1x32x64xf32>
    tpu.vector_store %arg5[%c0_6, %c0_7, %c0_8], %10 {strides = array<i32>} : memref<1x32x64xf32, #tpu.memory_space<vmem>>, vector<1x32x64xf32>,
    return
  }
  func.func @transform_0(%arg0: i32, %arg1: i32) -> (i32, i32) {
    %c0_i32 = arith.constant 0 : i32
    %c0_i32_0 = arith.constant 0 : i32
    %c0_i32_1 = arith.constant 0 : i32
    return %c0_i32, %c0_i32_0 : i32, i32
  }
  func.func @transform_1(%arg0: i32, %arg1: i32) -> (i32, i32, i32) {
    %c0_i32 = arith.constant 0 : i32
    %c0_i32_0 = arith.constant 0 : i32
    return %arg0, %c0_i32, %arg1 : i32, i32, i32
  }
  func.func @transform_2(%arg0: i32, %arg1: i32) -> (i32, i32) {
    %c0_i32 = arith.constant 0 : i32
    %c0_i32_0 = arith.constant 0 : i32
    %c0_i32_1 = arith.constant 0 : i32
    return %c0_i32, %c0_i32_0 : i32, i32
  }
  func.func @transform_3(%arg0: i32, %arg1: i32) -> (i32, i32, i32) {
    %c0_i32 = arith.constant 0 : i32
    %c0_i32_0 = arith.constant 0 : i32
    return %arg0, %c0_i32, %arg1 : i32, i32, i32
  }
}

module attributes {stable_mosaic.version = 11 : i64} {
  func.func @_mm_bias_kernel(%arg0: i32, %arg1: memref<16x32xf32, #tpu.memory_space<vmem>>, %arg2: memref<32x11xf32, #tpu.memory_space<vmem>>, %arg3: memref<1x11xf32, #tpu.memory_space<vmem>>, %arg4: memref<16x11xf32, #tpu.memory_space<vmem>>) attributes {dimension_semantics = [#tpu.dimension_semantics<parallel>], iteration_bounds = array<i64: 1>, scalar_prefetch = 0 : i64, scratch_operands = 0 : i64, tpu.core_type = #tpu.core_type<tc>, window_params = [{transform_indices = @transform_0, window_bounds = array<i64: 16, 32>}, {pipeline_mode = #tpu.pipeline_mode<synchronous>, transform_indices = @transform_1, window_bounds = array<i64: 32, 11>}, {pipeline_mode = #tpu.pipeline_mode<synchronous>, transform_indices = @transform_2, window_bounds = array<i64: 1, 11>}, {transform_indices = @transform_3, window_bounds = array<i64: 16, 11>}]} {
    %c0 = arith.constant 0 : index
    %c0_0 = arith.constant 0 : index
    %0 = vector.load %arg1[%c0, %c0_0] : memref<16x32xf32, #tpu.memory_space<vmem>>, vector<16x32xf32>
    %c0_1 = arith.constant 0 : index
    %c0_2 = arith.constant 0 : index
    %1 = vector.load %arg2[%c0_1, %c0_2] : memref<32x11xf32, #tpu.memory_space<vmem>>, vector<32x11xf32>
    %cst = arith.constant dense<0.000000e+00> : vector<16x11xf32>
    %2 = tpu.matmul %0, %1, %cst {dimension_numbers = #tpu.dot_dimension_numbers<[1], [0], [0], [1], [0, 0, 1, 1], [], []>} : vector<16x32xf32>, vector<32x11xf32>, vector<16x11xf32> -> vector<16x11xf32>
    %c0_3 = arith.constant 0 : index
    %c0_4 = arith.constant 0 : index
    %3 = vector.load %arg3[%c0_3, %c0_4] : memref<1x11xf32, #tpu.memory_space<vmem>>, vector<1x11xf32>
    %4 = vector.broadcast %3 : vector<1x11xf32> to vector<16x11xf32>
    %5 = arith.addf %2, %4 : vector<16x11xf32>
    %c0_5 = arith.constant 0 : index
    %c0_6 = arith.constant 0 : index
    %6 = vector.load %arg4[%c0_5, %c0_6] : memref<16x11xf32, #tpu.memory_space<vmem>>, vector<16x11xf32>
    tpu.vector_store %arg4[%c0_5, %c0_6], %5 {strides = array<i32>} : memref<16x11xf32, #tpu.memory_space<vmem>>, vector<16x11xf32>,
    return
  }
  func.func @transform_0(%arg0: i32) -> (i32, i32) {
    %c0_i32 = arith.constant 0 : i32
    %c0_i32_0 = arith.constant 0 : i32
    return %arg0, %c0_i32 : i32, i32
  }
  func.func @transform_1(%arg0: i32) -> (i32, i32) {
    %c0_i32 = arith.constant 0 : i32
    %c0_i32_0 = arith.constant 0 : i32
    %c0_i32_1 = arith.constant 0 : i32
    return %c0_i32, %c0_i32_0 : i32, i32
  }
  func.func @transform_2(%arg0: i32) -> (i32, i32) {
    %c0_i32 = arith.constant 0 : i32
    %c0_i32_0 = arith.constant 0 : i32
    %c0_i32_1 = arith.constant 0 : i32
    return %c0_i32, %c0_i32_0 : i32, i32
  }
  func.func @transform_3(%arg0: i32) -> (i32, i32) {
    %c0_i32 = arith.constant 0 : i32
    %c0_i32_0 = arith.constant 0 : i32
    return %arg0, %c0_i32 : i32, i32
  }
}

</mosaic_0001>

<bundles_post_ra>
// kernel: swformer_forward.22
= control target key start
LH: loop header
LB: loop body
LE: loop exit
PB: predicated region body
PF: predicated region fallthrough
CT: control target
= control target key end

     0   :  { %s1024_s9 = smov 0   ;;  %s1026_s10 = smov 0   ;;  %s1335_s0 = inlined_call_operand.vmem [shape: f32[4,18], index: 0, kind: input, shape index: {}]   ;;  %s1336_s1 = inlined_call_operand.vmem [shape: f32[2,18,16384], index: 1, kind: input, shape index: {}]   ;;  %s1337_s2 = inlined_call_operand.vmem [shape: f32[2,4,16384], index: 2, kind: output, shape index: {}]  }
   0x1   :  { %s1028_s11 = smov 0   ;;  %s1030_s12 = smov 0  }
   0x2   :  { %s1032_s13 = smov 0   ;;  %s1034_s14 = smov 0  }
   0x3   :  { %s1036_s15 = smov 0  }
   0x4 LB: > { %s21_s16 = sadd.s32 1, %s999_s13  ;;  %s24_s17 = sadd.s32 1, %s1003_s14  ;;  %s1007_s15 = sphi %s1036_s15, %s12_s15   ;;  %s1003_s14 = sphi %s1034_s14, %s1343_s14   ;;  %s999_s13 = sphi %s1032_s13, %s1342_s13   ;;  %s995_s12 = sphi %s1030_s12, %s1341_s12   ;;  %s991_s11 = sphi %s1028_s11, %s1340_s11   ;;  %s987_s10 = sphi %s1026_s10, %s1339_s10   ;;  %s983_s9 = sphi %s1024_s9, %s1338_s9  }
   0x5   : > { %p22_p0 = scmp.ge.s32.totalorder %s21_s16, 8  ;;  %p61_p1 = scmp.ne.s32.totalorder %s987_s10, %s983_s9 }
   0x6   : > { %p62_p2 = scmp.eq.s32.totalorder %s1007_s15, 0  ;;  %s54_s21 = sadd.s32 1, %s987_s10 }
   0x7   : > { %s1345_s16 = smov (%p22_p0, %s21_s16), 0  ;;  %s1347_s17 = smov (!%p22_p0, %s24_s17), %s1003_s14 }
   0x8   : > { %p63_p3 = por %p62_p2, %p61_p1  ;;  %p26_p4 = scmp.ge.s32.totalorder %s1347_s17, 2 }
   0x9   : > { %s50_s18 = ssub.s32 %s999_s13, %s1345_s16  ;;  %p853_p6 = scmp.ge.s32.totalorder %s1007_s15, 16 }
   0xa   : > { %s1349_s17 = smov (%p26_p4, %s1347_s17), 0 }
   0xb   : > { %s49_s19 = ssub.s32 %s1003_s14, %s1349_s17  ;;  %118 = sbr.rel (%p853_p6) target bundleno = 72 (0x48), region = 20 }
   0xc   : > { %s51_s20 = sor.u32 %s50_s18, %s49_s19 }
   0xd   : > { %p52_p5 = scmp.eq.s32.totalorder %s51_s20, 0 }
   0xf   : > { %s1075_s22 = scalar_select %p52_p5, %s987_s10, %s54_s21  }
  0x10   : > { %121 = sbr.rel (!%p63_p3) target bundleno = 72 (0x48), region = 24  ;;  %s123_s23 = sand.u32 (%p63_p3), 1, %s987_s10  }
  0x11   : > { %s894_s24 = smul.u32 (%p63_p3), 384, %s123_s23  ;;  %s854_s25 = sshll.u32 (%p63_p3), %s999_s13, 4 }
  0x12   : > { %s895_s26 = smul.u32 (%p63_p3), 384, %s1003_s14 }
  0x13   : > { %s1089_s4 = scalar_lea.vmem (%p63_p3), [#allocation2], %s894_s24 }
  0x14   : > { %s128_s27 = sadd.s32 (%p63_p3), %s895_s26, %s854_s25 }
  0x15   : > { %s855_s28 = sshll.u32 %s128_s27, 3 }
  0x16   : > { %s1084_s3 = scalar_lea.vmem %s1336_s1, %s855_s28 }
  0x17   : > { %v143_v0 = vld [vmem:[%s1084_s3] sm:$0xff]  ;;  %v145_v1 = vld [vmem:[%s1084_s3 + $0x8] sm:$0xff]  ;;  %v147_v2 = vld [vmem:[%s1084_s3 + $0x10] sm:$0xff] }
  0x18   : > { %144 = vst [vmem:[%s1089_s4] sm:$0xff] %v143_v0  ;;  %v149_v3 = vld [vmem:[%s1084_s3 + $0x18] sm:$0xff]  ;;  %v151_v4 = vld [vmem:[%s1084_s3 + $0x20] sm:$0xff]  ;;  %v153_v5 = vld [vmem:[%s1084_s3 + $0x28] sm:$0xff] }
  0x19   : > { %146 = vst [vmem:[%s1089_s4 + $0x8] sm:$0xff] %v145_v1  ;;  %v155_v6 = vld [vmem:[%s1084_s3 + $0x30] sm:$0xff]  ;;  %v157_v7 = vld [vmem:[%s1084_s3 + $0x38] sm:$0xff]  ;;  %v159_v8 = vld [vmem:[%s1084_s3 + $0x40] sm:$0xff] }
  0x1a   : > { %148 = vst [vmem:[%s1089_s4 + $0x10] sm:$0xff] %v147_v2  ;;  %v161_v9 = vld [vmem:[%s1084_s3 + $0x48] sm:$0xff]  ;;  %v163_v10 = vld [vmem:[%s1084_s3 + $0x50] sm:$0xff]  ;;  %v165_v11 = vld [vmem:[%s1084_s3 + $0x58] sm:$0xff] }
  0x1b   : > { %150 = vst [vmem:[%s1089_s4 + $0x18] sm:$0xff] %v149_v3  ;;  %v167_v12 = vld [vmem:[%s1084_s3 + $0x60] sm:$0xff]  ;;  %v169_v13 = vld [vmem:[%s1084_s3 + $0x68] sm:$0xff]  ;;  %v171_v14 = vld [vmem:[%s1084_s3 + $0x70] sm:$0xff] }
  0x1c   : > { %152 = vst [vmem:[%s1089_s4 + $0x20] sm:$0xff] %v151_v4  ;;  %v173_v15 = vld [vmem:[%s1084_s3 + $0x78] sm:$0xff]  ;;  %v175_v16 = vld [vmem:[%s1084_s3 + $0x400] sm:$0xff]  ;;  %v177_v17 = vld [vmem:[%s1084_s3 + $0x408] sm:$0xff] }
  0x1d   : > { %154 = vst [vmem:[%s1089_s4 + $0x28] sm:$0xff] %v153_v5  ;;  %v179_v18 = vld [vmem:[%s1084_s3 + $0x410] sm:$0xff]  ;;  %v181_v19 = vld [vmem:[%s1084_s3 + $0x418] sm:$0xff]  ;;  %v183_v20 = vld [vmem:[%s1084_s3 + $0x420] sm:$0xff] }
  0x1e   : > { %156 = vst [vmem:[%s1089_s4 + $0x30] sm:$0xff] %v155_v6  ;;  %v185_v21 = vld [vmem:[%s1084_s3 + $0x428] sm:$0xff]  ;;  %v187_v22 = vld [vmem:[%s1084_s3 + $0x430] sm:$0xff]  ;;  %v189_v23 = vld [vmem:[%s1084_s3 + $0x438] sm:$0xff] }
  0x1f   : > { %158 = vst [vmem:[%s1089_s4 + $0x38] sm:$0xff] %v157_v7  ;;  %v191_v24 = vld [vmem:[%s1084_s3 + $0x440] sm:$0xff]  ;;  %v193_v25 = vld [vmem:[%s1084_s3 + $0x448] sm:$0xff]  ;;  %v195_v26 = vld [vmem:[%s1084_s3 + $0x450] sm:$0xff] }
  0x20   : > { %160 = vst [vmem:[%s1089_s4 + $0x40] sm:$0xff] %v159_v8  ;;  %v197_v27 = vld [vmem:[%s1084_s3 + $0x458] sm:$0xff]  ;;  %v199_v28 = vld [vmem:[%s1084_s3 + $0x460] sm:$0xff]  ;;  %v201_v29 = vld [vmem:[%s1084_s3 + $0x468] sm:$0xff] }
  0x21   : > { %162 = vst [vmem:[%s1089_s4 + $0x48] sm:$0xff] %v161_v9  ;;  %v203_v30 = vld [vmem:[%s1084_s3 + $0x470] sm:$0xff]  ;;  %v205_v31 = vld [vmem:[%s1084_s3 + $0x478] sm:$0xff]  ;;  %v207_v32 = vld [vmem:[%s1084_s3 + $0x800] sm:$0xff] }
  0x22   : > { %164 = vst [vmem:[%s1089_s4 + $0x50] sm:$0xff] %v163_v10  ;;  %v209_v33 = vld [vmem:[%s1084_s3 + $0x808] sm:$0xff]  ;;  %v211_v34 = vld [vmem:[%s1084_s3 + $0x810] sm:$0xff]  ;;  %v213_v35 = vld [vmem:[%s1084_s3 + $0x818] sm:$0xff] }
  0x23   : > { %166 = vst [vmem:[%s1089_s4 + $0x58] sm:$0xff] %v165_v11  ;;  %v215_v36 = vld [vmem:[%s1084_s3 + $0x820] sm:$0xff]  ;;  %v217_v37 = vld [vmem:[%s1084_s3 + $0x828] sm:$0xff]  ;;  %v219_v38 = vld [vmem:[%s1084_s3 + $0x830] sm:$0xff] }
  0x24   : > { %168 = vst [vmem:[%s1089_s4 + $0x60] sm:$0xff] %v167_v12  ;;  %v221_v39 = vld [vmem:[%s1084_s3 + $0x838] sm:$0xff]  ;;  %v223_v40 = vld [vmem:[%s1084_s3 + $0x840] sm:$0xff]  ;;  %v225_v41 = vld [vmem:[%s1084_s3 + $0x848] sm:$0xff] }
  0x25   : > { %170 = vst [vmem:[%s1089_s4 + $0x68] sm:$0xff] %v169_v13  ;;  %v227_v42 = vld [vmem:[%s1084_s3 + $0x850] sm:$0xff]  ;;  %v229_v43 = vld [vmem:[%s1084_s3 + $0x858] sm:$0xff]  ;;  %v231_v44 = vld [vmem:[%s1084_s3 + $0x860] sm:$0xff] }
  0x26   : > { %172 = vst [vmem:[%s1089_s4 + $0x70] sm:$0xff] %v171_v14  ;;  %v233_v45 = vld [vmem:[%s1084_s3 + $0x868] sm:$0xff]  ;;  %v235_v46 = vld [vmem:[%s1084_s3 + $0x870] sm:$0xff]  ;;  %v237_v47 = vld [vmem:[%s1084_s3 + $0x878] sm:$0xff] }
  0x27   : > { %174 = vst [vmem:[%s1089_s4 + $0x78] sm:$0xff] %v173_v15 }
  0x28   : > { %176 = vst [vmem:[%s1089_s4 + $0x80] sm:$0xff] %v175_v16 }
  0x29   : > { %178 = vst [vmem:[%s1089_s4 + $0x88] sm:$0xff] %v177_v17 }
  0x2a   : > { %180 = vst [vmem:[%s1089_s4 + $0x90] sm:$0xff] %v179_v18 }
  0x2b   : > { %182 = vst [vmem:[%s1089_s4 + $0x98] sm:$0xff] %v181_v19 }
  0x2c   : > { %184 = vst [vmem:[%s1089_s4 + $0xa0] sm:$0xff] %v183_v20 }
  0x2d   : > { %186 = vst [vmem:[%s1089_s4 + $0xa8] sm:$0xff] %v185_v21 }
  0x2e   : > { %188 = vst [vmem:[%s1089_s4 + $0xb0] sm:$0xff] %v187_v22 }
  0x2f   : > { %190 = vst [vmem:[%s1089_s4 + $0xb8] sm:$0xff] %v189_v23 }
  0x30   : > { %192 = vst [vmem:[%s1089_s4 + $0xc0] sm:$0xff] %v191_v24 }
  0x31   : > { %194 = vst [vmem:[%s1089_s4 + $0xc8] sm:$0xff] %v193_v25 }
  0x32   : > { %196 = vst [vmem:[%s1089_s4 + $0xd0] sm:$0xff] %v195_v26 }
  0x33   : > { %198 = vst [vmem:[%s1089_s4 + $0xd8] sm:$0xff] %v197_v27 }
  0x34   : > { %200 = vst [vmem:[%s1089_s4 + $0xe0] sm:$0xff] %v199_v28 }
  0x35   : > { %202 = vst [vmem:[%s1089_s4 + $0xe8] sm:$0xff] %v201_v29 }
  0x36   : > { %204 = vst [vmem:[%s1089_s4 + $0xf0] sm:$0xff] %v203_v30 }
  0x37   : > { %206 = vst [vmem:[%s1089_s4 + $0xf8] sm:$0xff] %v205_v31 }
  0x38   : > { %208 = vst [vmem:[%s1089_s4 + $0x100] sm:$0xff] %v207_v32 }
  0x39   : > { %210 = vst [vmem:[%s1089_s4 + $0x108] sm:$0xff] %v209_v33 }
  0x3a   : > { %212 = vst [vmem:[%s1089_s4 + $0x110] sm:$0xff] %v211_v34 }
  0x3b   : > { %214 = vst [vmem:[%s1089_s4 + $0x118] sm:$0xff] %v213_v35 }
  0x3c   : > { %216 = vst [vmem:[%s1089_s4 + $0x120] sm:$0xff] %v215_v36 }
  0x3d   : > { %218 = vst [vmem:[%s1089_s4 + $0x128] sm:$0xff] %v217_v37 }
  0x3e   : > { %220 = vst [vmem:[%s1089_s4 + $0x130] sm:$0xff] %v219_v38 }
  0x3f   : > { %222 = vst [vmem:[%s1089_s4 + $0x138] sm:$0xff] %v221_v39 }
  0x40   : > { %224 = vst [vmem:[%s1089_s4 + $0x140] sm:$0xff] %v223_v40 }
  0x41   : > { %226 = vst [vmem:[%s1089_s4 + $0x148] sm:$0xff] %v225_v41 }
  0x42   : > { %228 = vst [vmem:[%s1089_s4 + $0x150] sm:$0xff] %v227_v42 }
  0x43   : > { %230 = vst [vmem:[%s1089_s4 + $0x158] sm:$0xff] %v229_v43 }
  0x44   : > { %232 = vst [vmem:[%s1089_s4 + $0x160] sm:$0xff] %v231_v44 }
  0x45   : > { %234 = vst [vmem:[%s1089_s4 + $0x168] sm:$0xff] %v233_v45 }
  0x46   : > { %236 = vst [vmem:[%s1089_s4 + $0x170] sm:$0xff] %v235_v46 }
  0x47   : > { %238 = vst [vmem:[%s1089_s4 + $0x178] sm:$0xff] %v237_v47 }
  0x48 PF: > { %p856_p7 = scmp.ge.s32.totalorder %s1007_s15, 1  ;;  %p243_p8 = scmp.lt.s32.totalorder %s1007_s15, 17 }
  0x4a   : > { %p244_p9 = pnand %p856_p7, %p243_p8 }
  0x4b   : > { %s250_s5 = sand.u32 (!%p244_p9), 1, %s983_s9   ;;  %s857_s18 = sshll.u32 (!%p244_p9), %s991_s11, 4 }
  0x4c   : > { %247 = sbr.rel (%p244_p9) target bundleno = 247 (0xf7), region = 47  ;;  %p277_p10 = scmp.lt.s32.totalorder (!%p244_p9), %s995_s12, 1 }
  0x4d   : > { %s896_s6 = smul.u32 (!%p244_p9), 384, %s250_s5  ;;  %p279_p11 = scmp.lt.s32.totalorder (!%p244_p9), %s857_s18, 127 }
  0x4f   : > { %s1187_s7 = scalar_lea.vmem (!%p244_p9), [#allocation2], %s896_s6 }
  0x51   : > { %vm339_vm0 = vcmask 1041408   ;;  %v322_v48 = vld [vmem:[%s1187_s7 + $0x118] sm:$0x3]  ;;  %v321_v49 = vld [vmem:[%s1187_s7 + $0x110] sm:$0x3]  ;;  %vm335_vm1 = vcmask 146432  }
  0x52   : > { %v306_v50 = vld [vmem:[%s1187_s7 + $0x98] sm:$0xff]  ;;  %866 = vmatpush.msk.msra.mxu3 %vm339_vm0, %v322_v48  ;;  %864 = vmatpush.msk.msra.mxu2 %vm339_vm0, %v321_v49  ;;  %v305_v51 = vld [vmem:[%s1187_s7 + $0x90] sm:$0xff]  ;;  %v320_v53 = vld [vmem:[%s1187_s7 + $0x108] sm:$0x3]  ;;  %s1351_s12 = smov (!%p277_p10, %s995_s12), 1  ;;  %s1353_s18 = smov (!%p279_p11, %s857_s18), 127 }
  0x53   : > { %v290_v52 = vld [vmem:[%s1187_s7 + $0x18] sm:$0xff]  ;;  %v289_v54 = vld [vmem:[%s1187_s7 + $0x10] sm:$0xff]  ;;  %v1201_v55 = vld [vmem:[%s1335_s0] sm:$0xf]  ;;  %862 = vmatpush.msk.msra.mxu1 %vm339_vm0, %v320_v53  ;;  %s858_s19 = sshll.u32 %s1351_s12, 7  ;;  %vm732_vm2 = vcmask 1043456  }
  0x54   : > { %462 = vmatpush.msra.mxu3 %v306_v50  ;;  %442 = vmatpush.msra.mxu2 %v305_v51  ;;  %v319_v56 = vld [vmem:[%s1187_s7 + $0x100] sm:$0x3]  ;;  %v326_v57 = vld [vmem:[%s1187_s7 + $0x138] sm:$0x3]  ;;  %v325_v58 = vld [vmem:[%s1187_s7 + $0x130] sm:$0x3]  ;;  %s282_s20 = sadd.s32 %s858_s19, %s1353_s18 }
  0x55   : > { %860 = vmatpush.msk.msra.mxu0 %vm339_vm0, %v319_v56  ;;  %v304_v59 = vld [vmem:[%s1187_s7 + $0x88] sm:$0xff]  ;;  %v303_v60 = vld [vmem:[%s1187_s7 + $0x80] sm:$0xff]  ;;  %v310_v61 = vld [vmem:[%s1187_s7 + $0xb8] sm:$0xff]  ;;  %s859_s21 = sshll.u32 %s282_s20, 2 }
  0x56   : > { %463 = vmatpush.msra.mxu3 %v290_v52  ;;  %443 = vmatpush.msra.mxu2 %v289_v54  ;;  %v309_v62 = vld [vmem:[%s1187_s7 + $0xb0] sm:$0xff]  ;;  %v288_v63 = vld [vmem:[%s1187_s7 + $0x8] sm:$0xff]  ;;  %v287_v0 = vld [vmem:[%s1187_s7] sm:$0xff]  ;;  %s1296_s25 = scalar_lea.vmem %s1337_s2, %s859_s21 }
  0x57   : > { %867 = vmatmul.msk.f32.vlgmr.msra.gmra.mxu3 %vm335_vm1, %v1201_v55  ;;  %865 = vmatmul.msk.f32.vlgmr.msra.gmra.mxu2 %vm335_vm1, %v1201_v55  ;;  %v294_v1 = vld [vmem:[%s1187_s7 + $0x38] sm:$0xff]  ;;  %v324_v2 = vld [vmem:[%s1187_s7 + $0x128] sm:$0x3]  ;;  %v323_v3 = vld [vmem:[%s1187_s7 + $0x120] sm:$0x3] }
  0x58   : > { %874 = vmatpush.msk.msrb.mxu3 %vm339_vm0, %v326_v57  ;;  %872 = vmatpush.msk.msrb.mxu2 %vm339_vm0, %v325_v58  ;;  %v293_v4 = vld [vmem:[%s1187_s7 + $0x30] sm:$0xff]  ;;  %v308_v5 = vld [vmem:[%s1187_s7 + $0xa8] sm:$0xff]  ;;  %v330_v6 = vld [vmem:[%s1187_s7 + $0x158] sm:$0x3] }
  0x59   : > { %422 = vmatpush.msra.mxu1 %v304_v59  ;;  %402 = vmatpush.msra.mxu0 %v303_v60  ;;  %v329_v7 = vld [vmem:[%s1187_s7 + $0x150] sm:$0x3]  ;;  %v307_v8 = vld [vmem:[%s1187_s7 + $0xa0] sm:$0xff]  ;;  %v314_v9 = vld [vmem:[%s1187_s7 + $0xd8] sm:$0xff] }
  0x5a   : > { %542 = vmatpush.msrb.mxu3 %v310_v61  ;;  %522 = vmatpush.msrb.mxu2 %v309_v62  ;;  %v292_v10 = vld [vmem:[%s1187_s7 + $0x28] sm:$0xff]  ;;  %v313_v11 = vld [vmem:[%s1187_s7 + $0xd0] sm:$0xff]  ;;  %v291_v12 = vld [vmem:[%s1187_s7 + $0x20] sm:$0xff] }
  0x5b   : > { %423 = vmatpush.msra.mxu1 %v288_v63  ;;  %403 = vmatpush.msra.mxu0 %v287_v0  ;;  %v298_v13 = vld [vmem:[%s1187_s7 + $0x58] sm:$0xff]  ;;  %v328_v14 = vld [vmem:[%s1187_s7 + $0x148] sm:$0x3]  ;;  %v327_v15 = vld [vmem:[%s1187_s7 + $0x140] sm:$0x3] }
  0x5c   : > { %863 = vmatmul.msk.f32.vlgmr.msra.gmra.mxu1 %vm335_vm1, %v1201_v55  ;;  %543 = vmatpush.msrb.mxu3 %v294_v1  ;;  %v297_v16 = vld [vmem:[%s1187_s7 + $0x50] sm:$0xff]  ;;  %v312_v17 = vld [vmem:[%s1187_s7 + $0xc8] sm:$0xff]  ;;  %v334_v18 = vld [vmem:[%s1187_s7 + $0x178] sm:$0x3] }
  0x5d   : > { %870 = vmatpush.msk.msrb.mxu1 %vm339_vm0, %v324_v2  ;;  %861 = vmatmul.msk.f32.vlgmr.msra.gmra.mxu0 %vm335_vm1, %v1201_v55  ;;  %v333_v19 = vld [vmem:[%s1187_s7 + $0x170] sm:$0x3]  ;;  %v311_v20 = vld [vmem:[%s1187_s7 + $0xc0] sm:$0xff]  ;;  %v318_v21 = vld [vmem:[%s1187_s7 + $0xf8] sm:$0xff] }
  0x5e   : > { %868 = vmatpush.msk.msrb.mxu0 %vm339_vm0, %v323_v3  ;;  %523 = vmatpush.msrb.mxu2 %v293_v4  ;;  %v296_v22 = vld [vmem:[%s1187_s7 + $0x48] sm:$0xff]  ;;  %v317_v23 = vld [vmem:[%s1187_s7 + $0xf0] sm:$0xff]  ;;  %v295_v24 = vld [vmem:[%s1187_s7 + $0x40] sm:$0xff] }
  0x5f   : > { %875 = vmatmul.msk.f32.vlgmr.msrb.gmra.mxu3 %vm335_vm1, %v1201_v55  ;;  %502 = vmatpush.msrb.mxu1 %v308_v5  ;;  %v302_v25 = vld [vmem:[%s1187_s7 + $0x78] sm:$0xff]  ;;  %v332_v26 = vld [vmem:[%s1187_s7 + $0x168] sm:$0x3]  ;;  %v331_v27 = vld [vmem:[%s1187_s7 + $0x160] sm:$0x3] }
  0x60   : > { %882 = vmatpush.msk.msra.mxu3 %vm339_vm0, %v330_v6  ;;  %873 = vmatmul.msk.f32.vlgmr.msrb.gmra.mxu2 %vm335_vm1, %v1201_v55  ;;  %v301_v28 = vld [vmem:[%s1187_s7 + $0x70] sm:$0xff]  ;;  %v316_v29 = vld [vmem:[%s1187_s7 + $0xe8] sm:$0xff]  ;;  %v315_v30 = vld [vmem:[%s1187_s7 + $0xe0] sm:$0xff] }
  0x61   : > { %880 = vmatpush.msk.msra.mxu2 %vm339_vm0, %v329_v7  ;;  %482 = vmatpush.msrb.mxu0 %v307_v8  ;;  %v300_v31 = vld [vmem:[%s1187_s7 + $0x68] sm:$0xff]  ;;  %v299_v32 = vld [vmem:[%s1187_s7 + $0x60] sm:$0xff] }
  0x62   : > { %622 = vmatpush.msra.mxu3 %v314_v9  ;;  %503 = vmatpush.msrb.mxu1 %v292_v10 }
  0x63   : > { %602 = vmatpush.msra.mxu2 %v313_v11  ;;  %483 = vmatpush.msrb.mxu0 %v291_v12 }
  0x64   : > { %871 = vmatmul.msk.f32.vlgmr.msrb.gmra.mxu1 %vm335_vm1, %v1201_v55  ;;  %623 = vmatpush.msra.mxu3 %v298_v13 }
  0x65   : > { %878 = vmatpush.msk.msra.mxu1 %vm339_vm0, %v328_v14  ;;  %869 = vmatmul.msk.f32.vlgmr.msrb.gmra.mxu0 %vm335_vm1, %v1201_v55 }
  0x66   : > { %876 = vmatpush.msk.msra.mxu0 %vm339_vm0, %v327_v15  ;;  %603 = vmatpush.msra.mxu2 %v297_v16 }
  0x67   : > { %883 = vmatmul.msk.f32.vlgmr.msra.gmra.mxu3 %vm335_vm1, %v1201_v55  ;;  %582 = vmatpush.msra.mxu1 %v312_v17 }
  0x68   : > { %890 = vmatpush.msk.msrb.mxu3 %vm339_vm0, %v334_v18  ;;  %881 = vmatmul.msk.f32.vlgmr.msra.gmra.mxu2 %vm335_vm1, %v1201_v55 }
  0x69   : > { %888 = vmatpush.msk.msrb.mxu2 %vm339_vm0, %v333_v19  ;;  %562 = vmatpush.msra.mxu0 %v311_v20 }
  0x6a   : > { %702 = vmatpush.msrb.mxu3 %v318_v21  ;;  %583 = vmatpush.msra.mxu1 %v296_v22 }
  0x6b   : > { %682 = vmatpush.msrb.mxu2 %v317_v23  ;;  %563 = vmatpush.msra.mxu0 %v295_v24 }
  0x6c   : > { %879 = vmatmul.msk.f32.vlgmr.msra.gmra.mxu1 %vm335_vm1, %v1201_v55  ;;  %703 = vmatpush.msrb.mxu3 %v302_v25 }
  0x6d   : > { %886 = vmatpush.msk.msrb.mxu1 %vm339_vm0, %v332_v26  ;;  %877 = vmatmul.msk.f32.vlgmr.msra.gmra.mxu0 %vm335_vm1, %v1201_v55 }
  0x6e   : > { %884 = vmatpush.msk.msrb.mxu0 %vm339_vm0, %v331_v27  ;;  %683 = vmatpush.msrb.mxu2 %v301_v28 }
  0x6f   : > { %891 = vmatmul.msk.f32.vlgmr.msrb.gmra.mxu3 %vm335_vm1, %v1201_v55  ;;  %662 = vmatpush.msrb.mxu1 %v316_v29 }
  0x70   : > { %889 = vmatmul.msk.f32.vlgmr.msrb.gmra.mxu2 %vm335_vm1, %v1201_v55  ;;  %642 = vmatpush.msrb.mxu0 %v315_v30 }
  0x71   : > { %663 = vmatpush.msrb.mxu1 %v300_v31 }
  0x72   : > { %643 = vmatpush.msrb.mxu0 %v299_v32 }
  0x74   : > { %887 = vmatmul.msk.f32.vlgmr.msrb.gmra.mxu1 %vm335_vm1, %v1201_v55 }
  0x75   : > { %885 = vmatmul.msk.f32.vlgmr.msrb.gmra.mxu0 %vm335_vm1, %v1201_v55 }
  0xd9   : > { %v425_v33 = vpop.f32.mrf.mxu1 }
  0xda   : > { %v724_v34 = vrot.slane %v425_v33, 4  ;;  %v465_v35 = vpop.f32.mrf.mxu3  ;;  %v405_v36 = vpop.f32.mrf.mxu0 }
  0xdb   : > { %v725_v37 = vrot.slane %v465_v35, 4  ;;  %v445_v38 = vpop.f32.mrf.mxu2 }
  0xdc   : > { %v733_v39 = vsel %vm732_vm2, %v405_v36, %v724_v34 }
  0xdd   : > { %749 = vst [vmem:[%s1296_s25] sm:$0xff] %v733_v39  ;;  %v734_v40 = vsel %vm732_vm2, %v445_v38, %v725_v37 }
  0xde   : > { %750 = vst [vmem:[%s1296_s25 + $0x8] sm:$0xff] %v734_v40 }
  0xe1   : > { %v505_v41 = vpop.f32.mrf.mxu1 }
  0xe2   : > { %v726_v42 = vrot.slane %v505_v41, 4  ;;  %v545_v43 = vpop.f32.mrf.mxu3  ;;  %v485_v44 = vpop.f32.mrf.mxu0 }
  0xe3   : > { %v727_v45 = vrot.slane %v545_v43, 4  ;;  %v525_v46 = vpop.f32.mrf.mxu2 }
  0xe4   : > { %v735_v47 = vsel %vm732_vm2, %v485_v44, %v726_v42 }
  0xe5   : > { %751 = vst [vmem:[%s1296_s25 + $0x10] sm:$0xff] %v735_v47  ;;  %v736_v48 = vsel %vm732_vm2, %v525_v46, %v727_v45 }
  0xe6   : > { %752 = vst [vmem:[%s1296_s25 + $0x18] sm:$0xff] %v736_v48 }
  0xe9   : > { %v585_v49 = vpop.f32.mrf.mxu1 }
  0xea   : > { %v728_v50 = vrot.slane %v585_v49, 4  ;;  %v625_v51 = vpop.f32.mrf.mxu3  ;;  %v565_v52 = vpop.f32.mrf.mxu0 }
  0xeb   : > { %v729_v53 = vrot.slane %v625_v51, 4  ;;  %v605_v54 = vpop.f32.mrf.mxu2 }
  0xec   : > { %v737_v55 = vsel %vm732_vm2, %v565_v52, %v728_v50 }
  0xed   : > { %753 = vst [vmem:[%s1296_s25 + $0x20] sm:$0xff] %v737_v55  ;;  %v738_v56 = vsel %vm732_vm2, %v605_v54, %v729_v53 }
  0xee   : > { %754 = vst [vmem:[%s1296_s25 + $0x28] sm:$0xff] %v738_v56 }
  0xf1   : > { %v665_v57 = vpop.f32.mrf.mxu1 }
  0xf2   : > { %v730_v58 = vrot.slane %v665_v57, 4  ;;  %v705_v59 = vpop.f32.mrf.mxu3  ;;  %v645_v60 = vpop.f32.mrf.mxu0 }
  0xf3   : > { %v731_v61 = vrot.slane %v705_v59, 4  ;;  %v685_v62 = vpop.f32.mrf.mxu2 }
  0xf4   : > { %v739_v63 = vsel %vm732_vm2, %v645_v60, %v730_v58 }
  0xf5   : > { %755 = vst [vmem:[%s1296_s25 + $0x30] sm:$0xff] %v739_v63  ;;  %v740_v0 = vsel %vm732_vm2, %v685_v62, %v731_v61 }
  0xf6   : > { %756 = vst [vmem:[%s1296_s25 + $0x38] sm:$0xff] %v740_v0 }
  0xf7 PF: > { %s12_s15 = sadd.s32 1, %s1007_s15   ;;  %s1338_s9 = smov %s987_s10 }
  0xf8   : > { %p9_p12 = scmp.ge.s32.totalorder %s12_s15, 18   ;;  %s1339_s10 = smov %s1075_s22 }
  0xf9   : > { %s1340_s11 = smov %s999_s13  ;;  %s1341_s12 = smov %s1003_s14 }
  0xfa   : > { %s1342_s13 = smov %s1345_s16  ;;  %s1343_s14 = smov %s1349_s17 }
  0xfb   :  { %11 = sbr.rel (!%p9_p12) target bundleno = 4 (0x4), region = 86 }

// kernel: swformer_forward.23
= control target key start
LH: loop header
LB: loop body
LE: loop exit
PB: predicated region body
PF: predicated region fallthrough
CT: control target
= control target key end

     0   :  { %s2355_s12 = smov 0   ;;  %s2357_s13 = smov 0   ;;  %s3372_s0 = inlined_call_operand.vmem [shape: f32[2,512,128], index: 0, kind: input, shape index: {}]   ;;  %s3373_s1 = inlined_call_operand.vmem [shape: f32[512,1], index: 1, kind: input, shape index: {}]   ;;  %s3374_s2 = inlined_call_operand.vmem [shape: f32[512,1], index: 2, kind: input, shape index: {}]   ;;  %s3375_s3 = inlined_call_operand.vmem [shape: bf16[2,512,128], index: 3, kind: output, shape index: {}]  }
   0x1   :  { %s2359_s14 = smov 0  }
   0x2 LB: > { %s2371_s15 = sadd.s32 4294967295, %s2331_s14   ;;  %s2374_s16 = sadd.s32 1, %s2331_s14   ;;  %s2331_s14 = sphi %s2359_s14, %s3424_s14   ;;  %s2327_s13 = sphi %s2357_s13, %s3423_s13   ;;  %s2323_s12 = sphi %s2355_s12, %s3422_s12  }
   0x3   : > { %s17_s17 = ssub.s32 %s2331_s14, %s2374_s16  ;;  %s20_s18 = sadd.s32 1, %s2327_s13 }
   0x4   : > { %p18_p0 = scmp.eq.s32.totalorder %s17_s17, 0  ;;  %p27_p1 = scmp.ne.s32.totalorder %s2327_s13, %s2323_s12 }
   0x5   : > { %p28_p2 = scmp.eq.s32.totalorder %s2331_s14, 0  ;;  %p109_p3 = scmp.eq.s32.totalorder %s2371_s15, 1 }
   0x6   : > { %s2384_s19 = scalar_select %p18_p0, %s2327_s13, %s20_s18  }
   0x7   : > { %p29_p4 = por %p28_p2, %p27_p1  ;;  %p2386_p5 = por %p109_p3, %p27_p1 }
   0x8   : > { %p2007_p6 = scmp.ge.s32.totalorder %s2331_s14, 2 }
   0xa   : > { %131 = sbr.rel (%p2007_p6) target bundleno = 83 (0x53), region = 16 }
   0xf   : > { %134 = sbr.rel (!%p29_p4) target bundleno = 83 (0x53), region = 20  ;;  %s136_s21 = sand.u32 (%p29_p4), 1, %s2327_s13  }
  0x10   : > { %s2151_s22 = sshll.u32 (%p29_p4), %s2331_s14, 8  ;;  %s2008_s23 = sshll.u32 (%p29_p4), %s136_s21, 9 }
  0x11   : > { %s2396_s26 = scalar_lea.vmem (%p29_p4), %s3372_s0, %s2151_s22  ;;  %s2401_s27 = scalar_lea.vmem (%p29_p4), [#allocation2], %s2008_s23 }
  0x12   : > { %v296_v0 = vld [vmem:[%s2396_s26] sm:$0xff] (%p29_p4)  ;;  %v298_v1 = vld [vmem:[%s2396_s26 + $0x8] sm:$0xff] (%p29_p4)  ;;  %v300_v2 = vld [vmem:[%s2396_s26 + $0x10] sm:$0xff] (%p29_p4) }
  0x13   : > { %297 = vst [vmem:[%s2401_s27] sm:$0xff] (%p29_p4), %v296_v0  ;;  %v302_v3 = vld [vmem:[%s2396_s26 + $0x18] sm:$0xff] (%p29_p4)  ;;  %v304_v4 = vld [vmem:[%s2396_s26 + $0x20] sm:$0xff] (%p29_p4)  ;;  %v306_v5 = vld [vmem:[%s2396_s26 + $0x28] sm:$0xff] (%p29_p4) }
  0x14   : > { %299 = vst [vmem:[%s2401_s27 + $0x8] sm:$0xff] %v298_v1  ;;  %v308_v6 = vld [vmem:[%s2396_s26 + $0x30] sm:$0xff]  ;;  %v310_v7 = vld [vmem:[%s2396_s26 + $0x38] sm:$0xff]  ;;  %v312_v8 = vld [vmem:[%s2396_s26 + $0x40] sm:$0xff] }
  0x15   : > { %301 = vst [vmem:[%s2401_s27 + $0x10] sm:$0xff] %v300_v2  ;;  %v314_v9 = vld [vmem:[%s2396_s26 + $0x48] sm:$0xff]  ;;  %v316_v10 = vld [vmem:[%s2396_s26 + $0x50] sm:$0xff]  ;;  %v318_v11 = vld [vmem:[%s2396_s26 + $0x58] sm:$0xff] }
  0x16   : > { %303 = vst [vmem:[%s2401_s27 + $0x18] sm:$0xff] %v302_v3  ;;  %v320_v12 = vld [vmem:[%s2396_s26 + $0x60] sm:$0xff]  ;;  %v322_v13 = vld [vmem:[%s2396_s26 + $0x68] sm:$0xff]  ;;  %v324_v14 = vld [vmem:[%s2396_s26 + $0x70] sm:$0xff] }
  0x17   : > { %305 = vst [vmem:[%s2401_s27 + $0x20] sm:$0xff] %v304_v4  ;;  %v326_v15 = vld [vmem:[%s2396_s26 + $0x78] sm:$0xff]  ;;  %v328_v16 = vld [vmem:[%s2396_s26 + $0x80] sm:$0xff]  ;;  %v330_v17 = vld [vmem:[%s2396_s26 + $0x88] sm:$0xff] }
  0x18   : > { %307 = vst [vmem:[%s2401_s27 + $0x28] sm:$0xff] %v306_v5  ;;  %v332_v18 = vld [vmem:[%s2396_s26 + $0x90] sm:$0xff]  ;;  %v334_v19 = vld [vmem:[%s2396_s26 + $0x98] sm:$0xff]  ;;  %v336_v20 = vld [vmem:[%s2396_s26 + $0xa0] sm:$0xff] }
  0x19   : > { %309 = vst [vmem:[%s2401_s27 + $0x30] sm:$0xff] %v308_v6  ;;  %v338_v21 = vld [vmem:[%s2396_s26 + $0xa8] sm:$0xff]  ;;  %v340_v22 = vld [vmem:[%s2396_s26 + $0xb0] sm:$0xff]  ;;  %v342_v23 = vld [vmem:[%s2396_s26 + $0xb8] sm:$0xff] }
  0x1a   : > { %311 = vst [vmem:[%s2401_s27 + $0x38] sm:$0xff] %v310_v7  ;;  %v344_v24 = vld [vmem:[%s2396_s26 + $0xc0] sm:$0xff]  ;;  %v346_v25 = vld [vmem:[%s2396_s26 + $0xc8] sm:$0xff]  ;;  %v348_v26 = vld [vmem:[%s2396_s26 + $0xd0] sm:$0xff] }
  0x1b   : > { %313 = vst [vmem:[%s2401_s27 + $0x40] sm:$0xff] %v312_v8  ;;  %v350_v27 = vld [vmem:[%s2396_s26 + $0xd8] sm:$0xff]  ;;  %v352_v28 = vld [vmem:[%s2396_s26 + $0xe0] sm:$0xff]  ;;  %v354_v29 = vld [vmem:[%s2396_s26 + $0xe8] sm:$0xff] }
  0x1c   : > { %315 = vst [vmem:[%s2401_s27 + $0x48] sm:$0xff] %v314_v9  ;;  %v356_v30 = vld [vmem:[%s2396_s26 + $0xf0] sm:$0xff]  ;;  %v358_v31 = vld [vmem:[%s2396_s26 + $0xf8] sm:$0xff]  ;;  %v360_v32 = vld [vmem:[%s2396_s26 + $0x200] sm:$0xff] }
  0x1d   : > { %317 = vst [vmem:[%s2401_s27 + $0x50] sm:$0xff] %v316_v10  ;;  %v362_v33 = vld [vmem:[%s2396_s26 + $0x208] sm:$0xff]  ;;  %v364_v34 = vld [vmem:[%s2396_s26 + $0x210] sm:$0xff]  ;;  %v366_v35 = vld [vmem:[%s2396_s26 + $0x218] sm:$0xff] }
  0x1e   : > { %319 = vst [vmem:[%s2401_s27 + $0x58] sm:$0xff] %v318_v11  ;;  %v368_v36 = vld [vmem:[%s2396_s26 + $0x220] sm:$0xff]  ;;  %v370_v37 = vld [vmem:[%s2396_s26 + $0x228] sm:$0xff]  ;;  %v372_v38 = vld [vmem:[%s2396_s26 + $0x230] sm:$0xff] }
  0x1f   : > { %321 = vst [vmem:[%s2401_s27 + $0x60] sm:$0xff] %v320_v12  ;;  %v374_v39 = vld [vmem:[%s2396_s26 + $0x238] sm:$0xff]  ;;  %v376_v40 = vld [vmem:[%s2396_s26 + $0x240] sm:$0xff]  ;;  %v378_v41 = vld [vmem:[%s2396_s26 + $0x248] sm:$0xff] }
  0x20   : > { %323 = vst [vmem:[%s2401_s27 + $0x68] sm:$0xff] %v322_v13  ;;  %v380_v42 = vld [vmem:[%s2396_s26 + $0x250] sm:$0xff]  ;;  %v382_v43 = vld [vmem:[%s2396_s26 + $0x258] sm:$0xff]  ;;  %v384_v44 = vld [vmem:[%s2396_s26 + $0x260] sm:$0xff] }
  0x21   : > { %325 = vst [vmem:[%s2401_s27 + $0x70] sm:$0xff] %v324_v14  ;;  %v386_v45 = vld [vmem:[%s2396_s26 + $0x268] sm:$0xff]  ;;  %v388_v46 = vld [vmem:[%s2396_s26 + $0x270] sm:$0xff]  ;;  %v390_v47 = vld [vmem:[%s2396_s26 + $0x278] sm:$0xff] }
  0x22   : > { %327 = vst [vmem:[%s2401_s27 + $0x78] sm:$0xff] %v326_v15  ;;  %v392_v48 = vld [vmem:[%s2396_s26 + $0x280] sm:$0xff]  ;;  %v394_v49 = vld [vmem:[%s2396_s26 + $0x288] sm:$0xff]  ;;  %v396_v50 = vld [vmem:[%s2396_s26 + $0x290] sm:$0xff] }
  0x23   : > { %329 = vst [vmem:[%s2401_s27 + $0x80] sm:$0xff] %v328_v16  ;;  %v398_v51 = vld [vmem:[%s2396_s26 + $0x298] sm:$0xff]  ;;  %v400_v52 = vld [vmem:[%s2396_s26 + $0x2a0] sm:$0xff]  ;;  %v402_v53 = vld [vmem:[%s2396_s26 + $0x2a8] sm:$0xff] }
  0x24   : > { %331 = vst [vmem:[%s2401_s27 + $0x88] sm:$0xff] %v330_v17  ;;  %v404_v54 = vld [vmem:[%s2396_s26 + $0x2b0] sm:$0xff]  ;;  %v406_v55 = vld [vmem:[%s2396_s26 + $0x2b8] sm:$0xff]  ;;  %v408_v56 = vld [vmem:[%s2396_s26 + $0x2c0] sm:$0xff] }
  0x25   : > { %333 = vst [vmem:[%s2401_s27 + $0x90] sm:$0xff] %v332_v18  ;;  %v410_v57 = vld [vmem:[%s2396_s26 + $0x2c8] sm:$0xff]  ;;  %v412_v58 = vld [vmem:[%s2396_s26 + $0x2d0] sm:$0xff]  ;;  %v414_v59 = vld [vmem:[%s2396_s26 + $0x2d8] sm:$0xff] }
  0x26   : > { %335 = vst [vmem:[%s2401_s27 + $0x98] sm:$0xff] %v334_v19  ;;  %v416_v60 = vld [vmem:[%s2396_s26 + $0x2e0] sm:$0xff]  ;;  %v418_v61 = vld [vmem:[%s2396_s26 + $0x2e8] sm:$0xff]  ;;  %v420_v62 = vld [vmem:[%s2396_s26 + $0x2f0] sm:$0xff] }
  0x27   : > { %337 = vst [vmem:[%s2401_s27 + $0xa0] sm:$0xff] %v336_v20  ;;  %v422_v63 = vld [vmem:[%s2396_s26 + $0x2f8] sm:$0xff] }
  0x28   : > { %339 = vst [vmem:[%s2401_s27 + $0xa8] sm:$0xff] %v338_v21 }
  0x29   : > { %341 = vst [vmem:[%s2401_s27 + $0xb0] sm:$0xff] %v340_v22 }
  0x2a   : > { %343 = vst [vmem:[%s2401_s27 + $0xb8] sm:$0xff] %v342_v23 }
  0x2b   : > { %345 = vst [vmem:[%s2401_s27 + $0xc0] sm:$0xff] %v344_v24 }
  0x2c   : > { %347 = vst [vmem:[%s2401_s27 + $0xc8] sm:$0xff] %v346_v25 }
  0x2d   : > { %349 = vst [vmem:[%s2401_s27 + $0xd0] sm:$0xff] %v348_v26 }
  0x2e   : > { %351 = vst [vmem:[%s2401_s27 + $0xd8] sm:$0xff] %v350_v27 }
  0x2f   : > { %353 = vst [vmem:[%s2401_s27 + $0xe0] sm:$0xff] %v352_v28 }
  0x30   : > { %355 = vst [vmem:[%s2401_s27 + $0xe8] sm:$0xff] %v354_v29 }
  0x31   : > { %357 = vst [vmem:[%s2401_s27 + $0xf0] sm:$0xff] %v356_v30 }
  0x32   : > { %359 = vst [vmem:[%s2401_s27 + $0xf8] sm:$0xff] %v358_v31 }
  0x33   : > { %361 = vst [vmem:[%s2401_s27 + $0x100] sm:$0xff] %v360_v32 }
  0x34   : > { %363 = vst [vmem:[%s2401_s27 + $0x108] sm:$0xff] %v362_v33 }
  0x35   : > { %365 = vst [vmem:[%s2401_s27 + $0x110] sm:$0xff] %v364_v34 }
  0x36   : > { %367 = vst [vmem:[%s2401_s27 + $0x118] sm:$0xff] %v366_v35 }
  0x37   : > { %369 = vst [vmem:[%s2401_s27 + $0x120] sm:$0xff] %v368_v36 }
  0x38   : > { %371 = vst [vmem:[%s2401_s27 + $0x128] sm:$0xff] %v370_v37 }
  0x39   : > { %373 = vst [vmem:[%s2401_s27 + $0x130] sm:$0xff] %v372_v38 }
  0x3a   : > { %375 = vst [vmem:[%s2401_s27 + $0x138] sm:$0xff] %v374_v39 }
  0x3b   : > { %377 = vst [vmem:[%s2401_s27 + $0x140] sm:$0xff] %v376_v40 }
  0x3c   : > { %379 = vst [vmem:[%s2401_s27 + $0x148] sm:$0xff] %v378_v41 }
  0x3d   : > { %381 = vst [vmem:[%s2401_s27 + $0x150] sm:$0xff] %v380_v42 }
  0x3e   : > { %383 = vst [vmem:[%s2401_s27 + $0x158] sm:$0xff] %v382_v43 }
  0x3f   : > { %385 = vst [vmem:[%s2401_s27 + $0x160] sm:$0xff] %v384_v44 }
  0x40   : > { %387 = vst [vmem:[%s2401_s27 + $0x168] sm:$0xff] %v386_v45 }
  0x41   : > { %389 = vst [vmem:[%s2401_s27 + $0x170] sm:$0xff] %v388_v46 }
  0x42   : > { %391 = vst [vmem:[%s2401_s27 + $0x178] sm:$0xff] %v390_v47 }
  0x43   : > { %393 = vst [vmem:[%s2401_s27 + $0x180] sm:$0xff] %v392_v48 }
  0x44   : > { %395 = vst [vmem:[%s2401_s27 + $0x188] sm:$0xff] %v394_v49 }
  0x45   : > { %397 = vst [vmem:[%s2401_s27 + $0x190] sm:$0xff] %v396_v50 }
  0x46   : > { %399 = vst [vmem:[%s2401_s27 + $0x198] sm:$0xff] %v398_v51 }
  0x47   : > { %401 = vst [vmem:[%s2401_s27 + $0x1a0] sm:$0xff] %v400_v52 }
  0x48   : > { %403 = vst [vmem:[%s2401_s27 + $0x1a8] sm:$0xff] %v402_v53 }
  0x49   : > { %405 = vst [vmem:[%s2401_s27 + $0x1b0] sm:$0xff] %v404_v54 }
  0x4a   : > { %407 = vst [vmem:[%s2401_s27 + $0x1b8] sm:$0xff] %v406_v55 }
  0x4b   : > { %409 = vst [vmem:[%s2401_s27 + $0x1c0] sm:$0xff] %v408_v56 }
  0x4c   : > { %411 = vst [vmem:[%s2401_s27 + $0x1c8] sm:$0xff] %v410_v57 }
  0x4d   : > { %413 = vst [vmem:[%s2401_s27 + $0x1d0] sm:$0xff] %v412_v58 }
  0x4e   : > { %415 = vst [vmem:[%s2401_s27 + $0x1d8] sm:$0xff] %v414_v59 }
  0x4f   : > { %417 = vst [vmem:[%s2401_s27 + $0x1e0] sm:$0xff] %v416_v60 }
  0x50   : > { %419 = vst [vmem:[%s2401_s27 + $0x1e8] sm:$0xff] %v418_v61 }
  0x51   : > { %421 = vst [vmem:[%s2401_s27 + $0x1f0] sm:$0xff] %v420_v62 }
  0x52   : > { %423 = vst [vmem:[%s2401_s27 + $0x1f8] sm:$0xff] %v422_v63 }
  0x53 PF: > { %p2011_p7 = scmp.ge.s32.totalorder %s2331_s14, 1  ;;  %p446_p8 = scmp.lt.s32.totalorder %s2331_s14, 3 }
  0x55   : > { %p447_p9 = pnand %p2011_p7, %p446_p8 }
  0x57   : > { %450 = sbr.rel (%p447_p9) target bundleno = 424 (0x1a8), region = 66 }
  0x5c   : > { %s2014_s28 = sshll.u32 %s2371_s15, 5  ;;  %v2333_v0 = vmov 0   ;;  %s453_s9 = sand.u32 1, %s2323_s12  }
  0x5d   : > { %2308 = vset.pattern.permute.xlu2 %v2333_v0  ;;  %2307 = vset.pattern.permute.xlu1 %v2333_v0  ;;  %p487_p10 = scmp.lt.s32.totalorder %s2014_s28, 63  ;;  %s2012_s10 = sshll.u32 %s453_s9, 9 }
  0x5e   : > { %2306 = vset.pattern.permute.xlu0 %v2333_v0  ;;  %s2662_s11 = scalar_lea.vmem [#allocation2], %s2012_s10  ;;  %s2013_s14 = sshll.u32 %s453_s9, 8 }
  0x5f   : > { %s3426_s28 = smov (!%p487_p10, %s2014_s28), 63  ;;  %s2990_s12 = scalar_lea.vmem [#allocation3], %s2013_s14 }
  0x60   : > { %s2015_s29 = sshll.u32 %s3426_s28, 3  ;;  %s2152_s17 = sshll.u32 (%p2386_p5), %s2371_s15, 7 }
  0x61   : > { %s2539_s5 = scalar_lea.vmem %s3373_s1, %s2015_s29  ;;  %s2576_s8 = scalar_lea.vmem %s3374_s2, %s2015_s29 }
  0x62   : > { %v503_v1 = vld [vmem:[%s2539_s5 + $0x20] sm:$0xff]  ;;  %v501_v2 = vld [vmem:[%s2539_s5 + $0x10] sm:$0xff]  ;;  %v504_v4 = vld [vmem:[%s2539_s5 + $0x28] sm:$0xff]  ;;  %s3298_s22 = scalar_lea.vmem (%p2386_p5), %s3375_s3, %s2152_s17 }
  0x63   : > { %v499_v3 = vld [vmem:[%s2539_s5] sm:$0xff]  ;;  %617 = vperm.xlu2 %2308, %v503_v1   ;;  %607 = vperm.xlu1 %2307, %v501_v2   ;;  %v502_v5 = vld [vmem:[%s2539_s5 + $0x18] sm:$0xff]  ;;  %v500_v6 = vld [vmem:[%s2539_s5 + $0x8] sm:$0xff] }
  0x64   : > { %597 = vperm.xlu0 %2306, %v499_v3   ;;  %v507_v7 = vld [vmem:[%s2539_s5 + $0x40] sm:$0xff]  ;;  %v506_v8 = vld [vmem:[%s2539_s5 + $0x38] sm:$0xff]  ;;  %v505_v9 = vld [vmem:[%s2539_s5 + $0x30] sm:$0xff] }
  0x65   : > { %v510_v10 = vld [vmem:[%s2539_s5 + $0x58] sm:$0xff]  ;;  %v509_v11 = vld [vmem:[%s2539_s5 + $0x50] sm:$0xff]  ;;  %v508_v12 = vld [vmem:[%s2539_s5 + $0x48] sm:$0xff] }
  0x66   : > { %v513_v13 = vld [vmem:[%s2539_s5 + $0x70] sm:$0xff]  ;;  %v512_v14 = vld [vmem:[%s2539_s5 + $0x68] sm:$0xff]  ;;  %v511_v15 = vld [vmem:[%s2539_s5 + $0x60] sm:$0xff] }
  0x67   : > { %v516_v16 = vld [vmem:[%s2539_s5 + $0x88] sm:$0xff]  ;;  %v515_v17 = vld [vmem:[%s2539_s5 + $0x80] sm:$0xff]  ;;  %v514_v18 = vld [vmem:[%s2539_s5 + $0x78] sm:$0xff] }
  0x68   : > { %v519_v19 = vld [vmem:[%s2539_s5 + $0xa0] sm:$0xff]  ;;  %v518_v20 = vld [vmem:[%s2539_s5 + $0x98] sm:$0xff]  ;;  %v517_v21 = vld [vmem:[%s2539_s5 + $0x90] sm:$0xff] }
  0x69   : > { %v522_v22 = vld [vmem:[%s2539_s5 + $0xb8] sm:$0xff]  ;;  %v521_v23 = vld [vmem:[%s2539_s5 + $0xb0] sm:$0xff]  ;;  %v520_v24 = vld [vmem:[%s2539_s5 + $0xa8] sm:$0xff] }
  0x6a   : > { %v525_v25 = vld [vmem:[%s2539_s5 + $0xd0] sm:$0xff]  ;;  %v524_v26 = vld [vmem:[%s2539_s5 + $0xc8] sm:$0xff]  ;;  %v523_v27 = vld [vmem:[%s2539_s5 + $0xc0] sm:$0xff] }
  0x6b   : > { %622 = vperm.xlu2 %2308, %v504_v4   ;;  %612 = vperm.xlu1 %2307, %v502_v5   ;;  %v528_v28 = vld [vmem:[%s2539_s5 + $0xe8] sm:$0xff]  ;;  %v527_v29 = vld [vmem:[%s2539_s5 + $0xe0] sm:$0xff]  ;;  %v526_v30 = vld [vmem:[%s2539_s5 + $0xd8] sm:$0xff] }
  0x6c   : > { %602 = vperm.xlu0 %2306, %v500_v6   ;;  %v531_v31 = vld [vmem:[%s2576_s8] sm:$0xff]  ;;  %v530_v32 = vld [vmem:[%s2539_s5 + $0xf8] sm:$0xff]  ;;  %v529_v33 = vld [vmem:[%s2539_s5 + $0xf0] sm:$0xff] }
  0x6d   : > { %v534_v34 = vld [vmem:[%s2576_s8 + $0x18] sm:$0xff]  ;;  %v533_v35 = vld [vmem:[%s2576_s8 + $0x10] sm:$0xff]  ;;  %v532_v36 = vld [vmem:[%s2576_s8 + $0x8] sm:$0xff] }
  0x6e   : > { %v537_v38 = vld [vmem:[%s2576_s8 + $0x30] sm:$0xff]  ;;  %v536_v39 = vld [vmem:[%s2576_s8 + $0x28] sm:$0xff]  ;;  %v535_v40 = vld [vmem:[%s2576_s8 + $0x20] sm:$0xff] }
  0x6f   : > { %v540_v42 = vld [vmem:[%s2576_s8 + $0x48] sm:$0xff]  ;;  %v539_v43 = vld [vmem:[%s2576_s8 + $0x40] sm:$0xff]  ;;  %v538_v44 = vld [vmem:[%s2576_s8 + $0x38] sm:$0xff] }
  0x70   : > { %v543_v46 = vld [vmem:[%s2576_s8 + $0x60] sm:$0xff]  ;;  %v542_v47 = vld [vmem:[%s2576_s8 + $0x58] sm:$0xff]  ;;  %v541_v48 = vld [vmem:[%s2576_s8 + $0x50] sm:$0xff] }
  0x71   : > { %v546_v52 = vld [vmem:[%s2576_s8 + $0x78] sm:$0xff]  ;;  %v545_v53 = vld [vmem:[%s2576_s8 + $0x70] sm:$0xff]  ;;  %v544_v54 = vld [vmem:[%s2576_s8 + $0x68] sm:$0xff] }
  0x72   : > { %v549_v58 = vld [vmem:[%s2576_s8 + $0x90] sm:$0xff]  ;;  %v548_v59 = vld [vmem:[%s2576_s8 + $0x88] sm:$0xff]  ;;  %v547_v60 = vld [vmem:[%s2576_s8 + $0x80] sm:$0xff] }
  0x73   : > { %637 = vperm.xlu2 %2308, %v507_v7   ;;  %632 = vperm.xlu1 %2307, %v506_v8   ;;  %v552_v0 = vld [vmem:[%s2576_s8 + $0xa8] sm:$0xff]  ;;  %v551_v1 = vld [vmem:[%s2576_s8 + $0xa0] sm:$0xff]  ;;  %v550_v2 = vld [vmem:[%s2576_s8 + $0x98] sm:$0xff] }
  0x74   : > { %627 = vperm.xlu0 %2306, %v505_v9   ;;  %v555_v6 = vld [vmem:[%s2576_s8 + $0xc0] sm:$0xff]  ;;  %v554_v7 = vld [vmem:[%s2576_s8 + $0xb8] sm:$0xff]  ;;  %v553_v8 = vld [vmem:[%s2576_s8 + $0xb0] sm:$0xff] }
  0x7b   : > { %652 = vperm.xlu2 %2308, %v510_v10   ;;  %647 = vperm.xlu1 %2307, %v509_v11  }
  0x7c   : > { %642 = vperm.xlu0 %2306, %v508_v12   ;;  %v558_v12 = vld [vmem:[%s2576_s8 + $0xd8] sm:$0xff] }
  0x83   : > { %667 = vperm.xlu2 %2308, %v513_v13   ;;  %662 = vperm.xlu1 %2307, %v512_v14   ;;  %v557_v13 = vld [vmem:[%s2576_s8 + $0xd0] sm:$0xff]  ;;  %v556_v14 = vld [vmem:[%s2576_s8 + $0xc8] sm:$0xff] }
  0x84   : > { %657 = vperm.xlu0 %2306, %v511_v15  }
  0x8b   : > { %682 = vperm.xlu2 %2308, %v516_v16   ;;  %677 = vperm.xlu1 %2307, %v515_v17  }
  0x8c   : > { %672 = vperm.xlu0 %2306, %v514_v18   ;;  %v561_v18 = vld [vmem:[%s2576_s8 + $0xf0] sm:$0xff] }
  0x93   : > { %697 = vperm.xlu2 %2308, %v519_v19   ;;  %692 = vperm.xlu1 %2307, %v518_v20   ;;  %v560_v19 = vld [vmem:[%s2576_s8 + $0xe8] sm:$0xff]  ;;  %v559_v20 = vld [vmem:[%s2576_s8 + $0xe0] sm:$0xff] }
  0x94   : > { %687 = vperm.xlu0 %2306, %v517_v21  }
  0x9b   : > { %712 = vperm.xlu2 %2308, %v522_v22   ;;  %707 = vperm.xlu1 %2307, %v521_v23  }
  0x9c   : > { %702 = vperm.xlu0 %2306, %v520_v24   ;;  %v563_v24 = vld [vmem:[%s2662_s11] sm:$0xff] }
  0xa3   : > { %727 = vperm.xlu2 %2308, %v525_v25   ;;  %722 = vperm.xlu1 %2307, %v524_v26   ;;  %v562_v25 = vld [vmem:[%s2576_s8 + $0xf8] sm:$0xff] }
  0xa4   : > { %717 = vperm.xlu0 %2306, %v523_v27  }
  0xab   : > { %742 = vperm.xlu2 %2308, %v528_v28   ;;  %737 = vperm.xlu1 %2307, %v527_v29  }
  0xac   : > { %732 = vperm.xlu0 %2306, %v526_v30  }
  0xb3   : > { %789 = vperm.xlu2 %2308, %v531_v31   ;;  %752 = vperm.xlu1 %2307, %v530_v32   ;;  %v566_v32 = vld [vmem:[%s2662_s11 + $0x18] sm:$0xff] }
  0xb4   : > { %747 = vperm.xlu0 %2306, %v529_v33  }
  0xbb   : > { %804 = vperm.xlu2 %2308, %v534_v34   ;;  %799 = vperm.xlu1 %2307, %v533_v35  }
  0xbc   : > { %794 = vperm.xlu0 %2306, %v532_v36   ;;  %v3376_v36 = vmov 0.0  }
  0xbd   : > { %v2584_v37 = vpop.permute.xlu2 %617 }
  0xc3   : > { %819 = vperm.xlu2 %2308, %v537_v38   ;;  %814 = vperm.xlu1 %2307, %v536_v39  }
  0xc4   : > { %809 = vperm.xlu0 %2306, %v535_v40  }
  0xc5   : > { %v2589_v41 = vpop.permute.xlu2 %622 }
  0xcb   : > { %834 = vperm.xlu2 %2308, %v540_v42   ;;  %829 = vperm.xlu1 %2307, %v539_v43   ;;  %v567_v42 = vld [vmem:[%s2662_s11 + $0x20] sm:$0xff] }
  0xcc   : > { %824 = vperm.xlu0 %2306, %v538_v44   ;;  %v2054_v44 = vld [vmem:[%s2662_s11 + $0x120] sm:$0xff] }
  0xcd   : > { %v2594_v45 = vpop.permute.xlu2 %637 }
  0xd3   : > { %849 = vperm.xlu2 %2308, %v543_v46   ;;  %844 = vperm.xlu1 %2307, %v542_v47   ;;  %v568_v46 = vld [vmem:[%s2662_s11 + $0x28] sm:$0xff]  ;;  %v569_v47 = vld [vmem:[%s2662_s11 + $0x30] sm:$0xff] }
  0xd4   : > { %839 = vperm.xlu0 %2306, %v541_v48  }
  0xd5   : > { %v2599_v49 = vpop.permute.xlu2 %652  ;;  %v2601_v50 = vpop.permute.xlu1 %607 }
  0xd6   : > { %v2603_v51 = vpop.permute.xlu0 %597 }
  0xd7   : > { %v755_v26 = vmul.f32 %v2603_v51, %v563_v24  ;;  %v2053_v24 = vld [vmem:[%s2662_s11 + $0x118] sm:$0xff] }
  0xdb   : > { %864 = vperm.xlu2 %2308, %v546_v52   ;;  %859 = vperm.xlu1 %2307, %v545_v53   ;;  %v2055_v52 = vld [vmem:[%s2662_s11 + $0x128] sm:$0xff]  ;;  %v571_v53 = vld [vmem:[%s2662_s11 + $0x40] sm:$0xff] }
  0xdc   : > { %854 = vperm.xlu0 %2306, %v544_v54   ;;  %v2050_v54 = vld [vmem:[%s2662_s11 + $0x100] sm:$0xff] }
  0xdd   : > { %v2608_v55 = vpop.permute.xlu2 %667  ;;  %v2610_v56 = vpop.permute.xlu1 %612 }
  0xde   : > { %v2612_v57 = vpop.permute.xlu0 %602  ;;  %v758_v33 = vmul.f32 %v2610_v56, %v566_v32 }
  0xe3   : > { %879 = vperm.xlu2 %2308, %v549_v58   ;;  %874 = vperm.xlu1 %2307, %v548_v59   ;;  %v2692_v58 = vmul.f32 %v2584_v37, %v567_v42  ;;  %v2058_v59 = vld [vmem:[%s2662_s11 + $0x140] sm:$0xff] }
  0xe4   : > { %869 = vperm.xlu0 %2306, %v547_v60   ;;  %v574_v60 = vld [vmem:[%s2662_s11 + $0x58] sm:$0xff]  ;;  %v2727_v32 = vmul.f32 %v2058_v59, %v2594_v45 }
  0xe5   : > { %v2617_v61 = vpop.permute.xlu2 %682  ;;  %v2619_v62 = vpop.permute.xlu1 %632  ;;  %v2057_v59 = vld [vmem:[%s2662_s11 + $0x138] sm:$0xff] }
  0xe6   : > { %v2621_v63 = vpop.permute.xlu0 %627 }
  0xeb   : > { %894 = vperm.xlu2 %2308, %v552_v0   ;;  %889 = vperm.xlu1 %2307, %v551_v1   ;;  %v2061_v0 = vld [vmem:[%s2662_s11 + $0x158] sm:$0xff] }
  0xec   : > { %884 = vperm.xlu0 %2306, %v550_v2   ;;  %v2701_v2 = vmul.f32 %v2054_v44, %v2584_v37  ;;  %v1300_v37 = vmul.f32 %v2050_v54, %v2603_v51  ;;  %v2733_v51 = vmul.f32 %v2061_v0, %v2599_v49  ;;  %v1303_v54 = vmul.f32 %v2053_v24, %v2610_v56  ;;  %v2070_v56 = vld [vmem:[%s2662_s11 + $0x1a0] sm:$0xff]  ;;  %v586_v24 = vld [vmem:[%s2662_s11 + $0xb8] sm:$0xff] }
  0xed   : > { %v2626_v3 = vpop.permute.xlu2 %697  ;;  %v2628_v4 = vpop.permute.xlu1 %647 }
  0xee   : > { %v2630_v5 = vpop.permute.xlu0 %642 }
  0xf3   : > { %909 = vperm.xlu2 %2308, %v555_v6   ;;  %904 = vperm.xlu1 %2307, %v554_v7   ;;  %v2704_v6 = vmul.f32 %v2589_v41, %v568_v46  ;;  %v565_v7 = vld [vmem:[%s2662_s11 + $0x10] sm:$0xff] }
  0xf4   : > { %899 = vperm.xlu0 %2306, %v553_v8   ;;  %v2052_v8 = vld [vmem:[%s2662_s11 + $0x110] sm:$0xff]  ;;  %v2742_v46 = vmul.f32 %v2601_v50, %v565_v7 }
  0xf5   : > { %v2635_v9 = vpop.permute.xlu2 %712  ;;  %v2637_v10 = vpop.permute.xlu1 %662 }
  0xf6   : > { %v2639_v11 = vpop.permute.xlu0 %657 }
  0xfb   : > { %924 = vperm.xlu2 %2308, %v558_v12   ;;  %919 = vperm.xlu1 %2307, %v557_v13   ;;  %v577_v12 = vld [vmem:[%s2662_s11 + $0x70] sm:$0xff]  ;;  %v761_v13 = vmul.f32 %v2621_v63, %v569_v47 }
  0xfc   : > { %914 = vperm.xlu0 %2306, %v556_v14   ;;  %v2748_v47 = vmul.f32 %v2608_v55, %v577_v12  ;;  %v573_v12 = vld [vmem:[%s2662_s11 + $0x50] sm:$0xff] }
  0xfd   : > { %v2644_v15 = vpop.permute.xlu2 %727  ;;  %v2646_v16 = vpop.permute.xlu1 %677 }
  0xfe   : > { %v2648_v17 = vpop.permute.xlu0 %672 }
 0x103   : > { %939 = vperm.xlu2 %2308, %v561_v18   ;;  %934 = vperm.xlu1 %2307, %v560_v19   ;;  %v2712_v18 = vmul.f32 %v2055_v52, %v2589_v41  ;;  %v2715_v19 = vmul.f32 %v2594_v45, %v571_v53  ;;  %v2730_v41 = vmul.f32 %v2599_v49, %v574_v60  ;;  %v2067_v49 = vld [vmem:[%s2662_s11 + $0x188] sm:$0xff]  ;;  %v2056_v60 = vld [vmem:[%s2662_s11 + $0x130] sm:$0xff] }
 0x104   : > { %929 = vperm.xlu0 %2306, %v559_v20   ;;  %v2064_v20 = vld [vmem:[%s2662_s11 + $0x170] sm:$0xff]  ;;  %v2745_v45 = vmul.f32 %v2052_v8, %v2601_v50  ;;  %v583_v50 = vld [vmem:[%s2662_s11 + $0xa0] sm:$0xff] }
 0x105   : > { %v2656_v21 = vpop.permute.xlu2 %742  ;;  %v2658_v22 = vpop.permute.xlu1 %692  ;;  %v2753_v53 = vmul.f32 %v2064_v20, %v2608_v55  ;;  %v2059_v20 = vld [vmem:[%s2662_s11 + $0x148] sm:$0xff] }
 0x106   : > { %v2660_v23 = vpop.permute.xlu0 %687 }
 0x107   : > { %3379 = vst [vmem:[#allocation4_spill] sm:$0xff] %v2753_v53  ;;  %v2079_v53 = vld [vmem:[%s2662_s11 + $0x1e8] sm:$0xff] }
 0x10c   : > { %944 = vperm.xlu0 %2306, %v562_v25  }
 0x10d   : > { %v790_v27 = vpop.permute.xlu2 %789  ;;  %v2667_v28 = vpop.permute.xlu1 %707 }
 0x10e   : > { %v947_v29 = vadd.f32 %v790_v27, %v755_v26  ;;  %v2669_v30 = vpop.permute.xlu0 %702  ;;  %v1332_v52 = vadd.f32 %v1300_v37, %v790_v27 }
 0x110   : > { %v979_v31 = vmul.f32 0.5, %v947_v29 }
 0x112   : > { %vm1043_vm0 = vcmp.ge.f32.partialorder %v979_v31, 1.0 }
 0x113   : > { %v2678_v38 = vsel %vm1043_vm0, 1.0, %v3376_v36 }
 0x114   : > { %v1203_v48 = vsub.f32 1.0, %v2678_v38 }
 0x115   : > { %v2673_v34 = vpop.permute.xlu2 %804  ;;  %v2675_v35 = vpop.permute.xlu1 %722 }
 0x116   : > { %v950_v39 = vadd.f32 %v2673_v34, %v758_v33  ;;  %v2681_v40 = vpop.permute.xlu0 %717  ;;  %v2720_v25 = vmul.f32 %v1203_v48, %v979_v31  ;;  %v564_v33 = vld [vmem:[%s2662_s11 + $0x8] sm:$0xff]  ;;  %v570_v48 = vld [vmem:[%s2662_s11 + $0x38] sm:$0xff] }
 0x117   : > { %v580_v31 = vld [vmem:[%s2662_s11 + $0x88] sm:$0xff]  ;;  %v2764_v8 = vmul.f32 %v2612_v57, %v564_v33  ;;  %v2780_v37 = vmul.f32 %v2619_v62, %v570_v48  ;;  %v1335_v33 = vadd.f32 %v1303_v54, %v2673_v34  ;;  %v2803_v34 = vmul.f32 %v2070_v56, %v2626_v3  ;;  %v575_v54 = vld [vmem:[%s2662_s11 + $0x60] sm:$0xff]  ;;  %v2076_v56 = vld [vmem:[%s2662_s11 + $0x1d0] sm:$0xff] }
 0x118   : > { %v982_v43 = vmul.f32 0.5, %v950_v39  ;;  %v2051_v39 = vld [vmem:[%s2662_s11 + $0x108] sm:$0xff]  ;;  %v2770_v55 = vmul.f32 %v2617_v61, %v580_v31  ;;  %v2791_v31 = vmul.f32 %v2056_v60, %v2621_v63  ;;  %v589_v60 = vld [vmem:[%s2662_s11 + $0xd0] sm:$0xff] }
 0x119   : > { %v2767_v27 = vmul.f32 %v2051_v39, %v2612_v57  ;;  %v2060_v57 = vld [vmem:[%s2662_s11 + $0x150] sm:$0xff]  ;;  %v2788_v39 = vmul.f32 %v2057_v59, %v2619_v62  ;;  %v2063_v48 = vld [vmem:[%s2662_s11 + $0x168] sm:$0xff]  ;;  %3383 = vst [vmem:[#allocation8_spill] sm:$0xff] %v2803_v34  ;;  %v2806_v62 = vmul.f32 %v2628_v4, %v573_v12  ;;  %v2062_v59 = vld [vmem:[%s2662_s11 + $0x160] sm:$0xff] }
 0x11a   : > { %vm1046_vm1 = vcmp.ge.f32.partialorder %v982_v43, 1.0  ;;  %3380 = vst [vmem:[#allocation5_spill] sm:$0xff] %v2770_v55  ;;  %v579_v12 = vld [vmem:[%s2662_s11 + $0x80] sm:$0xff]  ;;  %v2842_v55 = vmul.f32 %v2063_v48, %v2637_v10  ;;  %v582_v48 = vld [vmem:[%s2662_s11 + $0x98] sm:$0xff] }
 0x11b   : > { %v2698_v1 = vsel %vm1046_vm1, 1.0, %v3376_v36 }
 0x11c   : > { %v1206_v14 = vsub.f32 1.0, %v2698_v1  ;;  %3387 = vst [vmem:[#allocation12_spill] sm:$0xff] %v2842_v55  ;;  %v2069_v55 = vld [vmem:[%s2662_s11 + $0x198] sm:$0xff] }
 0x11d   : > { %v2722_v26 = vpop.permute.xlu2 %819  ;;  %v2724_v29 = vpop.permute.xlu1 %737 }
 0x11e   : > { %v953_v42 = vadd.f32 %v2722_v26, %v761_v13  ;;  %v2739_v44 = vpop.permute.xlu0 %732  ;;  %v2759_v0 = vmul.f32 %v1206_v14, %v982_v43  ;;  %v572_v13 = vld [vmem:[%s2662_s11 + $0x48] sm:$0xff]  ;;  %v1364_v43 = vsub.f32 %v1332_v52, %v2720_v25  ;;  %v2777_v14 = vmul.f32 %v2067_v49, %v2617_v61 }
 0x11f   : > { %v2794_v61 = vmul.f32 %v2626_v3, %v583_v50  ;;  %v576_v49 = vld [vmem:[%s2662_s11 + $0x68] sm:$0xff]  ;;  %v764_v63 = vmul.f32 %v2630_v5, %v572_v13  ;;  %v2820_v3 = vmul.f32 %v2635_v9, %v586_v24 }
 0x120   : > { %v2761_v7 = vmul.f32 0.5, %v953_v42  ;;  %3381 = vst [vmem:[#allocation6_spill] sm:$0xff] %v2777_v14  ;;  %v2073_v42 = vld [vmem:[%s2662_s11 + $0x1b8] sm:$0xff]  ;;  %v1367_v50 = vsub.f32 %v1335_v33, %v2759_v0  ;;  %v1396_v13 = vmul.f32 0.5, %v1364_v43 }
 0x121   : > { %3382 = vst [vmem:[#allocation7_spill] sm:$0xff] %v2794_v61  ;;  %v2814_v61 = vmul.f32 %v2060_v57, %v2628_v4  ;;  %v2829_v33 = vmul.f32 %v2073_v42, %v2635_v9  ;;  %v2832_v4 = vmul.f32 %v2637_v10, %v576_v49  ;;  %v578_v57 = vld [vmem:[%s2662_s11 + $0x78] sm:$0xff]  ;;  %v767_v9 = vmul.f32 %v2639_v11, %v575_v54  ;;  %v581_v54 = vld [vmem:[%s2662_s11 + $0x90] sm:$0xff] }
 0x122   : > { %vm1049_vm2 = vcmp.ge.f32.partialorder %v2761_v7, 1.0  ;;  %3384 = vst [vmem:[#allocation9_spill] sm:$0xff] %v2820_v3  ;;  %v2846_v42 = vmul.f32 %v2062_v59, %v2639_v11  ;;  %v2849_v49 = vmul.f32 %v2644_v15, %v589_v60  ;;  %v2857_v10 = vmul.f32 %v2646_v16, %v579_v12 }
 0x123   : > { %v2800_v52 = vsel %vm1049_vm2, 1.0, %v3376_v36  ;;  %v2817_v36 = vmul.f32 %v2059_v20, %v2630_v5  ;;  %3385 = vst [vmem:[#allocation10_spill] sm:$0xff] %v2829_v33  ;;  %v2066_v5 = vld [vmem:[%s2662_s11 + $0x180] sm:$0xff]  ;;  %v2065_v20 = vld [vmem:[%s2662_s11 + $0x178] sm:$0xff]  ;;  %v592_v33 = vld [vmem:[%s2662_s11 + $0xe8] sm:$0xff]  ;;  %v2866_v60 = vmul.f32 %v2648_v17, %v578_v57  ;;  %v1428_v12 = vadd.f32 %v1396_v13, %v2720_v25 }
 0x124   : > { %3386 = vst [vmem:[#allocation11_spill] sm:$0xff] %v2832_v4  ;;  %v1209_v24 = vsub.f32 1.0, %v2800_v52  ;;  %v1399_v4 = vmul.f32 0.5, %v1367_v50  ;;  %v2863_v59 = vmul.f32 %v2066_v5, %v2646_v16  ;;  %v2877_v50 = vmul.f32 %v2079_v53, %v2656_v21  ;;  %v585_v16 = vld [vmem:[%s2662_s11 + $0xb0] sm:$0xff]  ;;  %v2075_v53 = vld [vmem:[%s2662_s11 + $0x1c8] sm:$0xff] }
 0x125   : > { %v2824_v34 = vpop.permute.xlu2 %834  ;;  %v2826_v14 = vpop.permute.xlu1 %752  ;;  %3388 = vst [vmem:[#allocation13_spill] sm:$0xff] %v2849_v49  ;;  %v2072_v5 = vld [vmem:[%s2662_s11 + $0x1b0] sm:$0xff]  ;;  %v2889_v25 = vmul.f32 %v2069_v55, %v2658_v22  ;;  %v2892_v13 = vmul.f32 %v2660_v23, %v581_v54  ;;  %vm1460_vm4 = vcmp.ge.f32.partialorder %v1428_v12, 1.0  ;;  %v2910_v54 = vmul.f32 %v2667_v28, %v585_v16 }
 0x126   : > { %v956_v43 = vadd.f32 %v2824_v34, %v764_v63  ;;  %v2839_v3 = vpop.permute.xlu0 %747  ;;  %v2854_v63 = vmul.f32 %v2076_v56, %v2644_v15  ;;  %v2869_v15 = vmul.f32 %v2065_v20, %v2648_v17  ;;  %v2068_v56 = vld [vmem:[%s2662_s11 + $0x190] sm:$0xff]  ;;  %3391 = vst [vmem:[#allocation16_spill] sm:$0xff] %v2877_v50  ;;  %v2883_v57 = vmul.f32 %v1209_v24, %v2761_v7  ;;  %v587_v24 = vld [vmem:[%s2662_s11 + $0xc0] sm:$0xff] }
 0x127   : > { %v2886_v17 = vmul.f32 %v2658_v22, %v582_v48  ;;  %3392 = vst [vmem:[#allocation17_spill] sm:$0xff] %v2889_v25  ;;  %v3393_v20 = vmov 0.0   ;;  %v1431_v7 = vadd.f32 %v1399_v4, %v2759_v0  ;;  %v2074_v48 = vld [vmem:[%s2662_s11 + $0x1c0] sm:$0xff]  ;;  %v1338_v22 = vadd.f32 %v2791_v31, %v2722_v26 }
 0x128   : > { %3389 = vst [vmem:[#allocation14_spill] sm:$0xff] %v2854_v63  ;;  %v988_v11 = vmul.f32 0.5, %v956_v43  ;;  %v2874_v63 = vmul.f32 %v2656_v21, %v592_v33  ;;  %v584_v43 = vld [vmem:[%s2662_s11 + $0xa8] sm:$0xff]  ;;  %v2927_v31 = vmul.f32 %v2075_v53, %v2675_v35  ;;  %v2936_v25 = vmul.f32 %v2074_v48, %v2681_v40 }
 0x129   : > { %v2071_v33 = vld [vmem:[%s2662_s11 + $0x1a8] sm:$0xff]  ;;  %v1370_v16 = vsub.f32 %v1338_v22, %v2883_v57  ;;  %vm1463_vm5 = vcmp.ge.f32.partialorder %v1431_v7, 1.0  ;;  %v594_v22 = vld [vmem:[%s2662_s11 + $0xf8] sm:$0xff] }
 0x12a   : > { %3390 = vst [vmem:[#allocation15_spill] sm:$0xff] %v2874_v63  ;;  %vm1052_vm3 = vcmp.ge.f32.partialorder %v988_v11, 1.0  ;;  %v588_v21 = vld [vmem:[%s2662_s11 + $0xc8] sm:$0xff]  ;;  %v2901_v63 = vmul.f32 %v2068_v56, %v2660_v23  ;;  %v2913_v23 = vmul.f32 %v2072_v5, %v2667_v28  ;;  %v2916_v56 = vmul.f32 %v2669_v30, %v584_v43  ;;  %v591_v28 = vld [vmem:[%s2662_s11 + $0xe0] sm:$0xff] }
 0x12b   : > { %v2898_v50 = vsel %vm1052_vm3, 1.0, %v3393_v20  ;;  %v2921_v49 = vmul.f32 %v2071_v33, %v2669_v30  ;;  %v2924_v26 = vmul.f32 %v2675_v35, %v588_v21  ;;  %3396 = vst [vmem:[#allocation20_spill] sm:$0xff] %v2927_v31  ;;  %v2078_v5 = vld [vmem:[%s2662_s11 + $0x1e0] sm:$0xff]  ;;  %v590_v30 = vld [vmem:[%s2662_s11 + $0xd8] sm:$0xff]  ;;  %v2944_v35 = vsel %vm1460_vm4, 1.0, %v3393_v20 }
 0x12c   : > { %v1212_v55 = vsub.f32 1.0, %v2898_v50  ;;  %3394 = vst [vmem:[#allocation18_spill] sm:$0xff] %v2913_v23  ;;  %v2933_v23 = vmul.f32 %v2681_v40, %v587_v24  ;;  %v2077_v33 = vld [vmem:[%s2662_s11 + $0x1d8] sm:$0xff]  ;;  %v2949_v31 = vmul.f32 %v2724_v29, %v591_v28  ;;  %v2952_v40 = vmul.f32 %v2078_v5, %v2724_v29 }
 0x12d   : > { %v2918_v0 = vpop.permute.xlu2 %849  ;;  %v800_v4 = vpop.permute.xlu1 %799  ;;  %3395 = vst [vmem:[#allocation19_spill] sm:$0xff] %v2924_v26  ;;  %v1402_v48 = vmul.f32 0.5, %v1370_v16  ;;  %v2957_v12 = vmul.f32 %v2739_v44, %v590_v30  ;;  %v2960_v7 = vmul.f32 %v2077_v33, %v2739_v44  ;;  %v2968_v29 = vmul.f32 %v2826_v14, %v594_v22 }
 0x12e   : > { %v795_v43 = vpop.permute.xlu0 %794  ;;  %v949_v21 = vadd.f32 %v800_v4, %v2742_v46  ;;  %v1244_v53 = vmul.f32 %v1212_v55, %v988_v11  ;;  %v959_v24 = vadd.f32 %v2918_v0, %v767_v9  ;;  %3397 = vst [vmem:[#allocation21_spill] sm:$0xff] %v2949_v31  ;;  %v1341_v9 = vadd.f32 %v2817_v36, %v2824_v34  ;;  %v2081_v55 = vld [vmem:[%s2662_s11 + $0x1f8] sm:$0xff] }
 0x12f   : > { %v948_v26 = vadd.f32 %v795_v43, %v2764_v8  ;;  %3398 = vst [vmem:[#allocation22_spill] sm:$0xff] %v2952_v40  ;;  %v2965_v11 = vsel %vm1463_vm5, 1.0, %v3393_v20  ;;  %v2980_v22 = vadd.f32 %v1402_v48, %v2883_v57  ;;  %v1334_v40 = vadd.f32 %v2745_v45, %v800_v4 }
 0x130   : > { %v981_v46 = vmul.f32 0.5, %v949_v21  ;;  %3399 = vst [vmem:[#allocation23_spill] sm:$0xff] %v2968_v29  ;;  %v2971_v16 = vmul.f32 0.5, %v959_v24  ;;  %v593_v24 = vld [vmem:[%s2662_s11 + $0xf0] sm:$0xff]  ;;  %v1333_v57 = vadd.f32 %v2767_v27, %v795_v43 }
 0x131   : > { %v980_v8 = vmul.f32 0.5, %v948_v26  ;;  %v1373_v26 = vsub.f32 %v1341_v9, %v1244_v53  ;;  %v2983_v9 = vmul.f32 %v2081_v55, %v2826_v14  ;;  %v2999_v4 = vmul.f32 %v2839_v3, %v593_v24 }
 0x132   : > { %vm1045_vm6 = vcmp.ge.f32.partialorder %v981_v46, 1.0  ;;  %vm1055_vm8 = vcmp.ge.f32.partialorder %v2971_v16, 1.0  ;;  %vm1466_vm9 = vcmp.ge.f32.partialorder %v2980_v22, 1.0 }
 0x133   : > { %vm1044_vm7 = vcmp.ge.f32.partialorder %v980_v8, 1.0  ;;  %v2020_v44 = vsel %vm1045_vm6, 1.0, %v3393_v20  ;;  %3400 = vst [vmem:[#allocation24_spill] sm:$0xff] %v2983_v9  ;;  %v1405_v48 = vmul.f32 0.5, %v1373_v26  ;;  %v3006_v27 = vsel %vm1055_vm8, 1.0, %v3393_v20 }
 0x134   : > { %v2019_v28 = vsel %vm1044_vm7, 1.0, %v3393_v20  ;;  %v2157_v36 = vpack.c.bf16 %v2698_v1, %v2020_v44  ;;  %v1205_v34 = vsub.f32 1.0, %v2020_v44  ;;  %v2080_v44 = vld [vmem:[%s2662_s11 + $0x1f0] sm:$0xff]  ;;  %v1215_v24 = vsub.f32 1.0, %v3006_v27 }
 0x135   : > { %v2154_v5 = vpack.c.bf16 %v2019_v28, %v2678_v38  ;;  %v1204_v30 = vsub.f32 1.0, %v2019_v28  ;;  %v2977_v33 = vpop.permute.xlu2 %864  ;;  %v815_v21 = vpop.permute.xlu1 %814 }
 0x136   : > { %v962_v29 = vadd.f32 %v2977_v33, %v2866_v60  ;;  %v810_v1 = vpop.permute.xlu0 %809  ;;  %2249 = vst [vmem:[%s2990_s12 + $0x8] sm:$0xff] %v2157_v36   ;;  %v1237_v38 = vmul.f32 %v1205_v34, %v981_v46  ;;  %v952_v14 = vadd.f32 %v815_v21, %v2704_v6  ;;  %v3003_v46 = vmul.f32 %v2080_v44, %v2839_v3 }
 0x137   : > { %v1236_v28 = vmul.f32 %v1204_v30, %v980_v8  ;;  %2155 = vst [vmem:[%s2990_s12] sm:$0xff] %v2154_v5   ;;  %v951_v60 = vadd.f32 %v810_v1, %v2692_v58  ;;  %v1437_v58 = vadd.f32 %v1405_v48, %v1244_v53 }
 0x138   : > { %v994_v45 = vmul.f32 0.5, %v962_v29  ;;  %v1366_v55 = vsub.f32 %v1334_v40, %v1237_v38  ;;  %v984_v31 = vmul.f32 0.5, %v952_v14 }
 0x139   : > { %v1365_v9 = vsub.f32 %v1333_v57, %v1236_v28  ;;  %v983_v6 = vmul.f32 0.5, %v951_v60  ;;  %vm1469_vm15 = vcmp.ge.f32.partialorder %v1437_v58, 1.0 }
 0x13a   : > { %vm1058_vm10 = vcmp.ge.f32.partialorder %v994_v45, 1.0  ;;  %v1398_v43 = vmul.f32 0.5, %v1366_v55  ;;  %vm1048_vm11 = vcmp.ge.f32.partialorder %v984_v31, 1.0  ;;  %v1336_v55 = vadd.f32 %v2701_v2, %v810_v1 }
 0x13b   : > { %v1397_v8 = vmul.f32 0.5, %v1365_v9  ;;  %v3009_v29 = vsel %vm1058_vm10, 1.0, %v3393_v20  ;;  %v2023_v40 = vsel %vm1048_vm11, 1.0, %v3393_v20  ;;  %vm1047_vm12 = vcmp.ge.f32.partialorder %v983_v6, 1.0 }
 0x13c   : > { %v1430_v26 = vadd.f32 %v1398_v43, %v1237_v38  ;;  %v1208_v3 = vsub.f32 1.0, %v2023_v40  ;;  %v2022_v34 = vsel %vm1047_vm12, 1.0, %v3393_v20  ;;  %v1337_v9 = vadd.f32 %v2712_v18, %v815_v21 }
 0x13d   : > { %v1429_v36 = vadd.f32 %v1397_v8, %v1236_v28  ;;  %v3013_v5 = vpop.permute.xlu2 %879  ;;  %v830_v30 = vpop.permute.xlu1 %829  ;;  %v2160_v53 = vpack.c.bf16 %v2023_v40, %v2022_v34  ;;  %v1207_v44 = vsub.f32 1.0, %v2022_v34  ;;  %v1218_v38 = vsub.f32 1.0, %v3009_v29 }
 0x13e   : > { %v3017_v57 = vpop.permute.xlu0 %824  ;;  %vm1462_vm13 = vcmp.ge.f32.partialorder %v1430_v26, 1.0  ;;  %v1240_v28 = vmul.f32 %v1208_v3, %v984_v31  ;;  %v965_v8 = vadd.f32 %v3013_v5, %v2892_v13  ;;  %v3029_v31 = vmul.f32 %v1215_v24, %v2971_v16 }
 0x13f   : > { %vm1461_vm14 = vcmp.ge.f32.partialorder %v1429_v36, 1.0  ;;  %v2084_v14 = vsel %vm1462_vm13, 1.0, %v3393_v20  ;;  %2250 = vst [vmem:[%s2990_s12 + $0x10] sm:$0xff] %v2160_v53   ;;  %v1239_v60 = vmul.f32 %v1207_v44, %v983_v6  ;;  %v955_v26 = vadd.f32 %v830_v30, %v2715_v19 }
 0x140   : > { %v2083_v48 = vsel %vm1461_vm14, 1.0, %v3393_v20  ;;  %v2205_v18 = vpack.c.bf16 %v2965_v11, %v2084_v14  ;;  %v1369_v43 = vsub.f32 %v1337_v9, %v1240_v28  ;;  %v1250_v6 = vmul.f32 %v1218_v38, %v994_v45 }
 0x141   : > { %v2202_v21 = vpack.c.bf16 %v2083_v48, %v2944_v35  ;;  %v1368_v40 = vsub.f32 %v1336_v55, %v1239_v60  ;;  %v997_v2 = vmul.f32 0.5, %v965_v8  ;;  %v954_v11 = vadd.f32 %v3017_v57, %v2780_v37 }
 0x142   : > { %2265 = vst [vmem:[%s2990_s12 + $0x88] sm:$0xff] %v2205_v18   ;;  %v1401_v36 = vmul.f32 0.5, %v1369_v43  ;;  %v3038_v35 = vsel %vm1466_vm9, 1.0, %v3393_v20  ;;  %v1344_v13 = vadd.f32 %v2846_v42, %v2918_v0  ;;  %v987_v1 = vmul.f32 0.5, %v955_v26 }
 0x143   : > { %2264 = vst [vmem:[%s2990_s12 + $0x80] sm:$0xff] %v2202_v21   ;;  %v1400_v16 = vmul.f32 0.5, %v1368_v40  ;;  %v1347_v19 = vadd.f32 %v2869_v15, %v2977_v33  ;;  %vm1061_vm0 = vcmp.ge.f32.partialorder %v997_v2, 1.0  ;;  %v986_v3 = vmul.f32 0.5, %v954_v11 }
 0x144   : > { %v1433_v45 = vadd.f32 %v1401_v36, %v1240_v28  ;;  %v3047_v37 = vsel %vm1469_vm15, 1.0, %v3393_v20  ;;  %v3050_v9 = vsel %vm1061_vm0, 1.0, %v3393_v20  ;;  %vm1051_vm1 = vcmp.ge.f32.partialorder %v987_v1, 1.0 }
 0x145   : > { %v895_v34 = vpop.permute.xlu2 %894  ;;  %v845_v24 = vpop.permute.xlu1 %844  ;;  %v1432_v22 = vadd.f32 %v1400_v16, %v1239_v60  ;;  %v1376_v0 = vsub.f32 %v1344_v13, %v3029_v31  ;;  %v1379_v15 = vsub.f32 %v1347_v19, %v1250_v6  ;;  %v2026_v33 = vsel %vm1051_vm1, 1.0, %v3393_v20 }
 0x146   : > { %v3052_v42 = vpop.permute.xlu0 %839  ;;  %vm1465_vm2 = vcmp.ge.f32.partialorder %v1433_v45, 1.0  ;;  %v2166_v58 = vpack.c.bf16 %v2898_v50, %v2026_v33  ;;  %v1211_v44 = vsub.f32 1.0, %v2026_v33  ;;  %v1221_v28 = vsub.f32 1.0, %v3050_v9 }
 0x147   : > { %v2087_v53 = vsel %vm1465_vm2, 1.0, %v3393_v20  ;;  %vm1464_vm3 = vcmp.ge.f32.partialorder %v1432_v22, 1.0  ;;  %vm1050_vm4 = vcmp.ge.f32.partialorder %v986_v3, 1.0  ;;  %v968_v14 = vadd.f32 %v895_v34, %v2916_v56 }
 0x148   : > { %v2086_v38 = vsel %vm1464_vm3, 1.0, %v3393_v20  ;;  %2252 = vst [vmem:[%s2990_s12 + $0x20] sm:$0xff] %v2166_v58   ;;  %v1243_v60 = vmul.f32 %v1211_v44, %v987_v1  ;;  %v1340_v55 = vadd.f32 %v2727_v32, %v830_v30  ;;  %v2025_v18 = vsel %vm1050_vm4, 1.0, %v3393_v20 }
 0x149   : > { %v2208_v48 = vpack.c.bf16 %v2087_v53, %v2086_v38  ;;  %v1411_v21 = vmul.f32 0.5, %v1379_v15  ;;  %v2163_v50 = vpack.c.bf16 %v2025_v18, %v2800_v52  ;;  %v1210_v43 = vsub.f32 1.0, %v2025_v18 }
 0x14a   : > { %v1000_v8 = vmul.f32 0.5, %v968_v14  ;;  %v1408_v40 = vmul.f32 0.5, %v1376_v0  ;;  %v1372_v26 = vsub.f32 %v1340_v55, %v1243_v60  ;;  %v958_v36 = vadd.f32 %v845_v24, %v2730_v41 }
 0x14b   : > { %2266 = vst [vmem:[%s2990_s12 + $0x90] sm:$0xff] %v2208_v48   ;;  %v957_v56 = vadd.f32 %v3052_v42, %v2806_v62  ;;  %v1253_v11 = vmul.f32 %v1221_v28, %v997_v2  ;;  %v1242_v13 = vmul.f32 %v1210_v43, %v986_v3  ;;  %v1339_v32 = vadd.f32 %v2788_v39, %v3017_v57 }
 0x14c   : > { %2251 = vst [vmem:[%s2990_s12 + $0x18] sm:$0xff] %v2163_v50   ;;  %vm1064_vm5 = vcmp.ge.f32.partialorder %v1000_v8, 1.0  ;;  %v1404_v52 = vmul.f32 0.5, %v1372_v26  ;;  %v990_v19 = vmul.f32 0.5, %v958_v36  ;;  %v3079_v22 = vadd.f32 %v1411_v21, %v1250_v6 }
 0x14d   : > { %v910_v30 = vpop.permute.xlu2 %909  ;;  %v3072_v16 = vpop.permute.xlu1 %859  ;;  %v3075_v1 = vsel %vm1064_vm5, 1.0, %v3393_v20  ;;  %v989_v45 = vmul.f32 0.5, %v957_v56  ;;  %v1350_v62 = vadd.f32 %v2901_v63, %v3013_v5  ;;  %v1371_v2 = vsub.f32 %v1339_v32, %v1242_v13  ;;  %v3401_v56 = vld [vmem:[#allocation11_spill] sm:$0xff] }
 0x14e   : > { %v3077_v41 = vpop.permute.xlu0 %854  ;;  %v1224_v39 = vsub.f32 1.0, %v3075_v1  ;;  %v1436_v57 = vadd.f32 %v1404_v52, %v1243_v60  ;;  %vm1054_vm6 = vcmp.ge.f32.partialorder %v990_v19, 1.0  ;;  %v971_v3 = vadd.f32 %v910_v30, %v2933_v23 }
 0x14f   : > { %vm1053_vm7 = vcmp.ge.f32.partialorder %v989_v45, 1.0  ;;  %v1382_v0 = vsub.f32 %v1350_v62, %v1253_v11  ;;  %v1403_v15 = vmul.f32 0.5, %v1371_v2  ;;  %v1353_v33 = vadd.f32 %v2921_v49, %v895_v34 }
 0x150   : > { %v2029_v53 = vsel %vm1054_vm6, 1.0, %v3393_v20  ;;  %vm1468_vm8 = vcmp.ge.f32.partialorder %v1436_v57, 1.0  ;;  %v1343_v58 = vadd.f32 %v2733_v51, %v845_v24  ;;  %v2028_v63 = vsel %vm1053_vm7, 1.0, %v3393_v20 }
 0x151   : > { %v1214_v6 = vsub.f32 1.0, %v2029_v53  ;;  %v2090_v5 = vsel %vm1468_vm8, 1.0, %v3393_v20  ;;  %v1435_v44 = vadd.f32 %v1403_v15, %v1242_v13  ;;  %v1256_v38 = vmul.f32 %v1224_v39, %v1000_v8 }
 0x152   : > { %v2169_v28 = vpack.c.bf16 %v2029_v53, %v2028_v63  ;;  %v2214_v23 = vpack.c.bf16 %v3047_v37, %v2090_v5  ;;  %v1213_v48 = vsub.f32 1.0, %v2028_v63  ;;  %v1003_v49 = vmul.f32 0.5, %v971_v3  ;;  %v3402_v3 = vld [vmem:[#allocation4_spill] sm:$0xff] }
 0x153   : > { %v1246_v14 = vmul.f32 %v1214_v6, %v990_v19  ;;  %v1414_v34 = vmul.f32 0.5, %v1382_v0  ;;  %vm1467_vm9 = vcmp.ge.f32.partialorder %v1435_v44, 1.0  ;;  %v1342_v60 = vadd.f32 %v2814_v61, %v3052_v42 }
 0x154   : > { %2253 = vst [vmem:[%s2990_s12 + $0x28] sm:$0xff] %v2169_v28   ;;  %v961_v51 = vadd.f32 %v3072_v16, %v2748_v47  ;;  %v2089_v55 = vsel %vm1467_vm9, 1.0, %v3393_v20  ;;  %v1245_v37 = vmul.f32 %v1213_v48, %v989_v45  ;;  %vm1067_vm10 = vcmp.ge.f32.partialorder %v1003_v49, 1.0 }
 0x155   : > { %v3096_v24 = vpop.permute.xlu1 %874  ;;  %2268 = vst [vmem:[%s2990_s12 + $0xa0] sm:$0xff] %v2214_v23   ;;  %v1375_v18 = vsub.f32 %v1343_v58, %v1246_v14  ;;  %v3100_v21 = vpop.permute.xlu2 %924  ;;  %v2211_v43 = vpack.c.bf16 %v2089_v55, %v3038_v35  ;;  %v1385_v8 = vsub.f32 %v1353_v33, %v1256_v38  ;;  %v3106_v61 = vsel %vm1067_vm10, 1.0, %v3393_v20  ;;  %v3403_v23 = vld [vmem:[#allocation5_spill] sm:$0xff] }
 0x156   : > { %v3102_v50 = vpop.permute.xlu0 %869  ;;  %v993_v47 = vmul.f32 0.5, %v961_v51  ;;  %v3109_v42 = vadd.f32 %v1408_v40, %v3029_v31  ;;  %v1374_v36 = vsub.f32 %v1342_v60, %v1245_v37  ;;  %v960_v13 = vadd.f32 %v3077_v41, %v3401_v56 }
 0x157   : > { %v1407_v26 = vmul.f32 0.5, %v1375_v18  ;;  %vm1475_vm11 = vcmp.ge.f32.partialorder %v3079_v22, 1.0  ;;  %v3114_v32 = vadd.f32 %v1414_v34, %v1253_v11  ;;  %2267 = vst [vmem:[%s2990_s12 + $0x98] sm:$0xff] %v2211_v43   ;;  %v974_v35 = vadd.f32 %v3100_v21, %v2957_v12  ;;  %v3404_v34 = vld [vmem:[#allocation12_spill] sm:$0xff] }
 0x158   : > { %vm1057_vm12 = vcmp.ge.f32.partialorder %v993_v47, 1.0  ;;  %v1406_v19 = vmul.f32 0.5, %v1374_v36  ;;  %v1227_v45 = vsub.f32 1.0, %v3106_v61  ;;  %v1356_v31 = vadd.f32 %v2936_v25, %v910_v30 }
 0x159   : > { %v1439_v52 = vadd.f32 %v1407_v26, %v1246_v14  ;;  %v1417_v40 = vmul.f32 0.5, %v1385_v8  ;;  %v2032_v62 = vsel %vm1057_vm12, 1.0, %v3393_v20  ;;  %v992_v2 = vmul.f32 0.5, %v960_v13 }
 0x15a   : > { %v1006_v39 = vmul.f32 0.5, %v974_v35  ;;  %v1438_v11 = vadd.f32 %v1406_v19, %v1245_v37  ;;  %v2175_v57 = vpack.c.bf16 %v3009_v29, %v2032_v62  ;;  %v1346_v0 = vadd.f32 %v3402_v3, %v3072_v16 }
 0x15b   : > { %vm1471_vm13 = vcmp.ge.f32.partialorder %v1439_v52, 1.0  ;;  %v1217_v15 = vsub.f32 1.0, %v2032_v62  ;;  %vm1056_vm14 = vcmp.ge.f32.partialorder %v992_v2, 1.0  ;;  %v3128_v25 = vmul.f32 %v1227_v45, %v1003_v49  ;;  %v3405_v62 = vld [vmem:[#allocation6_spill] sm:$0xff] }
 0x15c   : > { %v2093_v12 = vsel %vm1471_vm13, 1.0, %v3393_v20  ;;  %vm1070_vm15 = vcmp.ge.f32.partialorder %v1006_v39, 1.0  ;;  %vm1470_vm0 = vcmp.ge.f32.partialorder %v1438_v11, 1.0  ;;  %2255 = vst [vmem:[%s2990_s12 + $0x38] sm:$0xff] %v2175_v57   ;;  %v2031_v30 = vsel %vm1056_vm14, 1.0, %v3393_v20 }
 0x15d   : > { %v3126_v33 = vpop.permute.xlu1 %889  ;;  %v3133_v53 = vsel %vm1070_vm15, 1.0, %v3393_v20  ;;  %vm1472_vm1 = vcmp.ge.f32.partialorder %v3109_v42, 1.0  ;;  %v2092_v16 = vsel %vm1470_vm0, 1.0, %v3393_v20  ;;  %v1249_v6 = vmul.f32 %v1217_v15, %v993_v47  ;;  %v940_v55 = vpop.permute.xlu2 %939 }
 0x15e   : > { %v3135_v29 = vpop.permute.xlu0 %884  ;;  %v2172_v58 = vpack.c.bf16 %v2031_v30, %v3006_v27  ;;  %v1216_v63 = vsub.f32 1.0, %v2031_v30  ;;  %v1449_v5 = vadd.f32 %v1417_v40, %v1256_v38  ;;  %v2217_v44 = vpack.c.bf16 %v2093_v12, %v2092_v16 }
 0x15f   : > { %v1230_v28 = vsub.f32 1.0, %v3133_v53  ;;  %v964_v14 = vadd.f32 %v3096_v24, %v3403_v23  ;;  %v1378_v48 = vsub.f32 %v1346_v0, %v1249_v6  ;;  %v1345_v60 = vadd.f32 %v3404_v34, %v3077_v41  ;;  %v3407_v23 = vld [vmem:[#allocation9_spill] sm:$0xff] }
 0x160   : > { %2254 = vst [vmem:[%s2990_s12 + $0x30] sm:$0xff] %v2172_v58   ;;  %v1248_v49 = vmul.f32 %v1216_v63, %v992_v2  ;;  %v963_v51 = vadd.f32 %v3102_v50, %v2857_v10  ;;  %v2097_v27 = vsel %vm1475_vm11, 1.0, %v3393_v20  ;;  %v1388_v38 = vsub.f32 %v1356_v31, %v3128_v25  ;;  %v3406_v58 = vld [vmem:[#allocation7_spill] sm:$0xff] }
 0x161   : > { %2269 = vst [vmem:[%s2990_s12 + $0xa8] sm:$0xff] %v2217_v44   ;;  %v1262_v18 = vmul.f32 %v1230_v28, %v1006_v39  ;;  %v996_v37 = vmul.f32 0.5, %v964_v14  ;;  %vm1478_vm2 = vcmp.ge.f32.partialorder %v3114_v32, 1.0  ;;  %v1410_v43 = vmul.f32 0.5, %v1378_v48 }
 0x162   : > { %v1377_v8 = vsub.f32 %v1345_v60, %v1248_v49  ;;  %v995_v47 = vmul.f32 0.5, %v963_v51  ;;  %vm1481_vm3 = vcmp.ge.f32.partialorder %v1449_v5, 1.0  ;;  %v1359_v41 = vadd.f32 %v2960_v7, %v3100_v21 }
 0x163   : > { %vm1060_vm4 = vcmp.ge.f32.partialorder %v996_v37, 1.0  ;;  %v977_v10 = vadd.f32 %v940_v55, %v2999_v4  ;;  %v1442_v26 = vadd.f32 %v1410_v43, %v1249_v6  ;;  %v1420_v13 = vmul.f32 0.5, %v1388_v38 }
 0x164   : > { %v1409_v22 = vmul.f32 0.5, %v1377_v8  ;;  %v2035_v36 = vsel %vm1060_vm4, 1.0, %v3393_v20  ;;  %vm1059_vm5 = vcmp.ge.f32.partialorder %v995_v47, 1.0  ;;  %v1391_v35 = vsub.f32 %v1359_v41, %v1262_v18  ;;  %v3408_v8 = vld [vmem:[#allocation8_spill] sm:$0xff] }
 0x165   : > { %v3158_v56 = vpop.permute.xlu1 %904  ;;  %v1220_v52 = vsub.f32 1.0, %v2035_v36  ;;  %v2034_v19 = vsel %vm1059_vm5, 1.0, %v3393_v20  ;;  %vm1474_vm6 = vcmp.ge.f32.partialorder %v1442_v26, 1.0  ;;  %v1349_v2 = vadd.f32 %v3405_v62, %v3096_v24 }
 0x166   : > { %v3161_v45 = vpop.permute.xlu0 %899  ;;  %v1441_v7 = vadd.f32 %v1409_v22, %v1248_v49  ;;  %v2178_v21 = vpack.c.bf16 %v2035_v36, %v2034_v19  ;;  %v1219_v4 = vsub.f32 1.0, %v2034_v19  ;;  %v2096_v31 = vsel %vm1474_vm6, 1.0, %v3393_v20 }
 0x167   : > { %v1252_v40 = vmul.f32 %v1220_v52, %v996_v37  ;;  %v3166_v39 = vmul.f32 0.5, %v977_v10  ;;  %v2223_v11 = vpack.c.bf16 %v2097_v27, %v2096_v31  ;;  %v1348_v3 = vadd.f32 %v2863_v59, %v3102_v50 }
 0x168   : > { %vm1473_vm7 = vcmp.ge.f32.partialorder %v1441_v7, 1.0  ;;  %2256 = vst [vmem:[%s2990_s12 + $0x40] sm:$0xff] %v2178_v21   ;;  %v1251_v57 = vmul.f32 %v1219_v4, %v995_v47  ;;  %v2094_v0 = vsel %vm1472_vm1, 1.0, %v3393_v20  ;;  %v1423_v15 = vmul.f32 0.5, %v1391_v35  ;;  %v3410_v21 = vld [vmem:[#allocation10_spill] sm:$0xff] }
 0x169   : > { %v2095_v12 = vsel %vm1473_vm7, 1.0, %v3393_v20  ;;  %v1381_v30 = vsub.f32 %v1349_v2, %v1252_v40  ;;  %v3178_v24 = vsel %vm1478_vm2, 1.0, %v3393_v20  ;;  %2271 = vst [vmem:[%s2990_s12 + $0xb8] sm:$0xff] %v2223_v11   ;;  %v967_v63 = vadd.f32 %v3126_v33, %v3406_v58  ;;  %v3413_v2 = vld [vmem:[#allocation19_spill] sm:$0xff] }
 0x16a   : > { %v2220_v16 = vpack.c.bf16 %v2095_v12, %v2094_v0  ;;  %v1380_v6 = vsub.f32 %v1348_v3, %v1251_v57  ;;  %v3185_v59 = vsel %vm1481_vm3, 1.0, %v3393_v20  ;;  %vm1073_vm8 = vcmp.ge.f32.partialorder %v3166_v39, 1.0 }
 0x16b   : > { %v1413_v50 = vmul.f32 0.5, %v1381_v30  ;;  %v966_v42 = vadd.f32 %v3135_v29, %v2886_v17  ;;  %v3191_v32 = vadd.f32 %v1420_v13, %v3128_v25  ;;  %v999_v28 = vmul.f32 0.5, %v967_v63 }
 0x16c   : > { %2270 = vst [vmem:[%s2990_s12 + $0xb0] sm:$0xff] %v2220_v16   ;;  %v1412_v44 = vmul.f32 0.5, %v1380_v6  ;;  %v970_v14 = vadd.f32 %v3158_v56, %v3407_v23  ;;  %v3196_v49 = vadd.f32 %v1423_v15, %v1262_v18  ;;  %v3199_v34 = vadd.f32 %v3003_v46, %v940_v55 }
 0x16d   : > { %v920_v48 = vpop.permute.xlu1 %919  ;;  %v1445_v5 = vadd.f32 %v1413_v50, %v1252_v40  ;;  %v998_v60 = vmul.f32 0.5, %v966_v42  ;;  %v3204_v25 = vsel %vm1073_vm8, 1.0, %v3393_v20  ;;  %vm1063_vm9 = vcmp.ge.f32.partialorder %v999_v28, 1.0  ;;  %v3412_v40 = vld [vmem:[#allocation13_spill] sm:$0xff]  ;;  %v3414_v50 = vld [vmem:[#allocation14_spill] sm:$0xff] }
 0x16e   : > { %v3201_v51 = vpop.permute.xlu0 %914  ;;  %v1444_v17 = vadd.f32 %v1412_v44, %v1251_v57  ;;  %v1002_v27 = vmul.f32 0.5, %v970_v14  ;;  %v2038_v38 = vsel %vm1063_vm9, 1.0, %v3393_v20  ;;  %v969_v18 = vadd.f32 %v3161_v45, %v2910_v54 }
 0x16f   : > { %vm1477_vm10 = vcmp.ge.f32.partialorder %v1445_v5, 1.0  ;;  %vm1062_vm11 = vcmp.ge.f32.partialorder %v998_v60, 1.0  ;;  %v2184_v55 = vpack.c.bf16 %v3075_v1, %v2038_v38  ;;  %v1223_v37 = vsub.f32 1.0, %v2038_v38  ;;  %v3409_v1 = vld [vmem:[#allocation17_spill] sm:$0xff] }
 0x170   : > { %v2099_v46 = vsel %vm1477_vm10, 1.0, %v3393_v20  ;;  %vm1476_vm12 = vcmp.ge.f32.partialorder %v1444_v17, 1.0  ;;  %v1352_v47 = vadd.f32 %v3408_v8, %v3126_v33  ;;  %v2037_v41 = vsel %vm1062_vm11, 1.0, %v3393_v20 }
 0x171   : > { %v2098_v43 = vsel %vm1476_vm12, 1.0, %v3393_v20  ;;  %vm1066_vm13 = vcmp.ge.f32.partialorder %v1002_v27, 1.0  ;;  %2258 = vst [vmem:[%s2990_s12 + $0x50] sm:$0xff] %v2184_v55   ;;  %v1255_v26 = vmul.f32 %v1223_v37, %v999_v28  ;;  %v2181_v54 = vpack.c.bf16 %v2037_v41, %v3050_v9  ;;  %v3411_v9 = vld [vmem:[#allocation18_spill] sm:$0xff]  ;;  %v3415_v28 = vld [vmem:[#allocation15_spill] sm:$0xff] }
 0x172   : > { %v2226_v10 = vpack.c.bf16 %v2099_v46, %v2098_v43  ;;  %v1222_v22 = vsub.f32 1.0, %v2037_v41  ;;  %v1233_v36 = vsub.f32 1.0, %v3204_v25  ;;  %v1351_v13 = vadd.f32 %v3409_v1, %v3135_v29  ;;  %v3416_v1 = vld [vmem:[#allocation20_spill] sm:$0xff] }
 0x173   : > { %v2041_v35 = vsel %vm1066_vm13, 1.0, %v3393_v20  ;;  %v1001_v52 = vmul.f32 0.5, %v969_v18  ;;  %v1384_v33 = vsub.f32 %v1352_v47, %v1255_v26  ;;  %v1355_v4 = vadd.f32 %v3410_v21, %v3158_v56  ;;  %2257 = vst [vmem:[%s2990_s12 + $0x48] sm:$0xff] %v2181_v54  }
 0x174   : > { %2272 = vst [vmem:[%s2990_s12 + $0xc0] sm:$0xff] %v2226_v10   ;;  %v1254_v19 = vmul.f32 %v1222_v22, %v998_v60  ;;  %v1226_v7 = vsub.f32 1.0, %v2041_v35  ;;  %v1354_v31 = vadd.f32 %v3411_v9, %v3161_v45  ;;  %v973_v62 = vadd.f32 %v920_v48, %v3412_v40 }
 0x175   : > { %vm1065_vm14 = vcmp.ge.f32.partialorder %v1001_v52, 1.0  ;;  %v972_v29 = vadd.f32 %v3201_v51, %v3413_v2  ;;  %v1416_v57 = vmul.f32 0.5, %v1384_v33  ;;  %v3233_v15 = vpop.permute.xlu1 %934  ;;  %v1358_v42 = vadd.f32 %v3414_v50, %v920_v48 }
 0x176   : > { %v3230_v11 = vpop.permute.xlu0 %929  ;;  %v1383_v3 = vsub.f32 %v1351_v13, %v1254_v19  ;;  %v1258_v0 = vmul.f32 %v1226_v7, %v1002_v27  ;;  %v2040_v12 = vsel %vm1065_vm14, 1.0, %v3393_v20  ;;  %v1005_v16 = vmul.f32 0.5, %v973_v62 }
 0x177   : > { %v2187_v56 = vpack.c.bf16 %v2041_v35, %v2040_v12  ;;  %v1225_v30 = vsub.f32 1.0, %v2040_v12  ;;  %v1004_v6 = vmul.f32 0.5, %v972_v29  ;;  %v1448_v45 = vadd.f32 %v1416_v57, %v1255_v26  ;;  %v3419_v57 = vld [vmem:[#allocation16_spill] sm:$0xff] }
 0x178   : > { %v1415_v58 = vmul.f32 0.5, %v1383_v3  ;;  %v1387_v63 = vsub.f32 %v1355_v4, %v1258_v0  ;;  %vm1069_vm15 = vcmp.ge.f32.partialorder %v1005_v16, 1.0  ;;  %v976_v23 = vadd.f32 %v3233_v15, %v3415_v28 }
 0x179   : > { %2259 = vst [vmem:[%s2990_s12 + $0x58] sm:$0xff] %v2187_v56   ;;  %v1257_v44 = vmul.f32 %v1225_v30, %v1001_v52  ;;  %vm1068_vm0 = vcmp.ge.f32.partialorder %v1004_v6, 1.0  ;;  %vm1487_vm1 = vcmp.ge.f32.partialorder %v3196_v49, 1.0  ;;  %vm1480_vm2 = vcmp.ge.f32.partialorder %v1448_v45, 1.0  ;;  %v3417_v52 = vld [vmem:[#allocation21_spill] sm:$0xff] }
 0x17a   : > { %v1447_v14 = vadd.f32 %v1415_v58, %v1254_v19  ;;  %v1419_v5 = vmul.f32 0.5, %v1387_v63  ;;  %v2044_v60 = vsel %vm1069_vm15, 1.0, %v3393_v20  ;;  %v2102_v17 = vsel %vm1480_vm2, 1.0, %v3393_v20 }
 0x17b   : > { %v1386_v27 = vsub.f32 %v1354_v31, %v1257_v44  ;;  %v2193_v48 = vpack.c.bf16 %v3133_v53, %v2044_v60  ;;  %v1229_v38 = vsub.f32 1.0, %v2044_v60  ;;  %v2232_v18 = vpack.c.bf16 %v3185_v59, %v2102_v17 }
 0x17c   : > { %vm1479_vm3 = vcmp.ge.f32.partialorder %v1447_v14, 1.0  ;;  %v1451_v46 = vadd.f32 %v1419_v5, %v1258_v0  ;;  %v2043_v55 = vsel %vm1068_vm0, 1.0, %v3393_v20  ;;  %vm1484_vm4 = vcmp.ge.f32.partialorder %v3191_v32, 1.0 }
 0x17d   : > { %v2101_v37 = vsel %vm1479_vm3, 1.0, %v3393_v20  ;;  %v1418_v43 = vmul.f32 0.5, %v1386_v27  ;;  %2261 = vst [vmem:[%s2990_s12 + $0x68] sm:$0xff] %v2193_v48   ;;  %v1261_v8 = vmul.f32 %v1229_v38, %v1005_v16  ;;  %v2190_v47 = vpack.c.bf16 %v2043_v55, %v3106_v61  ;;  %v3421_v27 = vld [vmem:[#allocation24_spill] sm:$0xff] }
 0x17e   : > { %2274 = vst [vmem:[%s2990_s12 + $0xd0] sm:$0xff] %v2232_v18   ;;  %v2229_v53 = vpack.c.bf16 %v2101_v37, %v3178_v24  ;;  %vm1483_vm5 = vcmp.ge.f32.partialorder %v1451_v46, 1.0  ;;  %v1228_v59 = vsub.f32 1.0, %v2043_v55  ;;  %v1008_v41 = vmul.f32 0.5, %v976_v23  ;;  %v945_v10 = vpop.permute.xlu0 %944  ;;  %v3420_v23 = vld [vmem:[#allocation22_spill] sm:$0xff] }
 0x17f   : > { %v1265_v26 = vmul.f32 %v1233_v36, %v3166_v39  ;;  %v1450_v54 = vadd.f32 %v1418_v43, %v1257_v44  ;;  %v1390_v22 = vsub.f32 %v1358_v42, %v1261_v8  ;;  %2260 = vst [vmem:[%s2990_s12 + $0x60] sm:$0xff] %v2190_v47   ;;  %v1357_v13 = vadd.f32 %v3416_v1, %v3201_v51  ;;  %v3418_v39 = vld [vmem:[#allocation23_spill] sm:$0xff]  ;;  %v1671_v1 = vld [vmem:[%s2990_s12 + $0x30] sm:$0xff] (%p2386_p5)  }
 0x180   : > { %2273 = vst [vmem:[%s2990_s12 + $0xc8] sm:$0xff] %v2229_v53   ;;  %v2105_v61 = vsel %vm1483_vm5, 1.0, %v3393_v20  ;;  %v1260_v35 = vmul.f32 %v1228_v59, %v1004_v6  ;;  %vm1072_vm6 = vcmp.ge.f32.partialorder %v1008_v41, 1.0  ;;  %v975_v24 = vadd.f32 %v3230_v11, %v3417_v52  ;;  %v1687_v52 = vld [vmem:[%s2990_s12 + $0x50] sm:$0xff] (%p2386_p5)  }
 0x181   : > { %vm1482_vm7 = vcmp.ge.f32.partialorder %v1450_v54, 1.0  ;;  %v1422_v33 = vmul.f32 0.5, %v1390_v22  ;;  %v2047_v19 = vsel %vm1072_vm6, 1.0, %v3393_v20  ;;  %v978_v36 = vadd.f32 %v945_v10, %v3418_v39  ;;  %v1663_v54 = vld [vmem:[%s2990_s12 + $0x20] sm:$0xff] (%p2386_p5)   ;;  %v1667_v22 = vld [vmem:[%s2990_s12 + $0x28] sm:$0xff] (%p2386_p5)   ;;  %1672 = vst [vmem:[%s3298_s22 + $0x30] sm:$0xff] (%p2386_p5), %v1671_v1  }
 0x182   : > { %v2104_v7 = vsel %vm1482_vm7, 1.0, %v3393_v20  ;;  %v1389_v21 = vsub.f32 %v1357_v13, %v1260_v35  ;;  %v1232_v4 = vsub.f32 1.0, %v2047_v19  ;;  %v1007_v51 = vmul.f32 0.5, %v975_v24  ;;  %1664 = vst [vmem:[%s3298_s22 + $0x20] sm:$0xff] (%p2386_p5), %v1663_v54   ;;  %v1675_v13 = vld [vmem:[%s2990_s12 + $0x38] sm:$0xff] (%p2386_p5)  }
 0x183   : > { %v1394_v9 = vsub.f32 %v3199_v34, %v1265_v26  ;;  %v2235_v31 = vpack.c.bf16 %v2105_v61, %v2104_v7  ;;  %v1454_v40 = vadd.f32 %v1422_v33, %v1261_v8  ;;  %v1010_v62 = vmul.f32 0.5, %v978_v36  ;;  %1668 = vst [vmem:[%s3298_s22 + $0x28] sm:$0xff] (%p2386_p5), %v1667_v22   ;;  %v1679_v61 = vld [vmem:[%s2990_s12 + $0x40] sm:$0xff] (%p2386_p5)   ;;  %v1691_v24 = vld [vmem:[%s2990_s12 + $0x58] sm:$0xff] (%p2386_p5)  }
 0x184   : > { %v1421_v2 = vmul.f32 0.5, %v1389_v21  ;;  %v1264_v29 = vmul.f32 %v1232_v4, %v1008_v41  ;;  %v1361_v3 = vadd.f32 %v3419_v57, %v3233_v15  ;;  %vm1071_vm8 = vcmp.ge.f32.partialorder %v1007_v51, 1.0  ;;  %v1647_v41 = vld [vmem:[%s2990_s12] sm:$0xff] (%p2386_p5)   ;;  %1676 = vst [vmem:[%s3298_s22 + $0x38] sm:$0xff] (%p2386_p5), %v1675_v13   ;;  %v1715_v21 = vld [vmem:[%s2990_s12 + $0x88] sm:$0xff] (%p2386_p5)   ;;  %v1719_v4 = vld [vmem:[%s2990_s12 + $0x90] sm:$0xff] (%p2386_p5)  }
 0x185   : > { %v2109_v0 = vsel %vm1487_vm1, 1.0, %v3393_v20  ;;  %2275 = vst [vmem:[%s2990_s12 + $0xd8] sm:$0xff] %v2235_v31   ;;  %vm1486_vm9 = vcmp.ge.f32.partialorder %v1454_v40, 1.0  ;;  %v2046_v12 = vsel %vm1071_vm8, 1.0, %v3393_v20  ;;  %vm1074_vm10 = vcmp.ge.f32.partialorder %v1010_v62, 1.0  ;;  %v1711_v7 = vld [vmem:[%s2990_s12 + $0x80] sm:$0xff] (%p2386_p5)  }
 0x186   : > { %v2108_v34 = vsel %vm1486_vm9, 1.0, %v3393_v20  ;;  %v1453_v56 = vadd.f32 %v1421_v2, %v1260_v35  ;;  %v1393_v30 = vsub.f32 %v1361_v3, %v1264_v29  ;;  %v2196_v16 = vpack.c.bf16 %v2047_v19, %v2046_v12  ;;  %1648 = vst [vmem:[%s3298_s22] sm:$0xff] (%p2386_p5), %v1647_v41   ;;  %v1683_v35 = vld [vmem:[%s2990_s12 + $0x48] sm:$0xff] (%p2386_p5)   ;;  %v1695_v33 = vld [vmem:[%s2990_s12 + $0x60] sm:$0xff] (%p2386_p5)   ;;  %v1735_v40 = vld [vmem:[%s2990_s12 + $0xb0] sm:$0xff] (%p2386_p5)  }
 0x187   : > { %v1426_v6 = vmul.f32 0.5, %v1394_v9  ;;  %v2241_v15 = vpack.c.bf16 %v2109_v0, %v2108_v34  ;;  %v1231_v45 = vsub.f32 1.0, %v2046_v12  ;;  %v2049_v58 = vsel %vm1074_vm10, 1.0, %v3393_v20  ;;  %1680 = vst [vmem:[%s3298_s22 + $0x40] sm:$0xff] (%p2386_p5), %v1679_v61   ;;  %v1699_v19 = vld [vmem:[%s2990_s12 + $0x68] sm:$0xff] (%p2386_p5)   ;;  %v1727_v9 = vld [vmem:[%s2990_s12 + $0xa0] sm:$0xff] (%p2386_p5)  }
 0x188   : > { %vm1485_vm11 = vcmp.ge.f32.partialorder %v1453_v56, 1.0  ;;  %v1425_v49 = vmul.f32 0.5, %v1393_v30  ;;  %2262 = vst [vmem:[%s2990_s12 + $0x70] sm:$0xff] %v2196_v16   ;;  %v2199_v63 = vpack.c.bf16 %v2049_v58, %v3204_v25  ;;  %v1234_v50 = vsub.f32 1.0, %v2049_v58  ;;  %v1731_v31 = vld [vmem:[%s2990_s12 + $0xa8] sm:$0xff] (%p2386_p5)   ;;  %v1743_v2 = vld [vmem:[%s2990_s12 + $0xc0] sm:$0xff] (%p2386_p5)  }
 0x189   : > { %v2106_v42 = vsel %vm1484_vm4, 1.0, %v3393_v20  ;;  %2277 = vst [vmem:[%s2990_s12 + $0xe8] sm:$0xff] %v2241_v15   ;;  %v2107_v44 = vsel %vm1485_vm11, 1.0, %v3393_v20  ;;  %v1263_v28 = vmul.f32 %v1231_v45, %v1007_v51  ;;  %v1360_v14 = vadd.f32 %v3420_v23, %v3230_v11  ;;  %v1723_v51 = vld [vmem:[%s2990_s12 + $0x98] sm:$0xff] (%p2386_p5)   ;;  %v1751_v57 = vld [vmem:[%s2990_s12 + $0xd0] sm:$0xff] (%p2386_p5)  }
 0x18a   : > { %v2238_v5 = vpack.c.bf16 %v2107_v44, %v2106_v42  ;;  %v1457_v60 = vadd.f32 %v1425_v49, %v1264_v29  ;;  %2263 = vst [vmem:[%s2990_s12 + $0x78] sm:$0xff] %v2199_v63   ;;  %v1266_v17 = vmul.f32 %v1234_v50, %v1010_v62  ;;  %v1363_v48 = vadd.f32 %v3421_v27, %v945_v10  ;;  %v1651_v10 = vld [vmem:[%s2990_s12 + $0x8] sm:$0xff] (%p2386_p5)   ;;  %v1739_v62 = vld [vmem:[%s2990_s12 + $0xb8] sm:$0xff] (%p2386_p5)  }
 0x18b   : > { %v1392_v38 = vsub.f32 %v1360_v14, %v1263_v28  ;;  %v1458_v25 = vadd.f32 %v1426_v6, %v1265_v26  ;;  %v1659_v26 = vld [vmem:[%s2990_s12 + $0x18] sm:$0xff] (%p2386_p5)   ;;  %1652 = vst [vmem:[%s3298_s22 + $0x8] sm:$0xff] (%p2386_p5), %v1651_v10   ;;  %v1747_v29 = vld [vmem:[%s2990_s12 + $0xc8] sm:$0xff] (%p2386_p5)  }
 0x18c   : > { %2276 = vst [vmem:[%s2990_s12 + $0xe0] sm:$0xff] %v2238_v5   ;;  %v1395_v18 = vsub.f32 %v1363_v48, %v1266_v17  ;;  %vm1489_vm12 = vcmp.ge.f32.partialorder %v1457_v60, 1.0  ;;  %v1755_v3 = vld [vmem:[%s2990_s12 + $0xd8] sm:$0xff] (%p2386_p5)  }
 0x18d   : > { %v1424_v32 = vmul.f32 0.5, %v1392_v38  ;;  %vm1490_vm13 = vcmp.ge.f32.partialorder %v1458_v25, 1.0  ;;  %v2111_v37 = vsel %vm1489_vm12, 1.0, %v3393_v20  ;;  %1660 = vst [vmem:[%s3298_s22 + $0x18] sm:$0xff] (%p2386_p5), %v1659_v26  }
 0x18e   : > { %v1427_v46 = vmul.f32 0.5, %v1395_v18  ;;  %v2112_v8 = vsel %vm1490_vm13, 1.0, %v3393_v20  ;;  %1684 = vst [vmem:[%s3298_s22 + $0x48] sm:$0xff] (%p2386_p5), %v1683_v35  }
 0x18f   : > { %v1456_v55 = vadd.f32 %v1424_v32, %v1263_v28  ;;  %1688 = vst [vmem:[%s3298_s22 + $0x50] sm:$0xff] (%p2386_p5), %v1687_v52   ;;  %v1703_v39 = vld [vmem:[%s2990_s12 + $0x70] sm:$0xff] (%p2386_p5)  }
 0x190   : > { %v1459_v11 = vadd.f32 %v1427_v46, %v1266_v17  ;;  %1692 = vst [vmem:[%s3298_s22 + $0x58] sm:$0xff] (%p2386_p5), %v1691_v24   ;;  %v1763_v12 = vld [vmem:[%s2990_s12 + $0xe8] sm:$0xff] (%p2386_p5)  }
 0x191   : > { %vm1488_vm14 = vcmp.ge.f32.partialorder %v1456_v55, 1.0  ;;  %1696 = vst [vmem:[%s3298_s22 + $0x60] sm:$0xff] (%p2386_p5), %v1695_v33   ;;  %v1707_v36 = vld [vmem:[%s2990_s12 + $0x78] sm:$0xff] (%p2386_p5)  }
 0x192   : > { %v2110_v43 = vsel %vm1488_vm14, 1.0, %v3393_v20  ;;  %vm1491_vm15 = vcmp.ge.f32.partialorder %v1459_v11, 1.0  ;;  %1627 = sbr.rel (!%p2386_p5) target bundleno = 424 (0x1a8), region = 74  ;;  %1700 = vst [vmem:[%s3298_s22 + $0x68] sm:$0xff] (%p2386_p5), %v1699_v19  }
 0x193   : > { %v2244_v47 = vpack.c.bf16 %v2111_v37, %v2110_v43  ;;  %v2113_v53 = vsel %vm1491_vm15, 1.0, %v3393_v20  ;;  %v1655_v20 = vld [vmem:[%s2990_s12 + $0x10] sm:$0xff] (%p2386_p5)   ;;  %1704 = vst [vmem:[%s3298_s22 + $0x70] sm:$0xff] (%p2386_p5), %v1703_v39   ;;  %v1759_v0 = vld [vmem:[%s2990_s12 + $0xe0] sm:$0xff] (%p2386_p5)  }
 0x194   : > { %v2247_v59 = vpack.c.bf16 %v2113_v53, %v2112_v8  ;;  %1656 = vst [vmem:[%s3298_s22 + $0x10] sm:$0xff] (%p2386_p5), %v1655_v20  }
 0x195   : > { %2278 = vst [vmem:[%s2990_s12 + $0xf0] sm:$0xff] %v2244_v47  }
 0x196   : > { %2279 = vst [vmem:[%s2990_s12 + $0xf8] sm:$0xff] %v2247_v59  }
 0x197   : > { %1708 = vst [vmem:[%s3298_s22 + $0x78] sm:$0xff] %v1707_v36  }
 0x198   : > { %1712 = vst [vmem:[%s3298_s22 + $0x100] sm:$0xff] %v1711_v7  }
 0x199   : > { %1716 = vst [vmem:[%s3298_s22 + $0x108] sm:$0xff] %v1715_v21  }
 0x19a   : > { %1720 = vst [vmem:[%s3298_s22 + $0x110] sm:$0xff] %v1719_v4  }
 0x19b   : > { %1724 = vst [vmem:[%s3298_s22 + $0x118] sm:$0xff] %v1723_v51  }
 0x19c   : > { %1728 = vst [vmem:[%s3298_s22 + $0x120] sm:$0xff] %v1727_v9   ;;  %v1767_v34 = vld [vmem:[%s2990_s12 + $0xf0] sm:$0xff]  }
 0x19d   : > { %1732 = vst [vmem:[%s3298_s22 + $0x128] sm:$0xff] %v1731_v31   ;;  %v1771_v56 = vld [vmem:[%s2990_s12 + $0xf8] sm:$0xff]  }
 0x19e   : > { %1736 = vst [vmem:[%s3298_s22 + $0x130] sm:$0xff] %v1735_v40  }
 0x19f   : > { %1740 = vst [vmem:[%s3298_s22 + $0x138] sm:$0xff] %v1739_v62  }
 0x1a0   : > { %1744 = vst [vmem:[%s3298_s22 + $0x140] sm:$0xff] %v1743_v2  }
 0x1a1   : > { %1748 = vst [vmem:[%s3298_s22 + $0x148] sm:$0xff] %v1747_v29  }
 0x1a2   : > { %1752 = vst [vmem:[%s3298_s22 + $0x150] sm:$0xff] %v1751_v57  }
 0x1a3   : > { %1756 = vst [vmem:[%s3298_s22 + $0x158] sm:$0xff] %v1755_v3  }
 0x1a4   : > { %1760 = vst [vmem:[%s3298_s22 + $0x160] sm:$0xff] %v1759_v0  }
 0x1a5   : > { %1764 = vst [vmem:[%s3298_s22 + $0x168] sm:$0xff] %v1763_v12  }
 0x1a6   : > { %1768 = vst [vmem:[%s3298_s22 + $0x170] sm:$0xff] %v1767_v34  }
 0x1a7   : > { %1772 = vst [vmem:[%s3298_s22 + $0x178] sm:$0xff] %v1771_v56  }
 0x1a8 PF: > { %p10_p11 = scmp.ge.s32.totalorder %s2374_s16, 4   ;;  %s3422_s12 = smov %s2327_s13 }
 0x1a9   : > { %s3423_s13 = smov %s2384_s19  ;;  %s3424_s14 = smov %s2374_s16 }
 0x1aa   :  { %12 = sbr.rel (!%p10_p11) target bundleno = 2 (0x2), region = 154 }

// kernel: swformer_forward.24
= control target key start
LH: loop header
LB: loop body
LE: loop exit
PB: predicated region body
PF: predicated region fallthrough
CT: control target
= control target key end

     0   :  { %s1047_s9 = smov 0   ;;  %s1049_s10 = smov 0   ;;  %s1334_s0 = inlined_call_operand.vmem [shape: f32[8,36], index: 0, kind: input, shape index: {}]   ;;  %s1335_s1 = inlined_call_operand.vmem [shape: bf16[2,36,4096], index: 1, kind: input, shape index: {}]   ;;  %s1336_s2 = inlined_call_operand.vmem [shape: f32[2,8,4096], index: 2, kind: output, shape index: {}]  }
   0x1   :  { %s1051_s11 = smov 0   ;;  %s1053_s12 = smov 0  }
   0x2   :  { %s1055_s13 = smov 0   ;;  %s1057_s14 = smov 0  }
   0x3   :  { %s1059_s15 = smov 0  }
   0x4 LB: > { %s21_s16 = sadd.s32 1, %s1022_s13  ;;  %s24_s17 = sadd.s32 1, %s1026_s14  ;;  %s1030_s15 = sphi %s1059_s15, %s12_s15   ;;  %s1026_s14 = sphi %s1057_s14, %s1342_s14   ;;  %s1022_s13 = sphi %s1055_s13, %s1341_s13   ;;  %s1018_s12 = sphi %s1053_s12, %s1340_s12   ;;  %s1014_s11 = sphi %s1051_s11, %s1339_s11   ;;  %s1010_s10 = sphi %s1049_s10, %s1338_s10   ;;  %s1006_s9 = sphi %s1047_s9, %s1337_s9  }
   0x5   : > { %p22_p0 = scmp.ge.s32.totalorder %s21_s16, 2  ;;  %p61_p1 = scmp.ne.s32.totalorder %s1010_s10, %s1006_s9 }
   0x6   : > { %p62_p2 = scmp.eq.s32.totalorder %s1030_s15, 0  ;;  %s54_s21 = sadd.s32 1, %s1010_s10 }
   0x7   : > { %s1344_s16 = smov (%p22_p0, %s21_s16), 0  ;;  %s1346_s17 = smov (!%p22_p0, %s24_s17), %s1026_s14 }
   0x8   : > { %p63_p3 = por %p62_p2, %p61_p1  ;;  %p26_p4 = scmp.ge.s32.totalorder %s1346_s17, 2 }
   0x9   : > { %s50_s18 = ssub.s32 %s1022_s13, %s1344_s16  ;;  %p876_p6 = scmp.ge.s32.totalorder %s1030_s15, 4 }
   0xa   : > { %s1348_s17 = smov (%p26_p4, %s1346_s17), 0 }
   0xb   : > { %s49_s19 = ssub.s32 %s1026_s14, %s1348_s17  ;;  %118 = sbr.rel (%p876_p6) target bundleno = 64 (0x40), region = 20 }
   0xc   : > { %s51_s20 = sor.u32 %s50_s18, %s49_s19 }
   0xd   : > { %p52_p5 = scmp.eq.s32.totalorder %s51_s20, 0 }
   0xf   : > { %s1098_s22 = scalar_select %p52_p5, %s1010_s10, %s54_s21  }
  0x10   : > { %121 = sbr.rel (!%p63_p3) target bundleno = 64 (0x40), region = 24  ;;  %s123_s23 = sand.u32 (%p63_p3), 1, %s1010_s10  }
  0x11   : > { %s917_s24 = smul.u32 (%p63_p3), 320, %s123_s23  ;;  %s877_s25 = sshll.u32 (%p63_p3), %s1022_s13, 4 }
  0x12   : > { %s918_s26 = smul.u32 (%p63_p3), 160, %s1026_s14 }
  0x13   : > { %s1112_s4 = scalar_lea.vmem (%p63_p3), [#allocation2], %s917_s24 }
  0x14   : > { %s128_s27 = sadd.s32 (%p63_p3), %s918_s26, %s877_s25 }
  0x15   : > { %s878_s28 = sshll.u32 %s128_s27, 2 }
  0x16   : > { %s1107_s3 = scalar_lea.vmem %s1335_s1, %s878_s28 }
  0x17   : > { %v143_v0 = vld [vmem:[%s1107_s3] sm:$0xff]  ;;  %v145_v1 = vld [vmem:[%s1107_s3 + $0x8] sm:$0xff]  ;;  %v147_v2 = vld [vmem:[%s1107_s3 + $0x10] sm:$0xff] }
  0x18   : > { %144 = vst [vmem:[%s1112_s4] sm:$0xff] %v143_v0  ;;  %v149_v3 = vld [vmem:[%s1107_s3 + $0x18] sm:$0xff]  ;;  %v151_v4 = vld [vmem:[%s1107_s3 + $0x20] sm:$0xff]  ;;  %v153_v5 = vld [vmem:[%s1107_s3 + $0x28] sm:$0xff] }
  0x19   : > { %146 = vst [vmem:[%s1112_s4 + $0x8] sm:$0xff] %v145_v1  ;;  %v155_v6 = vld [vmem:[%s1107_s3 + $0x30] sm:$0xff]  ;;  %v157_v7 = vld [vmem:[%s1107_s3 + $0x38] sm:$0xff]  ;;  %v159_v8 = vld [vmem:[%s1107_s3 + $0x80] sm:$0xff] }
  0x1a   : > { %148 = vst [vmem:[%s1112_s4 + $0x10] sm:$0xff] %v147_v2  ;;  %v161_v9 = vld [vmem:[%s1107_s3 + $0x88] sm:$0xff]  ;;  %v163_v10 = vld [vmem:[%s1107_s3 + $0x90] sm:$0xff]  ;;  %v165_v11 = vld [vmem:[%s1107_s3 + $0x98] sm:$0xff] }
  0x1b   : > { %150 = vst [vmem:[%s1112_s4 + $0x18] sm:$0xff] %v149_v3  ;;  %v167_v12 = vld [vmem:[%s1107_s3 + $0xa0] sm:$0xff]  ;;  %v169_v13 = vld [vmem:[%s1107_s3 + $0xa8] sm:$0xff]  ;;  %v171_v14 = vld [vmem:[%s1107_s3 + $0xb0] sm:$0xff] }
  0x1c   : > { %152 = vst [vmem:[%s1112_s4 + $0x20] sm:$0xff] %v151_v4  ;;  %v173_v15 = vld [vmem:[%s1107_s3 + $0xb8] sm:$0xff]  ;;  %v175_v16 = vld [vmem:[%s1107_s3 + $0x100] sm:$0xff]  ;;  %v177_v17 = vld [vmem:[%s1107_s3 + $0x108] sm:$0xff] }
  0x1d   : > { %154 = vst [vmem:[%s1112_s4 + $0x28] sm:$0xff] %v153_v5  ;;  %v179_v18 = vld [vmem:[%s1107_s3 + $0x110] sm:$0xff]  ;;  %v181_v19 = vld [vmem:[%s1107_s3 + $0x118] sm:$0xff]  ;;  %v183_v20 = vld [vmem:[%s1107_s3 + $0x120] sm:$0xff] }
  0x1e   : > { %156 = vst [vmem:[%s1112_s4 + $0x30] sm:$0xff] %v155_v6  ;;  %v185_v21 = vld [vmem:[%s1107_s3 + $0x128] sm:$0xff]  ;;  %v187_v22 = vld [vmem:[%s1107_s3 + $0x130] sm:$0xff]  ;;  %v189_v23 = vld [vmem:[%s1107_s3 + $0x138] sm:$0xff] }
  0x1f   : > { %158 = vst [vmem:[%s1112_s4 + $0x38] sm:$0xff] %v157_v7  ;;  %v191_v24 = vld [vmem:[%s1107_s3 + $0x180] sm:$0xff]  ;;  %v193_v25 = vld [vmem:[%s1107_s3 + $0x188] sm:$0xff]  ;;  %v195_v26 = vld [vmem:[%s1107_s3 + $0x190] sm:$0xff] }
  0x20   : > { %160 = vst [vmem:[%s1112_s4 + $0x40] sm:$0xff] %v159_v8  ;;  %v197_v27 = vld [vmem:[%s1107_s3 + $0x198] sm:$0xff]  ;;  %v199_v28 = vld [vmem:[%s1107_s3 + $0x1a0] sm:$0xff]  ;;  %v201_v29 = vld [vmem:[%s1107_s3 + $0x1a8] sm:$0xff] }
  0x21   : > { %162 = vst [vmem:[%s1112_s4 + $0x48] sm:$0xff] %v161_v9  ;;  %v203_v30 = vld [vmem:[%s1107_s3 + $0x1b0] sm:$0xff]  ;;  %v205_v31 = vld [vmem:[%s1107_s3 + $0x1b8] sm:$0xff]  ;;  %v207_v32 = vld [vmem:[%s1107_s3 + $0x200] sm:$0xff] }
  0x22   : > { %164 = vst [vmem:[%s1112_s4 + $0x50] sm:$0xff] %v163_v10  ;;  %v209_v33 = vld [vmem:[%s1107_s3 + $0x208] sm:$0xff]  ;;  %v211_v34 = vld [vmem:[%s1107_s3 + $0x210] sm:$0xff]  ;;  %v213_v35 = vld [vmem:[%s1107_s3 + $0x218] sm:$0xff] }
  0x23   : > { %166 = vst [vmem:[%s1112_s4 + $0x58] sm:$0xff] %v165_v11  ;;  %v215_v36 = vld [vmem:[%s1107_s3 + $0x220] sm:$0xff]  ;;  %v217_v37 = vld [vmem:[%s1107_s3 + $0x228] sm:$0xff]  ;;  %v219_v38 = vld [vmem:[%s1107_s3 + $0x230] sm:$0xff] }
  0x24   : > { %168 = vst [vmem:[%s1112_s4 + $0x60] sm:$0xff] %v167_v12  ;;  %v221_v39 = vld [vmem:[%s1107_s3 + $0x238] sm:$0xff] }
  0x25   : > { %170 = vst [vmem:[%s1112_s4 + $0x68] sm:$0xff] %v169_v13 }
  0x26   : > { %172 = vst [vmem:[%s1112_s4 + $0x70] sm:$0xff] %v171_v14 }
  0x27   : > { %174 = vst [vmem:[%s1112_s4 + $0x78] sm:$0xff] %v173_v15 }
  0x28   : > { %176 = vst [vmem:[%s1112_s4 + $0x80] sm:$0xff] %v175_v16 }
  0x29   : > { %178 = vst [vmem:[%s1112_s4 + $0x88] sm:$0xff] %v177_v17 }
  0x2a   : > { %180 = vst [vmem:[%s1112_s4 + $0x90] sm:$0xff] %v179_v18 }
  0x2b   : > { %182 = vst [vmem:[%s1112_s4 + $0x98] sm:$0xff] %v181_v19 }
  0x2c   : > { %184 = vst [vmem:[%s1112_s4 + $0xa0] sm:$0xff] %v183_v20 }
  0x2d   : > { %186 = vst [vmem:[%s1112_s4 + $0xa8] sm:$0xff] %v185_v21 }
  0x2e   : > { %188 = vst [vmem:[%s1112_s4 + $0xb0] sm:$0xff] %v187_v22 }
  0x2f   : > { %190 = vst [vmem:[%s1112_s4 + $0xb8] sm:$0xff] %v189_v23 }
  0x30   : > { %192 = vst [vmem:[%s1112_s4 + $0xc0] sm:$0xff] %v191_v24 }
  0x31   : > { %194 = vst [vmem:[%s1112_s4 + $0xc8] sm:$0xff] %v193_v25 }
  0x32   : > { %196 = vst [vmem:[%s1112_s4 + $0xd0] sm:$0xff] %v195_v26 }
  0x33   : > { %198 = vst [vmem:[%s1112_s4 + $0xd8] sm:$0xff] %v197_v27 }
  0x34   : > { %200 = vst [vmem:[%s1112_s4 + $0xe0] sm:$0xff] %v199_v28 }
  0x35   : > { %202 = vst [vmem:[%s1112_s4 + $0xe8] sm:$0xff] %v201_v29 }
  0x36   : > { %204 = vst [vmem:[%s1112_s4 + $0xf0] sm:$0xff] %v203_v30 }
  0x37   : > { %206 = vst [vmem:[%s1112_s4 + $0xf8] sm:$0xff] %v205_v31 }
  0x38   : > { %208 = vst [vmem:[%s1112_s4 + $0x100] sm:$0xff] %v207_v32 }
  0x39   : > { %210 = vst [vmem:[%s1112_s4 + $0x108] sm:$0xff] %v209_v33 }
  0x3a   : > { %212 = vst [vmem:[%s1112_s4 + $0x110] sm:$0xff] %v211_v34 }
  0x3b   : > { %214 = vst [vmem:[%s1112_s4 + $0x118] sm:$0xff] %v213_v35 }
  0x3c   : > { %216 = vst [vmem:[%s1112_s4 + $0x120] sm:$0xff] %v215_v36 }
  0x3d   : > { %218 = vst [vmem:[%s1112_s4 + $0x128] sm:$0xff] %v217_v37 }
  0x3e   : > { %220 = vst [vmem:[%s1112_s4 + $0x130] sm:$0xff] %v219_v38 }
  0x3f   : > { %222 = vst [vmem:[%s1112_s4 + $0x138] sm:$0xff] %v221_v39 }
  0x40 PF: > { %p879_p7 = scmp.ge.s32.totalorder %s1030_s15, 1  ;;  %p227_p8 = scmp.lt.s32.totalorder %s1030_s15, 5 }
  0x42   : > { %p228_p9 = pnand %p879_p7, %p227_p8 }
  0x43   : > { %s234_s5 = sand.u32 (!%p228_p9), 1, %s1006_s9   ;;  %s880_s18 = sshll.u32 (!%p228_p9), %s1014_s11, 4 }
  0x44   : > { %231 = sbr.rel (%p228_p9) target bundleno = 255 (0xff), region = 47  ;;  %p261_p10 = scmp.lt.s32.totalorder (!%p228_p9), %s1018_s12, 1 }
  0x45   : > { %s919_s6 = smul.u32 (!%p228_p9), 320, %s234_s5  ;;  %p263_p11 = scmp.lt.s32.totalorder (!%p228_p9), %s880_s18, 31 }
  0x47   : > { %s1194_s7 = scalar_lea.vmem (!%p228_p9), [#allocation2], %s919_s6 }
  0x49   : > { %v304_v40 = vld [vmem:[%s1194_s7 + $0x108] sm:$0x33]  ;;  %vm395_vm0 = vcmask 1043456   ;;  %v303_v47 = vld [vmem:[%s1194_s7 + $0x100] sm:$0x33]  ;;  %v298_v4 = vld [vmem:[%s1194_s7 + $0xd8] sm:$0xff] }
  0x4a   : > { %v296_v41 = vld [vmem:[%s1194_s7 + $0xc8] sm:$0xff]  ;;  %v377_v43 = vunpack.c.l.bf16 %v304_v40  ;;  %v378_v44 = vunpack.c.h.bf16 %v304_v40  ;;  %v295_v48 = vld [vmem:[%s1194_s7 + $0xc0] sm:$0xff]  ;;  %v375_v49 = vunpack.c.l.bf16 %v303_v47  ;;  %v376_v50 = vunpack.c.h.bf16 %v303_v47  ;;  %v306_v61 = vld [vmem:[%s1194_s7 + $0x118] sm:$0x33]  ;;  %s1350_s12 = smov (!%p261_p10, %s1018_s12), 1  ;;  %s1352_s18 = smov (!%p263_p11, %s880_s18), 31 }
  0x4b   : > { %v288_v42 = vld [vmem:[%s1194_s7 + $0x88] sm:$0xff]  ;;  %v361_v45 = vunpack.c.l.bf16 %v296_v41  ;;  %v362_v46 = vunpack.c.h.bf16 %v296_v41  ;;  %v287_v52 = vld [vmem:[%s1194_s7 + $0x80] sm:$0xff]  ;;  %v359_v55 = vunpack.c.l.bf16 %v295_v48  ;;  %v360_v56 = vunpack.c.h.bf16 %v295_v48  ;;  %v290_v8 = vld [vmem:[%s1194_s7 + $0x98] sm:$0xff]  ;;  %s881_s19 = sshll.u32 %s1350_s12, 5 }
  0x4c   : > { %v280_v51 = vld [vmem:[%s1194_s7 + $0x48] sm:$0xff]  ;;  %887 = vmatpush.msk.msra.mxu2 %vm395_vm0, %v377_v43  ;;  %889 = vmatpush.msk.msra.mxu3 %vm395_vm0, %v378_v44  ;;  %v345_v53 = vunpack.c.l.bf16 %v288_v42  ;;  %v346_v54 = vunpack.c.h.bf16 %v288_v42  ;;  %v279_v57 = vld [vmem:[%s1194_s7 + $0x40] sm:$0xff]  ;;  %v343_v62 = vunpack.c.l.bf16 %v287_v52  ;;  %v344_v63 = vunpack.c.h.bf16 %v287_v52  ;;  %v305_v12 = vld [vmem:[%s1194_s7 + $0x110] sm:$0x33]  ;;  %s266_s20 = sadd.s32 %s881_s19, %s1352_s18 }
  0x4d   : > { %883 = vmatpush.msk.msra.mxu0 %vm395_vm0, %v375_v49  ;;  %885 = vmatpush.msk.msra.mxu1 %vm395_vm0, %v376_v50  ;;  %v272_v58 = vld [vmem:[%s1194_s7 + $0x8] sm:$0xff]  ;;  %v329_v59 = vunpack.c.l.bf16 %v280_v51  ;;  %v330_v60 = vunpack.c.h.bf16 %v280_v51  ;;  %v327_v0 = vunpack.c.l.bf16 %v279_v57  ;;  %v328_v1 = vunpack.c.h.bf16 %v279_v57  ;;  %v271_v7 = vld [vmem:[%s1194_s7] sm:$0xff]  ;;  %v282_v15 = vld [vmem:[%s1194_s7 + $0x58] sm:$0xff]  ;;  %s882_s21 = sshll.u32 %s266_s20, 3 }
  0x4e   : > { %496 = vmatpush.msra.mxu2 %v361_v45  ;;  %516 = vmatpush.msra.mxu3 %v362_v46  ;;  %v313_v2 = vunpack.c.l.bf16 %v272_v58  ;;  %v314_v3 = vunpack.c.h.bf16 %v272_v58  ;;  %v381_v5 = vunpack.c.l.bf16 %v306_v61  ;;  %v382_v6 = vunpack.c.h.bf16 %v306_v61  ;;  %v1216_v11 = vld [vmem:[%s1334_s0] sm:$0xff]  ;;  %v297_v18 = vld [vmem:[%s1194_s7 + $0xd0] sm:$0xff]  ;;  %v274_v21 = vld [vmem:[%s1194_s7 + $0x18] sm:$0xff]  ;;  %s1295_s25 = scalar_lea.vmem %s1336_s2, %s882_s21 }
  0x4f   : > { %456 = vmatpush.msra.mxu0 %v359_v55  ;;  %476 = vmatpush.msra.mxu1 %v360_v56  ;;  %v365_v9 = vunpack.c.l.bf16 %v298_v4  ;;  %v366_v10 = vunpack.c.h.bf16 %v298_v4  ;;  %vm391_vm1 = vcmask 293888   ;;  %v311_v13 = vunpack.c.l.bf16 %v271_v7  ;;  %v308_v26 = vld [vmem:[%s1194_s7 + $0x128] sm:$0x33]  ;;  %v289_v29 = vld [vmem:[%s1194_s7 + $0x90] sm:$0xff]  ;;  %v307_v42 = vld [vmem:[%s1194_s7 + $0x120] sm:$0x33] }
  0x50   : > { %497 = vmatpush.msra.mxu2 %v345_v53  ;;  %517 = vmatpush.msra.mxu3 %v346_v54  ;;  %v312_v14 = vunpack.c.h.bf16 %v271_v7  ;;  %v349_v16 = vunpack.c.l.bf16 %v290_v8  ;;  %v350_v17 = vunpack.c.h.bf16 %v290_v8  ;;  %v379_v19 = vunpack.c.l.bf16 %v305_v12  ;;  %v300_v32 = vld [vmem:[%s1194_s7 + $0xe8] sm:$0xff]  ;;  %v281_v35 = vld [vmem:[%s1194_s7 + $0x50] sm:$0xff]  ;;  %v299_v50 = vld [vmem:[%s1194_s7 + $0xe0] sm:$0xff] }
  0x51   : > { %457 = vmatpush.msra.mxu0 %v343_v62  ;;  %477 = vmatpush.msra.mxu1 %v344_v63  ;;  %v380_v20 = vunpack.c.h.bf16 %v305_v12  ;;  %v333_v22 = vunpack.c.l.bf16 %v282_v15  ;;  %v334_v23 = vunpack.c.h.bf16 %v282_v15  ;;  %v363_v24 = vunpack.c.l.bf16 %v297_v18  ;;  %v292_v36 = vld [vmem:[%s1194_s7 + $0xa8] sm:$0xff]  ;;  %v273_v39 = vld [vmem:[%s1194_s7 + $0x10] sm:$0xff]  ;;  %v310_v54 = vld [vmem:[%s1194_s7 + $0x138] sm:$0x33] }
  0x52   : > { %498 = vmatpush.msra.mxu2 %v329_v59  ;;  %518 = vmatpush.msra.mxu3 %v330_v60  ;;  %v364_v25 = vunpack.c.h.bf16 %v297_v18  ;;  %v317_v27 = vunpack.c.l.bf16 %v274_v21  ;;  %v318_v28 = vunpack.c.h.bf16 %v274_v21  ;;  %v385_v30 = vunpack.c.l.bf16 %v308_v26  ;;  %v284_v45 = vld [vmem:[%s1194_s7 + $0x68] sm:$0xff]  ;;  %v291_v57 = vld [vmem:[%s1194_s7 + $0xa0] sm:$0xff]  ;;  %v302_v62 = vld [vmem:[%s1194_s7 + $0xf8] sm:$0xff] }
  0x53   : > { %458 = vmatpush.msra.mxu0 %v327_v0  ;;  %478 = vmatpush.msra.mxu1 %v328_v1  ;;  %v386_v31 = vunpack.c.h.bf16 %v308_v26  ;;  %v347_v33 = vunpack.c.l.bf16 %v289_v29  ;;  %v348_v34 = vunpack.c.h.bf16 %v289_v29  ;;  %v369_v37 = vunpack.c.l.bf16 %v300_v32  ;;  %v276_v53 = vld [vmem:[%s1194_s7 + $0x28] sm:$0xff]  ;;  %v283_v1 = vld [vmem:[%s1194_s7 + $0x60] sm:$0xff]  ;;  %v309_v8 = vld [vmem:[%s1194_s7 + $0x130] sm:$0x33] }
  0x54   : > { %499 = vmatpush.msra.mxu2 %v313_v2  ;;  %519 = vmatpush.msra.mxu3 %v314_v3  ;;  %v370_v38 = vunpack.c.h.bf16 %v300_v32  ;;  %v331_v40 = vunpack.c.l.bf16 %v281_v35  ;;  %v332_v41 = vunpack.c.h.bf16 %v281_v35  ;;  %v353_v43 = vunpack.c.l.bf16 %v292_v36  ;;  %v294_v2 = vld [vmem:[%s1194_s7 + $0xb8] sm:$0xff]  ;;  %v285_v26 = vld [vmem:[%s1194_s7 + $0x70] sm:$0xff] }
  0x55   : > { %888 = vmatmul.msk.f32.vlgmr.msra.gmra.mxu2 %vm391_vm1, %v1216_v11  ;;  %890 = vmatmul.msk.f32.vlgmr.msra.gmra.mxu3 %vm391_vm1, %v1216_v11  ;;  %v354_v44 = vunpack.c.h.bf16 %v292_v36  ;;  %v315_v46 = vunpack.c.l.bf16 %v273_v39  ;;  %v316_v47 = vunpack.c.h.bf16 %v273_v39  ;;  %v383_v48 = vunpack.c.l.bf16 %v307_v42  ;;  %v286_v12 = vld [vmem:[%s1194_s7 + $0x78] sm:$0xff]  ;;  %v277_v29 = vld [vmem:[%s1194_s7 + $0x30] sm:$0xff] }
  0x56   : > { %895 = vmatpush.msk.msrb.mxu2 %vm395_vm0, %v381_v5  ;;  %897 = vmatpush.msk.msrb.mxu3 %vm395_vm0, %v382_v6  ;;  %v384_v49 = vunpack.c.h.bf16 %v307_v42  ;;  %v337_v51 = vunpack.c.l.bf16 %v284_v45  ;;  %v338_v52 = vunpack.c.h.bf16 %v284_v45  ;;  %v367_v55 = vunpack.c.l.bf16 %v299_v50  ;;  %v275_v5 = vld [vmem:[%s1194_s7 + $0x20] sm:$0xff] }
  0x57   : > { %459 = vmatpush.msra.mxu0 %v311_v13  ;;  %479 = vmatpush.msra.mxu1 %v312_v14  ;;  %v368_v56 = vunpack.c.h.bf16 %v299_v50  ;;  %v321_v58 = vunpack.c.l.bf16 %v276_v53  ;;  %v322_v59 = vunpack.c.h.bf16 %v276_v53  ;;  %v389_v60 = vunpack.c.l.bf16 %v310_v54 }
  0x58   : > { %576 = vmatpush.msrb.mxu2 %v365_v9  ;;  %596 = vmatpush.msrb.mxu3 %v366_v10  ;;  %v390_v61 = vunpack.c.h.bf16 %v310_v54  ;;  %v351_v63 = vunpack.c.l.bf16 %v291_v57  ;;  %v352_v0 = vunpack.c.h.bf16 %v291_v57  ;;  %v373_v3 = vunpack.c.l.bf16 %v302_v62 }
  0x59   : > { %891 = vmatpush.msk.msrb.mxu0 %vm395_vm0, %v379_v19  ;;  %893 = vmatpush.msk.msrb.mxu1 %vm395_vm0, %v380_v20  ;;  %v374_v4 = vunpack.c.h.bf16 %v302_v62  ;;  %v335_v6 = vunpack.c.l.bf16 %v283_v1  ;;  %v336_v7 = vunpack.c.h.bf16 %v283_v1  ;;  %v357_v9 = vunpack.c.l.bf16 %v294_v2  ;;  %v278_v20 = vld [vmem:[%s1194_s7 + $0x38] sm:$0xff] }
  0x5a   : > { %577 = vmatpush.msrb.mxu2 %v349_v16  ;;  %597 = vmatpush.msrb.mxu3 %v350_v17  ;;  %v358_v10 = vunpack.c.h.bf16 %v294_v2  ;;  %v319_v13 = vunpack.c.l.bf16 %v275_v5  ;;  %v320_v14 = vunpack.c.h.bf16 %v275_v5  ;;  %v387_v15 = vunpack.c.l.bf16 %v309_v8  ;;  %v301_v17 = vld [vmem:[%s1194_s7 + $0xf0] sm:$0xff] }
  0x5b   : > { %536 = vmatpush.msrb.mxu0 %v363_v24  ;;  %556 = vmatpush.msrb.mxu1 %v364_v25  ;;  %v388_v16 = vunpack.c.h.bf16 %v309_v8  ;;  %v341_v18 = vunpack.c.l.bf16 %v286_v12  ;;  %v342_v19 = vunpack.c.h.bf16 %v286_v12  ;;  %v371_v21 = vunpack.c.l.bf16 %v301_v17 }
  0x5c   : > { %578 = vmatpush.msrb.mxu2 %v333_v22  ;;  %598 = vmatpush.msrb.mxu3 %v334_v23  ;;  %v372_v22 = vunpack.c.h.bf16 %v301_v17  ;;  %v293_v23 = vld [vmem:[%s1194_s7 + $0xb0] sm:$0xff]  ;;  %v325_v24 = vunpack.c.l.bf16 %v278_v20  ;;  %v326_v25 = vunpack.c.h.bf16 %v278_v20  ;;  %v323_v32 = vunpack.c.l.bf16 %v277_v29 }
  0x5d   : > { %884 = vmatmul.msk.f32.vlgmr.msra.gmra.mxu0 %vm391_vm1, %v1216_v11  ;;  %886 = vmatmul.msk.f32.vlgmr.msra.gmra.mxu1 %vm391_vm1, %v1216_v11 }
  0x5e   : > { %579 = vmatpush.msrb.mxu2 %v317_v27  ;;  %599 = vmatpush.msrb.mxu3 %v318_v28  ;;  %v355_v27 = vunpack.c.l.bf16 %v293_v23  ;;  %v356_v28 = vunpack.c.h.bf16 %v293_v23 }
  0x5f   : > { %537 = vmatpush.msrb.mxu0 %v347_v33  ;;  %557 = vmatpush.msrb.mxu1 %v348_v34  ;;  %v324_v33 = vunpack.c.h.bf16 %v277_v29 }
  0x60   : > { %903 = vmatpush.msk.msra.mxu2 %vm395_vm0, %v385_v30  ;;  %905 = vmatpush.msk.msra.mxu3 %vm395_vm0, %v386_v31  ;;  %v339_v30 = vunpack.c.l.bf16 %v285_v26  ;;  %v340_v31 = vunpack.c.h.bf16 %v285_v26 }
  0x61   : > { %896 = vmatmul.msk.f32.vlgmr.msrb.gmra.mxu2 %vm391_vm1, %v1216_v11  ;;  %898 = vmatmul.msk.f32.vlgmr.msrb.gmra.mxu3 %vm391_vm1, %v1216_v11 }
  0x62   : > { %656 = vmatpush.msra.mxu2 %v369_v37  ;;  %676 = vmatpush.msra.mxu3 %v370_v38 }
  0x63   : > { %538 = vmatpush.msrb.mxu0 %v331_v40  ;;  %558 = vmatpush.msrb.mxu1 %v332_v41 }
  0x64   : > { %657 = vmatpush.msra.mxu2 %v353_v43  ;;  %677 = vmatpush.msra.mxu3 %v354_v44 }
  0x65   : > { %539 = vmatpush.msrb.mxu0 %v315_v46  ;;  %559 = vmatpush.msrb.mxu1 %v316_v47 }
  0x66   : > { %658 = vmatpush.msra.mxu2 %v337_v51  ;;  %678 = vmatpush.msra.mxu3 %v338_v52 }
  0x67   : > { %899 = vmatpush.msk.msra.mxu0 %vm395_vm0, %v383_v48  ;;  %901 = vmatpush.msk.msra.mxu1 %vm395_vm0, %v384_v49 }
  0x68   : > { %892 = vmatmul.msk.f32.vlgmr.msrb.gmra.mxu0 %vm391_vm1, %v1216_v11  ;;  %894 = vmatmul.msk.f32.vlgmr.msrb.gmra.mxu1 %vm391_vm1, %v1216_v11 }
  0x69   : > { %616 = vmatpush.msra.mxu0 %v367_v55  ;;  %636 = vmatpush.msra.mxu1 %v368_v56 }
  0x6a   : > { %659 = vmatpush.msra.mxu2 %v321_v58  ;;  %679 = vmatpush.msra.mxu3 %v322_v59 }
  0x6b   : > { %617 = vmatpush.msra.mxu0 %v351_v63  ;;  %637 = vmatpush.msra.mxu1 %v352_v0 }
  0x6c   : > { %911 = vmatpush.msk.msrb.mxu2 %vm395_vm0, %v389_v60  ;;  %913 = vmatpush.msk.msrb.mxu3 %vm395_vm0, %v390_v61 }
  0x6d   : > { %904 = vmatmul.msk.f32.vlgmr.msra.gmra.mxu2 %vm391_vm1, %v1216_v11  ;;  %906 = vmatmul.msk.f32.vlgmr.msra.gmra.mxu3 %vm391_vm1, %v1216_v11 }
  0x6e   : > { %736 = vmatpush.msrb.mxu2 %v373_v3  ;;  %756 = vmatpush.msrb.mxu3 %v374_v4 }
  0x6f   : > { %618 = vmatpush.msra.mxu0 %v335_v6  ;;  %638 = vmatpush.msra.mxu1 %v336_v7 }
  0x70   : > { %737 = vmatpush.msrb.mxu2 %v357_v9  ;;  %757 = vmatpush.msrb.mxu3 %v358_v10 }
  0x71   : > { %619 = vmatpush.msra.mxu0 %v319_v13  ;;  %639 = vmatpush.msra.mxu1 %v320_v14 }
  0x72   : > { %738 = vmatpush.msrb.mxu2 %v341_v18  ;;  %758 = vmatpush.msrb.mxu3 %v342_v19 }
  0x73   : > { %907 = vmatpush.msk.msrb.mxu0 %vm395_vm0, %v387_v15  ;;  %909 = vmatpush.msk.msrb.mxu1 %vm395_vm0, %v388_v16 }
  0x74   : > { %900 = vmatmul.msk.f32.vlgmr.msra.gmra.mxu0 %vm391_vm1, %v1216_v11  ;;  %902 = vmatmul.msk.f32.vlgmr.msra.gmra.mxu1 %vm391_vm1, %v1216_v11 }
  0x75   : > { %696 = vmatpush.msrb.mxu0 %v371_v21  ;;  %716 = vmatpush.msrb.mxu1 %v372_v22 }
  0x76   : > { %739 = vmatpush.msrb.mxu2 %v325_v24  ;;  %759 = vmatpush.msrb.mxu3 %v326_v25 }
  0x77   : > { %912 = vmatmul.msk.f32.vlgmr.msrb.gmra.mxu2 %vm391_vm1, %v1216_v11  ;;  %914 = vmatmul.msk.f32.vlgmr.msrb.gmra.mxu3 %vm391_vm1, %v1216_v11 }
  0x78   : > { %697 = vmatpush.msrb.mxu0 %v355_v27  ;;  %717 = vmatpush.msrb.mxu1 %v356_v28 }
  0x7a   : > { %698 = vmatpush.msrb.mxu0 %v339_v30  ;;  %718 = vmatpush.msrb.mxu1 %v340_v31 }
  0x7c   : > { %699 = vmatpush.msrb.mxu0 %v323_v32  ;;  %719 = vmatpush.msrb.mxu1 %v324_v33 }
  0x7d   : > { %908 = vmatmul.msk.f32.vlgmr.msrb.gmra.mxu0 %vm391_vm1, %v1216_v11  ;;  %910 = vmatmul.msk.f32.vlgmr.msrb.gmra.mxu1 %vm391_vm1, %v1216_v11 }
  0xd8   : > { %v501_v11 = vpop.f32.mrf.mxu2  ;;  %v521_v34 = vpop.f32.mrf.mxu3 }
  0xd9   : > { %766 = vst [vmem:[%s1295_s25 + $0x10] sm:$0xff] %v501_v11 }
  0xda   : > { %v461_v35 = vpop.f32.mrf.mxu0  ;;  %v481_v36 = vpop.f32.mrf.mxu1  ;;  %767 = vst [vmem:[%s1295_s25 + $0x18] sm:$0xff] %v521_v34 }
  0xdb   : > { %764 = vst [vmem:[%s1295_s25] sm:$0xff] %v461_v35 }
  0xdc   : > { %765 = vst [vmem:[%s1295_s25 + $0x8] sm:$0xff] %v481_v36 }
  0xe4   : > { %v581_v37 = vpop.f32.mrf.mxu2  ;;  %v601_v38 = vpop.f32.mrf.mxu3 }
  0xe5   : > { %v541_v39 = vpop.f32.mrf.mxu0  ;;  %v561_v40 = vpop.f32.mrf.mxu1  ;;  %770 = vst [vmem:[%s1295_s25 + $0x30] sm:$0xff] %v581_v37 }
  0xe6   : > { %768 = vst [vmem:[%s1295_s25 + $0x20] sm:$0xff] %v541_v39 }
  0xe7   : > { %769 = vst [vmem:[%s1295_s25 + $0x28] sm:$0xff] %v561_v40 }
  0xe8   : > { %771 = vst [vmem:[%s1295_s25 + $0x38] sm:$0xff] %v601_v38 }
  0xf0   : > { %v661_v41 = vpop.f32.mrf.mxu2  ;;  %v681_v42 = vpop.f32.mrf.mxu3 }
  0xf1   : > { %v621_v43 = vpop.f32.mrf.mxu0  ;;  %v641_v44 = vpop.f32.mrf.mxu1  ;;  %774 = vst [vmem:[%s1295_s25 + $0x50] sm:$0xff] %v661_v41 }
  0xf2   : > { %772 = vst [vmem:[%s1295_s25 + $0x40] sm:$0xff] %v621_v43 }
  0xf3   : > { %773 = vst [vmem:[%s1295_s25 + $0x48] sm:$0xff] %v641_v44 }
  0xf4   : > { %775 = vst [vmem:[%s1295_s25 + $0x58] sm:$0xff] %v681_v42 }
  0xfa   : > { %v701_v45 = vpop.f32.mrf.mxu0  ;;  %v721_v46 = vpop.f32.mrf.mxu1 }
  0xfb   : > { %776 = vst [vmem:[%s1295_s25 + $0x60] sm:$0xff] %v701_v45  ;;  %v741_v47 = vpop.f32.mrf.mxu2  ;;  %v761_v48 = vpop.f32.mrf.mxu3 }
  0xfc   : > { %777 = vst [vmem:[%s1295_s25 + $0x68] sm:$0xff] %v721_v46 }
  0xfd   : > { %778 = vst [vmem:[%s1295_s25 + $0x70] sm:$0xff] %v741_v47 }
  0xfe   : > { %779 = vst [vmem:[%s1295_s25 + $0x78] sm:$0xff] %v761_v48 }
  0xff PF: > { %s12_s15 = sadd.s32 1, %s1030_s15   ;;  %s1337_s9 = smov %s1010_s10 }
 0x100   : > { %p9_p12 = scmp.ge.s32.totalorder %s12_s15, 6   ;;  %s1338_s10 = smov %s1098_s22 }
 0x101   : > { %s1339_s11 = smov %s1022_s13  ;;  %s1340_s12 = smov %s1026_s14 }
 0x102   : > { %s1341_s13 = smov %s1344_s16  ;;  %s1342_s14 = smov %s1348_s17 }
 0x103   :  { %11 = sbr.rel (!%p9_p12) target bundleno = 4 (0x4), region = 86 }

// kernel: swformer_forward.25
= control target key start
LH: loop header
LB: loop body
LE: loop exit
PB: predicated region body
PF: predicated region fallthrough
CT: control target
= control target key end

     0   :  { %s1411_s12 = smov 0   ;;  %s1413_s13 = smov 0   ;;  %s1852_s0 = inlined_call_operand.vmem [shape: f32[2,256,128], index: 0, kind: input, shape index: {}]   ;;  %s1853_s1 = inlined_call_operand.vmem [shape: f32[256,1], index: 1, kind: input, shape index: {}]   ;;  %s1854_s2 = inlined_call_operand.vmem [shape: f32[256,1], index: 2, kind: input, shape index: {}]   ;;  %s1855_s3 = inlined_call_operand.vmem [shape: bf16[2,256,128], index: 3, kind: output, shape index: {}]  }
   0x1   :  { %s1415_s14 = smov 0  }
   0x2 LB: > { %s1427_s15 = sadd.s32 4294967295, %s1387_s14   ;;  %s1430_s16 = sadd.s32 1, %s1387_s14   ;;  %s1387_s14 = sphi %s1415_s14, %s1859_s14   ;;  %s1383_s13 = sphi %s1413_s13, %s1858_s13   ;;  %s1379_s12 = sphi %s1411_s12, %s1857_s12  }
   0x3   : > { %s17_s17 = ssub.s32 %s1387_s14, %s1430_s16  ;;  %s20_s18 = sadd.s32 1, %s1383_s13 }
   0x4   : > { %p18_p0 = scmp.eq.s32.totalorder %s17_s17, 0  ;;  %p27_p1 = scmp.ne.s32.totalorder %s1383_s13, %s1379_s12 }
   0x5   : > { %p28_p2 = scmp.eq.s32.totalorder %s1387_s14, 0  ;;  %p109_p3 = scmp.eq.s32.totalorder %s1427_s15, 1 }
   0x6   : > { %s1440_s19 = scalar_select %p18_p0, %s1383_s13, %s20_s18  }
   0x7   : > { %p29_p4 = por %p28_p2, %p27_p1  ;;  %p1442_p5 = por %p109_p3, %p27_p1 }
   0x8   : > { %p1191_p6 = scmp.ge.s32.totalorder %s1387_s14, 2 }
   0xa   : > { %131 = sbr.rel (%p1191_p6) target bundleno = 51 (0x33), region = 16 }
   0xf   : > { %134 = sbr.rel (!%p29_p4) target bundleno = 51 (0x33), region = 20  ;;  %s136_s21 = sand.u32 (%p29_p4), 1, %s1383_s13  }
  0x10   : > { %s1271_s22 = sshll.u32 (%p29_p4), %s1387_s14, 7  ;;  %s1192_s23 = sshll.u32 (%p29_p4), %s136_s21, 8 }
  0x11   : > { %s1452_s26 = scalar_lea.vmem (%p29_p4), %s1852_s0, %s1271_s22  ;;  %s1457_s27 = scalar_lea.vmem (%p29_p4), [#allocation2], %s1192_s23 }
  0x12   : > { %v232_v0 = vld [vmem:[%s1452_s26] sm:$0xff] (%p29_p4)  ;;  %v234_v1 = vld [vmem:[%s1452_s26 + $0x8] sm:$0xff] (%p29_p4)  ;;  %v236_v2 = vld [vmem:[%s1452_s26 + $0x10] sm:$0xff] (%p29_p4) }
  0x13   : > { %233 = vst [vmem:[%s1457_s27] sm:$0xff] (%p29_p4), %v232_v0  ;;  %v238_v3 = vld [vmem:[%s1452_s26 + $0x18] sm:$0xff] (%p29_p4)  ;;  %v240_v4 = vld [vmem:[%s1452_s26 + $0x20] sm:$0xff] (%p29_p4)  ;;  %v242_v5 = vld [vmem:[%s1452_s26 + $0x28] sm:$0xff] (%p29_p4) }
  0x14   : > { %235 = vst [vmem:[%s1457_s27 + $0x8] sm:$0xff] %v234_v1  ;;  %v244_v6 = vld [vmem:[%s1452_s26 + $0x30] sm:$0xff]  ;;  %v246_v7 = vld [vmem:[%s1452_s26 + $0x38] sm:$0xff]  ;;  %v248_v8 = vld [vmem:[%s1452_s26 + $0x40] sm:$0xff] }
  0x15   : > { %237 = vst [vmem:[%s1457_s27 + $0x10] sm:$0xff] %v236_v2  ;;  %v250_v9 = vld [vmem:[%s1452_s26 + $0x48] sm:$0xff]  ;;  %v252_v10 = vld [vmem:[%s1452_s26 + $0x50] sm:$0xff]  ;;  %v254_v11 = vld [vmem:[%s1452_s26 + $0x58] sm:$0xff] }
  0x16   : > { %239 = vst [vmem:[%s1457_s27 + $0x18] sm:$0xff] %v238_v3  ;;  %v256_v12 = vld [vmem:[%s1452_s26 + $0x60] sm:$0xff]  ;;  %v258_v13 = vld [vmem:[%s1452_s26 + $0x68] sm:$0xff]  ;;  %v260_v14 = vld [vmem:[%s1452_s26 + $0x70] sm:$0xff] }
  0x17   : > { %241 = vst [vmem:[%s1457_s27 + $0x20] sm:$0xff] %v240_v4  ;;  %v262_v15 = vld [vmem:[%s1452_s26 + $0x78] sm:$0xff]  ;;  %v264_v16 = vld [vmem:[%s1452_s26 + $0x100] sm:$0xff]  ;;  %v266_v17 = vld [vmem:[%s1452_s26 + $0x108] sm:$0xff] }
  0x18   : > { %243 = vst [vmem:[%s1457_s27 + $0x28] sm:$0xff] %v242_v5  ;;  %v268_v18 = vld [vmem:[%s1452_s26 + $0x110] sm:$0xff]  ;;  %v270_v19 = vld [vmem:[%s1452_s26 + $0x118] sm:$0xff]  ;;  %v272_v20 = vld [vmem:[%s1452_s26 + $0x120] sm:$0xff] }
  0x19   : > { %245 = vst [vmem:[%s1457_s27 + $0x30] sm:$0xff] %v244_v6  ;;  %v274_v21 = vld [vmem:[%s1452_s26 + $0x128] sm:$0xff]  ;;  %v276_v22 = vld [vmem:[%s1452_s26 + $0x130] sm:$0xff]  ;;  %v278_v23 = vld [vmem:[%s1452_s26 + $0x138] sm:$0xff] }
  0x1a   : > { %247 = vst [vmem:[%s1457_s27 + $0x38] sm:$0xff] %v246_v7  ;;  %v280_v24 = vld [vmem:[%s1452_s26 + $0x140] sm:$0xff]  ;;  %v282_v25 = vld [vmem:[%s1452_s26 + $0x148] sm:$0xff]  ;;  %v284_v26 = vld [vmem:[%s1452_s26 + $0x150] sm:$0xff] }
  0x1b   : > { %249 = vst [vmem:[%s1457_s27 + $0x40] sm:$0xff] %v248_v8  ;;  %v286_v27 = vld [vmem:[%s1452_s26 + $0x158] sm:$0xff]  ;;  %v288_v28 = vld [vmem:[%s1452_s26 + $0x160] sm:$0xff]  ;;  %v290_v29 = vld [vmem:[%s1452_s26 + $0x168] sm:$0xff] }
  0x1c   : > { %251 = vst [vmem:[%s1457_s27 + $0x48] sm:$0xff] %v250_v9  ;;  %v292_v30 = vld [vmem:[%s1452_s26 + $0x170] sm:$0xff]  ;;  %v294_v31 = vld [vmem:[%s1452_s26 + $0x178] sm:$0xff] }
  0x1d   : > { %253 = vst [vmem:[%s1457_s27 + $0x50] sm:$0xff] %v252_v10 }
  0x1e   : > { %255 = vst [vmem:[%s1457_s27 + $0x58] sm:$0xff] %v254_v11 }
  0x1f   : > { %257 = vst [vmem:[%s1457_s27 + $0x60] sm:$0xff] %v256_v12 }
  0x20   : > { %259 = vst [vmem:[%s1457_s27 + $0x68] sm:$0xff] %v258_v13 }
  0x21   : > { %261 = vst [vmem:[%s1457_s27 + $0x70] sm:$0xff] %v260_v14 }
  0x22   : > { %263 = vst [vmem:[%s1457_s27 + $0x78] sm:$0xff] %v262_v15 }
  0x23   : > { %265 = vst [vmem:[%s1457_s27 + $0x80] sm:$0xff] %v264_v16 }
  0x24   : > { %267 = vst [vmem:[%s1457_s27 + $0x88] sm:$0xff] %v266_v17 }
  0x25   : > { %269 = vst [vmem:[%s1457_s27 + $0x90] sm:$0xff] %v268_v18 }
  0x26   : > { %271 = vst [vmem:[%s1457_s27 + $0x98] sm:$0xff] %v270_v19 }
  0x27   : > { %273 = vst [vmem:[%s1457_s27 + $0xa0] sm:$0xff] %v272_v20 }
  0x28   : > { %275 = vst [vmem:[%s1457_s27 + $0xa8] sm:$0xff] %v274_v21 }
  0x29   : > { %277 = vst [vmem:[%s1457_s27 + $0xb0] sm:$0xff] %v276_v22 }
  0x2a   : > { %279 = vst [vmem:[%s1457_s27 + $0xb8] sm:$0xff] %v278_v23 }
  0x2b   : > { %281 = vst [vmem:[%s1457_s27 + $0xc0] sm:$0xff] %v280_v24 }
  0x2c   : > { %283 = vst [vmem:[%s1457_s27 + $0xc8] sm:$0xff] %v282_v25 }
  0x2d   : > { %285 = vst [vmem:[%s1457_s27 + $0xd0] sm:$0xff] %v284_v26 }
  0x2e   : > { %287 = vst [vmem:[%s1457_s27 + $0xd8] sm:$0xff] %v286_v27 }
  0x2f   : > { %289 = vst [vmem:[%s1457_s27 + $0xe0] sm:$0xff] %v288_v28 }
  0x30   : > { %291 = vst [vmem:[%s1457_s27 + $0xe8] sm:$0xff] %v290_v29 }
  0x31   : > { %293 = vst [vmem:[%s1457_s27 + $0xf0] sm:$0xff] %v292_v30 }
  0x32   : > { %295 = vst [vmem:[%s1457_s27 + $0xf8] sm:$0xff] %v294_v31 }
  0x33 PF: > { %p1195_p7 = scmp.ge.s32.totalorder %s1387_s14, 1  ;;  %p318_p8 = scmp.lt.s32.totalorder %s1387_s14, 3 }
  0x35   : > { %p319_p9 = pnand %p1195_p7, %p318_p8 }
  0x36   : > { %s1198_s28 = sshll.u32 (!%p319_p9), %s1427_s15, 4  ;;  %s325_s9 = sand.u32 (!%p319_p9), 1, %s1379_s12  }
  0x37   : > { %322 = sbr.rel (%p319_p9) target bundleno = 289 (0x121), region = 66  ;;  %p359_p10 = scmp.lt.s32.totalorder (!%p319_p9), %s1198_s28, 31 }
  0x38   : > { %s1196_s10 = sshll.u32 (!%p319_p9), %s325_s9, 8  ;;  %s1665_s14 = sshll.u32 (!%p319_p9), %s325_s9, 7 }
  0x39   : > { %s1589_s11 = scalar_lea.vmem (!%p319_p9), [#allocation2], %s1196_s10  ;;  %s1695_s12 = scalar_lea.vmem (!%p319_p9), [#allocation3], %s1665_s14 }
  0x3c   : > { %v1389_v32 = vmov 0   ;;  %s1861_s28 = smov (!%p359_p10, %s1198_s28), 31  ;;  %v404_v10 = vld [vmem:[%s1589_s11 + $0x8] sm:$0xff]  ;;  %v407_v17 = vld [vmem:[%s1589_s11 + $0x20] sm:$0xff]  ;;  %v1390_v23 = vmov 0.0   ;;  %v410_v26 = vld [vmem:[%s1589_s11 + $0x38] sm:$0xff] }
  0x3d   : > { %1364 = vset.pattern.permute.xlu2 %v1389_v32  ;;  %1363 = vset.pattern.permute.xlu1 %v1389_v32  ;;  %s1199_s29 = sshll.u32 %s1861_s28, 3  ;;  %v1219_v28 = vld [vmem:[%s1589_s11 + $0x88] sm:$0xff]  ;;  %s1272_s17 = sshll.u32 (%p1442_p5), %s1427_s15, 6 }
  0x3e   : > { %1362 = vset.pattern.permute.xlu0 %v1389_v32  ;;  %s1531_s5 = scalar_lea.vmem %s1853_s1, %s1199_s29  ;;  %s1553_s8 = scalar_lea.vmem %s1854_s2, %s1199_s29 }
  0x3f   : > { %v375_v33 = vld [vmem:[%s1531_s5 + $0x20] sm:$0xff]  ;;  %v373_v34 = vld [vmem:[%s1531_s5 + $0x10] sm:$0xff]  ;;  %v376_v36 = vld [vmem:[%s1531_s5 + $0x28] sm:$0xff]  ;;  %s942_s22 = scalar_lea.vmem (%p1442_p5), %s1855_s3, %s1272_s17 }
  0x40   : > { %v371_v35 = vld [vmem:[%s1531_s5] sm:$0xff]  ;;  %441 = vperm.xlu2 %1364, %v375_v33   ;;  %431 = vperm.xlu1 %1363, %v373_v34   ;;  %v374_v37 = vld [vmem:[%s1531_s5 + $0x18] sm:$0xff]  ;;  %v372_v38 = vld [vmem:[%s1531_s5 + $0x8] sm:$0xff] }
  0x41   : > { %421 = vperm.xlu0 %1362, %v371_v35   ;;  %v379_v39 = vld [vmem:[%s1531_s5 + $0x40] sm:$0xff]  ;;  %v378_v40 = vld [vmem:[%s1531_s5 + $0x38] sm:$0xff]  ;;  %v377_v41 = vld [vmem:[%s1531_s5 + $0x30] sm:$0xff] }
  0x42   : > { %v382_v42 = vld [vmem:[%s1531_s5 + $0x58] sm:$0xff]  ;;  %v381_v43 = vld [vmem:[%s1531_s5 + $0x50] sm:$0xff]  ;;  %v380_v44 = vld [vmem:[%s1531_s5 + $0x48] sm:$0xff] }
  0x43   : > { %v385_v45 = vld [vmem:[%s1531_s5 + $0x70] sm:$0xff]  ;;  %v384_v46 = vld [vmem:[%s1531_s5 + $0x68] sm:$0xff]  ;;  %v383_v47 = vld [vmem:[%s1531_s5 + $0x60] sm:$0xff] }
  0x44   : > { %v388_v48 = vld [vmem:[%s1553_s8 + $0x8] sm:$0xff]  ;;  %v387_v49 = vld [vmem:[%s1553_s8] sm:$0xff]  ;;  %v386_v50 = vld [vmem:[%s1531_s5 + $0x78] sm:$0xff] }
  0x45   : > { %v391_v51 = vld [vmem:[%s1553_s8 + $0x20] sm:$0xff]  ;;  %v390_v52 = vld [vmem:[%s1553_s8 + $0x18] sm:$0xff]  ;;  %v389_v53 = vld [vmem:[%s1553_s8 + $0x10] sm:$0xff] }
  0x46   : > { %v394_v54 = vld [vmem:[%s1553_s8 + $0x38] sm:$0xff]  ;;  %v393_v55 = vld [vmem:[%s1553_s8 + $0x30] sm:$0xff]  ;;  %v392_v56 = vld [vmem:[%s1553_s8 + $0x28] sm:$0xff] }
  0x47   : > { %v397_v57 = vld [vmem:[%s1553_s8 + $0x50] sm:$0xff]  ;;  %v396_v58 = vld [vmem:[%s1553_s8 + $0x48] sm:$0xff]  ;;  %v395_v59 = vld [vmem:[%s1553_s8 + $0x40] sm:$0xff] }
  0x48   : > { %446 = vperm.xlu2 %1364, %v376_v36   ;;  %436 = vperm.xlu1 %1363, %v374_v37   ;;  %v400_v60 = vld [vmem:[%s1553_s8 + $0x68] sm:$0xff]  ;;  %v399_v61 = vld [vmem:[%s1553_s8 + $0x60] sm:$0xff]  ;;  %v398_v62 = vld [vmem:[%s1553_s8 + $0x58] sm:$0xff] }
  0x49   : > { %426 = vperm.xlu0 %1362, %v372_v38   ;;  %v402_v63 = vld [vmem:[%s1553_s8 + $0x78] sm:$0xff]  ;;  %v401_v0 = vld [vmem:[%s1553_s8 + $0x70] sm:$0xff] }
  0x50   : > { %461 = vperm.xlu2 %1364, %v379_v39   ;;  %456 = vperm.xlu1 %1363, %v378_v40   ;;  %v1222_v40 = vld [vmem:[%s1589_s11 + $0xa0] sm:$0xff] }
  0x51   : > { %451 = vperm.xlu0 %1362, %v377_v41   ;;  %v403_v41 = vld [vmem:[%s1589_s11] sm:$0xff] }
  0x58   : > { %476 = vperm.xlu2 %1364, %v382_v42   ;;  %471 = vperm.xlu1 %1363, %v381_v43  }
  0x59   : > { %466 = vperm.xlu0 %1362, %v380_v44  }
  0x60   : > { %491 = vperm.xlu2 %1364, %v385_v45   ;;  %486 = vperm.xlu1 %1363, %v384_v46   ;;  %v408_v45 = vld [vmem:[%s1589_s11 + $0x28] sm:$0xff] }
  0x61   : > { %481 = vperm.xlu0 %1362, %v383_v47   ;;  %v1223_v46 = vld [vmem:[%s1589_s11 + $0xa8] sm:$0xff] }
  0x68   : > { %522 = vperm.xlu2 %1364, %v388_v48   ;;  %517 = vperm.xlu1 %1363, %v387_v49   ;;  %v411_v48 = vld [vmem:[%s1589_s11 + $0x40] sm:$0xff] }
  0x69   : > { %496 = vperm.xlu0 %1362, %v386_v50   ;;  %v1226_v49 = vld [vmem:[%s1589_s11 + $0xc0] sm:$0xff]  ;;  %v414_v50 = vld [vmem:[%s1589_s11 + $0x58] sm:$0xff] }
  0x70   : > { %537 = vperm.xlu2 %1364, %v391_v51   ;;  %532 = vperm.xlu1 %1363, %v390_v52  }
  0x71   : > { %527 = vperm.xlu0 %1362, %v389_v53  }
  0x78   : > { %552 = vperm.xlu2 %1364, %v394_v54   ;;  %547 = vperm.xlu1 %1363, %v393_v55   ;;  %v1229_v54 = vld [vmem:[%s1589_s11 + $0xd8] sm:$0xff]  ;;  %v405_v55 = vld [vmem:[%s1589_s11 + $0x10] sm:$0xff] }
  0x79   : > { %542 = vperm.xlu0 %1362, %v392_v56  }
  0x80   : > { %567 = vperm.xlu2 %1364, %v397_v57   ;;  %562 = vperm.xlu1 %1363, %v396_v58   ;;  %v413_v58 = vld [vmem:[%s1589_s11 + $0x50] sm:$0xff] }
  0x81   : > { %557 = vperm.xlu0 %1362, %v395_v59  }
  0x88   : > { %582 = vperm.xlu2 %1364, %v400_v60   ;;  %577 = vperm.xlu1 %1363, %v399_v61  }
  0x89   : > { %572 = vperm.xlu0 %1362, %v398_v62  }
  0x90   : > { %592 = vperm.xlu1 %1363, %v402_v63   ;;  %v1220_v63 = vld [vmem:[%s1589_s11 + $0x90] sm:$0xff] }
  0x91   : > { %587 = vperm.xlu0 %1362, %v401_v0   ;;  %v1225_v0 = vld [vmem:[%s1589_s11 + $0xb8] sm:$0xff] }
  0x9a   : > { %v442_v1 = vpop.permute.xlu2 %441 }
  0x9b   : > { %v503_v18 = vmul.f32 %v442_v1, %v407_v17  ;;  %v776_v44 = vmul.f32 %v1222_v40, %v442_v1 }
  0xa2   : > { %v1572_v2 = vpop.permute.xlu2 %446 }
  0xa3   : > { %v1638_v61 = vmul.f32 %v1572_v2, %v408_v45  ;;  %v1641_v62 = vmul.f32 %v1223_v46, %v1572_v2 }
  0xaa   : > { %v1574_v3 = vpop.permute.xlu2 %461 }
  0xb2   : > { %v1576_v4 = vpop.permute.xlu2 %476  ;;  %v1578_v5 = vpop.permute.xlu1 %431 }
  0xb3   : > { %v1580_v6 = vpop.permute.xlu0 %421  ;;  %v501_v17 = vmul.f32 %v1578_v5, %v405_v55 }
  0xb4   : > { %v499_v51 = vmul.f32 %v1580_v6, %v403_v41  ;;  %v1228_v41 = vld [vmem:[%s1589_s11 + $0xd0] sm:$0xff] }
  0xba   : > { %v1585_v7 = vpop.permute.xlu2 %491  ;;  %v1587_v8 = vpop.permute.xlu1 %436 }
  0xbb   : > { %v427_v9 = vpop.permute.xlu0 %426 }
  0xbc   : > { %v500_v11 = vmul.f32 %v427_v9, %v404_v10  ;;  %v773_v33 = vmul.f32 %v1219_v28, %v427_v9  ;;  %v1646_v9 = vmul.f32 %v1574_v3, %v411_v48  ;;  %v1649_v10 = vmul.f32 %v1226_v49, %v1574_v3  ;;  %v412_v48 = vld [vmem:[%s1589_s11 + $0x48] sm:$0xff] }
  0xc2   : > { %v523_v12 = vpop.permute.xlu2 %522  ;;  %v1592_v13 = vpop.permute.xlu1 %456 }
  0xc3   : > { %v596_v14 = vadd.f32 %v523_v12, %v500_v11  ;;  %v1594_v15 = vpop.permute.xlu0 %451  ;;  %v506_v29 = vmul.f32 %v1592_v13, %v410_v26  ;;  %v789_v37 = vadd.f32 %v773_v33, %v523_v12  ;;  %v1652_v11 = vmul.f32 %v1576_v4, %v414_v50  ;;  %v1218_v12 = vld [vmem:[%s1589_s11 + $0x80] sm:$0xff]  ;;  %v1221_v26 = vld [vmem:[%s1589_s11 + $0x98] sm:$0xff] }
  0xc5   : > { %v612_v16 = vmul.f32 0.5, %v596_v14  ;;  %v417_v14 = vld [vmem:[%s1589_s11 + $0x70] sm:$0xff] }
  0xc6   : > { %v1675_v33 = vmul.f32 %v1585_v7, %v417_v14 }
  0xc7   : > { %vm644_vm0 = vcmp.ge.f32.partialorder %v612_v16, 1.0 }
  0xc8   : > { %v1602_v24 = vsel %vm644_vm0, 1.0, %v1390_v23 }
  0xc9   : > { %v724_v27 = vsub.f32 1.0, %v1602_v24 }
  0xca   : > { %v538_v19 = vpop.permute.xlu2 %537  ;;  %v1597_v20 = vpop.permute.xlu1 %471 }
  0xcb   : > { %v599_v21 = vadd.f32 %v538_v19, %v503_v18  ;;  %v1599_v22 = vpop.permute.xlu0 %466  ;;  %v740_v34 = vmul.f32 %v724_v27, %v612_v16  ;;  %v792_v57 = vadd.f32 %v776_v44, %v538_v19  ;;  %v1658_v16 = vmul.f32 %v1229_v54, %v1576_v4  ;;  %v416_v19 = vld [vmem:[%s1589_s11 + $0x68] sm:$0xff] }
  0xcc   : > { %v509_v18 = vmul.f32 %v1597_v20, %v413_v58  ;;  %v779_v4 = vmul.f32 %v1225_v0, %v1592_v13  ;;  %v1227_v54 = vld [vmem:[%s1589_s11 + $0xc8] sm:$0xff] }
  0xcd   : > { %v615_v25 = vmul.f32 0.5, %v599_v21  ;;  %v805_v42 = vsub.f32 %v789_v37, %v740_v34  ;;  %v1668_v21 = vmul.f32 %v1220_v63, %v1578_v5  ;;  %v1231_v63 = vld [vmem:[%s1589_s11 + $0xe8] sm:$0xff] }
  0xcf   : > { %vm647_vm1 = vcmp.ge.f32.partialorder %v615_v25, 1.0  ;;  %v821_v56 = vmul.f32 0.5, %v805_v42 }
  0xd0   : > { %v1609_v30 = vsel %vm647_vm1, 1.0, %v1390_v23 }
  0xd1   : > { %v727_v38 = vsub.f32 1.0, %v1609_v30  ;;  %v837_v27 = vadd.f32 %v821_v56, %v740_v34 }
  0xd2   : > { %v553_v31 = vpop.permute.xlu2 %552  ;;  %v1611_v32 = vpop.permute.xlu1 %486 }
  0xd3   : > { %v602_v35 = vadd.f32 %v553_v31, %v506_v29  ;;  %v1613_v36 = vpop.permute.xlu0 %481  ;;  %v1623_v47 = vmul.f32 %v727_v38, %v615_v25  ;;  %v406_v25 = vld [vmem:[%s1589_s11 + $0x18] sm:$0xff]  ;;  %v772_v29 = vmul.f32 %v1218_v12, %v1580_v6  ;;  %v795_v38 = vadd.f32 %v779_v4, %v553_v31  ;;  %v415_v12 = vld [vmem:[%s1589_s11 + $0x60] sm:$0xff] }
  0xd4   : > { %v512_v40 = vmul.f32 %v1611_v32, %v416_v19  ;;  %v502_v13 = vmul.f32 %v1587_v8, %v406_v25  ;;  %v775_v6 = vmul.f32 %v1221_v26, %v1587_v8  ;;  %vm853_vm4 = vcmp.ge.f32.partialorder %v837_v27, 1.0 }
  0xd5   : > { %v618_v39 = vmul.f32 0.5, %v602_v35  ;;  %v808_v2 = vsub.f32 %v792_v57, %v1623_v47  ;;  %v409_v35 = vld [vmem:[%s1589_s11 + $0x30] sm:$0xff]  ;;  %v1711_v19 = vmul.f32 %v1227_v54, %v1599_v22 }
  0xd6   : > { %v505_v31 = vmul.f32 %v1594_v15, %v409_v35 }
  0xd7   : > { %vm650_vm2 = vcmp.ge.f32.partialorder %v618_v39, 1.0  ;;  %v824_v5 = vmul.f32 0.5, %v808_v2 }
  0xd8   : > { %v1619_v43 = vsel %vm650_vm2, 1.0, %v1390_v23 }
  0xd9   : > { %v730_v59 = vsub.f32 1.0, %v1619_v43  ;;  %v840_v58 = vadd.f32 %v824_v5, %v1623_v47  ;;  %v1714_v47 = vmul.f32 %v1231_v63, %v1611_v32 }
  0xda   : > { %v1629_v52 = vpop.permute.xlu2 %567  ;;  %v518_v53 = vpop.permute.xlu1 %517 }
  0xdb   : > { %v1635_v60 = vpop.permute.xlu0 %496  ;;  %v595_v1 = vadd.f32 %v518_v53, %v499_v51  ;;  %v746_v28 = vmul.f32 %v730_v59, %v618_v39  ;;  %v605_v37 = vadd.f32 %v1629_v52, %v509_v18  ;;  %v1224_v39 = vld [vmem:[%s1589_s11 + $0xb0] sm:$0xff]  ;;  %v788_v55 = vadd.f32 %v772_v29, %v518_v53 }
  0xdc   : > { %v1699_v57 = vmul.f32 %v1224_v39, %v1594_v15  ;;  %v782_v59 = vmul.f32 %v1228_v41, %v1597_v20  ;;  %v1235_v53 = vsel %vm853_vm4, 1.0, %v1390_v23  ;;  %vm856_vm7 = vcmp.ge.f32.partialorder %v840_v58, 1.0 }
  0xdd   : > { %v611_v3 = vmul.f32 0.5, %v595_v1  ;;  %v811_v49 = vsub.f32 %v795_v38, %v746_v28  ;;  %v1692_v8 = vmul.f32 0.5, %v605_v37  ;;  %v508_v1 = vmul.f32 %v1599_v22, %v412_v48  ;;  %v1230_v38 = vld [vmem:[%s1589_s11 + $0xe0] sm:$0xff] }
  0xde   : > { %v1737_v54 = vmul.f32 %v1230_v38, %v1613_v36 }
  0xdf   : > { %vm643_vm3 = vcmp.ge.f32.partialorder %v611_v3, 1.0  ;;  %v827_v15 = vmul.f32 0.5, %v811_v49  ;;  %vm653_vm5 = vcmp.ge.f32.partialorder %v1692_v8, 1.0 }
  0xe0   : > { %v1202_v34 = vsel %vm643_vm3, 1.0, %v1390_v23  ;;  %v1726_v29 = vsel %vm653_vm5, 1.0, %v1390_v23 }
  0xe1   : > { %v1274_v42 = vpack.c.bf16 %v1602_v24, %v1202_v34  ;;  %v723_v44 = vsub.f32 1.0, %v1202_v34  ;;  %v1723_v4 = vadd.f32 %v827_v15, %v746_v28 }
  0xe2   : > { %v1686_v45 = vpop.permute.xlu2 %582  ;;  %v533_v46 = vpop.permute.xlu1 %532 }
  0xe3   : > { %v608_v50 = vadd.f32 %v1686_v45, %v512_v40  ;;  %v528_v51 = vpop.permute.xlu0 %527  ;;  %1275 = vst [vmem:[%s1695_s12] sm:$0xff] %v1274_v42   ;;  %v739_v24 = vmul.f32 %v723_v44, %v611_v3  ;;  %v598_v56 = vadd.f32 %v533_v46, %v502_v13  ;;  %v791_v34 = vadd.f32 %v775_v6, %v533_v46 }
  0xe4   : > { %v597_v0 = vadd.f32 %v528_v51, %v501_v17  ;;  %v1718_v17 = vmul.f32 %v1613_v36, %v415_v12  ;;  %v790_v42 = vadd.f32 %v1668_v21, %v528_v51  ;;  %v733_v6 = vsub.f32 1.0, %v1726_v29 }
  0xe5   : > { %v804_v14 = vsub.f32 %v788_v55, %v739_v24  ;;  %v1706_v2 = vmul.f32 0.5, %v608_v50  ;;  %v614_v18 = vmul.f32 0.5, %v598_v56  ;;  %v1741_v46 = vadd.f32 %v782_v59, %v1629_v52 }
  0xe6   : > { %v613_v3 = vmul.f32 0.5, %v597_v0  ;;  %vm859_vm12 = vcmp.ge.f32.partialorder %v1723_v4, 1.0  ;;  %v1753_v63 = vmul.f32 %v733_v6, %v1692_v8  ;;  %v418_v8 = vld [vmem:[%s1589_s11 + $0x78] sm:$0xff] }
  0xe7   : > { %v820_v20 = vmul.f32 0.5, %v804_v14  ;;  %vm646_vm6 = vcmp.ge.f32.partialorder %v614_v18, 1.0  ;;  %vm656_vm9 = vcmp.ge.f32.partialorder %v1706_v2, 1.0 }
  0xe8   : > { %v1205_v25 = vsel %vm646_vm6, 1.0, %v1390_v23  ;;  %vm645_vm8 = vcmp.ge.f32.partialorder %v613_v3, 1.0  ;;  %v1731_v41 = vsel %vm656_vm9, 1.0, %v1390_v23 }
  0xe9   : > { %v836_v26 = vadd.f32 %v820_v20, %v739_v24  ;;  %v726_v22 = vsub.f32 1.0, %v1205_v25  ;;  %v1204_v32 = vsel %vm645_vm8, 1.0, %v1390_v23  ;;  %v1745_v24 = vsel %vm856_vm7, 1.0, %v1390_v23 }
  0xea   : > { %v548_v27 = vpop.permute.xlu1 %547  ;;  %v1277_v35 = vpack.c.bf16 %v1205_v25, %v1204_v32  ;;  %v725_v37 = vsub.f32 1.0, %v1204_v32  ;;  %v736_v36 = vsub.f32 1.0, %v1731_v41 }
  0xeb   : > { %v543_v5 = vpop.permute.xlu0 %542  ;;  %vm852_vm10 = vcmp.ge.f32.partialorder %v836_v26, 1.0  ;;  %v742_v40 = vmul.f32 %v726_v22, %v614_v18  ;;  %v601_v13 = vadd.f32 %v548_v27, %v505_v31  ;;  %v794_v15 = vadd.f32 %v1699_v57, %v548_v27 }
  0xec   : > { %v1234_v39 = vsel %vm852_vm10, 1.0, %v1390_v23  ;;  %1321 = vst [vmem:[%s1695_s12 + $0x8] sm:$0xff] %v1277_v35   ;;  %v741_v28 = vmul.f32 %v725_v37, %v613_v3  ;;  %v600_v50 = vadd.f32 %v543_v5, %v1638_v61  ;;  %v1762_v26 = vmul.f32 %v736_v36, %v1706_v2 }
  0xed   : > { %v1298_v44 = vpack.c.bf16 %v1235_v53, %v1234_v39  ;;  %v807_v48 = vsub.f32 %v791_v34, %v742_v40  ;;  %v617_v49 = vmul.f32 0.5, %v601_v13  ;;  %v801_v27 = vadd.f32 %v1714_v47, %v1686_v45 }
  0xee   : > { %v806_v31 = vsub.f32 %v790_v42, %v741_v28  ;;  %v616_v51 = vmul.f32 0.5, %v600_v50  ;;  %v1241_v2 = vsel %vm859_vm12, 1.0, %v1390_v23  ;;  %v514_v34 = vmul.f32 %v1635_v60, %v418_v8 }
  0xef   : > { %1328 = vst [vmem:[%s1695_s12 + $0x40] sm:$0xff] %v1298_v44   ;;  %v823_v21 = vmul.f32 0.5, %v807_v48  ;;  %vm649_vm11 = vcmp.ge.f32.partialorder %v617_v49, 1.0  ;;  %v817_v39 = vsub.f32 %v801_v27, %v1762_v26  ;;  %v814_v48 = vsub.f32 %v1741_v46, %v1753_v63 }
  0xf0   : > { %v822_v61 = vmul.f32 0.5, %v806_v31  ;;  %v1208_v55 = vsel %vm649_vm11, 1.0, %v1390_v23  ;;  %vm648_vm13 = vcmp.ge.f32.partialorder %v616_v51, 1.0 }
  0xf1   : > { %v839_v56 = vadd.f32 %v823_v21, %v742_v40  ;;  %v1283_v52 = vpack.c.bf16 %v1619_v43, %v1208_v55  ;;  %v729_v59 = vsub.f32 1.0, %v1208_v55  ;;  %v1207_v12 = vsel %vm648_vm13, 1.0, %v1390_v23 }
  0xf2   : > { %v563_v58 = vpop.permute.xlu1 %562  ;;  %v838_v0 = vadd.f32 %v822_v61, %v741_v28  ;;  %v1280_v43 = vpack.c.bf16 %v1207_v12, %v1609_v30  ;;  %v728_v20 = vsub.f32 1.0, %v1207_v12  ;;  %v793_v30 = vadd.f32 %v1641_v62, %v543_v5 }
  0xf3   : > { %v604_v14 = vadd.f32 %v563_v58, %v508_v1  ;;  %v558_v18 = vpop.permute.xlu0 %557  ;;  %vm855_vm14 = vcmp.ge.f32.partialorder %v839_v56, 1.0  ;;  %1323 = vst [vmem:[%s1695_s12 + $0x18] sm:$0xff] %v1283_v52   ;;  %v745_v53 = vmul.f32 %v729_v59, %v617_v49  ;;  %v797_v5 = vadd.f32 %v1711_v19, %v563_v58 }
  0xf4   : > { %v1237_v3 = vsel %vm855_vm14, 1.0, %v1390_v23  ;;  %vm854_vm15 = vcmp.ge.f32.partialorder %v838_v0, 1.0  ;;  %1322 = vst [vmem:[%s1695_s12 + $0x10] sm:$0xff] %v1280_v43   ;;  %v603_v32 = vadd.f32 %v558_v18, %v1646_v9  ;;  %v744_v57 = vmul.f32 %v728_v20, %v616_v51  ;;  %v1233_v43 = vld [vmem:[%s1589_s11 + $0xf8] sm:$0xff] }
  0xf5   : > { %v620_v25 = vmul.f32 0.5, %v604_v14  ;;  %v1236_v1 = vsel %vm854_vm15, 1.0, %v1390_v23  ;;  %v810_v22 = vsub.f32 %v794_v15, %v745_v53  ;;  %v796_v61 = vadd.f32 %v1649_v10, %v558_v18 }
  0xf6   : > { %v1301_v35 = vpack.c.bf16 %v1237_v3, %v1236_v1  ;;  %v619_v40 = vmul.f32 0.5, %v603_v32  ;;  %v809_v9 = vsub.f32 %v793_v30, %v744_v57  ;;  %v833_v55 = vmul.f32 0.5, %v817_v39 }
  0xf7   : > { %vm652_vm0 = vcmp.ge.f32.partialorder %v620_v25, 1.0  ;;  %v826_v37 = vmul.f32 0.5, %v810_v22  ;;  %v830_v14 = vmul.f32 0.5, %v814_v48  ;;  %v787_v30 = vmul.f32 %v1233_v43, %v1635_v60 }
  0xf8   : > { %v1211_v38 = vsel %vm652_vm0, 1.0, %v1390_v23  ;;  %1329 = vst [vmem:[%s1695_s12 + $0x48] sm:$0xff] %v1301_v35   ;;  %vm651_vm1 = vcmp.ge.f32.partialorder %v619_v40, 1.0  ;;  %v825_v47 = vmul.f32 0.5, %v809_v9 }
  0xf9   : > { %v732_v13 = vsub.f32 1.0, %v1211_v38  ;;  %v842_v62 = vadd.f32 %v826_v37, %v745_v53  ;;  %v1210_v42 = vsel %vm651_vm1, 1.0, %v1390_v23 }
  0xfa   : > { %v578_v45 = vpop.permute.xlu1 %577  ;;  %v1286_v49 = vpack.c.bf16 %v1211_v38, %v1210_v42  ;;  %v731_v50 = vsub.f32 1.0, %v1210_v42  ;;  %v841_v19 = vadd.f32 %v825_v47, %v744_v57 }
  0xfb   : > { %v748_v28 = vmul.f32 %v732_v13, %v620_v25  ;;  %v607_v4 = vadd.f32 %v578_v45, %v1718_v17  ;;  %v573_v44 = vpop.permute.xlu0 %572  ;;  %vm858_vm2 = vcmp.ge.f32.partialorder %v842_v62, 1.0  ;;  %v800_v53 = vadd.f32 %v1737_v54, %v578_v45 }
  0xfc   : > { %v1240_v6 = vsel %vm858_vm2, 1.0, %v1390_v23  ;;  %1324 = vst [vmem:[%s1695_s12 + $0x20] sm:$0xff] %v1286_v49   ;;  %v747_v36 = vmul.f32 %v731_v50, %v619_v40  ;;  %v606_v17 = vadd.f32 %v573_v44, %v1652_v11  ;;  %vm857_vm3 = vcmp.ge.f32.partialorder %v841_v19, 1.0 }
  0xfd   : > { %v813_v31 = vsub.f32 %v797_v5, %v748_v28  ;;  %v623_v21 = vmul.f32 0.5, %v607_v4  ;;  %v1307_v51 = vpack.c.bf16 %v1241_v2, %v1240_v6  ;;  %v1239_v46 = vsel %vm857_vm3, 1.0, %v1390_v23 }
  0xfe   : > { %v812_v52 = vsub.f32 %v796_v61, %v747_v36  ;;  %v622_v58 = vmul.f32 0.5, %v606_v17  ;;  %v1304_v0 = vpack.c.bf16 %v1239_v46, %v1745_v24  ;;  %v799_v37 = vadd.f32 %v1658_v16, %v573_v44  ;;  %v959_v46 = vld [vmem:[%s1695_s12] sm:$0xff] (%p1442_p5)  }
  0xff   : > { %v829_v56 = vmul.f32 0.5, %v813_v31  ;;  %vm655_vm4 = vcmp.ge.f32.partialorder %v623_v21, 1.0  ;;  %1331 = vst [vmem:[%s1695_s12 + $0x58] sm:$0xff] %v1307_v51   ;;  %v846_v2 = vadd.f32 %v830_v14, %v1753_v63  ;;  %v995_v14 = vld [vmem:[%s1695_s12 + $0x48] sm:$0xff] (%p1442_p5)  }
 0x100   : > { %v1214_v59 = vsel %vm655_vm4, 1.0, %v1390_v23  ;;  %v828_v18 = vmul.f32 0.5, %v812_v52  ;;  %vm654_vm5 = vcmp.ge.f32.partialorder %v622_v58, 1.0  ;;  %1330 = vst [vmem:[%s1695_s12 + $0x50] sm:$0xff] %v1304_v0   ;;  %v963_v52 = vld [vmem:[%s1695_s12 + $0x8] sm:$0xff] (%p1442_p5)  }
 0x101   : > { %v845_v12 = vadd.f32 %v829_v56, %v748_v28  ;;  %v1292_v10 = vpack.c.bf16 %v1731_v41, %v1214_v59  ;;  %v735_v11 = vsub.f32 1.0, %v1214_v59  ;;  %v1213_v20 = vsel %vm654_vm5, 1.0, %v1390_v23  ;;  %960 = vst [vmem:[%s942_s22] sm:$0xff] (%p1442_p5), %v959_v46   ;;  %v971_v59 = vld [vmem:[%s1695_s12 + $0x18] sm:$0xff] (%p1442_p5)  }
 0x102   : > { %v593_v15 = vpop.permute.xlu1 %592  ;;  %v849_v41 = vadd.f32 %v833_v55, %v1762_v26  ;;  %v844_v8 = vadd.f32 %v828_v18, %v747_v36  ;;  %v1289_v1 = vpack.c.bf16 %v1213_v20, %v1726_v29  ;;  %v734_v22 = vsub.f32 1.0, %v1213_v20  ;;  %v1232_v26 = vld [vmem:[%s1589_s11 + $0xf0] sm:$0xff]  ;;  %964 = vst [vmem:[%s942_s22 + $0x8] sm:$0xff] (%p1442_p5), %v963_v52  }
 0x103   : > { %vm861_vm6 = vcmp.ge.f32.partialorder %v845_v12, 1.0  ;;  %v751_v3 = vmul.f32 %v735_v11, %v623_v21  ;;  %v610_v25 = vadd.f32 %v593_v15, %v514_v34  ;;  %v588_v24 = vpop.permute.xlu0 %587  ;;  %1326 = vst [vmem:[%s1695_s12 + $0x30] sm:$0xff] %v1292_v10   ;;  %v786_v39 = vmul.f32 %v1232_v26, %v1585_v7  ;;  %v991_v11 = vld [vmem:[%s1695_s12 + $0x40] sm:$0xff] (%p1442_p5)  }
 0x104   : > { %v1243_v54 = vsel %vm861_vm6, 1.0, %v1390_v23  ;;  %v609_v57 = vadd.f32 %v588_v24, %v1675_v33  ;;  %vm860_vm7 = vcmp.ge.f32.partialorder %v844_v8, 1.0  ;;  %1325 = vst [vmem:[%s1695_s12 + $0x28] sm:$0xff] %v1289_v1   ;;  %v750_v27 = vmul.f32 %v734_v22, %v622_v58  ;;  %v975_v58 = vld [vmem:[%s1695_s12 + $0x20] sm:$0xff] (%p1442_p5)  }
 0x105   : > { %v816_v32 = vsub.f32 %v800_v53, %v751_v3  ;;  %v626_v35 = vmul.f32 0.5, %v610_v25  ;;  %v1242_v38 = vsel %vm860_vm7, 1.0, %v1390_v23  ;;  %vm865_vm9 = vcmp.ge.f32.partialorder %v849_v41, 1.0  ;;  %972 = vst [vmem:[%s942_s22 + $0x18] sm:$0xff] (%p1442_p5), %v971_v59  }
 0x106   : > { %v625_v29 = vmul.f32 0.5, %v609_v57  ;;  %v1310_v34 = vpack.c.bf16 %v1243_v54, %v1242_v38  ;;  %v815_v9 = vsub.f32 %v799_v37, %v750_v27  ;;  %v803_v62 = vadd.f32 %v787_v30, %v593_v15  ;;  %976 = vst [vmem:[%s942_s22 + $0x20] sm:$0xff] (%p1442_p5), %v975_v58   ;;  %v1003_v53 = vld [vmem:[%s1695_s12 + $0x58] sm:$0xff] (%p1442_p5)  }
 0x107   : > { %v832_v40 = vmul.f32 0.5, %v816_v32  ;;  %vm658_vm8 = vcmp.ge.f32.partialorder %v626_v35, 1.0  ;;  %vm862_vm12 = vcmp.ge.f32.partialorder %v846_v2, 1.0  ;;  %v1247_v28 = vsel %vm865_vm9, 1.0, %v1390_v23  ;;  %v999_v18 = vld [vmem:[%s1695_s12 + $0x50] sm:$0xff] (%p1442_p5)   ;;  %992 = vst [vmem:[%s942_s22 + $0x80] sm:$0xff] (%p1442_p5), %v991_v11  }
 0x108   : > { %v1217_v33 = vsel %vm658_vm8, 1.0, %v1390_v23  ;;  %vm657_vm10 = vcmp.ge.f32.partialorder %v625_v29, 1.0  ;;  %1332 = vst [vmem:[%s1695_s12 + $0x60] sm:$0xff] %v1310_v34   ;;  %v831_v16 = vmul.f32 0.5, %v815_v9  ;;  %v802_v49 = vadd.f32 %v786_v39, %v588_v24 }
 0x109   : > { %v848_v60 = vadd.f32 %v832_v40, %v751_v3  ;;  %v738_v13 = vsub.f32 1.0, %v1217_v33  ;;  %v1216_v5 = vsel %vm657_vm10, 1.0, %v1390_v23  ;;  %v1244_v50 = vsel %vm862_vm12, 1.0, %v1390_v23  ;;  %996 = vst [vmem:[%s942_s22 + $0x88] sm:$0xff] (%p1442_p5), %v995_v14  }
 0x10a   : > { %v1295_v63 = vpack.c.bf16 %v1217_v33, %v1216_v5  ;;  %v737_v47 = vsub.f32 1.0, %v1216_v5  ;;  %v847_v4 = vadd.f32 %v831_v16, %v750_v27  ;;  %v983_v12 = vld [vmem:[%s1695_s12 + $0x30] sm:$0xff] (%p1442_p5)   ;;  %1000 = vst [vmem:[%s942_s22 + $0x90] sm:$0xff] (%p1442_p5), %v999_v18  }
 0x10b   : > { %vm864_vm11 = vcmp.ge.f32.partialorder %v848_v60, 1.0  ;;  %v754_v45 = vmul.f32 %v738_v13, %v626_v35  ;;  %v979_v0 = vld [vmem:[%s1695_s12 + $0x28] sm:$0xff] (%p1442_p5)   ;;  %984 = vst [vmem:[%s942_s22 + $0x30] sm:$0xff] (%p1442_p5), %v983_v12  }
 0x10c   : > { %v1246_v42 = vsel %vm864_vm11, 1.0, %v1390_v23  ;;  %1327 = vst [vmem:[%s1695_s12 + $0x38] sm:$0xff] %v1295_v63   ;;  %v753_v7 = vmul.f32 %v737_v47, %v625_v29  ;;  %vm863_vm13 = vcmp.ge.f32.partialorder %v847_v4, 1.0 }
 0x10d   : > { %v1316_v44 = vpack.c.bf16 %v1247_v28, %v1246_v42  ;;  %v819_v48 = vsub.f32 %v803_v62, %v754_v45  ;;  %v1245_v6 = vsel %vm863_vm13, 1.0, %v1390_v23  ;;  %980 = vst [vmem:[%s942_s22 + $0x28] sm:$0xff] (%p1442_p5), %v979_v0  }
 0x10e   : > { %v818_v31 = vsub.f32 %v802_v49, %v753_v7  ;;  %v1313_v21 = vpack.c.bf16 %v1245_v6, %v1244_v50  ;;  %1004 = vst [vmem:[%s942_s22 + $0x98] sm:$0xff] (%p1442_p5), %v1003_v53  }
 0x10f   : > { %1334 = vst [vmem:[%s1695_s12 + $0x70] sm:$0xff] %v1316_v44   ;;  %v835_v19 = vmul.f32 0.5, %v819_v48  ;;  %v1007_v15 = vld [vmem:[%s1695_s12 + $0x60] sm:$0xff] (%p1442_p5)  }
 0x110   : > { %v834_v36 = vmul.f32 0.5, %v818_v31  ;;  %1333 = vst [vmem:[%s1695_s12 + $0x68] sm:$0xff] %v1313_v21  }
 0x111   : > { %v851_v51 = vadd.f32 %v835_v19, %v754_v45  ;;  %1008 = vst [vmem:[%s942_s22 + $0xa0] sm:$0xff] (%p1442_p5), %v1007_v15  }
 0x112   : > { %v850_v61 = vadd.f32 %v834_v36, %v753_v7 }
 0x113   : > { %vm867_vm14 = vcmp.ge.f32.partialorder %v851_v51, 1.0  ;;  %v987_v10 = vld [vmem:[%s1695_s12 + $0x38] sm:$0xff] (%p1442_p5)  }
 0x114   : > { %v1249_v17 = vsel %vm867_vm14, 1.0, %v1390_v23  ;;  %vm866_vm15 = vcmp.ge.f32.partialorder %v850_v61, 1.0  ;;  %939 = sbr.rel (!%p1442_p5) target bundleno = 289 (0x121), region = 74  ;;  %988 = vst [vmem:[%s942_s22 + $0x38] sm:$0xff] (%p1442_p5), %v987_v10  }
 0x115   : > { %v1248_v55 = vsel %vm866_vm15, 1.0, %v1390_v23  ;;  %v967_v23 = vld [vmem:[%s1695_s12 + $0x10] sm:$0xff] (%p1442_p5)  }
 0x116   : > { %v1319_v56 = vpack.c.bf16 %v1249_v17, %v1248_v55  ;;  %968 = vst [vmem:[%s942_s22 + $0x10] sm:$0xff] (%p1442_p5), %v967_v23   ;;  %v1015_v3 = vld [vmem:[%s1695_s12 + $0x70] sm:$0xff] (%p1442_p5)  }
 0x117   : > { %v1011_v43 = vld [vmem:[%s1695_s12 + $0x68] sm:$0xff] (%p1442_p5)   ;;  %1016 = vst [vmem:[%s942_s22 + $0xb0] sm:$0xff] (%p1442_p5), %v1015_v3  }
 0x118   : > { %1335 = vst [vmem:[%s1695_s12 + $0x78] sm:$0xff] %v1319_v56  }
 0x119   : > { %1012 = vst [vmem:[%s942_s22 + $0xa8] sm:$0xff] %v1011_v43  }
 0x11f   : > { %v1019_v20 = vld [vmem:[%s1695_s12 + $0x78] sm:$0xff]  }
 0x120   : > { %1020 = vst [vmem:[%s942_s22 + $0xb8] sm:$0xff] %v1019_v20  }
 0x121 PF: > { %p10_p11 = scmp.ge.s32.totalorder %s1430_s16, 4   ;;  %s1857_s12 = smov %s1383_s13 }
 0x122   : > { %s1858_s13 = smov %s1440_s19  ;;  %s1859_s14 = smov %s1430_s16 }
 0x123   :  { %12 = sbr.rel (!%p10_p11) target bundleno = 2 (0x2), region = 154 }

// kernel: swformer_forward.26
= control target key start
LH: loop header
LB: loop body
LE: loop exit
PB: predicated region body
PF: predicated region fallthrough
CT: control target
= control target key end

     0   :  { %s678_s9 = smov 0   ;;  %s680_s10 = smov 0   ;;  %s813_s0 = inlined_call_operand.vmem [shape: f32[16,72], index: 0, kind: input, shape index: {}]   ;;  %s814_s1 = inlined_call_operand.vmem [shape: bf16[2,72,1024], index: 1, kind: input, shape index: {}]   ;;  %s815_s2 = inlined_call_operand.vmem [shape: f32[2,16,1024], index: 2, kind: output, shape index: {}]  }
   0x1   :  { %s682_s11 = smov 0  }
   0x2 LB: > { %s24_s12 = sadd.s32 1, %s657_s10  ;;  %p591_p0 = scmp.ge.s32.totalorder %s661_s11, 1  ;;  %s661_s11 = sphi %s682_s11, %s12_s11   ;;  %s657_s10 = sphi %s680_s10, %s817_s10   ;;  %s653_s9 = sphi %s678_s9, %s816_s9  }
   0x3   : > { %p26_p1 = scmp.ge.s32.totalorder %s24_s12, 2  ;;  %p133_p2 = scmp.lt.s32.totalorder %s661_s11, 3 }
   0x5   : > { %s819_s12 = smov (%p26_p1, %s24_s12), 0  ;;  %p134_p3 = pnand %p591_p0, %p133_p2 }
   0x6   : > { %p164_p4 = scmp.lt.s32.totalorder (!%p134_p3), %s653_s9, 1 }
   0x7   : > { %137 = sbr.rel (%p134_p3) target bundleno = 200 (0xc8), region = 28 }
   0xc   : > { %s821_s9 = smov (!%p164_p4, %s653_s9), 1  ;;  %v728_v57 = vld [vmem:[%s813_s0] sm:$0xff]  ;;  %vm293_vm0 = vcmask 588800  }
   0xd   : > { %s614_s13 = smul.u32 288, %s821_s9  ;;  %s613_s21 = sshll.u32 %s821_s9, 7 }
   0xe   : > { %s786_s24 = scalar_lea.vmem %s815_s2, %s613_s21 }
   0xf   : > { %s702_s16 = scalar_lea.vmem %s814_s1, %s614_s13 }
  0x10   : > { %v218_v0 = vld [vmem:[%s702_s16 + $0x108] sm:$0xff]  ;;  %v217_v7 = vld [vmem:[%s702_s16 + $0x100] sm:$0xff]  ;;  %v220_v47 = vld [vmem:[%s702_s16 + $0x118] sm:$0xff] }
  0x11   : > { %v214_v1 = vld [vmem:[%s702_s16 + $0xe8] sm:$0xff]  ;;  %v287_v3 = vunpack.c.l.bf16 %v218_v0  ;;  %v288_v4 = vunpack.c.h.bf16 %v218_v0  ;;  %v213_v8 = vld [vmem:[%s702_s16 + $0xe0] sm:$0xff]  ;;  %v285_v9 = vunpack.c.l.bf16 %v217_v7  ;;  %v286_v10 = vunpack.c.h.bf16 %v217_v7  ;;  %v216_v52 = vld [vmem:[%s702_s16 + $0xf8] sm:$0xff] }
  0x12   : > { %v210_v2 = vld [vmem:[%s702_s16 + $0xc8] sm:$0xff]  ;;  %v279_v5 = vunpack.c.l.bf16 %v214_v1  ;;  %v280_v6 = vunpack.c.h.bf16 %v214_v1  ;;  %v209_v12 = vld [vmem:[%s702_s16 + $0xc0] sm:$0xff]  ;;  %v277_v15 = vunpack.c.l.bf16 %v213_v8  ;;  %v278_v16 = vunpack.c.h.bf16 %v213_v8  ;;  %v212_v56 = vld [vmem:[%s702_s16 + $0xd8] sm:$0xff] }
  0x13   : > { %v206_v11 = vld [vmem:[%s702_s16 + $0xa8] sm:$0xff]  ;;  %353 = vmatpush.msra.mxu2 %v287_v3  ;;  %376 = vmatpush.msra.mxu3 %v288_v4  ;;  %v271_v13 = vunpack.c.l.bf16 %v210_v2  ;;  %v272_v14 = vunpack.c.h.bf16 %v210_v2  ;;  %v205_v17 = vld [vmem:[%s702_s16 + $0xa0] sm:$0xff]  ;;  %v269_v19 = vunpack.c.l.bf16 %v209_v12  ;;  %v270_v20 = vunpack.c.h.bf16 %v209_v12  ;;  %v219_v60 = vld [vmem:[%s702_s16 + $0x110] sm:$0xff] }
  0x14   : > { %307 = vmatpush.msra.mxu0 %v285_v9  ;;  %330 = vmatpush.msra.mxu1 %v286_v10  ;;  %v202_v18 = vld [vmem:[%s702_s16 + $0x88] sm:$0xff]  ;;  %v263_v21 = vunpack.c.l.bf16 %v206_v11  ;;  %v264_v22 = vunpack.c.h.bf16 %v206_v11  ;;  %v201_v23 = vld [vmem:[%s702_s16 + $0x80] sm:$0xff]  ;;  %v261_v25 = vunpack.c.l.bf16 %v205_v17  ;;  %v262_v26 = vunpack.c.h.bf16 %v205_v17  ;;  %v208_v63 = vld [vmem:[%s702_s16 + $0xb8] sm:$0xff] }
  0x15   : > { %354 = vmatpush.msra.mxu2 %v279_v5  ;;  %377 = vmatpush.msra.mxu3 %v280_v6  ;;  %v198_v24 = vld [vmem:[%s702_s16 + $0x68] sm:$0xff]  ;;  %v255_v27 = vunpack.c.l.bf16 %v202_v18  ;;  %v256_v28 = vunpack.c.h.bf16 %v202_v18  ;;  %v197_v29 = vld [vmem:[%s702_s16 + $0x60] sm:$0xff]  ;;  %v253_v31 = vunpack.c.l.bf16 %v201_v23  ;;  %v254_v32 = vunpack.c.h.bf16 %v201_v23  ;;  %v215_v4 = vld [vmem:[%s702_s16 + $0xf0] sm:$0xff] }
  0x16   : > { %308 = vmatpush.msra.mxu0 %v277_v15  ;;  %331 = vmatpush.msra.mxu1 %v278_v16  ;;  %v194_v30 = vld [vmem:[%s702_s16 + $0x48] sm:$0xff]  ;;  %v247_v33 = vunpack.c.l.bf16 %v198_v24  ;;  %v248_v34 = vunpack.c.h.bf16 %v198_v24  ;;  %v193_v35 = vld [vmem:[%s702_s16 + $0x40] sm:$0xff]  ;;  %v245_v37 = vunpack.c.l.bf16 %v197_v29  ;;  %v246_v38 = vunpack.c.h.bf16 %v197_v29  ;;  %v204_v7 = vld [vmem:[%s702_s16 + $0x98] sm:$0xff] }
  0x17   : > { %355 = vmatpush.msra.mxu2 %v271_v13  ;;  %378 = vmatpush.msra.mxu3 %v272_v14  ;;  %v190_v36 = vld [vmem:[%s702_s16 + $0x28] sm:$0xff]  ;;  %v239_v39 = vunpack.c.l.bf16 %v194_v30  ;;  %v240_v40 = vunpack.c.h.bf16 %v194_v30  ;;  %v189_v41 = vld [vmem:[%s702_s16 + $0x20] sm:$0xff]  ;;  %v237_v43 = vunpack.c.l.bf16 %v193_v35  ;;  %v238_v44 = vunpack.c.h.bf16 %v193_v35  ;;  %v211_v10 = vld [vmem:[%s702_s16 + $0xd0] sm:$0xff] }
  0x18   : > { %309 = vmatpush.msra.mxu0 %v269_v19  ;;  %332 = vmatpush.msra.mxu1 %v270_v20  ;;  %v186_v42 = vld [vmem:[%s702_s16 + $0x8] sm:$0xff]  ;;  %v231_v45 = vunpack.c.l.bf16 %v190_v36  ;;  %v232_v46 = vunpack.c.h.bf16 %v190_v36  ;;  %v229_v48 = vunpack.c.l.bf16 %v189_v41  ;;  %v230_v49 = vunpack.c.h.bf16 %v189_v41  ;;  %v185_v55 = vld [vmem:[%s702_s16] sm:$0xff]  ;;  %v200_v13 = vld [vmem:[%s702_s16 + $0x78] sm:$0xff] }
  0x19   : > { %356 = vmatpush.msra.mxu2 %v263_v21  ;;  %379 = vmatpush.msra.mxu3 %v264_v22  ;;  %v223_v50 = vunpack.c.l.bf16 %v186_v42  ;;  %v224_v51 = vunpack.c.h.bf16 %v186_v42  ;;  %v291_v53 = vunpack.c.l.bf16 %v220_v47  ;;  %v292_v54 = vunpack.c.h.bf16 %v220_v47  ;;  %v207_v14 = vld [vmem:[%s702_s16 + $0xb0] sm:$0xff]  ;;  %v748_v15 = vld [vmem:[%s813_s0 + $0x8] sm:$0xff]  ;;  %v196_v18 = vld [vmem:[%s702_s16 + $0x58] sm:$0xff] }
  0x1a   : > { %310 = vmatpush.msra.mxu0 %v261_v25  ;;  %333 = vmatpush.msra.mxu1 %v262_v26  ;;  %v283_v58 = vunpack.c.l.bf16 %v216_v52  ;;  %v284_v59 = vunpack.c.h.bf16 %v216_v52  ;;  %v221_v61 = vunpack.c.l.bf16 %v185_v55  ;;  %v222_v62 = vunpack.c.h.bf16 %v185_v55  ;;  %v203_v21 = vld [vmem:[%s702_s16 + $0x90] sm:$0xff]  ;;  %v192_v24 = vld [vmem:[%s702_s16 + $0x38] sm:$0xff] }
  0x1b   : > { %357 = vmatpush.msra.mxu2 %v255_v27  ;;  %380 = vmatpush.msra.mxu3 %v256_v28  ;;  %v275_v0 = vunpack.c.l.bf16 %v212_v56  ;;  %v276_v1 = vunpack.c.h.bf16 %v212_v56  ;;  %v289_v2 = vunpack.c.l.bf16 %v219_v60  ;;  %v290_v3 = vunpack.c.h.bf16 %v219_v60  ;;  %v199_v29 = vld [vmem:[%s702_s16 + $0x70] sm:$0xff] }
  0x1c   : > { %311 = vmatpush.msra.mxu0 %v253_v31  ;;  %334 = vmatpush.msra.mxu1 %v254_v32  ;;  %v267_v5 = vunpack.c.l.bf16 %v208_v63  ;;  %v268_v6 = vunpack.c.h.bf16 %v208_v63  ;;  %v281_v8 = vunpack.c.l.bf16 %v215_v4  ;;  %v282_v9 = vunpack.c.h.bf16 %v215_v4  ;;  %v188_v32 = vld [vmem:[%s702_s16 + $0x18] sm:$0xff]  ;;  %v195_v35 = vld [vmem:[%s702_s16 + $0x50] sm:$0xff] }
  0x1d   : > { %358 = vmatpush.msra.mxu2 %v247_v33  ;;  %381 = vmatpush.msra.mxu3 %v248_v34  ;;  %v259_v11 = vunpack.c.l.bf16 %v204_v7  ;;  %v260_v12 = vunpack.c.h.bf16 %v204_v7  ;;  %v273_v16 = vunpack.c.l.bf16 %v211_v10  ;;  %v274_v17 = vunpack.c.h.bf16 %v211_v10  ;;  %v187_v41 = vld [vmem:[%s702_s16 + $0x10] sm:$0xff] }
  0x1e   : > { %312 = vmatpush.msra.mxu0 %v245_v37  ;;  %335 = vmatpush.msra.mxu1 %v246_v38  ;;  %v251_v19 = vunpack.c.l.bf16 %v200_v13  ;;  %v252_v20 = vunpack.c.h.bf16 %v200_v13  ;;  %v265_v22 = vunpack.c.l.bf16 %v207_v14  ;;  %v266_v23 = vunpack.c.h.bf16 %v207_v14  ;;  %v191_v38 = vld [vmem:[%s702_s16 + $0x30] sm:$0xff] }
  0x1f   : > { %359 = vmatpush.msra.mxu2 %v239_v39  ;;  %382 = vmatpush.msra.mxu3 %v240_v40  ;;  %v243_v25 = vunpack.c.l.bf16 %v196_v18  ;;  %v244_v26 = vunpack.c.h.bf16 %v196_v18  ;;  %v257_v27 = vunpack.c.l.bf16 %v203_v21  ;;  %v258_v28 = vunpack.c.h.bf16 %v203_v21 }
  0x20   : > { %313 = vmatpush.msra.mxu0 %v237_v43  ;;  %336 = vmatpush.msra.mxu1 %v238_v44  ;;  %v235_v30 = vunpack.c.l.bf16 %v192_v24  ;;  %v236_v31 = vunpack.c.h.bf16 %v192_v24  ;;  %v249_v33 = vunpack.c.l.bf16 %v199_v29  ;;  %v250_v34 = vunpack.c.h.bf16 %v199_v29 }
  0x21   : > { %360 = vmatpush.msra.mxu2 %v231_v45  ;;  %383 = vmatpush.msra.mxu3 %v232_v46  ;;  %v227_v36 = vunpack.c.l.bf16 %v188_v32  ;;  %v228_v37 = vunpack.c.h.bf16 %v188_v32  ;;  %v241_v39 = vunpack.c.l.bf16 %v195_v35  ;;  %v242_v40 = vunpack.c.h.bf16 %v195_v35 }
  0x22   : > { %314 = vmatpush.msra.mxu0 %v229_v48  ;;  %337 = vmatpush.msra.mxu1 %v230_v49  ;;  %v233_v42 = vunpack.c.l.bf16 %v191_v38  ;;  %v234_v43 = vunpack.c.h.bf16 %v191_v38  ;;  %v225_v44 = vunpack.c.l.bf16 %v187_v41  ;;  %v226_v45 = vunpack.c.h.bf16 %v187_v41 }
  0x23   : > { %361 = vmatpush.msra.mxu2 %v223_v50  ;;  %384 = vmatpush.msra.mxu3 %v224_v51 }
  0x24   : > { %599 = vmatmul.msk.f32.vlgmr.msra.gmra.mxu2 %vm293_vm0, %v728_v57  ;;  %601 = vmatmul.msk.f32.vlgmr.msra.gmra.mxu3 %vm293_vm0, %v728_v57 }
  0x25   : > { %445 = vmatpush.msrb.mxu2 %v291_v53  ;;  %468 = vmatpush.msrb.mxu3 %v292_v54 }
  0x26   : > { %315 = vmatpush.msra.mxu0 %v221_v61  ;;  %338 = vmatpush.msra.mxu1 %v222_v62 }
  0x27   : > { %446 = vmatpush.msrb.mxu2 %v283_v58  ;;  %469 = vmatpush.msrb.mxu3 %v284_v59 }
  0x28   : > { %399 = vmatpush.msrb.mxu0 %v289_v2  ;;  %422 = vmatpush.msrb.mxu1 %v290_v3 }
  0x29   : > { %447 = vmatpush.msrb.mxu2 %v275_v0  ;;  %470 = vmatpush.msrb.mxu3 %v276_v1 }
  0x2a   : > { %595 = vmatmul.msk.f32.vlgmr.msra.gmra.mxu0 %vm293_vm0, %v728_v57  ;;  %597 = vmatmul.msk.f32.vlgmr.msra.gmra.mxu1 %vm293_vm0, %v728_v57 }
  0x2b   : > { %448 = vmatpush.msrb.mxu2 %v267_v5  ;;  %471 = vmatpush.msrb.mxu3 %v268_v6 }
  0x2c   : > { %400 = vmatpush.msrb.mxu0 %v281_v8  ;;  %423 = vmatpush.msrb.mxu1 %v282_v9 }
  0x2d   : > { %449 = vmatpush.msrb.mxu2 %v259_v11  ;;  %472 = vmatpush.msrb.mxu3 %v260_v12 }
  0x2e   : > { %600 = vmatmul.msk.f32.gmra.mxu2 %vm293_vm0, %v748_v15  ;;  %602 = vmatmul.msk.f32.gmra.mxu3 %vm293_vm0, %v748_v15 }
  0x2f   : > { %401 = vmatpush.msrb.mxu0 %v273_v16  ;;  %424 = vmatpush.msrb.mxu1 %v274_v17 }
  0x30   : > { %450 = vmatpush.msrb.mxu2 %v251_v19  ;;  %473 = vmatpush.msrb.mxu3 %v252_v20 }
  0x31   : > { %402 = vmatpush.msrb.mxu0 %v265_v22  ;;  %425 = vmatpush.msrb.mxu1 %v266_v23 }
  0x32   : > { %451 = vmatpush.msrb.mxu2 %v243_v25  ;;  %474 = vmatpush.msrb.mxu3 %v244_v26 }
  0x33   : > { %403 = vmatpush.msrb.mxu0 %v257_v27  ;;  %426 = vmatpush.msrb.mxu1 %v258_v28 }
  0x34   : > { %452 = vmatpush.msrb.mxu2 %v235_v30  ;;  %475 = vmatpush.msrb.mxu3 %v236_v31 }
  0x35   : > { %596 = vmatmul.msk.f32.gmra.mxu0 %vm293_vm0, %v748_v15  ;;  %598 = vmatmul.msk.f32.gmra.mxu1 %vm293_vm0, %v748_v15 }
  0x36   : > { %404 = vmatpush.msrb.mxu0 %v249_v33  ;;  %427 = vmatpush.msrb.mxu1 %v250_v34 }
  0x37   : > { %453 = vmatpush.msrb.mxu2 %v227_v36  ;;  %476 = vmatpush.msrb.mxu3 %v228_v37 }
  0x38   : > { %607 = vmatmul.msk.f32.vlgmr.msrb.gmra.mxu2 %vm293_vm0, %v728_v57  ;;  %609 = vmatmul.msk.f32.vlgmr.msrb.gmra.mxu3 %vm293_vm0, %v728_v57 }
  0x39   : > { %405 = vmatpush.msrb.mxu0 %v241_v39  ;;  %428 = vmatpush.msrb.mxu1 %v242_v40 }
  0x3b   : > { %406 = vmatpush.msrb.mxu0 %v233_v42  ;;  %429 = vmatpush.msrb.mxu1 %v234_v43 }
  0x3d   : > { %407 = vmatpush.msrb.mxu0 %v225_v44  ;;  %430 = vmatpush.msrb.mxu1 %v226_v45 }
  0x3e   : > { %603 = vmatmul.msk.f32.vlgmr.msrb.gmra.mxu0 %vm293_vm0, %v728_v57  ;;  %605 = vmatmul.msk.f32.vlgmr.msrb.gmra.mxu1 %vm293_vm0, %v728_v57 }
  0x40   : > { %608 = vmatmul.msk.f32.gmra.mxu2 %vm293_vm0, %v748_v15  ;;  %610 = vmatmul.msk.f32.gmra.mxu3 %vm293_vm0, %v748_v15 }
  0x46   : > { %604 = vmatmul.msk.f32.gmra.mxu0 %vm293_vm0, %v748_v15  ;;  %606 = vmatmul.msk.f32.gmra.mxu1 %vm293_vm0, %v748_v15 }
  0xa7   : > { %v317_v46 = vpop.f32.mrf.mxu0  ;;  %v340_v47 = vpop.f32.mrf.mxu1 }
  0xa8   : > { %484 = vst [vmem:[%s786_s24] sm:$0xff] %v317_v46  ;;  %v363_v48 = vpop.f32.mrf.mxu2  ;;  %v386_v49 = vpop.f32.mrf.mxu3 }
  0xa9   : > { %485 = vst [vmem:[%s786_s24 + $0x8] sm:$0xff] %v340_v47 }
  0xaa   : > { %486 = vst [vmem:[%s786_s24 + $0x10] sm:$0xff] %v363_v48 }
  0xab   : > { %487 = vst [vmem:[%s786_s24 + $0x18] sm:$0xff] %v386_v49 }
  0xb1   : > { %v366_v50 = vpop.f32.mrf.mxu2  ;;  %v389_v51 = vpop.f32.mrf.mxu3 }
  0xb2   : > { %v320_v52 = vpop.f32.mrf.mxu0  ;;  %v343_v53 = vpop.f32.mrf.mxu1  ;;  %494 = vst [vmem:[%s786_s24 + $0x50] sm:$0xff] %v366_v50 }
  0xb3   : > { %492 = vst [vmem:[%s786_s24 + $0x40] sm:$0xff] %v320_v52 }
  0xb4   : > { %493 = vst [vmem:[%s786_s24 + $0x48] sm:$0xff] %v343_v53 }
  0xb5   : > { %495 = vst [vmem:[%s786_s24 + $0x58] sm:$0xff] %v389_v51 }
  0xbb   : > { %v409_v54 = vpop.f32.mrf.mxu0  ;;  %v432_v55 = vpop.f32.mrf.mxu1 }
  0xbc   : > { %488 = vst [vmem:[%s786_s24 + $0x20] sm:$0xff] %v409_v54  ;;  %v455_v56 = vpop.f32.mrf.mxu2  ;;  %v478_v57 = vpop.f32.mrf.mxu3 }
  0xbd   : > { %489 = vst [vmem:[%s786_s24 + $0x28] sm:$0xff] %v432_v55 }
  0xbe   : > { %490 = vst [vmem:[%s786_s24 + $0x30] sm:$0xff] %v455_v56 }
  0xbf   : > { %491 = vst [vmem:[%s786_s24 + $0x38] sm:$0xff] %v478_v57 }
  0xc3   : > { %v412_v58 = vpop.f32.mrf.mxu0  ;;  %v435_v59 = vpop.f32.mrf.mxu1 }
  0xc4   : > { %496 = vst [vmem:[%s786_s24 + $0x60] sm:$0xff] %v412_v58  ;;  %v458_v60 = vpop.f32.mrf.mxu2  ;;  %v481_v61 = vpop.f32.mrf.mxu3 }
  0xc5   : > { %497 = vst [vmem:[%s786_s24 + $0x68] sm:$0xff] %v435_v59 }
  0xc6   : > { %498 = vst [vmem:[%s786_s24 + $0x70] sm:$0xff] %v458_v60 }
  0xc7   : > { %499 = vst [vmem:[%s786_s24 + $0x78] sm:$0xff] %v481_v61 }
  0xc8 PF: > { %s12_s11 = sadd.s32 1, %s661_s11   ;;  %s816_s9 = smov %s657_s10 }
  0xc9   : > { %p9_p5 = scmp.ge.s32.totalorder %s12_s11, 4   ;;  %s817_s10 = smov %s819_s12 }
  0xcb   :  { %11 = sbr.rel (!%p9_p5) target bundleno = 2 (0x2), region = 58 }

// kernel: swformer_forward.27
= control target key start
LH: loop header
LB: loop body
LE: loop exit
PB: predicated region body
PF: predicated region fallthrough
CT: control target
= control target key end

     0   :  { %s939_s12 = smov 0   ;;  %s941_s13 = smov 0   ;;  %s1105_s0 = inlined_call_operand.vmem [shape: f32[2,128,128], index: 0, kind: input, shape index: {}]   ;;  %s1106_s1 = inlined_call_operand.vmem [shape: f32[128,1], index: 1, kind: input, shape index: {}]   ;;  %s1107_s2 = inlined_call_operand.vmem [shape: f32[128,1], index: 2, kind: input, shape index: {}]   ;;  %s1108_s3 = inlined_call_operand.vmem [shape: bf16[2,128,128], index: 3, kind: output, shape index: {}]  }
   0x1   :  { %s943_s14 = smov 0  }
   0x2 LB: > { %s955_s15 = sadd.s32 4294967295, %s915_s14   ;;  %s958_s16 = sadd.s32 1, %s915_s14   ;;  %s915_s14 = sphi %s943_s14, %s1112_s14   ;;  %s911_s13 = sphi %s941_s13, %s1111_s13   ;;  %s907_s12 = sphi %s939_s12, %s1110_s12  }
   0x3   : > { %s17_s17 = ssub.s32 %s915_s14, %s958_s16  ;;  %s20_s18 = sadd.s32 1, %s911_s13 }
   0x4   : > { %p18_p0 = scmp.eq.s32.totalorder %s17_s17, 0  ;;  %p27_p1 = scmp.ne.s32.totalorder %s911_s13, %s907_s12 }
   0x5   : > { %p28_p2 = scmp.eq.s32.totalorder %s915_s14, 0  ;;  %p109_p3 = scmp.eq.s32.totalorder %s955_s15, 1 }
   0x6   : > { %s968_s19 = scalar_select %p18_p0, %s911_s13, %s20_s18  }
   0x7   : > { %p29_p4 = por %p28_p2, %p27_p1  ;;  %p970_p5 = por %p109_p3, %p27_p1 }
   0x8   : > { %p783_p6 = scmp.ge.s32.totalorder %s915_s14, 2 }
   0xa   : > { %131 = sbr.rel (%p783_p6) target bundleno = 35 (0x23), region = 16 }
   0xf   : > { %134 = sbr.rel (!%p29_p4) target bundleno = 35 (0x23), region = 20  ;;  %s136_s21 = sand.u32 (%p29_p4), 1, %s911_s13  }
  0x10   : > { %s831_s22 = sshll.u32 (%p29_p4), %s915_s14, 6  ;;  %s784_s23 = sshll.u32 (%p29_p4), %s136_s21, 7 }
  0x11   : > { %s980_s26 = scalar_lea.vmem (%p29_p4), %s1105_s0, %s831_s22  ;;  %s138_s27 = scalar_lea.vmem (%p29_p4), [#allocation2], %s784_s23 }
  0x12   : > { %v200_v0 = vld [vmem:[%s980_s26] sm:$0xff] (%p29_p4)  ;;  %v202_v1 = vld [vmem:[%s980_s26 + $0x8] sm:$0xff] (%p29_p4)  ;;  %v204_v2 = vld [vmem:[%s980_s26 + $0x10] sm:$0xff] (%p29_p4) }
  0x13   : > { %201 = vst [vmem:[%s138_s27] sm:$0xff] (%p29_p4), %v200_v0  ;;  %v206_v3 = vld [vmem:[%s980_s26 + $0x18] sm:$0xff] (%p29_p4)  ;;  %v208_v4 = vld [vmem:[%s980_s26 + $0x20] sm:$0xff] (%p29_p4)  ;;  %v210_v5 = vld [vmem:[%s980_s26 + $0x28] sm:$0xff] (%p29_p4) }
  0x14   : > { %203 = vst [vmem:[%s138_s27 + $0x8] sm:$0xff] %v202_v1  ;;  %v212_v6 = vld [vmem:[%s980_s26 + $0x30] sm:$0xff]  ;;  %v214_v7 = vld [vmem:[%s980_s26 + $0x38] sm:$0xff]  ;;  %v216_v8 = vld [vmem:[%s980_s26 + $0x80] sm:$0xff] }
  0x15   : > { %205 = vst [vmem:[%s138_s27 + $0x10] sm:$0xff] %v204_v2  ;;  %v218_v9 = vld [vmem:[%s980_s26 + $0x88] sm:$0xff]  ;;  %v220_v10 = vld [vmem:[%s980_s26 + $0x90] sm:$0xff]  ;;  %v222_v11 = vld [vmem:[%s980_s26 + $0x98] sm:$0xff] }
  0x16   : > { %207 = vst [vmem:[%s138_s27 + $0x18] sm:$0xff] %v206_v3  ;;  %v224_v12 = vld [vmem:[%s980_s26 + $0xa0] sm:$0xff]  ;;  %v226_v13 = vld [vmem:[%s980_s26 + $0xa8] sm:$0xff]  ;;  %v228_v14 = vld [vmem:[%s980_s26 + $0xb0] sm:$0xff] }
  0x17   : > { %209 = vst [vmem:[%s138_s27 + $0x20] sm:$0xff] %v208_v4  ;;  %v230_v15 = vld [vmem:[%s980_s26 + $0xb8] sm:$0xff] }
  0x18   : > { %211 = vst [vmem:[%s138_s27 + $0x28] sm:$0xff] %v210_v5 }
  0x19   : > { %213 = vst [vmem:[%s138_s27 + $0x30] sm:$0xff] %v212_v6 }
  0x1a   : > { %215 = vst [vmem:[%s138_s27 + $0x38] sm:$0xff] %v214_v7 }
  0x1b   : > { %217 = vst [vmem:[%s138_s27 + $0x40] sm:$0xff] %v216_v8 }
  0x1c   : > { %219 = vst [vmem:[%s138_s27 + $0x48] sm:$0xff] %v218_v9 }
  0x1d   : > { %221 = vst [vmem:[%s138_s27 + $0x50] sm:$0xff] %v220_v10 }
  0x1e   : > { %223 = vst [vmem:[%s138_s27 + $0x58] sm:$0xff] %v222_v11 }
  0x1f   : > { %225 = vst [vmem:[%s138_s27 + $0x60] sm:$0xff] %v224_v12 }
  0x20   : > { %227 = vst [vmem:[%s138_s27 + $0x68] sm:$0xff] %v226_v13 }
  0x21   : > { %229 = vst [vmem:[%s138_s27 + $0x70] sm:$0xff] %v228_v14 }
  0x22   : > { %231 = vst [vmem:[%s138_s27 + $0x78] sm:$0xff] %v230_v15 }
  0x23 PF: > { %p787_p7 = scmp.ge.s32.totalorder %s915_s14, 1  ;;  %p254_p8 = scmp.lt.s32.totalorder %s915_s14, 3 }
  0x25   : > { %p255_p9 = pnand %p787_p7, %p254_p8 }
  0x26   : > { %s790_s28 = sshll.u32 (!%p255_p9), %s955_s15, 3  ;;  %s261_s9 = sand.u32 (!%p255_p9), 1, %s907_s12  }
  0x27   : > { %258 = sbr.rel (%p255_p9) target bundleno = 233 (0xe9), region = 66  ;;  %p295_p10 = scmp.lt.s32.totalorder (!%p255_p9), %s790_s28, 15 }
  0x28   : > { %s788_s10 = sshll.u32 (!%p255_p9), %s261_s9, 7  ;;  %s789_s14 = sshll.u32 (!%p255_p9), %s261_s9, 6 }
  0x29   : > { %s1014_s11 = scalar_lea.vmem (!%p255_p9), [#allocation2], %s788_s10  ;;  %s1051_s12 = scalar_lea.vmem (!%p255_p9), [#allocation3], %s789_s14 }
  0x2c   : > { %v917_v16 = vmov 0   ;;  %s1114_s28 = smov (!%p295_p10, %s790_s28), 15  ;;  %v323_v35 = vld [vmem:[%s1014_s11] sm:$0xff]  ;;  %v326_v42 = vld [vmem:[%s1014_s11 + $0x18] sm:$0xff]  ;;  %v918_v48 = vmov 0.0   ;;  %v329_v52 = vld [vmem:[%s1014_s11 + $0x30] sm:$0xff] }
  0x2d   : > { %892 = vset.pattern.permute.xlu2 %v917_v16  ;;  %891 = vset.pattern.permute.xlu1 %v917_v16  ;;  %s791_s29 = sshll.u32 %s1114_s28, 3  ;;  %v802_v51 = vld [vmem:[%s1014_s11 + $0x40] sm:$0xff]  ;;  %v805_v55 = vld [vmem:[%s1014_s11 + $0x58] sm:$0xff]  ;;  %v325_v62 = vld [vmem:[%s1014_s11 + $0x10] sm:$0xff]  ;;  %s832_s17 = sshll.u32 (%p970_p5), %s955_s15, 5 }
  0x2e   : > { %890 = vset.pattern.permute.xlu0 %v917_v16  ;;  %s298_s5 = scalar_lea.vmem %s1106_s1, %s791_s29  ;;  %s304_s8 = scalar_lea.vmem %s1107_s2, %s791_s29  ;;  %v324_v2 = vld [vmem:[%s1014_s11 + $0x8] sm:$0xff]  ;;  %v327_v14 = vld [vmem:[%s1014_s11 + $0x20] sm:$0xff] }
  0x2f   : > { %v311_v17 = vld [vmem:[%s298_s5 + $0x20] sm:$0xff]  ;;  %v309_v18 = vld [vmem:[%s298_s5 + $0x10] sm:$0xff]  ;;  %v312_v20 = vld [vmem:[%s298_s5 + $0x28] sm:$0xff]  ;;  %s598_s22 = scalar_lea.vmem (%p970_p5), %s1108_s3, %s832_s17 }
  0x30   : > { %v307_v19 = vld [vmem:[%s298_s5] sm:$0xff]  ;;  %353 = vperm.xlu2 %892, %v311_v17   ;;  %343 = vperm.xlu1 %891, %v309_v18   ;;  %v310_v21 = vld [vmem:[%s298_s5 + $0x18] sm:$0xff]  ;;  %v308_v22 = vld [vmem:[%s298_s5 + $0x8] sm:$0xff] }
  0x31   : > { %333 = vperm.xlu0 %890, %v307_v19   ;;  %v315_v23 = vld [vmem:[%s304_s8] sm:$0xff]  ;;  %v314_v24 = vld [vmem:[%s298_s5 + $0x38] sm:$0xff]  ;;  %v313_v25 = vld [vmem:[%s298_s5 + $0x30] sm:$0xff] }
  0x32   : > { %v318_v26 = vld [vmem:[%s304_s8 + $0x18] sm:$0xff]  ;;  %v317_v27 = vld [vmem:[%s304_s8 + $0x10] sm:$0xff]  ;;  %v316_v28 = vld [vmem:[%s304_s8 + $0x8] sm:$0xff] }
  0x33   : > { %v321_v29 = vld [vmem:[%s304_s8 + $0x30] sm:$0xff]  ;;  %v320_v30 = vld [vmem:[%s304_s8 + $0x28] sm:$0xff]  ;;  %v319_v31 = vld [vmem:[%s304_s8 + $0x20] sm:$0xff] }
  0x34   : > { %v322_v32 = vld [vmem:[%s304_s8 + $0x38] sm:$0xff]  ;;  %v328_v16 = vld [vmem:[%s1014_s11 + $0x28] sm:$0xff]  ;;  %v804_v17 = vld [vmem:[%s1014_s11 + $0x50] sm:$0xff] }
  0x38   : > { %358 = vperm.xlu2 %892, %v312_v20   ;;  %348 = vperm.xlu1 %891, %v310_v21   ;;  %v803_v20 = vld [vmem:[%s1014_s11 + $0x48] sm:$0xff] }
  0x39   : > { %338 = vperm.xlu0 %890, %v308_v22  }
  0x40   : > { %381 = vperm.xlu2 %892, %v315_v23   ;;  %368 = vperm.xlu1 %891, %v314_v24  }
  0x41   : > { %363 = vperm.xlu0 %890, %v313_v25  }
  0x48   : > { %396 = vperm.xlu2 %892, %v318_v26   ;;  %391 = vperm.xlu1 %891, %v317_v27  }
  0x49   : > { %386 = vperm.xlu0 %890, %v316_v28   ;;  %v808_v28 = vld [vmem:[%s1014_s11 + $0x70] sm:$0xff] }
  0x50   : > { %411 = vperm.xlu2 %892, %v321_v29   ;;  %406 = vperm.xlu1 %891, %v320_v30  }
  0x51   : > { %401 = vperm.xlu0 %890, %v319_v31  }
  0x59   : > { %416 = vperm.xlu0 %890, %v322_v32   ;;  %v806_v32 = vld [vmem:[%s1014_s11 + $0x60] sm:$0xff] }
  0x8a   : > { %v1007_v33 = vpop.permute.xlu2 %353 }
  0x8b   : > { %v375_v22 = vmul.f32 %v1007_v33, %v327_v14 }
  0x92   : > { %v1010_v34 = vpop.permute.xlu2 %358 }
  0x93   : > { %v376_v24 = vmul.f32 %v1010_v34, %v328_v16 }
  0x9a   : > { %v382_v36 = vpop.permute.xlu2 %381 }
  0xa2   : > { %v344_v37 = vpop.permute.xlu1 %343  ;;  %v397_v46 = vpop.permute.xlu2 %396 }
  0xa3   : > { %v334_v38 = vpop.permute.xlu0 %333  ;;  %v373_v5 = vmul.f32 %v344_v37, %v325_v62  ;;  %v510_v25 = vmul.f32 %v804_v17, %v344_v37  ;;  %v807_v37 = vld [vmem:[%s1014_s11 + $0x68] sm:$0xff] }
  0xa4   : > { %v371_v39 = vmul.f32 %v334_v38, %v323_v35  ;;  %v508_v59 = vmul.f32 %v802_v51, %v334_v38 }
  0xa6   : > { %v419_v40 = vadd.f32 %v382_v36, %v371_v39  ;;  %v516_v4 = vadd.f32 %v508_v59, %v382_v36 }
  0xa8   : > { %v427_v41 = vmul.f32 0.5, %v419_v40 }
  0xaa   : > { %v349_v43 = vpop.permute.xlu1 %348  ;;  %vm443_vm0 = vcmp.ge.f32.partialorder %v427_v41, 1.0  ;;  %v1029_v0 = vpop.permute.xlu2 %411 }
  0xab   : > { %v374_v44 = vmul.f32 %v349_v43, %v326_v42  ;;  %v339_v45 = vpop.permute.xlu0 %338  ;;  %v1019_v49 = vsel %vm443_vm0, 1.0, %v918_v48  ;;  %v511_v61 = vmul.f32 %v805_v55, %v349_v43  ;;  %v330_v42 = vld [vmem:[%s1014_s11 + $0x38] sm:$0xff] }
  0xac   : > { %v483_v53 = vsub.f32 1.0, %v1019_v49  ;;  %v372_v8 = vmul.f32 %v339_v45, %v324_v2  ;;  %v509_v27 = vmul.f32 %v803_v20, %v339_v45 }
  0xad   : > { %v422_v47 = vadd.f32 %v397_v46, %v374_v44  ;;  %v519_v6 = vadd.f32 %v511_v61, %v397_v46 }
  0xae   : > { %v491_v63 = vmul.f32 %v483_v53, %v427_v41 }
  0xaf   : > { %v430_v50 = vmul.f32 0.5, %v422_v47 }
  0xb0   : > { %v524_v7 = vsub.f32 %v516_v4, %v491_v63 }
  0xb1   : > { %vm446_vm1 = vcmp.ge.f32.partialorder %v430_v50, 1.0 }
  0xb2   : > { %v797_v54 = vsel %vm446_vm1, 1.0, %v918_v48  ;;  %v1026_v56 = vpop.permute.xlu1 %368  ;;  %v532_v19 = vmul.f32 0.5, %v524_v7 }
  0xb3   : > { %v486_v57 = vsub.f32 1.0, %v797_v54  ;;  %v364_v58 = vpop.permute.xlu0 %363  ;;  %v378_v59 = vmul.f32 %v1026_v56, %v330_v42 }
  0xb4   : > { %v377_v60 = vmul.f32 %v364_v58, %v329_v52  ;;  %v540_v35 = vadd.f32 %v532_v19, %v491_v63  ;;  %v514_v47 = vmul.f32 %v808_v28, %v364_v58 }
  0xb5   : > { %v494_v1 = vmul.f32 %v486_v57, %v430_v50  ;;  %v513_v57 = vmul.f32 %v807_v37, %v1010_v34 }
  0xb6   : > { %v425_v3 = vadd.f32 %v1029_v0, %v377_v60  ;;  %vm548_vm5 = vcmp.ge.f32.partialorder %v540_v35, 1.0  ;;  %v522_v58 = vadd.f32 %v514_v47, %v1029_v0 }
  0xb7   : > { %v527_v10 = vsub.f32 %v519_v6, %v494_v1 }
  0xb8   : > { %v433_v11 = vmul.f32 0.5, %v425_v3 }
  0xb9   : > { %v535_v23 = vmul.f32 0.5, %v527_v10 }
  0xba   : > { %v392_v9 = vpop.permute.xlu1 %391  ;;  %vm449_vm2 = vcmp.ge.f32.partialorder %v433_v11, 1.0 }
  0xbb   : > { %v421_v12 = vadd.f32 %v392_v9, %v373_v5  ;;  %v387_v13 = vpop.permute.xlu0 %386  ;;  %v1046_v36 = vsel %vm449_vm2, 1.0, %v918_v48  ;;  %v543_v41 = vadd.f32 %v535_v23, %v494_v1  ;;  %v518_v44 = vadd.f32 %v510_v25, %v392_v9 }
  0xbc   : > { %v420_v15 = vadd.f32 %v387_v13, %v372_v8  ;;  %v517_v51 = vadd.f32 %v509_v27, %v387_v13  ;;  %v489_v53 = vsub.f32 1.0, %v1046_v36 }
  0xbd   : > { %v429_v18 = vmul.f32 0.5, %v421_v12  ;;  %vm551_vm6 = vcmp.ge.f32.partialorder %v543_v41, 1.0 }
  0xbe   : > { %v428_v21 = vmul.f32 0.5, %v420_v15  ;;  %v813_v4 = vsel %vm551_vm6, 1.0, %v918_v48  ;;  %v810_v15 = vsel %vm548_vm5, 1.0, %v918_v48 }
  0xbf   : > { %vm445_vm3 = vcmp.ge.f32.partialorder %v429_v18, 1.0 }
  0xc0   : > { %v796_v26 = vsel %vm445_vm3, 1.0, %v918_v48  ;;  %vm444_vm4 = vcmp.ge.f32.partialorder %v428_v21, 1.0 }
  0xc1   : > { %v837_v29 = vpack.c.bf16 %v797_v54, %v796_v26  ;;  %v485_v30 = vsub.f32 1.0, %v796_v26  ;;  %v795_v31 = vsel %vm444_vm4, 1.0, %v918_v48 }
  0xc2   : > { %v834_v38 = vpack.c.bf16 %v795_v31, %v1019_v49  ;;  %v484_v39 = vsub.f32 1.0, %v795_v31  ;;  %v407_v40 = vpop.permute.xlu1 %406  ;;  %v512_v49 = vmul.f32 %v806_v32, %v1007_v33  ;;  %v497_v33 = vmul.f32 %v489_v53, %v433_v11 }
  0xc3   : > { %857 = vst [vmem:[%s1051_s12 + $0x8] sm:$0xff] %v837_v29   ;;  %v493_v43 = vmul.f32 %v485_v30, %v429_v18  ;;  %v424_v45 = vadd.f32 %v407_v40, %v376_v24  ;;  %v402_v46 = vpop.permute.xlu0 %401  ;;  %v521_v9 = vadd.f32 %v513_v57, %v407_v40  ;;  %v809_v18 = vld [vmem:[%s1014_s11 + $0x78] sm:$0xff] }
  0xc4   : > { %835 = vst [vmem:[%s1051_s12] sm:$0xff] %v834_v38   ;;  %v492_v50 = vmul.f32 %v484_v39, %v428_v21  ;;  %v423_v52 = vadd.f32 %v402_v46, %v375_v22  ;;  %v520_v0 = vadd.f32 %v512_v49, %v402_v46  ;;  %v530_v19 = vsub.f32 %v522_v58, %v497_v33 }
  0xc5   : > { %v526_v54 = vsub.f32 %v518_v44, %v493_v43  ;;  %v432_v55 = vmul.f32 0.5, %v424_v45  ;;  %v515_v25 = vmul.f32 %v809_v18, %v1026_v56 }
  0xc6   : > { %v525_v60 = vsub.f32 %v517_v51, %v492_v50  ;;  %v431_v61 = vmul.f32 0.5, %v423_v52  ;;  %v538_v28 = vmul.f32 0.5, %v530_v19 }
  0xc7   : > { %v534_v62 = vmul.f32 0.5, %v526_v54  ;;  %vm448_vm7 = vcmp.ge.f32.partialorder %v432_v55, 1.0 }
  0xc8   : > { %v533_v63 = vmul.f32 0.5, %v525_v60  ;;  %v799_v1 = vsel %vm448_vm7, 1.0, %v918_v48  ;;  %vm447_vm8 = vcmp.ge.f32.partialorder %v431_v61, 1.0  ;;  %v546_v56 = vadd.f32 %v538_v28, %v497_v33 }
  0xc9   : > { %v542_v2 = vadd.f32 %v534_v62, %v493_v43  ;;  %v488_v3 = vsub.f32 1.0, %v799_v1  ;;  %v798_v34 = vsel %vm447_vm8, 1.0, %v918_v48 }
  0xca   : > { %v541_v5 = vadd.f32 %v533_v63, %v492_v50  ;;  %v840_v6 = vpack.c.bf16 %v799_v1, %v798_v34  ;;  %v487_v7 = vsub.f32 1.0, %v798_v34  ;;  %vm554_vm14 = vcmp.ge.f32.partialorder %v546_v56, 1.0  ;;  %v619_v46 = vld [vmem:[%s1051_s12 + $0x8] sm:$0xff] (%p970_p5)  }
  0xcb   : > { %vm550_vm9 = vcmp.ge.f32.partialorder %v542_v2, 1.0  ;;  %v496_v8 = vmul.f32 %v488_v3, %v432_v55  ;;  %v417_v10 = vpop.permute.xlu0 %416  ;;  %v615_v45 = vld [vmem:[%s1051_s12] sm:$0xff] (%p970_p5)   ;;  %620 = vst [vmem:[%s598_s22 + $0x8] sm:$0xff] (%p970_p5), %v619_v46  }
  0xcc   : > { %v812_v12 = vsel %vm550_vm9, 1.0, %v918_v48  ;;  %vm549_vm10 = vcmp.ge.f32.partialorder %v541_v5, 1.0  ;;  %858 = vst [vmem:[%s1051_s12 + $0x10] sm:$0xff] %v840_v6   ;;  %v495_v11 = vmul.f32 %v487_v7, %v431_v61  ;;  %v426_v13 = vadd.f32 %v417_v10, %v378_v59 }
  0xcd   : > { %v849_v14 = vpack.c.bf16 %v813_v4, %v812_v12  ;;  %v811_v16 = vsel %vm549_vm10, 1.0, %v918_v48  ;;  %v529_v17 = vsub.f32 %v521_v9, %v496_v8  ;;  %v523_v38 = vadd.f32 %v515_v25, %v417_v10  ;;  %616 = vst [vmem:[%s598_s22] sm:$0xff] (%p970_p5), %v615_v45  }
  0xce   : > { %v846_v20 = vpack.c.bf16 %v811_v16, %v810_v15  ;;  %v528_v21 = vsub.f32 %v520_v0, %v495_v11  ;;  %v434_v22 = vmul.f32 0.5, %v426_v13 }
  0xcf   : > { %861 = vst [vmem:[%s1051_s12 + $0x28] sm:$0xff] %v849_v14   ;;  %v537_v23 = vmul.f32 0.5, %v529_v17 }
  0xd0   : > { %860 = vst [vmem:[%s1051_s12 + $0x20] sm:$0xff] %v846_v20   ;;  %v536_v24 = vmul.f32 0.5, %v528_v21  ;;  %vm450_vm11 = vcmp.ge.f32.partialorder %v434_v22, 1.0 }
  0xd1   : > { %v545_v26 = vadd.f32 %v537_v23, %v496_v8  ;;  %v801_v27 = vsel %vm450_vm11, 1.0, %v918_v48 }
  0xd2   : > { %v544_v29 = vadd.f32 %v536_v24, %v495_v11  ;;  %v843_v30 = vpack.c.bf16 %v801_v27, %v1046_v36  ;;  %v490_v31 = vsub.f32 1.0, %v801_v27  ;;  %v816_v36 = vsel %vm554_vm14, 1.0, %v918_v48 }
  0xd3   : > { %vm553_vm12 = vcmp.ge.f32.partialorder %v545_v26, 1.0 }
  0xd4   : > { %v815_v32 = vsel %vm553_vm12, 1.0, %v918_v48  ;;  %vm552_vm13 = vcmp.ge.f32.partialorder %v544_v29, 1.0  ;;  %859 = vst [vmem:[%s1051_s12 + $0x18] sm:$0xff] %v843_v30   ;;  %v498_v35 = vmul.f32 %v490_v31, %v434_v22 }
  0xd5   : > { %v814_v39 = vsel %vm552_vm13, 1.0, %v918_v48 }
  0xd6   : > { %v852_v40 = vpack.c.bf16 %v815_v32, %v814_v39  ;;  %v531_v37 = vsub.f32 %v523_v38, %v498_v35  ;;  %v635_v51 = vld [vmem:[%s1051_s12 + $0x28] sm:$0xff] (%p970_p5)  }
  0xd7   : > { %v631_v50 = vld [vmem:[%s1051_s12 + $0x20] sm:$0xff] (%p970_p5)   ;;  %636 = vst [vmem:[%s598_s22 + $0x48] sm:$0xff] (%p970_p5), %v635_v51  }
  0xd8   : > { %862 = vst [vmem:[%s1051_s12 + $0x30] sm:$0xff] %v852_v40   ;;  %v539_v41 = vmul.f32 0.5, %v531_v37 }
  0xd9   : > { %632 = vst [vmem:[%s598_s22 + $0x40] sm:$0xff] (%p970_p5), %v631_v50  }
  0xda   : > { %v547_v42 = vadd.f32 %v539_v41, %v498_v35 }
  0xdb   : > { %v627_v47 = vld [vmem:[%s1051_s12 + $0x18] sm:$0xff] (%p970_p5)  }
  0xdc   : > { %vm555_vm15 = vcmp.ge.f32.partialorder %v547_v42, 1.0  ;;  %595 = sbr.rel (!%p970_p5) target bundleno = 233 (0xe9), region = 74  ;;  %628 = vst [vmem:[%s598_s22 + $0x18] sm:$0xff] (%p970_p5), %v627_v47  }
  0xdd   : > { %v817_v43 = vsel %vm555_vm15, 1.0, %v918_v48  ;;  %v623_v48 = vld [vmem:[%s1051_s12 + $0x10] sm:$0xff] (%p970_p5)  }
  0xde   : > { %v855_v44 = vpack.c.bf16 %v817_v43, %v816_v36  ;;  %624 = vst [vmem:[%s598_s22 + $0x10] sm:$0xff] (%p970_p5), %v623_v48  }
  0xdf   : > { %v639_v52 = vld [vmem:[%s1051_s12 + $0x30] sm:$0xff] (%p970_p5)  }
  0xe0   : > { %863 = vst [vmem:[%s1051_s12 + $0x38] sm:$0xff] %v855_v44  }
  0xe1   : > { %640 = vst [vmem:[%s598_s22 + $0x50] sm:$0xff] %v639_v52  }
  0xe7   : > { %v643_v49 = vld [vmem:[%s1051_s12 + $0x38] sm:$0xff]  }
  0xe8   : > { %644 = vst [vmem:[%s598_s22 + $0x58] sm:$0xff] %v643_v49  }
  0xe9 PF: > { %p10_p11 = scmp.ge.s32.totalorder %s958_s16, 4   ;;  %s1110_s12 = smov %s911_s13 }
  0xea   : > { %s1111_s13 = smov %s968_s19  ;;  %s1112_s14 = smov %s958_s16 }
  0xeb   :  { %12 = sbr.rel (!%p10_p11) target bundleno = 2 (0x2), region = 154 }

// kernel: swformer_forward.28
= control target key start
LH: loop header
LB: loop body
LE: loop exit
PB: predicated region body
PF: predicated region fallthrough
CT: control target
= control target key end

     0   :  { %s552_s9 = smov 0   ;;  %s554_s10 = smov 0   ;;  %s641_s0 = inlined_call_operand.vmem [shape: f32[32,144], index: 0, kind: input, shape index: {}]   ;;  %s642_s1 = inlined_call_operand.vmem [shape: bf16[2,144,256], index: 1, kind: input, shape index: {}]   ;;  %s643_s2 = inlined_call_operand.vmem [shape: f32[2,32,256], index: 2, kind: output, shape index: {}]  }
   0x1   :  { %s556_s11 = smov 0  }
   0x2 LB: > { %s24_s12 = sadd.s32 1, %s531_s10  ;;  %p473_p0 = scmp.ge.s32.totalorder %s535_s11, 1  ;;  %s535_s11 = sphi %s556_s11, %s12_s11   ;;  %s531_s10 = sphi %s554_s10, %s645_s10   ;;  %s527_s9 = sphi %s552_s9, %s644_s9  }
   0x3   : > { %p26_p1 = scmp.ge.s32.totalorder %s24_s12, 2  ;;  %p133_p2 = scmp.lt.s32.totalorder %s535_s11, 3 }
   0x5   : > { %s647_s12 = smov (%p26_p1, %s24_s12), 0  ;;  %p134_p3 = pnand %p473_p0, %p133_p2 }
   0x6   : > { %p164_p4 = scmp.lt.s32.totalorder (!%p134_p3), %s527_s9, 1 }
   0x7   : > { %137 = sbr.rel (%p134_p3) target bundleno = 209 (0xd1), region = 28 }
   0xc   : > { %s649_s9 = smov (!%p164_p4, %s527_s9), 1  ;;  %v184_v28 = vld [vmem:[%s641_s0 + $0x8] sm:$0xff]  ;;  %vm245_vm0 = vcmask 130048   ;;  %v186_v41 = vld [vmem:[%s641_s0 + $0x18] sm:$0xff]  ;;  %v183_v57 = vld [vmem:[%s641_s0] sm:$0xff] }
   0xd   : > { %s488_s13 = smul.u32 144, %s649_s9  ;;  %v188_v54 = vld [vmem:[%s641_s0 + $0x28] sm:$0xff]  ;;  %v190_v58 = vld [vmem:[%s641_s0 + $0x38] sm:$0xff]  ;;  %v185_v59 = vld [vmem:[%s641_s0 + $0x10] sm:$0xff]  ;;  %s487_s5 = sshll.u32 %s649_s9, 6 }
   0xe   : > { %v187_v60 = vld [vmem:[%s641_s0 + $0x20] sm:$0xff]  ;;  %v189_v61 = vld [vmem:[%s641_s0 + $0x30] sm:$0xff]  ;;  %s181_s8 = scalar_lea.vmem %s643_s2, %s487_s5 }
   0xf   : > { %s576_s16 = scalar_lea.vmem %s642_s1, %s488_s13 }
  0x10   : > { %v206_v0 = vld [vmem:[%s576_s16 + $0x78] sm:$0xff]  ;;  %v205_v1 = vld [vmem:[%s576_s16 + $0x70] sm:$0xff]  ;;  %v204_v2 = vld [vmem:[%s576_s16 + $0x68] sm:$0xff] }
  0x11   : > { %v240_v3 = vunpack.c.h.bf16 %v206_v0  ;;  %v238_v4 = vunpack.c.h.bf16 %v205_v1  ;;  %v239_v5 = vunpack.c.l.bf16 %v206_v0  ;;  %v203_v6 = vld [vmem:[%s576_s16 + $0x60] sm:$0xff]  ;;  %v237_v7 = vunpack.c.l.bf16 %v205_v1  ;;  %v202_v10 = vld [vmem:[%s576_s16 + $0x58] sm:$0xff]  ;;  %v208_v13 = vld [vmem:[%s576_s16 + $0x88] sm:$0xff] }
  0x12   : > { %v236_v8 = vunpack.c.h.bf16 %v204_v2  ;;  %v235_v9 = vunpack.c.l.bf16 %v204_v2  ;;  %v234_v11 = vunpack.c.h.bf16 %v203_v6  ;;  %v233_v12 = vunpack.c.l.bf16 %v203_v6  ;;  %v207_v14 = vld [vmem:[%s576_s16 + $0x80] sm:$0xff]  ;;  %v201_v15 = vld [vmem:[%s576_s16 + $0x50] sm:$0xff]  ;;  %v200_v19 = vld [vmem:[%s576_s16 + $0x48] sm:$0xff] }
  0x13   : > { %316 = vmatpush.msra.mxu2 %v240_v3  ;;  %258 = vmatpush.msra.mxu0 %v239_v5  ;;  %v232_v16 = vunpack.c.h.bf16 %v202_v10  ;;  %v231_v17 = vunpack.c.l.bf16 %v202_v10  ;;  %v244_v18 = vunpack.c.h.bf16 %v208_v13  ;;  %v242_v20 = vunpack.c.h.bf16 %v207_v14  ;;  %v199_v24 = vld [vmem:[%s576_s16 + $0x40] sm:$0xff]  ;;  %v198_v29 = vld [vmem:[%s576_s16 + $0x38] sm:$0xff]  ;;  %v197_v32 = vld [vmem:[%s576_s16 + $0x30] sm:$0xff] }
  0x14   : > { %v230_v21 = vunpack.c.h.bf16 %v201_v15  ;;  %v229_v22 = vunpack.c.l.bf16 %v201_v15  ;;  %v243_v23 = vunpack.c.l.bf16 %v208_v13  ;;  %v241_v25 = vunpack.c.l.bf16 %v207_v14  ;;  %v196_v35 = vld [vmem:[%s576_s16 + $0x28] sm:$0xff]  ;;  %v195_v38 = vld [vmem:[%s576_s16 + $0x20] sm:$0xff]  ;;  %v194_v42 = vld [vmem:[%s576_s16 + $0x18] sm:$0xff] }
  0x15   : > { %317 = vmatpush.msra.mxu2 %v238_v4  ;;  %259 = vmatpush.msra.mxu0 %v237_v7  ;;  %v228_v26 = vunpack.c.h.bf16 %v200_v19  ;;  %v227_v27 = vunpack.c.l.bf16 %v200_v19  ;;  %v226_v30 = vunpack.c.h.bf16 %v199_v24  ;;  %v225_v31 = vunpack.c.l.bf16 %v199_v24  ;;  %v193_v45 = vld [vmem:[%s576_s16 + $0x10] sm:$0xff]  ;;  %v192_v48 = vld [vmem:[%s576_s16 + $0x8] sm:$0xff]  ;;  %v191_v51 = vld [vmem:[%s576_s16] sm:$0xff] }
  0x16   : > { %359 = vmatpush.msra.mxu3 %v244_v18  ;;  %301 = vmatpush.msra.mxu1 %v243_v23  ;;  %v224_v33 = vunpack.c.h.bf16 %v198_v29  ;;  %v223_v34 = vunpack.c.l.bf16 %v198_v29  ;;  %v222_v36 = vunpack.c.h.bf16 %v197_v32  ;;  %v221_v37 = vunpack.c.l.bf16 %v197_v32 }
  0x17   : > { %318 = vmatpush.msra.mxu2 %v236_v8  ;;  %260 = vmatpush.msra.mxu0 %v235_v9  ;;  %v220_v39 = vunpack.c.h.bf16 %v196_v35  ;;  %v219_v40 = vunpack.c.l.bf16 %v196_v35  ;;  %v218_v43 = vunpack.c.h.bf16 %v195_v38  ;;  %v217_v44 = vunpack.c.l.bf16 %v195_v38 }
  0x18   : > { %360 = vmatpush.msra.mxu3 %v242_v20  ;;  %302 = vmatpush.msra.mxu1 %v241_v25  ;;  %v216_v46 = vunpack.c.h.bf16 %v194_v42  ;;  %v215_v47 = vunpack.c.l.bf16 %v194_v42  ;;  %v214_v49 = vunpack.c.h.bf16 %v193_v45  ;;  %v213_v50 = vunpack.c.l.bf16 %v193_v45 }
  0x19   : > { %319 = vmatpush.msra.mxu2 %v234_v11  ;;  %261 = vmatpush.msra.mxu0 %v233_v12  ;;  %v212_v52 = vunpack.c.h.bf16 %v192_v48  ;;  %v211_v53 = vunpack.c.l.bf16 %v192_v48  ;;  %v210_v55 = vunpack.c.h.bf16 %v191_v51  ;;  %v209_v56 = vunpack.c.l.bf16 %v191_v51 }
  0x1a   : > { %481 = vmatmul.msk.f32.vlgmr.msra.gmra.mxu3 %vm245_vm0, %v184_v28  ;;  %477 = vmatmul.msk.f32.vlgmr.msra.gmra.mxu1 %vm245_vm0, %v184_v28 }
  0x1b   : > { %320 = vmatpush.msra.mxu2 %v232_v16  ;;  %262 = vmatpush.msra.mxu0 %v231_v17 }
  0x1d   : > { %321 = vmatpush.msra.mxu2 %v230_v21  ;;  %263 = vmatpush.msra.mxu0 %v229_v22 }
  0x1f   : > { %322 = vmatpush.msra.mxu2 %v228_v26  ;;  %264 = vmatpush.msra.mxu0 %v227_v27 }
  0x21   : > { %323 = vmatpush.msra.mxu2 %v226_v30  ;;  %265 = vmatpush.msra.mxu0 %v225_v31 }
  0x22   : > { %482 = vmatmul.msk.f32.gmra.mxu3 %vm245_vm0, %v186_v41  ;;  %478 = vmatmul.msk.f32.gmra.mxu1 %vm245_vm0, %v186_v41 }
  0x23   : > { %324 = vmatpush.msra.mxu2 %v224_v33  ;;  %266 = vmatpush.msra.mxu0 %v223_v34 }
  0x25   : > { %325 = vmatpush.msra.mxu2 %v222_v36  ;;  %267 = vmatpush.msra.mxu0 %v221_v37 }
  0x27   : > { %326 = vmatpush.msra.mxu2 %v220_v39  ;;  %268 = vmatpush.msra.mxu0 %v219_v40 }
  0x29   : > { %327 = vmatpush.msra.mxu2 %v218_v43  ;;  %269 = vmatpush.msra.mxu0 %v217_v44 }
  0x2a   : > { %483 = vmatmul.msk.f32.gmra.mxu3 %vm245_vm0, %v188_v54  ;;  %479 = vmatmul.msk.f32.gmra.mxu1 %vm245_vm0, %v188_v54 }
  0x2b   : > { %328 = vmatpush.msra.mxu2 %v216_v46  ;;  %270 = vmatpush.msra.mxu0 %v215_v47 }
  0x2d   : > { %329 = vmatpush.msra.mxu2 %v214_v49  ;;  %271 = vmatpush.msra.mxu0 %v213_v50 }
  0x2f   : > { %330 = vmatpush.msra.mxu2 %v212_v52  ;;  %272 = vmatpush.msra.mxu0 %v211_v53 }
  0x31   : > { %331 = vmatpush.msra.mxu2 %v210_v55  ;;  %273 = vmatpush.msra.mxu0 %v209_v56 }
  0x32   : > { %332 = vmatmul.f32.vlgmr.msra.gmra.mxu2 %v183_v57  ;;  %274 = vmatmul.f32.vlgmr.msra.gmra.mxu0 %v183_v57 }
  0x33   : > { %484 = vmatmul.msk.f32.gmra.mxu3 %vm245_vm0, %v190_v58  ;;  %480 = vmatmul.msk.f32.gmra.mxu1 %vm245_vm0, %v190_v58 }
  0x3a   : > { %335 = vmatmul.f32.gmra.mxu2 %v185_v59  ;;  %277 = vmatmul.f32.gmra.mxu0 %v185_v59 }
  0x42   : > { %338 = vmatmul.f32.gmra.mxu2 %v187_v60  ;;  %280 = vmatmul.f32.gmra.mxu0 %v187_v60 }
  0x4a   : > { %341 = vmatmul.f32.gmra.mxu2 %v189_v61  ;;  %283 = vmatmul.f32.gmra.mxu0 %v189_v61 }
  0x97   : > { %v304_v62 = vpop.f32.mrf.mxu1 }
  0x9d   : > { %v362_v63 = vpop.f32.mrf.mxu3 }
  0x9f   : > { %v307_v2 = vpop.f32.mrf.mxu1 }
  0xa5   : > { %v365_v6 = vpop.f32.mrf.mxu3 }
  0xa7   : > { %v310_v8 = vpop.f32.mrf.mxu1 }
  0xad   : > { %v368_v13 = vpop.f32.mrf.mxu3 }
  0xaf   : > { %v275_v0 = vpop.f32.mrf.mxu0 }
  0xb0   : > { %v305_v1 = vadd.f32 %v304_v62, %v275_v0  ;;  %v313_v15 = vpop.f32.mrf.mxu1 }
  0xb2   : > { %374 = vst [vmem:[%s181_s8] sm:$0xff] %v305_v1 }
  0xb5   : > { %v333_v3 = vpop.f32.mrf.mxu2 }
  0xb6   : > { %v363_v4 = vadd.f32 %v362_v63, %v333_v3  ;;  %v371_v19 = vpop.f32.mrf.mxu3 }
  0xb7   : > { %v278_v5 = vpop.f32.mrf.mxu0 }
  0xb8   : > { %375 = vst [vmem:[%s181_s8 + $0x8] sm:$0xff] %v363_v4  ;;  %v308_v7 = vadd.f32 %v307_v2, %v278_v5 }
  0xba   : > { %376 = vst [vmem:[%s181_s8 + $0x10] sm:$0xff] %v308_v7 }
  0xbd   : > { %v336_v9 = vpop.f32.mrf.mxu2 }
  0xbe   : > { %v366_v10 = vadd.f32 %v365_v6, %v336_v9 }
  0xbf   : > { %v281_v11 = vpop.f32.mrf.mxu0 }
  0xc0   : > { %377 = vst [vmem:[%s181_s8 + $0x18] sm:$0xff] %v366_v10  ;;  %v311_v12 = vadd.f32 %v310_v8, %v281_v11 }
  0xc2   : > { %378 = vst [vmem:[%s181_s8 + $0x20] sm:$0xff] %v311_v12 }
  0xc5   : > { %v339_v14 = vpop.f32.mrf.mxu2 }
  0xc6   : > { %v369_v16 = vadd.f32 %v368_v13, %v339_v14 }
  0xc7   : > { %v284_v17 = vpop.f32.mrf.mxu0 }
  0xc8   : > { %379 = vst [vmem:[%s181_s8 + $0x28] sm:$0xff] %v369_v16  ;;  %v314_v18 = vadd.f32 %v313_v15, %v284_v17 }
  0xca   : > { %380 = vst [vmem:[%s181_s8 + $0x30] sm:$0xff] %v314_v18 }
  0xcd   : > { %v342_v20 = vpop.f32.mrf.mxu2 }
  0xce   : > { %v372_v21 = vadd.f32 %v371_v19, %v342_v20 }
  0xd0   : > { %381 = vst [vmem:[%s181_s8 + $0x38] sm:$0xff] %v372_v21 }
  0xd1 PF: > { %s12_s11 = sadd.s32 1, %s535_s11   ;;  %s644_s9 = smov %s531_s10 }
  0xd2   : > { %p9_p5 = scmp.ge.s32.totalorder %s12_s11, 4   ;;  %s645_s10 = smov %s647_s12 }
  0xd4   :  { %11 = sbr.rel (!%p9_p5) target bundleno = 2 (0x2), region = 58 }

// kernel: swformer_forward.29
= control target key start
LH: loop header
LB: loop body
LE: loop exit
PB: predicated region body
PF: predicated region fallthrough
CT: control target
= control target key end

     0   :  { %v109_v0 = vmov 0   ;;  %v110_v14 = vmov 0.0   ;;  %s161_s2 = inlined_call_operand.vmem [shape: f32[16,1], index: 2, kind: input, shape index: {}]   ;;  %s162_s1 = inlined_call_operand.vmem [shape: f32[16,1], index: 1, kind: input, shape index: {}]   ;;  %s163_s0 = inlined_call_operand.vmem [shape: f32[2,16,128], index: 0, kind: input, shape index: {}]   ;;  %s164_s3 = inlined_call_operand.vmem [shape: bf16[2,16,128], index: 3, kind: output, shape index: {}]  }
   0x1   :  { %108 = vset.pattern.permute.xlu1 %v109_v0  ;;  %107 = vset.pattern.permute.xlu0 %v109_v0  ;;  %v16_v1 = vld [vmem:[%s161_s2] sm:$0xff]  ;;  %v17_v3 = vld [vmem:[%s161_s2 + $0x8] sm:$0xff]  ;;  %v92_v10 = vld [vmem:[%s163_s0 + $0x10] sm:$0xff] }
   0x2   :  { %v14_v2 = vld [vmem:[%s162_s1] sm:$0xff]  ;;  %34 = vperm.xlu1 %108, %v16_v1   ;;  %v15_v4 = vld [vmem:[%s162_s1 + $0x8] sm:$0xff]  ;;  %v93_v23 = vld [vmem:[%s163_s0 + $0x18] sm:$0xff] }
   0x3   :  { %22 = vperm.xlu0 %107, %v14_v2   ;;  %v18_v5 = vld [vmem:[%s163_s0] sm:$0xff]  ;;  %v19_v12 = vld [vmem:[%s163_s0 + $0x8] sm:$0xff] }
   0xa   :  { %39 = vperm.xlu1 %108, %v17_v3  }
   0xb   :  { %27 = vperm.xlu0 %107, %v15_v4  }
  0x74   :  { %v35_v6 = vpop.permute.xlu1 %34 }
  0x75   :  { %v23_v7 = vpop.permute.xlu0 %22 }
  0x76   :  { %v30_v8 = vmul.f32 %v23_v7, %v18_v5  ;;  %v65_v13 = vmul.f32 %v92_v10, %v23_v7 }
  0x78   :  { %v42_v9 = vadd.f32 %v35_v6, %v30_v8  ;;  %v67_v21 = vadd.f32 %v65_v13, %v35_v6 }
  0x7a   :  { %v44_v11 = vmul.f32 0.5, %v42_v9 }
  0x7c   :  { %vm48_vm0 = vcmp.ge.f32.partialorder %v44_v11, 1.0  ;;  %v40_v19 = vpop.permute.xlu1 %39 }
  0x7d   :  { %v90_v15 = vsel %vm48_vm0, 1.0, %v110_v14  ;;  %v28_v16 = vpop.permute.xlu0 %27 }
  0x7e   :  { %v58_v17 = vsub.f32 1.0, %v90_v15  ;;  %v31_v18 = vmul.f32 %v28_v16, %v19_v12  ;;  %v66_v26 = vmul.f32 %v93_v23, %v28_v16 }
  0x80   :  { %v60_v20 = vmul.f32 %v58_v17, %v44_v11  ;;  %v43_v22 = vadd.f32 %v40_v19, %v31_v18  ;;  %v68_v32 = vadd.f32 %v66_v26, %v40_v19 }
  0x82   :  { %v69_v24 = vsub.f32 %v67_v21, %v60_v20  ;;  %v45_v25 = vmul.f32 0.5, %v43_v22 }
  0x84   :  { %vm49_vm1 = vcmp.ge.f32.partialorder %v45_v25, 1.0  ;;  %v71_v28 = vmul.f32 0.5, %v69_v24 }
  0x85   :  { %v91_v27 = vsel %vm49_vm1, 1.0, %v110_v14 }
  0x86   :  { %v99_v29 = vpack.c.bf16 %v91_v27, %v90_v15  ;;  %v59_v30 = vsub.f32 1.0, %v91_v27  ;;  %v73_v33 = vadd.f32 %v71_v28, %v60_v20 }
  0x88   :  { %100 = vst [vmem:[%s164_s3] sm:$0xff] %v99_v29   ;;  %v61_v31 = vmul.f32 %v59_v30, %v45_v25  ;;  %vm75_vm2 = vcmp.ge.f32.partialorder %v73_v33, 1.0 }
  0x89   :  { %v94_v37 = vsel %vm75_vm2, 1.0, %v110_v14 }
  0x8a   :  { %v70_v34 = vsub.f32 %v68_v32, %v61_v31 }
  0x8c   :  { %v72_v35 = vmul.f32 0.5, %v70_v34 }
  0x8e   :  { %v74_v36 = vadd.f32 %v72_v35, %v61_v31 }
  0x90   :  { %vm76_vm3 = vcmp.ge.f32.partialorder %v74_v36, 1.0 }
  0x91   :  { %v95_v38 = vsel %vm76_vm3, 1.0, %v110_v14 }
  0x92   :  { %v102_v39 = vpack.c.bf16 %v95_v38, %v94_v37 }
  0x94   :  { %104 = vst [vmem:[%s164_s3 + $0x8] sm:$0xff] %v102_v39  }

// kernel: swformer_forward.30
= control target key start
LH: loop header
LB: loop body
LE: loop exit
PB: predicated region body
PF: predicated region fallthrough
CT: control target
= control target key end

     0   :  { %s631_s9 = smov 0   ;;  %s633_s10 = smov 0   ;;  %s732_s0 = inlined_call_operand.vmem [shape: f32[32,288], index: 0, kind: input, shape index: {}]   ;;  %s733_s1 = inlined_call_operand.vmem [shape: bf16[2,288,64], index: 1, kind: input, shape index: {}]   ;;  %s734_s2 = inlined_call_operand.vmem [shape: f32[2,32,64], index: 2, kind: output, shape index: {}]  }
   0x1   :  { %s635_s11 = smov 0  }
   0x2 LB: > { %s24_s12 = sadd.s32 1, %s610_s10  ;;  %p451_p0 = scmp.ge.s32.totalorder %s614_s11, 1  ;;  %s614_s11 = sphi %s635_s11, %s12_s11   ;;  %s610_s10 = sphi %s633_s10, %s736_s10   ;;  %s606_s9 = sphi %s631_s9, %s735_s9  }
   0x3   : > { %p26_p1 = scmp.ge.s32.totalorder %s24_s12, 2  ;;  %p131_p2 = scmp.lt.s32.totalorder %s614_s11, 3 }
   0x5   : > { %s738_s12 = smov (%p26_p1, %s24_s12), 0  ;;  %p132_p3 = pnand %p451_p0, %p131_p2 }
   0x6   : > { %p159_p4 = scmp.lt.s32.totalorder (!%p132_p3), %s606_s9, 1 }
   0x7   : > { %135 = sbr.rel (%p132_p3) target bundleno = 206 (0xce), region = 28 }
   0xc   : > { %s740_s9 = smov (!%p159_p4, %s606_s9), 1  ;;  %v177_v32 = vld [vmem:[%s732_s0 + $0x10] sm:$0xff]  ;;  %vm259_vm0 = vcmask 261120   ;;  %v180_v45 = vld [vmem:[%s732_s0 + $0x28] sm:$0xff]  ;;  %v183_v56 = vld [vmem:[%s732_s0 + $0x40] sm:$0xff]  ;;  %vm359_vm1 = vcmask 523264  }
   0xd   : > { %s567_s13 = smul.u32 144, %s740_s9  ;;  %v175_v57 = vld [vmem:[%s732_s0] sm:$0xff]  ;;  %v176_v58 = vld [vmem:[%s732_s0 + $0x8] sm:$0xff]  ;;  %v178_v59 = vld [vmem:[%s732_s0 + $0x18] sm:$0xff]  ;;  %s461_s17 = sshll.u32 %s740_s9, 5 }
   0xe   : > { %v186_v60 = vld [vmem:[%s732_s0 + $0x58] sm:$0xff]  ;;  %v179_v61 = vld [vmem:[%s732_s0 + $0x20] sm:$0xff]  ;;  %v181_v62 = vld [vmem:[%s732_s0 + $0x30] sm:$0xff]  ;;  %s174_s20 = scalar_lea.vmem %s734_s2, %s461_s17 }
   0xf   : > { %s655_s16 = scalar_lea.vmem %s733_s1, %s567_s13  ;;  %v182_v63 = vld [vmem:[%s732_s0 + $0x38] sm:$0xff] }
  0x10   : > { %v540_v0 = vld [vmem:[%s655_s16 + $0x38] sm:$0xff]   ;;  %v539_v2 = vld [vmem:[%s655_s16 + $0x30] sm:$0xff]   ;;  %v538_v10 = vld [vmem:[%s655_s16 + $0x28] sm:$0xff]  }
  0x11   : > { %v548_v1 = vld [vmem:[%s655_s16 + $0x78] sm:$0xff]   ;;  %v493_v3 = vunpack.c.h.bf16 %v540_v0  ;;  %v492_v5 = vunpack.c.l.bf16 %v540_v0  ;;  %v547_v7 = vld [vmem:[%s655_s16 + $0x70] sm:$0xff]   ;;  %v489_v8 = vunpack.c.h.bf16 %v539_v2  ;;  %v546_v11 = vld [vmem:[%s655_s16 + $0x68] sm:$0xff]   ;;  %v488_v13 = vunpack.c.l.bf16 %v539_v2 }
  0x12   : > { %v525_v4 = vunpack.c.h.bf16 %v548_v1  ;;  %v524_v6 = vunpack.c.l.bf16 %v548_v1  ;;  %v521_v9 = vunpack.c.h.bf16 %v547_v7  ;;  %v550_v12 = vld [vmem:[%s655_s16 + $0x88] sm:$0xff]   ;;  %v520_v14 = vunpack.c.l.bf16 %v547_v7  ;;  %v549_v15 = vld [vmem:[%s655_s16 + $0x80] sm:$0xff]   ;;  %v536_v28 = vld [vmem:[%s655_s16 + $0x18] sm:$0xff]  }
  0x13   : > { %272 = vmatpush.msra.mxu0 %v493_v3  ;;  %551 = vmatpush.msra.mxu3 %v493_v3  ;;  %v533_v16 = vunpack.c.h.bf16 %v550_v12  ;;  %v485_v17 = vunpack.c.h.bf16 %v538_v10  ;;  %v517_v18 = vunpack.c.h.bf16 %v546_v11  ;;  %v532_v19 = vunpack.c.l.bf16 %v550_v12  ;;  %v537_v20 = vld [vmem:[%s655_s16 + $0x20] sm:$0xff]   ;;  %v544_v29 = vld [vmem:[%s655_s16 + $0x58] sm:$0xff]   ;;  %v535_v35 = vld [vmem:[%s655_s16 + $0x10] sm:$0xff]  }
  0x14   : > { %301 = vmatpush.msra.mxu1 %v525_v4  ;;  %v545_v21 = vld [vmem:[%s655_s16 + $0x60] sm:$0xff]   ;;  %v529_v22 = vunpack.c.h.bf16 %v549_v15  ;;  %v484_v23 = vunpack.c.l.bf16 %v538_v10  ;;  %v516_v24 = vunpack.c.l.bf16 %v546_v11  ;;  %v528_v25 = vunpack.c.l.bf16 %v549_v15  ;;  %v543_v36 = vld [vmem:[%s655_s16 + $0x50] sm:$0xff]   ;;  %v534_v41 = vld [vmem:[%s655_s16 + $0x8] sm:$0xff]  }
  0x15   : > { %273 = vmatpush.msra.mxu0 %v492_v5  ;;  %552 = vmatpush.msra.mxu3 %v492_v5  ;;  %v481_v26 = vunpack.c.h.bf16 %v537_v20  ;;  %v513_v27 = vunpack.c.h.bf16 %v545_v21  ;;  %v480_v30 = vunpack.c.l.bf16 %v537_v20  ;;  %v512_v31 = vunpack.c.l.bf16 %v545_v21  ;;  %v542_v42 = vld [vmem:[%s655_s16 + $0x48] sm:$0xff]   ;;  %v463_v48 = vld [vmem:[%s655_s16] sm:$0xff]   ;;  %v185_v1 = vld [vmem:[%s732_s0 + $0x50] sm:$0xff] }
  0x16   : > { %302 = vmatpush.msra.mxu1 %v524_v6  ;;  %342 = vmatpush.msra.mxu2 %v533_v16  ;;  %v477_v33 = vunpack.c.h.bf16 %v536_v28  ;;  %v509_v34 = vunpack.c.h.bf16 %v544_v29  ;;  %v476_v37 = vunpack.c.l.bf16 %v536_v28  ;;  %v508_v38 = vunpack.c.l.bf16 %v544_v29  ;;  %v541_v49 = vld [vmem:[%s655_s16 + $0x40] sm:$0xff]   ;;  %v184_v0 = vld [vmem:[%s732_s0 + $0x48] sm:$0xff] }
  0x17   : > { %274 = vmatpush.msra.mxu0 %v489_v8  ;;  %553 = vmatpush.msra.mxu3 %v489_v8  ;;  %v473_v39 = vunpack.c.h.bf16 %v535_v35  ;;  %v505_v40 = vunpack.c.h.bf16 %v543_v36  ;;  %v472_v43 = vunpack.c.l.bf16 %v535_v35  ;;  %v504_v44 = vunpack.c.l.bf16 %v543_v36 }
  0x18   : > { %303 = vmatpush.msra.mxu1 %v521_v9  ;;  %343 = vmatpush.msra.mxu2 %v532_v19  ;;  %v469_v46 = vunpack.c.h.bf16 %v534_v41  ;;  %v501_v47 = vunpack.c.h.bf16 %v542_v42  ;;  %v468_v50 = vunpack.c.l.bf16 %v534_v41  ;;  %v500_v51 = vunpack.c.l.bf16 %v542_v42 }
  0x19   : > { %275 = vmatpush.msra.mxu0 %v488_v13  ;;  %554 = vmatpush.msra.mxu3 %v488_v13  ;;  %v465_v52 = vunpack.c.h.bf16 %v463_v48  ;;  %v497_v53 = vunpack.c.h.bf16 %v541_v49  ;;  %v464_v54 = vunpack.c.l.bf16 %v463_v48  ;;  %v496_v55 = vunpack.c.l.bf16 %v541_v49 }
  0x1a   : > { %304 = vmatpush.msra.mxu1 %v520_v14  ;;  %344 = vmatpush.msra.mxu2 %v529_v22 }
  0x1b   : > { %276 = vmatpush.msra.mxu0 %v485_v17  ;;  %555 = vmatpush.msra.mxu3 %v485_v17 }
  0x1c   : > { %305 = vmatpush.msra.mxu1 %v517_v18  ;;  %345 = vmatpush.msra.mxu2 %v528_v25 }
  0x1d   : > { %277 = vmatpush.msra.mxu0 %v484_v23  ;;  %556 = vmatpush.msra.mxu3 %v484_v23 }
  0x1e   : > { %306 = vmatpush.msra.mxu1 %v516_v24  ;;  %455 = vmatmul.msk.f32.vlgmr.msra.gmra.mxu2 %vm259_vm0, %v177_v32 }
  0x1f   : > { %278 = vmatpush.msra.mxu0 %v481_v26  ;;  %557 = vmatpush.msra.mxu3 %v481_v26 }
  0x20   : > { %307 = vmatpush.msra.mxu1 %v513_v27 }
  0x21   : > { %279 = vmatpush.msra.mxu0 %v480_v30  ;;  %558 = vmatpush.msra.mxu3 %v480_v30 }
  0x22   : > { %308 = vmatpush.msra.mxu1 %v512_v31 }
  0x23   : > { %280 = vmatpush.msra.mxu0 %v477_v33  ;;  %559 = vmatpush.msra.mxu3 %v477_v33 }
  0x24   : > { %309 = vmatpush.msra.mxu1 %v509_v34 }
  0x25   : > { %281 = vmatpush.msra.mxu0 %v476_v37  ;;  %560 = vmatpush.msra.mxu3 %v476_v37 }
  0x26   : > { %310 = vmatpush.msra.mxu1 %v508_v38  ;;  %456 = vmatmul.msk.f32.gmra.mxu2 %vm259_vm0, %v180_v45 }
  0x27   : > { %282 = vmatpush.msra.mxu0 %v473_v39  ;;  %561 = vmatpush.msra.mxu3 %v473_v39 }
  0x28   : > { %311 = vmatpush.msra.mxu1 %v505_v40 }
  0x29   : > { %283 = vmatpush.msra.mxu0 %v472_v43  ;;  %562 = vmatpush.msra.mxu3 %v472_v43 }
  0x2a   : > { %312 = vmatpush.msra.mxu1 %v504_v44 }
  0x2b   : > { %284 = vmatpush.msra.mxu0 %v469_v46  ;;  %563 = vmatpush.msra.mxu3 %v469_v46 }
  0x2c   : > { %313 = vmatpush.msra.mxu1 %v501_v47 }
  0x2d   : > { %285 = vmatpush.msra.mxu0 %v468_v50  ;;  %564 = vmatpush.msra.mxu3 %v468_v50 }
  0x2e   : > { %314 = vmatpush.msra.mxu1 %v500_v51  ;;  %457 = vmatmul.msk.f32.gmra.mxu2 %vm259_vm0, %v183_v56 }
  0x2f   : > { %286 = vmatpush.msra.mxu0 %v465_v52  ;;  %565 = vmatpush.msra.mxu3 %v465_v52 }
  0x30   : > { %315 = vmatpush.msra.mxu1 %v497_v53 }
  0x31   : > { %287 = vmatpush.msra.mxu0 %v464_v54  ;;  %566 = vmatpush.msra.mxu3 %v464_v54 }
  0x32   : > { %316 = vmatpush.msra.mxu1 %v496_v55  ;;  %288 = vmatmul.f32.vlgmr.msra.gmra.mxu0 %v175_v57 }
  0x33   : > { %317 = vmatmul.f32.vlgmr.msra.gmra.mxu1 %v176_v58  ;;  %291 = vmatmul.f32.vlgmr.msra.gmra.mxu3 %v178_v59 }
  0x36   : > { %458 = vmatmul.msk.f32.gmra.mxu2 %vm259_vm0, %v186_v60 }
  0x3b   : > { %320 = vmatmul.f32.gmra.mxu1 %v179_v61  ;;  %294 = vmatmul.f32.gmra.mxu3 %v181_v62 }
  0x43   : > { %323 = vmatmul.f32.gmra.mxu1 %v182_v63  ;;  %297 = vmatmul.f32.gmra.mxu3 %v184_v0 }
  0x4b   : > { %326 = vmatmul.f32.gmra.mxu1 %v185_v1 }
  0xa1   : > { %v347_v2 = vpop.f32.mrf.mxu2 }
  0xa9   : > { %v350_v7 = vpop.f32.mrf.mxu2 }
  0xaf   : > { %v289_v3 = vpop.f32.mrf.mxu0 }
  0xb0   : > { %v318_v4 = vpop.f32.mrf.mxu1 }
  0xb1   : > { %v319_v5 = vadd.f32 %v318_v4, %v289_v3  ;;  %v353_v12 = vpop.f32.mrf.mxu2 }
  0xb3   : > { %v348_v6 = vadd.f32 %v347_v2, %v319_v5 }
  0xb5   : > { %360 = vst.msk [vmem:[%s174_s20] sm:$0xff] %vm359_vm1, %v348_v6 }
  0xb6   : > { %v292_v8 = vpop.f32.mrf.mxu3 }
  0xb8   : > { %v321_v9 = vpop.f32.mrf.mxu1 }
  0xb9   : > { %v322_v10 = vadd.f32 %v321_v9, %v292_v8  ;;  %v356_v17 = vpop.f32.mrf.mxu2 }
  0xbb   : > { %v351_v11 = vadd.f32 %v350_v7, %v322_v10 }
  0xbd   : > { %361 = vst.msk [vmem:[%s174_s20 + $0x8] sm:$0xff] %vm359_vm1, %v351_v11 }
  0xbe   : > { %v295_v13 = vpop.f32.mrf.mxu3 }
  0xc0   : > { %v324_v14 = vpop.f32.mrf.mxu1 }
  0xc1   : > { %v325_v15 = vadd.f32 %v324_v14, %v295_v13 }
  0xc3   : > { %v354_v16 = vadd.f32 %v353_v12, %v325_v15 }
  0xc5   : > { %362 = vst.msk [vmem:[%s174_s20 + $0x10] sm:$0xff] %vm359_vm1, %v354_v16 }
  0xc6   : > { %v298_v18 = vpop.f32.mrf.mxu3 }
  0xc8   : > { %v327_v19 = vpop.f32.mrf.mxu1 }
  0xc9   : > { %v328_v20 = vadd.f32 %v327_v19, %v298_v18 }
  0xcb   : > { %v357_v21 = vadd.f32 %v356_v17, %v328_v20 }
  0xcd   : > { %363 = vst.msk [vmem:[%s174_s20 + $0x18] sm:$0xff] %vm359_vm1, %v357_v21 }
  0xce PF: > { %s12_s11 = sadd.s32 1, %s614_s11   ;;  %s735_s9 = smov %s610_s10 }
  0xcf   : > { %p9_p5 = scmp.ge.s32.totalorder %s12_s11, 4   ;;  %s736_s10 = smov %s738_s12 }
  0xd1   :  { %11 = sbr.rel (!%p9_p5) target bundleno = 2 (0x2), region = 58 }

// kernel: swformer_forward.32
= control target key start
LH: loop header
LB: loop body
LE: loop exit
PB: predicated region body
PF: predicated region fallthrough
CT: control target
= control target key end

     0   :  { %v142_v0 = vmov 0   ;;  %v143_v13 = vmov 0.0   ;;  %s188_s2 = inlined_call_operand.vmem [shape: f32[16,1], index: 2, kind: input, shape index: {}]   ;;  %s189_s1 = inlined_call_operand.vmem [shape: f32[16,1], index: 1, kind: input, shape index: {}]   ;;  %s190_s0 = inlined_call_operand.vmem [shape: bf16[2,16,128], index: 0, kind: input, shape index: {}]   ;;  %s191_s3 = inlined_call_operand.vmem [shape: bf16[2,16,128], index: 3, kind: output, shape index: {}]  }
   0x1   :  { %141 = vset.pattern.permute.xlu1 %v142_v0  ;;  %140 = vset.pattern.permute.xlu0 %v142_v0  ;;  %v16_v1 = vld [vmem:[%s188_s2] sm:$0xff]  ;;  %v17_v3 = vld [vmem:[%s188_s2 + $0x8] sm:$0xff] }
   0x2   :  { %v14_v2 = vld [vmem:[%s189_s1] sm:$0xff]  ;;  %38 = vperm.xlu1 %141, %v16_v1   ;;  %v15_v4 = vld [vmem:[%s189_s1 + $0x8] sm:$0xff] }
   0x3   :  { %24 = vperm.xlu0 %140, %v14_v2   ;;  %v119_v5 = vld [vmem:[%s190_s0] sm:$0xff]   ;;  %v136_v11 = vld [vmem:[%s190_s0 + $0x8] sm:$0xff]  }
   0x4   :  { %v120_v6 = vunpack.c.l.bf16 %v119_v5  ;;  %v121_v12 = vunpack.c.h.bf16 %v119_v5  ;;  %v129_v16 = vunpack.c.l.bf16 %v136_v11  ;;  %v130_v31 = vunpack.c.h.bf16 %v136_v11 }
   0xa   :  { %43 = vperm.xlu1 %141, %v17_v3  }
   0xb   :  { %29 = vperm.xlu0 %140, %v15_v4  }
  0x74   :  { %v39_v7 = vpop.permute.xlu1 %38 }
  0x75   :  { %v25_v8 = vpop.permute.xlu0 %24 }
  0x76   :  { %v32_v9 = vmul.f32 %v120_v6, %v25_v8  ;;  %v77_v23 = vmul.f32 %v129_v16, %v25_v8 }
  0x78   :  { %v46_v10 = vadd.f32 %v39_v7, %v32_v9 }
  0x7a   :  { %vm48_vm0 = vcmp.ge.f32.partialorder %v46_v10, 1.0  ;;  %vm54_vm1 = vcmp.le.f32.partialorder %v46_v10, -1.0 }
  0x7b   :  { %v106_v14 = vsel %vm48_vm0, 1.0, %v143_v13  ;;  %v108_v17 = vsel %vm54_vm1, 1.0, %v143_v13 }
  0x7c   :  { %v66_v15 = vsub.f32 1.0, %v106_v14  ;;  %v44_v21 = vpop.permute.xlu1 %43  ;;  %v60_v28 = vsub.f32 %v106_v14, %v108_v17 }
  0x7d   :  { %v30_v18 = vpop.permute.xlu0 %29 }
  0x7e   :  { %v68_v19 = vsub.f32 %v66_v15, %v108_v17  ;;  %v33_v20 = vmul.f32 %v121_v12, %v30_v18  ;;  %v78_v36 = vmul.f32 %v130_v31, %v30_v18 }
  0x80   :  { %v70_v22 = vmul.f32 %v68_v19, %v46_v10  ;;  %v47_v24 = vadd.f32 %v44_v21, %v33_v20 }
  0x82   :  { %v79_v25 = vadd.f32 %v77_v23, %v70_v22  ;;  %vm49_vm2 = vcmp.ge.f32.partialorder %v47_v24, 1.0  ;;  %vm55_vm3 = vcmp.le.f32.partialorder %v47_v24, -1.0 }
  0x83   :  { %v107_v26 = vsel %vm49_vm2, 1.0, %v143_v13  ;;  %v109_v27 = vsel %vm55_vm3, 1.0, %v143_v13 }
  0x84   :  { %v61_v29 = vsub.f32 %v107_v26, %v109_v27  ;;  %v67_v30 = vsub.f32 1.0, %v107_v26  ;;  %v81_v32 = vadd.f32 %v79_v25, %v39_v7 }
  0x86   :  { %v125_v33 = vpack.c.bf16 %v61_v29, %v60_v28  ;;  %v69_v34 = vsub.f32 %v67_v30, %v109_v27  ;;  %vm83_vm4 = vcmp.ge.f32.partialorder %v81_v32, 1.0  ;;  %vm89_vm5 = vcmp.le.f32.partialorder %v81_v32, -1.0 }
  0x87   :  { %v112_v39 = vsel %vm83_vm4, 1.0, %v143_v13  ;;  %v114_v40 = vsel %vm89_vm5, 1.0, %v143_v13 }
  0x88   :  { %126 = vst [vmem:[%s191_s3] sm:$0xff] %v125_v33   ;;  %v71_v35 = vmul.f32 %v69_v34, %v47_v24  ;;  %v95_v43 = vsub.f32 %v112_v39, %v114_v40 }
  0x8a   :  { %v80_v37 = vadd.f32 %v78_v36, %v71_v35 }
  0x8c   :  { %v82_v38 = vadd.f32 %v80_v37, %v44_v21 }
  0x8e   :  { %vm84_vm6 = vcmp.ge.f32.partialorder %v82_v38, 1.0  ;;  %vm90_vm7 = vcmp.le.f32.partialorder %v82_v38, -1.0 }
  0x8f   :  { %v113_v41 = vsel %vm84_vm6, 1.0, %v143_v13  ;;  %v115_v42 = vsel %vm90_vm7, 1.0, %v143_v13 }
  0x90   :  { %v96_v44 = vsub.f32 %v113_v41, %v115_v42 }
  0x92   :  { %v134_v45 = vpack.c.bf16 %v96_v44, %v95_v43 }
  0x94   :  { %137 = vst [vmem:[%s191_s3 + $0x8] sm:$0xff] %v134_v45  }

// kernel: swformer_forward.33
= control target key start
LH: loop header
LB: loop body
LE: loop exit
PB: predicated region body
PF: predicated region fallthrough
CT: control target
= control target key end

     0   :  { %s344_s9 = smov 0   ;;  %s397_s0 = inlined_call_operand.vmem [shape: bf16[64,64], index: 0, kind: input, shape index: {}]   ;;  %s398_s1 = inlined_call_operand.vmem [shape: f32[64,64], index: 1, kind: input, shape index: {}]   ;;  %s399_s2 = inlined_call_operand.vmem [shape: f32[64,64], index: 2, kind: output, shape index: {}]  }
   0x1 LB: > { %s265_s10 = sadd.s32 4294967295, %s327_s9   ;;  %p269_p0 = scmp.ge.s32.totalorder %s327_s9, 1  ;;  %s327_s9 = sphi %s344_s9, %s12_s9  }
   0x2   : > { %p113_p1 = scmp.lt.s32.totalorder %s327_s9, 3 }
   0x4   : > { %p114_p2 = pnand %p269_p0, %p113_p1 }
   0x5   : > { %s270_s15 = sshll.u32 (!%p114_p2), %s265_s10, 2 }
   0x6   : > { %117 = sbr.rel (%p114_p2) target bundleno = 161 (0xa1), region = 28  ;;  %p136_p3 = scmp.lt.s32.totalorder (!%p114_p2), %s270_s15, 7 }
   0xb   : > { %v162_v0 = vld [vmem:[%s398_s1 + $0x38] sm:$0xff]  ;;  %v161_v1 = vld [vmem:[%s398_s1 + $0x30] sm:$0xff]  ;;  %v160_v2 = vld [vmem:[%s398_s1 + $0x28] sm:$0xff]  ;;  %s401_s15 = smov (!%p136_p3, %s270_s15), 7  ;;  %vm163_vm0 = vcmask 523264  }
   0xc   : > { %290 = vmatpush.msra.mxu2 %v162_v0  ;;  %291 = vmatpush.msra.mxu3 %v162_v0  ;;  %v159_v3 = vld [vmem:[%s398_s1 + $0x20] sm:$0xff]  ;;  %s271_s20 = sshll.u32 %s401_s15, 2  ;;  %v158_v4 = vld [vmem:[%s398_s1 + $0x18] sm:$0xff]  ;;  %v157_v5 = vld [vmem:[%s398_s1 + $0x10] sm:$0xff]  ;;  %s273_s4 = sshll.u32 %s401_s15, 3 }
   0xd   : > { %184 = vmatpush.msra.mxu0 %v162_v0  ;;  %289 = vmatpush.msra.mxu1 %v162_v0  ;;  %s139_s25 = scalar_lea.vmem %s397_s0, %s271_s20  ;;  %v156_v7 = vld [vmem:[%s398_s1 + $0x8] sm:$0xff]  ;;  %v155_v9 = vld [vmem:[%s398_s1] sm:$0xff]  ;;  %s145_s7 = scalar_lea.vmem %s399_s2, %s273_s4 }
   0xe   : > { %293 = vmatpush.msra.mxu2 %v161_v1  ;;  %294 = vmatpush.msra.mxu3 %v161_v1  ;;  %v288_v6 = vld [vmem:[%s139_s25 + $0x8] sm:$0xff]   ;;  %v281_v8 = vld [vmem:[%s139_s25] sm:$0xff]  }
   0xf   : > { %185 = vmatpush.msra.mxu0 %v161_v1  ;;  %292 = vmatpush.msra.mxu1 %v161_v1  ;;  %v286_v10 = vunpack.c.l.bf16 %v288_v6  ;;  %v287_v11 = vunpack.c.h.bf16 %v288_v6  ;;  %v282_v12 = vunpack.c.l.bf16 %v281_v8  ;;  %v283_v13 = vunpack.c.h.bf16 %v281_v8 }
  0x10   : > { %296 = vmatpush.msra.mxu2 %v160_v2  ;;  %297 = vmatpush.msra.mxu3 %v160_v2 }
  0x11   : > { %186 = vmatpush.msra.mxu0 %v160_v2  ;;  %295 = vmatpush.msra.mxu1 %v160_v2 }
  0x12   : > { %299 = vmatpush.msra.mxu2 %v159_v3  ;;  %300 = vmatpush.msra.mxu3 %v159_v3 }
  0x13   : > { %187 = vmatpush.msra.mxu0 %v159_v3  ;;  %298 = vmatpush.msra.mxu1 %v159_v3 }
  0x14   : > { %302 = vmatpush.msra.mxu2 %v158_v4  ;;  %303 = vmatpush.msra.mxu3 %v158_v4 }
  0x15   : > { %188 = vmatpush.msra.mxu0 %v158_v4  ;;  %301 = vmatpush.msra.mxu1 %v158_v4 }
  0x16   : > { %305 = vmatpush.msra.mxu2 %v157_v5  ;;  %306 = vmatpush.msra.mxu3 %v157_v5 }
  0x17   : > { %189 = vmatpush.msra.mxu0 %v157_v5  ;;  %304 = vmatpush.msra.mxu1 %v157_v5 }
  0x18   : > { %308 = vmatpush.msra.mxu2 %v156_v7  ;;  %309 = vmatpush.msra.mxu3 %v156_v7 }
  0x19   : > { %190 = vmatpush.msra.mxu0 %v156_v7  ;;  %307 = vmatpush.msra.mxu1 %v156_v7 }
  0x1a   : > { %311 = vmatpush.msra.mxu2 %v155_v9  ;;  %312 = vmatpush.msra.mxu3 %v155_v9 }
  0x1b   : > { %276 = vmatmul.msk.f32.vlgmr.msra.gmra.mxu2 %vm163_vm0, %v286_v10  ;;  %277 = vmatmul.msk.f32.vlgmr.msra.gmra.mxu3 %vm163_vm0, %v287_v11 }
  0x1c   : > { %191 = vmatpush.msra.mxu0 %v155_v9  ;;  %310 = vmatpush.msra.mxu1 %v155_v9 }
  0x1d   : > { %274 = vmatmul.msk.f32.vlgmr.msra.gmra.mxu0 %vm163_vm0, %v282_v12  ;;  %275 = vmatmul.msk.f32.vlgmr.msra.gmra.mxu1 %vm163_vm0, %v283_v13 }
  0x9a   : > { %v193_v14 = vpop.f32.mrf.mxu0  ;;  %v196_v15 = vpop.f32.mrf.mxu1 }
  0x9b   : > { %205 = vst.msk [vmem:[%s145_s7] sm:$0xff] %vm163_vm0, %v193_v14 }
  0x9c   : > { %206 = vst.msk [vmem:[%s145_s7 + $0x8] sm:$0xff] %vm163_vm0, %v196_v15 }
  0x9e   : > { %v199_v16 = vpop.f32.mrf.mxu2  ;;  %v202_v17 = vpop.f32.mrf.mxu3 }
  0x9f   : > { %207 = vst.msk [vmem:[%s145_s7 + $0x10] sm:$0xff] %vm163_vm0, %v199_v16 }
  0xa0   : > { %208 = vst.msk [vmem:[%s145_s7 + $0x18] sm:$0xff] %vm163_vm0, %v202_v17 }
  0xa1 PF: > { %s12_s9 = sadd.s32 1, %s327_s9  }
  0xa2   : > { %p9_p4 = scmp.ge.s32.totalorder %s12_s9, 4  }
  0xa4   :  { %11 = sbr.rel (!%p9_p4) target bundleno = 1 (0x1), region = 58 }

// kernel: swformer_forward.35
= control target key start
LH: loop header
LB: loop body
LE: loop exit
PB: predicated region body
PF: predicated region fallthrough
CT: control target
= control target key end

     0   :  { %s418_s9 = smov 0   ;;  %s420_s10 = smov 0   ;;  %s467_s0 = inlined_call_operand.vmem [shape: f32[32,32], index: 0, kind: input, shape index: {}]   ;;  %s468_s1 = inlined_call_operand.vmem [shape: bf16[2,32,64], index: 1, kind: input, shape index: {}]   ;;  %s469_s2 = inlined_call_operand.vmem [shape: f32[2,32,64], index: 2, kind: output, shape index: {}]  }
   0x1   :  { %s422_s11 = smov 0  }
   0x2 LB: > { %s24_s12 = sadd.s32 1, %s397_s10  ;;  %p321_p0 = scmp.ge.s32.totalorder %s401_s11, 1  ;;  %s401_s11 = sphi %s422_s11, %s12_s11   ;;  %s397_s10 = sphi %s420_s10, %s471_s10   ;;  %s393_s9 = sphi %s418_s9, %s470_s9  }
   0x3   : > { %p26_p1 = scmp.ge.s32.totalorder %s24_s12, 2  ;;  %p131_p2 = scmp.lt.s32.totalorder %s401_s11, 3 }
   0x5   : > { %s473_s12 = smov (%p26_p1, %s24_s12), 0  ;;  %p132_p3 = pnand %p321_p0, %p131_p2 }
   0x6   : > { %p159_p4 = scmp.lt.s32.totalorder (!%p132_p3), %s393_s9, 1 }
   0x7   : > { %135 = sbr.rel (%p132_p3) target bundleno = 159 (0x9f), region = 28 }
   0xc   : > { %s475_s9 = smov (!%p159_p4, %s393_s9), 1  ;;  %v177_v6 = vld [vmem:[%s467_s0 + $0x10] sm:$0xff]  ;;  %vm187_vm0 = vcmask 261120   ;;  %v178_v7 = vld [vmem:[%s467_s0 + $0x18] sm:$0xff]  ;;  %v175_v8 = vld [vmem:[%s467_s0] sm:$0xff]  ;;  %vm229_vm1 = vcmask 523264  }
   0xd   : > { %s332_s13 = sshll.u32 %s475_s9, 4  ;;  %v176_v9 = vld [vmem:[%s467_s0 + $0x8] sm:$0xff]  ;;  %s333_s25 = sshll.u32 %s475_s9, 5 }
   0xe   : > { %s166_s16 = scalar_lea.vmem %s468_s1, %s332_s13  ;;  %s174_s28 = scalar_lea.vmem %s469_s2, %s333_s25 }
   0xf   : > { %v342_v0 = vld [vmem:[%s166_s16 + $0x8] sm:$0xff]   ;;  %v335_v1 = vld [vmem:[%s166_s16] sm:$0xff]  }
  0x10   : > { %v341_v2 = vunpack.c.h.bf16 %v342_v0  ;;  %v340_v3 = vunpack.c.l.bf16 %v342_v0  ;;  %v337_v4 = vunpack.c.h.bf16 %v335_v1  ;;  %v336_v5 = vunpack.c.l.bf16 %v335_v1 }
  0x12   : > { %344 = vmatpush.msra.mxu2 %v341_v2  ;;  %345 = vmatpush.msra.mxu3 %v341_v2 }
  0x13   : > { %212 = vmatpush.msra.mxu0 %v341_v2  ;;  %343 = vmatpush.msra.mxu1 %v341_v2 }
  0x14   : > { %347 = vmatpush.msra.mxu2 %v340_v3  ;;  %348 = vmatpush.msra.mxu3 %v340_v3 }
  0x15   : > { %213 = vmatpush.msra.mxu0 %v340_v3  ;;  %346 = vmatpush.msra.mxu1 %v340_v3 }
  0x16   : > { %350 = vmatpush.msra.mxu2 %v337_v4  ;;  %351 = vmatpush.msra.mxu3 %v337_v4 }
  0x17   : > { %214 = vmatpush.msra.mxu0 %v337_v4  ;;  %349 = vmatpush.msra.mxu1 %v337_v4 }
  0x18   : > { %353 = vmatpush.msra.mxu2 %v336_v5  ;;  %354 = vmatpush.msra.mxu3 %v336_v5 }
  0x19   : > { %328 = vmatmul.msk.f32.vlgmr.msra.gmra.mxu2 %vm187_vm0, %v177_v6  ;;  %329 = vmatmul.msk.f32.vlgmr.msra.gmra.mxu3 %vm187_vm0, %v178_v7 }
  0x1a   : > { %215 = vmatpush.msra.mxu0 %v336_v5  ;;  %352 = vmatpush.msra.mxu1 %v336_v5 }
  0x1b   : > { %326 = vmatmul.msk.f32.vlgmr.msra.gmra.mxu0 %vm187_vm0, %v175_v8  ;;  %327 = vmatmul.msk.f32.vlgmr.msra.gmra.mxu1 %vm187_vm0, %v176_v9 }
  0x98   : > { %v217_v10 = vpop.f32.mrf.mxu0  ;;  %v220_v11 = vpop.f32.mrf.mxu1 }
  0x99   : > { %230 = vst.msk [vmem:[%s174_s28] sm:$0xff] %vm229_vm1, %v217_v10 }
  0x9a   : > { %231 = vst.msk [vmem:[%s174_s28 + $0x8] sm:$0xff] %vm229_vm1, %v220_v11 }
  0x9c   : > { %v223_v12 = vpop.f32.mrf.mxu2  ;;  %v226_v13 = vpop.f32.mrf.mxu3 }
  0x9d   : > { %232 = vst.msk [vmem:[%s174_s28 + $0x10] sm:$0xff] %vm229_vm1, %v223_v12 }
  0x9e   : > { %233 = vst.msk [vmem:[%s174_s28 + $0x18] sm:$0xff] %vm229_vm1, %v226_v13 }
  0x9f PF: > { %s12_s11 = sadd.s32 1, %s401_s11   ;;  %s470_s9 = smov %s397_s10 }
  0xa0   : > { %p9_p5 = scmp.ge.s32.totalorder %s12_s11, 4   ;;  %s471_s10 = smov %s473_s12 }
  0xa2   :  { %11 = sbr.rel (!%p9_p5) target bundleno = 2 (0x2), region = 58 }

// kernel: swformer_forward.36
= control target key start
LH: loop header
LB: loop body
LE: loop exit
PB: predicated region body
PF: predicated region fallthrough
CT: control target
= control target key end

     0   :  { %v129_v0 = vmov 0   ;;  %v130_v10 = vmov 0.0   ;;  %s181_s2 = inlined_call_operand.vmem [shape: f32[16,1], index: 2, kind: input, shape index: {}]   ;;  %s182_s1 = inlined_call_operand.vmem [shape: f32[16,1], index: 1, kind: input, shape index: {}]   ;;  %s183_s0 = inlined_call_operand.vmem [shape: f32[2,16,128], index: 0, kind: input, shape index: {}]   ;;  %s184_s3 = inlined_call_operand.vmem [shape: bf16[2,16,128], index: 3, kind: output, shape index: {}]  }
   0x1   :  { %128 = vset.pattern.permute.xlu1 %v129_v0  ;;  %127 = vset.pattern.permute.xlu0 %v129_v0  ;;  %v16_v1 = vld [vmem:[%s181_s2] sm:$0xff]  ;;  %v17_v3 = vld [vmem:[%s181_s2 + $0x8] sm:$0xff]  ;;  %v106_v15 = vld [vmem:[%s183_s0 + $0x10] sm:$0xff] }
   0x2   :  { %v14_v2 = vld [vmem:[%s182_s1] sm:$0xff]  ;;  %36 = vperm.xlu1 %128, %v16_v1   ;;  %v15_v4 = vld [vmem:[%s182_s1 + $0x8] sm:$0xff]  ;;  %v107_v29 = vld [vmem:[%s183_s0 + $0x18] sm:$0xff] }
   0x3   :  { %22 = vperm.xlu0 %127, %v14_v2   ;;  %v18_v5 = vld [vmem:[%s183_s0] sm:$0xff]  ;;  %v19_v12 = vld [vmem:[%s183_s0 + $0x8] sm:$0xff] }
   0xa   :  { %41 = vperm.xlu1 %128, %v17_v3  }
   0xb   :  { %27 = vperm.xlu0 %127, %v15_v4  }
  0x74   :  { %v37_v6 = vpop.permute.xlu1 %36 }
  0x75   :  { %v23_v7 = vpop.permute.xlu0 %22 }
  0x76   :  { %v30_v8 = vmul.f32 %v23_v7, %v18_v5  ;;  %v73_v21 = vmul.f32 %v106_v15, %v23_v7 }
  0x78   :  { %v44_v9 = vadd.f32 %v37_v6, %v30_v8 }
  0x7a   :  { %vm46_vm0 = vcmp.ge.f32.partialorder %v44_v9, 1.0  ;;  %vm52_vm1 = vcmp.le.f32.partialorder %v44_v9, -1.0 }
  0x7b   :  { %v102_v11 = vsel %vm46_vm0, 1.0, %v130_v10  ;;  %v104_v14 = vsel %vm52_vm1, 1.0, %v130_v10 }
  0x7c   :  { %v64_v13 = vsub.f32 1.0, %v102_v11  ;;  %v42_v19 = vpop.permute.xlu1 %41  ;;  %v58_v26 = vsub.f32 %v102_v11, %v104_v14 }
  0x7d   :  { %v28_v16 = vpop.permute.xlu0 %27 }
  0x7e   :  { %v66_v17 = vsub.f32 %v64_v13, %v104_v14  ;;  %v31_v18 = vmul.f32 %v28_v16, %v19_v12  ;;  %v74_v34 = vmul.f32 %v107_v29, %v28_v16 }
  0x80   :  { %v68_v20 = vmul.f32 %v66_v17, %v44_v9  ;;  %v45_v22 = vadd.f32 %v42_v19, %v31_v18 }
  0x82   :  { %v75_v23 = vadd.f32 %v73_v21, %v68_v20  ;;  %vm47_vm2 = vcmp.ge.f32.partialorder %v45_v22, 1.0  ;;  %vm53_vm3 = vcmp.le.f32.partialorder %v45_v22, -1.0 }
  0x83   :  { %v103_v24 = vsel %vm47_vm2, 1.0, %v130_v10  ;;  %v105_v25 = vsel %vm53_vm3, 1.0, %v130_v10 }
  0x84   :  { %v59_v27 = vsub.f32 %v103_v24, %v105_v25  ;;  %v65_v28 = vsub.f32 1.0, %v103_v24  ;;  %v77_v30 = vadd.f32 %v75_v23, %v37_v6 }
  0x86   :  { %v117_v31 = vpack.c.bf16 %v59_v27, %v58_v26  ;;  %v67_v32 = vsub.f32 %v65_v28, %v105_v25  ;;  %vm79_vm4 = vcmp.ge.f32.partialorder %v77_v30, 1.0  ;;  %vm85_vm5 = vcmp.le.f32.partialorder %v77_v30, -1.0 }
  0x87   :  { %v108_v37 = vsel %vm79_vm4, 1.0, %v130_v10  ;;  %v110_v38 = vsel %vm85_vm5, 1.0, %v130_v10 }
  0x88   :  { %118 = vst [vmem:[%s184_s3] sm:$0xff] %v117_v31   ;;  %v69_v33 = vmul.f32 %v67_v32, %v45_v22  ;;  %v91_v41 = vsub.f32 %v108_v37, %v110_v38 }
  0x8a   :  { %v76_v35 = vadd.f32 %v74_v34, %v69_v33 }
  0x8c   :  { %v78_v36 = vadd.f32 %v76_v35, %v42_v19 }
  0x8e   :  { %vm80_vm6 = vcmp.ge.f32.partialorder %v78_v36, 1.0  ;;  %vm86_vm7 = vcmp.le.f32.partialorder %v78_v36, -1.0 }
  0x8f   :  { %v109_v39 = vsel %vm80_vm6, 1.0, %v130_v10  ;;  %v111_v40 = vsel %vm86_vm7, 1.0, %v130_v10 }
  0x90   :  { %v92_v42 = vsub.f32 %v109_v39, %v111_v40 }
  0x92   :  { %v122_v43 = vpack.c.bf16 %v92_v42, %v91_v41 }
  0x94   :  { %124 = vst [vmem:[%s184_s3 + $0x8] sm:$0xff] %v122_v43  }

// kernel: swformer_forward.38
= control target key start
LH: loop header
LB: loop body
LE: loop exit
PB: predicated region body
PF: predicated region fallthrough
CT: control target
= control target key end

     0   :  { %s402_s12 = smov 0   ;;  %s404_s13 = smov 0   ;;  %s441_s0 = inlined_call_operand.vmem [shape: f32[8,36], index: 0, kind: input, shape index: {}]   ;;  %s442_s1 = inlined_call_operand.vmem [shape: f32[16,36,64], index: 1, kind: input, shape index: {}]   ;;  %s443_s2 = inlined_call_operand.vmem [shape: f32[8,1], index: 2, kind: input, shape index: {}]   ;;  %s444_s3 = inlined_call_operand.vmem [shape: f32[16,8,64], index: 3, kind: output, shape index: {}]  }
   0x1   :  { %s406_s14 = smov 0  }
   0x2 LB: > { %s25_s15 = sadd.s32 1, %s375_s13  ;;  %p323_p0 = scmp.ge.s32.totalorder %s379_s14, 1  ;;  %s379_s14 = sphi %s406_s14, %s13_s14   ;;  %s375_s13 = sphi %s404_s13, %s446_s13   ;;  %s371_s12 = sphi %s402_s12, %s445_s12  }
   0x3   : > { %p27_p1 = scmp.ge.s32.totalorder %s25_s15, 16  ;;  %p156_p2 = scmp.lt.s32.totalorder %s379_s14, 17 }
   0x5   : > { %s448_s15 = smov (%p27_p1, %s25_s15), 0  ;;  %p157_p3 = pnand %p323_p0, %p156_p2 }
   0x6   : > { %p185_p4 = scmp.lt.s32.totalorder (!%p157_p3), %s371_s12, 15 }
   0x7   : > { %160 = sbr.rel (%p157_p3) target bundleno = 155 (0x9b), region = 32 }
   0xc   : > { %v206_v0 = vld [vmem:[%s443_s2] sm:$0xff]  ;;  %v381_v1 = vmov 0   ;;  %s450_s12 = smov (!%p185_p4, %s371_s12), 15  ;;  %vm216_vm0 = vcmask 1043456   ;;  %vm212_vm1 = vcmask 293888   ;;  %vm240_vm2 = vcmask 523264  }
   0xd   : > { %356 = vset.pattern.permute.xlu0 %v381_v1  ;;  %s330_s18 = smul.u32 40, %s450_s12  ;;  %v200_v7 = vld [vmem:[%s441_s0] sm:$0xff]  ;;  %s325_s24 = sshll.u32 %s450_s12, 3 }
   0xe   : > { %209 = vperm.xlu0 %356, %v206_v0   ;;  %s199_s27 = scalar_lea.vmem %s444_s3, %s325_s24 }
   0xf   : > { %s192_s21 = scalar_lea.vmem %s442_s1, %s330_s18 }
  0x10   : > { %v205_v2 = vld [vmem:[%s192_s21 + $0x20] sm:$0xf]  ;;  %v204_v3 = vld [vmem:[%s192_s21 + $0x18] sm:$0xff]  ;;  %v203_v4 = vld [vmem:[%s192_s21 + $0x10] sm:$0xff] }
  0x11   : > { %326 = vmatpush.msk.msra.mxu0 %vm216_vm0, %v205_v2  ;;  %v202_v5 = vld [vmem:[%s192_s21 + $0x8] sm:$0xff]  ;;  %v201_v6 = vld [vmem:[%s192_s21] sm:$0xff] }
  0x13   : > { %232 = vmatpush.msra.mxu0 %v204_v3 }
  0x15   : > { %233 = vmatpush.msra.mxu0 %v203_v4 }
  0x17   : > { %234 = vmatpush.msra.mxu0 %v202_v5 }
  0x19   : > { %235 = vmatpush.msra.mxu0 %v201_v6 }
  0x1a   : > { %327 = vmatmul.msk.f32.vlgmr.msra.gmra.mxu0 %vm212_vm1, %v200_v7 }
  0x80   : > { %v210_v8 = vpop.permute.xlu0 %209 }
  0x97   : > { %v237_v9 = vpop.f32.mrf.mxu0 }
  0x98   : > { %v238_v10 = vadd.f32 %v237_v9, %v210_v8 }
  0x9a   : > { %241 = vst.msk [vmem:[%s199_s27] sm:$0xff] %vm240_vm2, %v238_v10 }
  0x9b PF: > { %s13_s14 = sadd.s32 1, %s379_s14   ;;  %s445_s12 = smov %s375_s13 }
  0x9c   : > { %p10_p5 = scmp.ge.s32.totalorder %s13_s14, 18   ;;  %s446_s13 = smov %s448_s15 }
  0x9e   :  { %12 = sbr.rel (!%p10_p5) target bundleno = 2 (0x2), region = 62 }

// kernel: swformer_forward.40
= control target key start
LH: loop header
LB: loop body
LE: loop exit
PB: predicated region body
PF: predicated region fallthrough
CT: control target
= control target key end

     0   :  { %s539_s12 = smov 0   ;;  %s541_s13 = smov 0   ;;  %s640_s0 = inlined_call_operand.vmem [shape: f32[64,32], index: 0, kind: input, shape index: {}]   ;;  %s641_s1 = inlined_call_operand.vmem [shape: bf16[2,32,64], index: 1, kind: input, shape index: {}]   ;;  %s642_s2 = inlined_call_operand.vmem [shape: f32[64,1], index: 2, kind: input, shape index: {}]   ;;  %s643_s3 = inlined_call_operand.vmem [shape: f32[2,64,64], index: 3, kind: output, shape index: {}]  }
   0x1   :  { %s543_s14 = smov 0  }
   0x2 LB: > { %s25_s15 = sadd.s32 1, %s512_s13  ;;  %p428_p0 = scmp.ge.s32.totalorder %s516_s14, 1  ;;  %s516_s14 = sphi %s543_s14, %s13_s14   ;;  %s512_s13 = sphi %s541_s13, %s645_s13   ;;  %s508_s12 = sphi %s539_s12, %s644_s12  }
   0x3   : > { %p27_p1 = scmp.ge.s32.totalorder %s25_s15, 2  ;;  %p156_p2 = scmp.lt.s32.totalorder %s516_s14, 3 }
   0x5   : > { %s647_s15 = smov (%p27_p1, %s25_s15), 0  ;;  %p157_p3 = pnand %p428_p0, %p156_p2 }
   0x6   : > { %p186_p4 = scmp.lt.s32.totalorder (!%p157_p3), %s508_s12, 1 }
   0x7   : > { %160 = sbr.rel (%p157_p3) target bundleno = 171 (0xab), region = 32 }
   0xc   : > { %v220_v0 = vld [vmem:[%s642_s2 + $0x10] sm:$0xff]  ;;  %v218_v1 = vld [vmem:[%s642_s2] sm:$0xff]  ;;  %v518_v2 = vmov 0   ;;  %s649_s12 = smov (!%p186_p4, %s508_s12), 1  ;;  %vm266_vm0 = vcmask 261120   ;;  %v221_v14 = vld [vmem:[%s642_s2 + $0x18] sm:$0xff] }
   0xd   : > { %492 = vset.pattern.permute.xlu1 %v518_v2  ;;  %491 = vset.pattern.permute.xlu0 %v518_v2  ;;  %s443_s20 = sshll.u32 %s649_s12, 4  ;;  %v222_v3 = vld [vmem:[%s642_s2 + $0x20] sm:$0xff]  ;;  %v204_v11 = vld [vmem:[%s640_s0 + $0x10] sm:$0xff]  ;;  %v219_v15 = vld [vmem:[%s642_s2 + $0x8] sm:$0xff]  ;;  %s444_s29 = sshll.u32 %s649_s12, 6  ;;  %vm332_vm1 = vcmask 523264  }
   0xe   : > { %238 = vperm.xlu1 %492, %v220_v0   ;;  %228 = vperm.xlu0 %491, %v218_v1   ;;  %s193_s25 = scalar_lea.vmem %s641_s1, %s443_s20  ;;  %v202_v10 = vld [vmem:[%s640_s0] sm:$0xff]  ;;  %v208_v13 = vld [vmem:[%s640_s0 + $0x30] sm:$0xff]  ;;  %v223_v16 = vld [vmem:[%s642_s2 + $0x28] sm:$0xff]  ;;  %s201_s5 = scalar_lea.vmem %s643_s3, %s444_s29 }
   0xf   : > { %493 = vset.pattern.permute.xlu2 %v518_v2  ;;  %v453_v4 = vld [vmem:[%s193_s25 + $0x8] sm:$0xff]   ;;  %v446_v5 = vld [vmem:[%s193_s25] sm:$0xff]   ;;  %v205_v18 = vld [vmem:[%s640_s0 + $0x18] sm:$0xff] }
  0x10   : > { %248 = vperm.xlu2 %493, %v222_v3   ;;  %v452_v6 = vunpack.c.h.bf16 %v453_v4  ;;  %v451_v7 = vunpack.c.l.bf16 %v453_v4  ;;  %v448_v8 = vunpack.c.h.bf16 %v446_v5  ;;  %v447_v9 = vunpack.c.l.bf16 %v446_v5  ;;  %v206_v12 = vld [vmem:[%s640_s0 + $0x20] sm:$0xff]  ;;  %v203_v17 = vld [vmem:[%s640_s0 + $0x8] sm:$0xff]  ;;  %v209_v20 = vld [vmem:[%s640_s0 + $0x38] sm:$0xff] }
  0x11   : > { %v207_v19 = vld [vmem:[%s640_s0 + $0x28] sm:$0xff]  ;;  %v225_v21 = vld [vmem:[%s642_s2 + $0x38] sm:$0xff]  ;;  %v224_v22 = vld [vmem:[%s642_s2 + $0x30] sm:$0xff] }
  0x12   : > { %303 = vmatpush.msra.mxu0 %v452_v6  ;;  %454 = vmatpush.msra.mxu1 %v452_v6 }
  0x13   : > { %455 = vmatpush.msra.mxu2 %v452_v6  ;;  %456 = vmatpush.msra.mxu3 %v452_v6 }
  0x14   : > { %304 = vmatpush.msra.mxu0 %v451_v7  ;;  %457 = vmatpush.msra.mxu1 %v451_v7 }
  0x15   : > { %458 = vmatpush.msra.mxu2 %v451_v7  ;;  %459 = vmatpush.msra.mxu3 %v451_v7 }
  0x16   : > { %305 = vmatpush.msra.mxu0 %v448_v8  ;;  %460 = vmatpush.msra.mxu1 %v448_v8 }
  0x17   : > { %461 = vmatpush.msra.mxu2 %v448_v8  ;;  %462 = vmatpush.msra.mxu3 %v448_v8 }
  0x18   : > { %306 = vmatpush.msra.mxu0 %v447_v9  ;;  %463 = vmatpush.msra.mxu1 %v447_v9 }
  0x19   : > { %464 = vmatpush.msra.mxu2 %v447_v9  ;;  %465 = vmatpush.msra.mxu3 %v447_v9 }
  0x1a   : > { %433 = vmatmul.msk.f32.vlgmr.msra.gmra.mxu0 %vm266_vm0, %v202_v10  ;;  %435 = vmatmul.msk.f32.vlgmr.msra.gmra.mxu1 %vm266_vm0, %v204_v11 }
  0x1b   : > { %437 = vmatmul.msk.f32.vlgmr.msra.gmra.mxu2 %vm266_vm0, %v206_v12  ;;  %439 = vmatmul.msk.f32.vlgmr.msra.gmra.mxu3 %vm266_vm0, %v208_v13 }
  0x1c   : > { %243 = vperm.xlu1 %492, %v221_v14   ;;  %233 = vperm.xlu0 %491, %v219_v15  }
  0x1d   : > { %253 = vperm.xlu2 %493, %v223_v16  }
  0x22   : > { %434 = vmatmul.msk.f32.gmra.mxu0 %vm266_vm0, %v203_v17  ;;  %436 = vmatmul.msk.f32.gmra.mxu1 %vm266_vm0, %v205_v18 }
  0x23   : > { %438 = vmatmul.msk.f32.gmra.mxu2 %vm266_vm0, %v207_v19  ;;  %440 = vmatmul.msk.f32.gmra.mxu3 %vm266_vm0, %v209_v20 }
  0x24   : > { %263 = vperm.xlu1 %492, %v225_v21   ;;  %258 = vperm.xlu0 %491, %v224_v22  }
  0x6a   : > { %v249_v31 = vpop.permute.xlu2 %248 }
  0x77   : > { %v254_v42 = vpop.permute.xlu2 %253 }
  0x80   : > { %v229_v23 = vpop.permute.xlu0 %228  ;;  %v239_v24 = vpop.permute.xlu1 %238 }
  0x8e   : > { %v234_v25 = vpop.permute.xlu0 %233  ;;  %v244_v30 = vpop.permute.xlu1 %243 }
  0x96   : > { %v259_v32 = vpop.permute.xlu0 %258  ;;  %v264_v41 = vpop.permute.xlu1 %263 }
  0x97   : > { %v308_v26 = vpop.f32.mrf.mxu0  ;;  %v314_v27 = vpop.f32.mrf.mxu1 }
  0x98   : > { %v309_v28 = vadd.f32 %v308_v26, %v229_v23  ;;  %v315_v29 = vadd.f32 %v314_v27, %v239_v24 }
  0x9a   : > { %333 = vst.msk [vmem:[%s201_s5] sm:$0xff] %vm332_vm1, %v309_v28 }
  0x9b   : > { %335 = vst.msk [vmem:[%s201_s5 + $0x10] sm:$0xff] %vm332_vm1, %v315_v29 }
  0x9e   : > { %v320_v33 = vpop.f32.mrf.mxu2  ;;  %v326_v34 = vpop.f32.mrf.mxu3 }
  0x9f   : > { %v321_v35 = vadd.f32 %v320_v33, %v249_v31  ;;  %v327_v36 = vadd.f32 %v326_v34, %v259_v32  ;;  %v311_v37 = vpop.f32.mrf.mxu0  ;;  %v317_v38 = vpop.f32.mrf.mxu1 }
  0xa0   : > { %v312_v39 = vadd.f32 %v311_v37, %v234_v25  ;;  %v318_v40 = vadd.f32 %v317_v38, %v244_v30 }
  0xa1   : > { %337 = vst.msk [vmem:[%s201_s5 + $0x20] sm:$0xff] %vm332_vm1, %v321_v35 }
  0xa2   : > { %339 = vst.msk [vmem:[%s201_s5 + $0x30] sm:$0xff] %vm332_vm1, %v327_v36 }
  0xa3   : > { %334 = vst.msk [vmem:[%s201_s5 + $0x8] sm:$0xff] %vm332_vm1, %v312_v39 }
  0xa4   : > { %336 = vst.msk [vmem:[%s201_s5 + $0x18] sm:$0xff] %vm332_vm1, %v318_v40 }
  0xa6   : > { %v323_v43 = vpop.f32.mrf.mxu2  ;;  %v329_v44 = vpop.f32.mrf.mxu3 }
  0xa7   : > { %v324_v45 = vadd.f32 %v323_v43, %v254_v42  ;;  %v330_v46 = vadd.f32 %v329_v44, %v264_v41 }
  0xa9   : > { %338 = vst.msk [vmem:[%s201_s5 + $0x28] sm:$0xff] %vm332_vm1, %v324_v45 }
  0xaa   : > { %340 = vst.msk [vmem:[%s201_s5 + $0x38] sm:$0xff] %vm332_vm1, %v330_v46 }
  0xab PF: > { %s13_s14 = sadd.s32 1, %s516_s14   ;;  %s644_s12 = smov %s512_s13 }
  0xac   : > { %p10_p5 = scmp.ge.s32.totalorder %s13_s14, 4   ;;  %s645_s13 = smov %s647_s15 }
  0xae   :  { %12 = sbr.rel (!%p10_p5) target bundleno = 2 (0x2), region = 62 }

// kernel: swformer_forward.41
= control target key start
LH: loop header
LB: loop body
LE: loop exit
PB: predicated region body
PF: predicated region fallthrough
CT: control target
= control target key end

     0   :  { %s584_s12 = smov 0   ;;  %s586_s13 = smov 0   ;;  %s651_s0 = inlined_call_operand.vmem [shape: f32[2,32,128], index: 0, kind: input, shape index: {}]   ;;  %s652_s1 = inlined_call_operand.vmem [shape: f32[32,1], index: 1, kind: input, shape index: {}]   ;;  %s653_s2 = inlined_call_operand.vmem [shape: f32[32,1], index: 2, kind: input, shape index: {}]   ;;  %s654_s3 = inlined_call_operand.vmem [shape: bf16[2,32,128], index: 3, kind: output, shape index: {}]  }
   0x1   :  { %s588_s14 = smov 0  }
   0x2 LB: > { %s600_s15 = sadd.s32 4294967295, %s560_s14   ;;  %s603_s16 = sadd.s32 1, %s560_s14   ;;  %s560_s14 = sphi %s588_s14, %s658_s14   ;;  %s556_s13 = sphi %s586_s13, %s657_s13   ;;  %s552_s12 = sphi %s584_s12, %s656_s12  }
   0x3   : > { %s17_s17 = ssub.s32 %s560_s14, %s603_s16  ;;  %s20_s18 = sadd.s32 1, %s556_s13 }
   0x4   : > { %p18_p0 = scmp.eq.s32.totalorder %s17_s17, 0  ;;  %p27_p1 = scmp.ne.s32.totalorder %s556_s13, %s552_s12 }
   0x5   : > { %p28_p2 = scmp.eq.s32.totalorder %s560_s14, 0  ;;  %p109_p3 = scmp.eq.s32.totalorder %s600_s15, 1 }
   0x6   : > { %s613_s19 = scalar_select %p18_p0, %s556_s13, %s20_s18  }
   0x7   : > { %p29_p4 = por %p28_p2, %p27_p1  ;;  %p615_p5 = por %p109_p3, %p27_p1 }
   0x8   : > { %p477_p6 = scmp.ge.s32.totalorder %s560_s14, 2 }
   0xa   : > { %131 = sbr.rel (%p477_p6) target bundleno = 23 (0x17), region = 16 }
   0xf   : > { %134 = sbr.rel (!%p29_p4) target bundleno = 23 (0x17), region = 20  ;;  %s136_s21 = sand.u32 (%p29_p4), 1, %s556_s13  }
  0x10   : > { %s501_s22 = sshll.u32 (%p29_p4), %s560_s14, 4  ;;  %s478_s23 = sshll.u32 (%p29_p4), %s136_s21, 5 }
  0x11   : > { %s141_s26 = scalar_lea.vmem (%p29_p4), %s651_s0, %s501_s22  ;;  %s138_s27 = scalar_lea.vmem (%p29_p4), [#allocation2], %s478_s23 }
  0x12   : > { %v176_v0 = vld [vmem:[%s141_s26] sm:$0xff] (%p29_p4)  ;;  %v178_v1 = vld [vmem:[%s141_s26 + $0x8] sm:$0xff] (%p29_p4) }
  0x13   : > { %v180_v2 = vld [vmem:[%s141_s26 + $0x20] sm:$0xff] (%p29_p4)  ;;  %177 = vst [vmem:[%s138_s27] sm:$0xff] (%p29_p4), %v176_v0  ;;  %v182_v3 = vld [vmem:[%s141_s26 + $0x28] sm:$0xff] (%p29_p4) }
  0x14   : > { %179 = vst [vmem:[%s138_s27 + $0x8] sm:$0xff] %v178_v1 }
  0x15   : > { %181 = vst [vmem:[%s138_s27 + $0x10] sm:$0xff] %v180_v2 }
  0x16   : > { %183 = vst [vmem:[%s138_s27 + $0x18] sm:$0xff] %v182_v3 }
  0x17 PF: > { %p481_p7 = scmp.ge.s32.totalorder %s560_s14, 1  ;;  %p206_p8 = scmp.lt.s32.totalorder %s560_s14, 3 }
  0x19   : > { %p207_p9 = pnand %p481_p7, %p206_p8 }
  0x1a   : > { %s484_s28 = sshll.u32 (!%p207_p9), %s600_s15, 1  ;;  %s213_s9 = sand.u32 (!%p207_p9), 1, %s552_s12  }
  0x1b   : > { %210 = sbr.rel (%p207_p9) target bundleno = 191 (0xbf), region = 66  ;;  %p247_p10 = scmp.lt.s32.totalorder (!%p207_p9), %s484_s28, 3 }
  0x1c   : > { %s482_s10 = sshll.u32 (!%p207_p9), %s213_s9, 5  ;;  %s483_s12 = sshll.u32 (!%p207_p9), %s213_s9, 4 }
  0x1d   : > { %s215_s11 = scalar_lea.vmem (!%p207_p9), [#allocation2], %s482_s10  ;;  %s244_s14 = scalar_lea.vmem (!%p207_p9), [#allocation3], %s483_s12 }
  0x20   : > { %v562_v4 = vmov 0   ;;  %s660_s28 = smov (!%p247_p10, %s484_s28), 3  ;;  %v263_v9 = vld [vmem:[%s215_s11] sm:$0xff]  ;;  %v490_v14 = vld [vmem:[%s215_s11 + $0x10] sm:$0xff]  ;;  %v264_v16 = vld [vmem:[%s215_s11 + $0x8] sm:$0xff]  ;;  %v563_v18 = vmov 0.0  }
  0x21   : > { %537 = vset.pattern.permute.xlu1 %v562_v4  ;;  %536 = vset.pattern.permute.xlu0 %v562_v4  ;;  %s485_s29 = sshll.u32 %s660_s28, 3  ;;  %v491_v27 = vld [vmem:[%s215_s11 + $0x18] sm:$0xff]  ;;  %s502_s17 = sshll.u32 (%p615_p5), %s600_s15, 3 }
  0x22   : > { %s256_s5 = scalar_lea.vmem %s653_s2, %s485_s29  ;;  %s250_s8 = scalar_lea.vmem %s652_s1, %s485_s29 }
  0x23   : > { %v261_v5 = vld [vmem:[%s256_s5] sm:$0xff]  ;;  %v262_v7 = vld [vmem:[%s256_s5 + $0x8] sm:$0xff]  ;;  %s340_s22 = scalar_lea.vmem (%p615_p5), %s654_s3, %s502_s17 }
  0x24   : > { %v259_v6 = vld [vmem:[%s250_s8] sm:$0xff]  ;;  %279 = vperm.xlu1 %537, %v261_v5   ;;  %v260_v8 = vld [vmem:[%s250_s8 + $0x8] sm:$0xff] }
  0x25   : > { %267 = vperm.xlu0 %536, %v259_v6  }
  0x2c   : > { %284 = vperm.xlu1 %537, %v262_v7  }
  0x2d   : > { %272 = vperm.xlu0 %536, %v260_v8  }
  0x96   : > { %v280_v10 = vpop.permute.xlu1 %279 }
  0x97   : > { %v268_v11 = vpop.permute.xlu0 %267 }
  0x98   : > { %v275_v12 = vmul.f32 %v268_v11, %v263_v9  ;;  %v310_v17 = vmul.f32 %v490_v14, %v268_v11 }
  0x9a   : > { %v287_v13 = vadd.f32 %v280_v10, %v275_v12  ;;  %v312_v25 = vadd.f32 %v310_v17, %v280_v10 }
  0x9c   : > { %v289_v15 = vmul.f32 0.5, %v287_v13 }
  0x9e   : > { %vm293_vm0 = vcmp.ge.f32.partialorder %v289_v15, 1.0  ;;  %v285_v23 = vpop.permute.xlu1 %284 }
  0x9f   : > { %v488_v19 = vsel %vm293_vm0, 1.0, %v563_v18  ;;  %v273_v20 = vpop.permute.xlu0 %272 }
  0xa0   : > { %v303_v21 = vsub.f32 1.0, %v488_v19  ;;  %v276_v22 = vmul.f32 %v273_v20, %v264_v16  ;;  %v311_v30 = vmul.f32 %v491_v27, %v273_v20 }
  0xa2   : > { %v305_v24 = vmul.f32 %v303_v21, %v289_v15  ;;  %v288_v26 = vadd.f32 %v285_v23, %v276_v22  ;;  %v313_v36 = vadd.f32 %v311_v30, %v285_v23 }
  0xa4   : > { %v314_v28 = vsub.f32 %v312_v25, %v305_v24  ;;  %v290_v29 = vmul.f32 0.5, %v288_v26 }
  0xa6   : > { %vm294_vm1 = vcmp.ge.f32.partialorder %v290_v29, 1.0  ;;  %v316_v32 = vmul.f32 0.5, %v314_v28 }
  0xa7   : > { %v489_v31 = vsel %vm294_vm1, 1.0, %v563_v18 }
  0xa8   : > { %v504_v33 = vpack.c.bf16 %v489_v31, %v488_v19  ;;  %v304_v34 = vsub.f32 1.0, %v489_v31  ;;  %v318_v37 = vadd.f32 %v316_v32, %v305_v24 }
  0xaa   : > { %505 = vst [vmem:[%s244_s14] sm:$0xff] %v504_v33   ;;  %v306_v35 = vmul.f32 %v304_v34, %v290_v29  ;;  %vm320_vm2 = vcmp.ge.f32.partialorder %v318_v37, 1.0 }
  0xab   : > { %v492_v41 = vsel %vm320_vm2, 1.0, %v563_v18 }
  0xac   : > { %v315_v38 = vsub.f32 %v313_v36, %v306_v35 }
  0xae   : > { %v317_v39 = vmul.f32 0.5, %v315_v38 }
  0xb0   : > { %v319_v40 = vadd.f32 %v317_v39, %v306_v35 }
  0xb1   : > { %v357_v44 = vld [vmem:[%s244_s14] sm:$0xff] (%p615_p5)  }
  0xb2   : > { %vm321_vm3 = vcmp.ge.f32.partialorder %v319_v40, 1.0  ;;  %337 = sbr.rel (!%p615_p5) target bundleno = 191 (0xbf), region = 74  ;;  %358 = vst [vmem:[%s340_s22] sm:$0xff] (%p615_p5), %v357_v44  }
  0xb3   : > { %v493_v42 = vsel %vm321_vm3, 1.0, %v563_v18 }
  0xb4   : > { %v507_v43 = vpack.c.bf16 %v493_v42, %v492_v41 }
  0xb6   : > { %509 = vst [vmem:[%s244_s14 + $0x8] sm:$0xff] %v507_v43  }
  0xbd   : > { %v361_v45 = vld [vmem:[%s244_s14 + $0x8] sm:$0xff]  }
  0xbe   : > { %362 = vst [vmem:[%s340_s22 + $0x10] sm:$0xff] %v361_v45  }
  0xbf PF: > { %p10_p11 = scmp.ge.s32.totalorder %s603_s16, 4   ;;  %s656_s12 = smov %s556_s13 }
  0xc0   : > { %s657_s13 = smov %s613_s19  ;;  %s658_s14 = smov %s603_s16 }
  0xc1   :  { %12 = sbr.rel (!%p10_p11) target bundleno = 2 (0x2), region = 154 }

// kernel: swformer_forward.42
= control target key start
LH: loop header
LB: loop body
LE: loop exit
PB: predicated region body
PF: predicated region fallthrough
CT: control target
= control target key end

     0   :  { %s507_s12 = smov 0   ;;  %s509_s13 = smov 0   ;;  %s579_s0 = inlined_call_operand.vmem [shape: f32[32,64], index: 0, kind: input, shape index: {}]   ;;  %s580_s1 = inlined_call_operand.vmem [shape: bf16[2,64,64], index: 1, kind: input, shape index: {}]   ;;  %s581_s2 = inlined_call_operand.vmem [shape: f32[32,1], index: 2, kind: input, shape index: {}]   ;;  %s582_s3 = inlined_call_operand.vmem [shape: f32[2,32,64], index: 3, kind: output, shape index: {}]  }
   0x1   :  { %s511_s14 = smov 0  }
   0x2 LB: > { %s25_s15 = sadd.s32 1, %s480_s13  ;;  %p379_p0 = scmp.ge.s32.totalorder %s484_s14, 1  ;;  %s484_s14 = sphi %s511_s14, %s13_s14   ;;  %s480_s13 = sphi %s509_s13, %s584_s13   ;;  %s476_s12 = sphi %s507_s12, %s583_s12  }
   0x3   : > { %p27_p1 = scmp.ge.s32.totalorder %s25_s15, 2  ;;  %p156_p2 = scmp.lt.s32.totalorder %s484_s14, 3 }
   0x5   : > { %s586_s15 = smov (%p27_p1, %s25_s15), 0  ;;  %p157_p3 = pnand %p379_p0, %p156_p2 }
   0x6   : > { %p186_p4 = scmp.lt.s32.totalorder (!%p157_p3), %s476_s12, 1 }
   0x7   : > { %160 = sbr.rel (%p157_p3) target bundleno = 171 (0xab), region = 32 }
   0xc   : > { %v486_v0 = vmov 0   ;;  %v224_v1 = vld [vmem:[%s581_s2 + $0x10] sm:$0xff]  ;;  %v222_v2 = vld [vmem:[%s581_s2] sm:$0xff]  ;;  %s588_s12 = smov (!%p186_p4, %s476_s12), 1  ;;  %vm246_vm0 = vcmask 523264   ;;  %v203_v16 = vld [vmem:[%s579_s0 + $0x8] sm:$0xff] }
   0xd   : > { %461 = vset.pattern.permute.xlu1 %v486_v0  ;;  %460 = vset.pattern.permute.xlu0 %v486_v0  ;;  %s390_s20 = sshll.u32 %s588_s12, 5  ;;  %v202_v15 = vld [vmem:[%s579_s0] sm:$0xff]  ;;  %v204_v17 = vld [vmem:[%s579_s0 + $0x10] sm:$0xff]  ;;  %v205_v18 = vld [vmem:[%s579_s0 + $0x18] sm:$0xff] }
   0xe   : > { %238 = vperm.xlu1 %461, %v224_v1   ;;  %228 = vperm.xlu0 %460, %v222_v2   ;;  %s193_s23 = scalar_lea.vmem %s580_s1, %s390_s20  ;;  %v225_v19 = vld [vmem:[%s581_s2 + $0x18] sm:$0xff]  ;;  %v223_v20 = vld [vmem:[%s581_s2 + $0x8] sm:$0xff]  ;;  %s201_s11 = scalar_lea.vmem %s582_s3, %s390_s20 }
   0xf   : > { %v410_v3 = vld [vmem:[%s193_s23 + $0x18] sm:$0xff]   ;;  %v409_v4 = vld [vmem:[%s193_s23 + $0x10] sm:$0xff]   ;;  %v408_v8 = vld [vmem:[%s193_s23 + $0x8] sm:$0xff]  }
  0x10   : > { %v407_v5 = vunpack.c.h.bf16 %v410_v3  ;;  %v406_v6 = vunpack.c.l.bf16 %v410_v3  ;;  %v403_v7 = vunpack.c.h.bf16 %v409_v4  ;;  %v402_v9 = vunpack.c.l.bf16 %v409_v4  ;;  %v393_v11 = vld [vmem:[%s193_s23] sm:$0xff]  }
  0x11   : > { %v399_v10 = vunpack.c.h.bf16 %v408_v8  ;;  %v398_v12 = vunpack.c.l.bf16 %v408_v8  ;;  %v395_v13 = vunpack.c.h.bf16 %v393_v11  ;;  %v394_v14 = vunpack.c.l.bf16 %v393_v11 }
  0x12   : > { %267 = vmatpush.msra.mxu0 %v407_v5  ;;  %411 = vmatpush.msra.mxu1 %v407_v5 }
  0x13   : > { %412 = vmatpush.msra.mxu2 %v407_v5  ;;  %413 = vmatpush.msra.mxu3 %v407_v5 }
  0x14   : > { %268 = vmatpush.msra.mxu0 %v406_v6  ;;  %414 = vmatpush.msra.mxu1 %v406_v6 }
  0x15   : > { %415 = vmatpush.msra.mxu2 %v406_v6  ;;  %416 = vmatpush.msra.mxu3 %v406_v6 }
  0x16   : > { %269 = vmatpush.msra.mxu0 %v403_v7  ;;  %417 = vmatpush.msra.mxu1 %v403_v7 }
  0x17   : > { %418 = vmatpush.msra.mxu2 %v403_v7  ;;  %419 = vmatpush.msra.mxu3 %v403_v7 }
  0x18   : > { %270 = vmatpush.msra.mxu0 %v402_v9  ;;  %420 = vmatpush.msra.mxu1 %v402_v9 }
  0x19   : > { %421 = vmatpush.msra.mxu2 %v402_v9  ;;  %422 = vmatpush.msra.mxu3 %v402_v9 }
  0x1a   : > { %271 = vmatpush.msra.mxu0 %v399_v10  ;;  %423 = vmatpush.msra.mxu1 %v399_v10 }
  0x1b   : > { %424 = vmatpush.msra.mxu2 %v399_v10  ;;  %425 = vmatpush.msra.mxu3 %v399_v10 }
  0x1c   : > { %272 = vmatpush.msra.mxu0 %v398_v12  ;;  %426 = vmatpush.msra.mxu1 %v398_v12 }
  0x1d   : > { %427 = vmatpush.msra.mxu2 %v398_v12  ;;  %428 = vmatpush.msra.mxu3 %v398_v12 }
  0x1e   : > { %273 = vmatpush.msra.mxu0 %v395_v13  ;;  %429 = vmatpush.msra.mxu1 %v395_v13 }
  0x1f   : > { %430 = vmatpush.msra.mxu2 %v395_v13  ;;  %431 = vmatpush.msra.mxu3 %v395_v13 }
  0x20   : > { %274 = vmatpush.msra.mxu0 %v394_v14  ;;  %432 = vmatpush.msra.mxu1 %v394_v14 }
  0x21   : > { %433 = vmatpush.msra.mxu2 %v394_v14  ;;  %434 = vmatpush.msra.mxu3 %v394_v14 }
  0x22   : > { %384 = vmatmul.msk.f32.vlgmr.msra.gmra.mxu0 %vm246_vm0, %v202_v15  ;;  %385 = vmatmul.msk.f32.vlgmr.msra.gmra.mxu1 %vm246_vm0, %v203_v16 }
  0x23   : > { %386 = vmatmul.msk.f32.vlgmr.msra.gmra.mxu2 %vm246_vm0, %v204_v17  ;;  %387 = vmatmul.msk.f32.vlgmr.msra.gmra.mxu3 %vm246_vm0, %v205_v18 }
  0x24   : > { %243 = vperm.xlu1 %461, %v225_v19   ;;  %233 = vperm.xlu0 %460, %v223_v20  }
  0x80   : > { %v229_v21 = vpop.permute.xlu0 %228  ;;  %v239_v22 = vpop.permute.xlu1 %238 }
  0x96   : > { %v234_v23 = vpop.permute.xlu0 %233  ;;  %v244_v28 = vpop.permute.xlu1 %243 }
  0x9f   : > { %v276_v24 = vpop.f32.mrf.mxu0  ;;  %v279_v25 = vpop.f32.mrf.mxu1 }
  0xa0   : > { %v277_v26 = vadd.f32 %v276_v24, %v229_v21  ;;  %v280_v27 = vadd.f32 %v279_v25, %v234_v23 }
  0xa2   : > { %288 = vst.msk [vmem:[%s201_s11] sm:$0xff] %vm246_vm0, %v277_v26 }
  0xa3   : > { %289 = vst.msk [vmem:[%s201_s11 + $0x8] sm:$0xff] %vm246_vm0, %v280_v27 }
  0xa6   : > { %v282_v29 = vpop.f32.mrf.mxu2  ;;  %v285_v30 = vpop.f32.mrf.mxu3 }
  0xa7   : > { %v283_v31 = vadd.f32 %v282_v29, %v239_v22  ;;  %v286_v32 = vadd.f32 %v285_v30, %v244_v28 }
  0xa9   : > { %290 = vst.msk [vmem:[%s201_s11 + $0x10] sm:$0xff] %vm246_vm0, %v283_v31 }
  0xaa   : > { %291 = vst.msk [vmem:[%s201_s11 + $0x18] sm:$0xff] %vm246_vm0, %v286_v32 }
  0xab PF: > { %s13_s14 = sadd.s32 1, %s484_s14   ;;  %s583_s12 = smov %s480_s13 }
  0xac   : > { %p10_p5 = scmp.ge.s32.totalorder %s13_s14, 4   ;;  %s584_s13 = smov %s586_s15 }
  0xae   :  { %12 = sbr.rel (!%p10_p5) target bundleno = 2 (0x2), region = 62 }

// kernel: swformer_forward.43
= control target key start
LH: loop header
LB: loop body
LE: loop exit
PB: predicated region body
PF: predicated region fallthrough
CT: control target
= control target key end

     0   :  { %vm24_vm0 = vcmask 261120   ;;  %vm54_vm1 = vcmask 89088   ;;  %s115_s1 = inlined_call_operand.vmem [shape: f32[32,11], index: 1, kind: input, shape index: {}]   ;;  %s116_s2 = inlined_call_operand.vmem [shape: f32[1,11], index: 2, kind: input, shape index: {}]   ;;  %s117_s0 = inlined_call_operand.vmem [shape: f32[16,32], index: 0, kind: input, shape index: {}]   ;;  %s118_s3 = inlined_call_operand.vmem [shape: f32[16,11], index: 3, kind: output, shape index: {}]  }
   0x1   :  { %v19_v0 = vld [vmem:[%s115_s1 + $0x18] sm:$0xff]  ;;  %v18_v1 = vld [vmem:[%s115_s1 + $0x10] sm:$0xff]  ;;  %v17_v2 = vld [vmem:[%s115_s1 + $0x8] sm:$0xff] }
   0x2   :  { %43 = vmatpush.msra.mxu0 %v19_v0  ;;  %63 = vmatpush.msra.mxu1 %v19_v0  ;;  %v16_v3 = vld [vmem:[%s115_s1] sm:$0xff]  ;;  %v15_v5 = vld [vmem:[%s117_s0 + $0x8] sm:$0xff] }
   0x3   :  { %v14_v4 = vld [vmem:[%s117_s0] sm:$0xff] }
   0x4   :  { %44 = vmatpush.msra.mxu0 %v18_v1  ;;  %64 = vmatpush.msra.mxu1 %v18_v1  ;;  %v67_v6 = vld [vmem:[%s116_s2] ss:$0 sm:$0xff] }
   0x6   :  { %45 = vmatpush.msra.mxu0 %v17_v2  ;;  %65 = vmatpush.msra.mxu1 %v17_v2 }
   0x8   :  { %46 = vmatpush.msra.mxu0 %v16_v3  ;;  %66 = vmatpush.msra.mxu1 %v16_v3 }
   0x9   :  { %61 = vmatmul.msk.f32.vlgmr.msra.gmra.mxu0 %vm24_vm0, %v14_v4  ;;  %62 = vmatmul.msk.f32.vlgmr.msra.gmra.mxu1 %vm24_vm0, %v15_v5 }
  0x86   :  { %v48_v7 = vpop.f32.mrf.mxu0  ;;  %v51_v8 = vpop.f32.mrf.mxu1 }
  0x87   :  { %v49_v9 = vadd.f32 %v67_v6, %v48_v7  ;;  %v52_v10 = vadd.f32 %v67_v6, %v51_v8 }
  0x89   :  { %55 = vst.msk [vmem:[%s118_s3] sm:$0xff] %vm54_vm1, %v49_v9 }
  0x8a   :  { %56 = vst.msk [vmem:[%s118_s3 + $0x8] sm:$0xff] %vm54_vm1, %v52_v10 }

</bundles_post_ra>
